<compile_context>
chip_gen: v6e
topology: v6e:2x2x1
jax: 0.10.0
libtpu: 0.0.40
codegen_flags: <defaults>
</compile_context>

<pallas_src>
import functools

import numpy as np
import jax
import jax.numpy as jnp
from jax import lax
from jax.experimental import pallas as pl
from jax.experimental.pallas import tpu as pltpu

# ---------------- problem sizes (small, consistent with the module) ----------
N, CIN, H, W = 2, 3, 16, 16          # input  (NCHW, torch layout)
COUT, K, STRIDE = 5, 3, 2            # ConvTranspose2d(3, 5, 3, stride=2)
HO = (H - 1) * STRIDE + K            # transposed-conv output height = 33
WO = (W - 1) * STRIDE + K            # transposed-conv output width  = 33

LANE = 128                           # c padded to a full vreg lane group
CO_SLAB = COUT * LANE                # 640 lanes: (co, c) per kh slab
N_LANES = K * CO_SLAB                # 1920 lanes: blocks ordered (kh, co, c)

CLAMP_MIN = 0.05
CLAMP_MAX = 0.08

# Static 0/1 column-placement pattern: VPAT[kw, w, c] = 1 iff c == 2*w + kw.
_W_IDX = np.arange(W)[:, None]
_C_IDX = np.arange(LANE)[None, :]
_VPAT = np.stack([(_C_IDX == STRIDE * _W_IDX + kw) for kw in range(K)],
                 axis=0).astype(np.float32)          # (K, W, 128)


def _make_kernel(clamp_min, clamp_max):
    """Kernel body with clamp bounds baked in."""

    def kernel(x_ref, rw_ref, b_ref, o_ref, m_ref):
        # x_ref : (N*H, CIN*W)        = (32, 48)    rows (n, h),  lanes (ci, w)
        # rw_ref: (CIN*W, K*COUT*128) = (48, 1920)  rows (ci, w), lanes (kh, co, c)
        # b_ref : (1, COUT*128)       = (1, 640)    bias row, lanes (co, c)
        # o_ref : (N, HO, COUT*128)   = (2, 33, 640)
        # m_ref : VMEM scratch (32, 1920)

        # ---- stage 1+2: column scatter + (ci, kw) weight contraction,
        #      a single wide MXU matmul. ----
        m_ref[...] = jnp.dot(x_ref[...], rw_ref[...],
                             preferred_element_type=jnp.float32,
                             precision=lax.Precision.HIGHEST)

        # ---- stage 3: row scatter.  U[kh][r, h] = 1 iff r == 2*h + kh ----
        r_io = lax.broadcasted_iota(jnp.int32, (HO, H), 0)
        h_io = lax.broadcasted_iota(jnp.int32, (HO, H), 1)
        U = [(r_io == STRIDE * h_io + kh).astype(jnp.float32) for kh in range(K)]

        bias = b_ref[...]                                     # (1, 640)
        for n in range(N):                                    # N = 2, unrolled
            acc = None
            for kh in range(K):
                mslab = m_ref[n * H:(n + 1) * H,
                              kh * CO_SLAB:(kh + 1) * CO_SLAB]   # (16, 640)
                d = jnp.dot(U[kh], mslab,
                            preferred_element_type=jnp.float32,
                            precision=lax.Precision.HIGHEST)     # (33, 640)
                acc = d if acc is None else acc + d
            # bias + clamp fused; one lane-dense slab store per batch element.
            o_ref[n] = jnp.clip(acc + bias, clamp_min, clamp_max)

    return kernel


@functools.partial(jax.jit, static_argnames=("clamp_min", "clamp_max"))
def deconv_clamp(x_nchw, w_torch, bias,
                 clamp_min=CLAMP_MIN, clamp_max=CLAMP_MAX):
    """x_nchw: (N, CIN, H, W) f32.  w_torch: (CIN, COUT, K, K) (PyTorch
    ConvTranspose2d layout).  bias: (COUT,).  Returns (N, COUT, HO, WO)."""
    x_nchw = x_nchw.astype(jnp.float32)
    w_torch = w_torch.astype(jnp.float32)
    bias = bias.astype(jnp.float32)

    # LHS rows (n, h), lanes (ci, w).  Tiny in-jit transpose, fused by XLA.
    x2d = jnp.transpose(x_nchw, (0, 2, 1, 3)).reshape(N * H, CIN * W)

    # RHS absorbs stride-2 column scatter AND the (ci, kw) weight contraction:
    # Rw[(ci, w), (kh, co, c)] = sum_kw w[ci, co, kh, kw] * [c == 2*w + kw]
    rw = jnp.einsum("iojl,lwc->iwjoc", w_torch, _VPAT).reshape(CIN * W, N_LANES)

    # Bias broadcast row over (co, c) lanes.
    b_row = jnp.repeat(bias, LANE).reshape(1, CO_SLAB)

    kernel = _make_kernel(float(clamp_min), float(clamp_max))
    out_wide = pl.pallas_call(
        kernel,
        out_shape=jax.ShapeDtypeStruct((N, HO, CO_SLAB), jnp.float32),
        in_specs=[
            pl.BlockSpec(memory_space=pltpu.MemorySpace.VMEM),   # x2d
            pl.BlockSpec(memory_space=pltpu.MemorySpace.VMEM),   # rw
            pl.BlockSpec(memory_space=pltpu.MemorySpace.VMEM),   # bias row
        ],
        out_specs=pl.BlockSpec(memory_space=pltpu.MemorySpace.VMEM),
        scratch_shapes=[pltpu.VMEM((N * H, N_LANES), jnp.float32)],
    )(x2d, rw, b_row)

    # Lane-padded (n, r, co, c128) -> NCHW (n, co, r, c); in-jit, fused.
    out = out_wide.reshape(N, HO, COUT, LANE)[..., :WO]
    return jnp.transpose(out, (0, 2, 1, 3))


def reference(x_nchw, w_torch, bias, clamp_min, clamp_max):
    """Pure-JAX reference of ConvTranspose2d + clamp (NCHW out)."""
    x_nhwc = jnp.transpose(x_nchw, (0, 2, 3, 1)).astype(jnp.float32)
    out = jnp.zeros((N, HO, WO, COUT), jnp.float32)
    for kh in range(K):
        for kw in range(K):
            contrib = jnp.einsum('nhwc,cd->nhwd', x_nhwc, w_torch[:, :, kh, kw],
                                 precision=lax.Precision.HIGHEST)
            out = out.at[:,
                         kh:kh + (H - 1) * STRIDE + 1:STRIDE,
                         kw:kw + (W - 1) * STRIDE + 1:STRIDE, :].add(contrib)
    out = out + bias.reshape(1, 1, 1, COUT)
    out = jnp.clip(out, clamp_min, clamp_max)
    return jnp.transpose(out, (0, 3, 1, 2))


if __name__ == "__main__":
    key = jax.random.PRNGKey(0)
    k_x, k_w, k_b = jax.random.split(key, 3)

    x = jax.random.normal(k_x, (N, CIN, H, W), jnp.float32)
    # deterministic parameter init (PyTorch-style fan-in scale, synthetic values)
    fan_in = CIN * K * K
    bound = 1.0 / (fan_in ** 0.5)
    w = jax.random.uniform(k_w, (CIN, COUT, K, K), jnp.float32, -bound, bound)
    b = jax.random.uniform(k_b, (COUT,), jnp.float32, -bound, bound)

    # 1) module semantics: deconv + clamp(0.05, 0.08)
    out = jax.block_until_ready(deconv_clamp(x, w, b))
    ref = reference(x, w, b, CLAMP_MIN, CLAMP_MAX)
    assert out.shape == (N, COUT, HO, WO), out.shape
    assert jnp.allclose(out, ref, atol=1e-5, rtol=1e-5), \
        float(jnp.max(jnp.abs(out - ref)))

    # 2) the narrow clamp saturates most outputs, so also validate the
    #    pre-clamp linear part with effectively-disabled bounds.
    wide = 1e9
    out_lin = jax.block_until_ready(
        deconv_clamp(x, w, b, clamp_min=-wide, clamp_max=wide))
    ref_lin = reference(x, w, b, -wide, wide)
    assert jnp.allclose(out_lin, ref_lin, atol=1e-4, rtol=1e-4), \
        float(jnp.max(jnp.abs(out_lin - ref_lin)))

    print("KERNEL_OK")
</pallas_src>

<mosaic_0001>
module attributes {stable_mosaic.version = 11 : i64} {
  func.func @kernel(%arg0: memref<32x48xf32, #tpu.memory_space<vmem>>, %arg1: memref<48x1920xf32, #tpu.memory_space<vmem>>, %arg2: memref<1x640xf32, #tpu.memory_space<vmem>>, %arg3: memref<2x33x640xf32, #tpu.memory_space<vmem>>, %arg4: memref<32x1920xf32, #tpu.memory_space<vmem>>) attributes {dimension_semantics = [], scalar_prefetch = 0 : i64, scratch_operands = 1 : i64, tpu.core_type = #tpu.core_type<tc>} {
    %c0 = arith.constant 0 : index
    %c0_0 = arith.constant 0 : index
    %0 = vector.load %arg0[%c0, %c0_0] : memref<32x48xf32, #tpu.memory_space<vmem>>, vector<32x48xf32>
    %c0_1 = arith.constant 0 : index
    %c0_2 = arith.constant 0 : index
    %1 = vector.load %arg1[%c0_1, %c0_2] : memref<48x1920xf32, #tpu.memory_space<vmem>>, vector<48x1920xf32>
    %cst = arith.constant dense<0.000000e+00> : vector<32x1920xf32>
    %2 = tpu.matmul %0, %1, %cst {dimension_numbers = #tpu.dot_dimension_numbers<[1], [0], [0], [1], [0, 0, 1, 1], [], []>, precision = #tpu.contract_precision<fp32>} : vector<32x48xf32>, vector<48x1920xf32>, vector<32x1920xf32> -> vector<32x1920xf32>
    %c0_3 = arith.constant 0 : index
    %c0_4 = arith.constant 0 : index
    %3 = vector.load %arg4[%c0_3, %c0_4] : memref<32x1920xf32, #tpu.memory_space<vmem>>, vector<32x1920xf32>
    tpu.vector_store %arg4[%c0_3, %c0_4], %2 {strides = array<i32>} : memref<32x1920xf32, #tpu.memory_space<vmem>>, vector<32x1920xf32>,
    %4 = tpu.iota {dimensions = array<i32: 0>} : vector<33x16xi32>
    %5 = tpu.iota {dimensions = array<i32: 1>} : vector<33x16xi32>
    %c2_i32 = arith.constant 2 : i32
    %6 = vector.broadcast %c2_i32 : i32 to vector<33x16xi32>
    %7 = arith.muli %6, %5 : vector<33x16xi32>
    %c0_i32 = arith.constant 0 : i32
    %8 = vector.broadcast %c0_i32 : i32 to vector<33x16xi32>
    %9 = arith.addi %7, %8 : vector<33x16xi32>
    %10 = arith.cmpi eq, %4, %9 : vector<33x16xi32>
    %11 = arith.extui %10 : vector<33x16xi1> to vector<33x16xi32>
    %12 = arith.sitofp %11 : vector<33x16xi32> to vector<33x16xf32>
    %c2_i32_5 = arith.constant 2 : i32
    %13 = vector.broadcast %c2_i32_5 : i32 to vector<33x16xi32>
    %14 = arith.muli %13, %5 : vector<33x16xi32>
    %c1_i32 = arith.constant 1 : i32
    %15 = vector.broadcast %c1_i32 : i32 to vector<33x16xi32>
    %16 = arith.addi %14, %15 : vector<33x16xi32>
    %17 = arith.cmpi eq, %4, %16 : vector<33x16xi32>
    %18 = arith.extui %17 : vector<33x16xi1> to vector<33x16xi32>
    %19 = arith.sitofp %18 : vector<33x16xi32> to vector<33x16xf32>
    %c2_i32_6 = arith.constant 2 : i32
    %20 = vector.broadcast %c2_i32_6 : i32 to vector<33x16xi32>
    %21 = arith.muli %20, %5 : vector<33x16xi32>
    %c2_i32_7 = arith.constant 2 : i32
    %22 = vector.broadcast %c2_i32_7 : i32 to vector<33x16xi32>
    %23 = arith.addi %21, %22 : vector<33x16xi32>
    %24 = arith.cmpi eq, %4, %23 : vector<33x16xi32>
    %25 = arith.extui %24 : vector<33x16xi1> to vector<33x16xi32>
    %26 = arith.sitofp %25 : vector<33x16xi32> to vector<33x16xf32>
    %c0_8 = arith.constant 0 : index
    %c0_9 = arith.constant 0 : index
    %27 = vector.load %arg2[%c0_8, %c0_9] : memref<1x640xf32, #tpu.memory_space<vmem>>, vector<1x640xf32>
    %c0_10 = arith.constant 0 : index
    %c0_11 = arith.constant 0 : index
    %28 = vector.load %arg4[%c0_10, %c0_11] : memref<32x1920xf32, #tpu.memory_space<vmem>>, vector<16x640xf32>
    %cst_12 = arith.constant dense<0.000000e+00> : vector<33x640xf32>
    %29 = tpu.matmul %12, %28, %cst_12 {dimension_numbers = #tpu.dot_dimension_numbers<[1], [0], [0], [1], [0, 0, 1, 1], [], []>, precision = #tpu.contract_precision<fp32>} : vector<33x16xf32>, vector<16x640xf32>, vector<33x640xf32> -> vector<33x640xf32>
    %c0_13 = arith.constant 0 : index
    %c640 = arith.constant 640 : index
    %30 = vector.load %arg4[%c0_13, %c640] : memref<32x1920xf32, #tpu.memory_space<vmem>>, vector<16x640xf32>
    %cst_14 = arith.constant dense<0.000000e+00> : vector<33x640xf32>
    %31 = tpu.matmul %19, %30, %cst_14 {dimension_numbers = #tpu.dot_dimension_numbers<[1], [0], [0], [1], [0, 0, 1, 1], [], []>, precision = #tpu.contract_precision<fp32>} : vector<33x16xf32>, vector<16x640xf32>, vector<33x640xf32> -> vector<33x640xf32>
    %32 = arith.addf %29, %31 : vector<33x640xf32>
    %c0_15 = arith.constant 0 : index
    %c1280 = arith.constant 1280 : index
    %33 = vector.load %arg4[%c0_15, %c1280] : memref<32x1920xf32, #tpu.memory_space<vmem>>, vector<16x640xf32>
    %cst_16 = arith.constant dense<0.000000e+00> : vector<33x640xf32>
    %34 = tpu.matmul %26, %33, %cst_16 {dimension_numbers = #tpu.dot_dimension_numbers<[1], [0], [0], [1], [0, 0, 1, 1], [], []>, precision = #tpu.contract_precision<fp32>} : vector<33x16xf32>, vector<16x640xf32>, vector<33x640xf32> -> vector<33x640xf32>
    %35 = arith.addf %32, %34 : vector<33x640xf32>
    %36 = vector.broadcast %27 : vector<1x640xf32> to vector<33x640xf32>
    %37 = arith.addf %35, %36 : vector<33x640xf32>
    %cst_17 = arith.constant 5.000000e-02 : f32
    %cst_18 = arith.constant 8.000000e-02 : f32
    %38 = vector.broadcast %cst_17 : f32 to vector<33x640xf32>
    %39 = arith.maximumf %38, %37 : vector<33x640xf32>
    %40 = vector.broadcast %cst_18 : f32 to vector<33x640xf32>
    %41 = arith.minimumf %40, %39 : vector<33x640xf32>
    %c0_19 = arith.constant 0 : index
    %c0_20 = arith.constant 0 : index
    %c0_21 = arith.constant 0 : index
    %42 = vector.load %arg3[%c0_19, %c0_20, %c0_21] : memref<2x33x640xf32, #tpu.memory_space<vmem>>, vector<1x33x640xf32>
    %43 = vector.shape_cast %42 : vector<1x33x640xf32> to vector<33x640xf32>
    %44 = vector.shape_cast %41 : vector<33x640xf32> to vector<1x33x640xf32>
    tpu.vector_store %arg3[%c0_19, %c0_20, %c0_21], %44 {strides = array<i32>} : memref<2x33x640xf32, #tpu.memory_space<vmem>>, vector<1x33x640xf32>,
    %c16 = arith.constant 16 : index
    %c0_22 = arith.constant 0 : index
    %45 = vector.load %arg4[%c16, %c0_22] : memref<32x1920xf32, #tpu.memory_space<vmem>>, vector<16x640xf32>
    %cst_23 = arith.constant dense<0.000000e+00> : vector<33x640xf32>
    %46 = tpu.matmul %12, %45, %cst_23 {dimension_numbers = #tpu.dot_dimension_numbers<[1], [0], [0], [1], [0, 0, 1, 1], [], []>, precision = #tpu.contract_precision<fp32>} : vector<33x16xf32>, vector<16x640xf32>, vector<33x640xf32> -> vector<33x640xf32>
    %c16_24 = arith.constant 16 : index
    %c640_25 = arith.constant 640 : index
    %47 = vector.load %arg4[%c16_24, %c640_25] : memref<32x1920xf32, #tpu.memory_space<vmem>>, vector<16x640xf32>
    %cst_26 = arith.constant dense<0.000000e+00> : vector<33x640xf32>
    %48 = tpu.matmul %19, %47, %cst_26 {dimension_numbers = #tpu.dot_dimension_numbers<[1], [0], [0], [1], [0, 0, 1, 1], [], []>, precision = #tpu.contract_precision<fp32>} : vector<33x16xf32>, vector<16x640xf32>, vector<33x640xf32> -> vector<33x640xf32>
    %49 = arith.addf %46, %48 : vector<33x640xf32>
    %c16_27 = arith.constant 16 : index
    %c1280_28 = arith.constant 1280 : index
    %50 = vector.load %arg4[%c16_27, %c1280_28] : memref<32x1920xf32, #tpu.memory_space<vmem>>, vector<16x640xf32>
    %cst_29 = arith.constant dense<0.000000e+00> : vector<33x640xf32>
    %51 = tpu.matmul %26, %50, %cst_29 {dimension_numbers = #tpu.dot_dimension_numbers<[1], [0], [0], [1], [0, 0, 1, 1], [], []>, precision = #tpu.contract_precision<fp32>} : vector<33x16xf32>, vector<16x640xf32>, vector<33x640xf32> -> vector<33x640xf32>
    %52 = arith.addf %49, %51 : vector<33x640xf32>
    %53 = vector.broadcast %27 : vector<1x640xf32> to vector<33x640xf32>
    %54 = arith.addf %52, %53 : vector<33x640xf32>
    %cst_30 = arith.constant 5.000000e-02 : f32
    %cst_31 = arith.constant 8.000000e-02 : f32
    %55 = vector.broadcast %cst_30 : f32 to vector<33x640xf32>
    %56 = arith.maximumf %55, %54 : vector<33x640xf32>
    %57 = vector.broadcast %cst_31 : f32 to vector<33x640xf32>
    %58 = arith.minimumf %57, %56 : vector<33x640xf32>
    %c1 = arith.constant 1 : index
    %c0_32 = arith.constant 0 : index
    %c0_33 = arith.constant 0 : index
    %59 = vector.load %arg3[%c1, %c0_32, %c0_33] : memref<2x33x640xf32, #tpu.memory_space<vmem>>, vector<1x33x640xf32>
    %60 = vector.shape_cast %59 : vector<1x33x640xf32> to vector<33x640xf32>
    %61 = vector.shape_cast %58 : vector<33x640xf32> to vector<1x33x640xf32>
    tpu.vector_store %arg3[%c1, %c0_32, %c0_33], %61 {strides = array<i32>} : memref<2x33x640xf32, #tpu.memory_space<vmem>>, vector<1x33x640xf32>,
    return
  }
}

</mosaic_0001>

<bundles_post_ra>
// kernel: deconv_clamp.1
= control target key start
LH: loop header
LB: loop body
LE: loop exit
PB: predicated region body
PF: predicated region fallthrough
CT: control target
= control target key end

     0   :  { %v26262_v3 = vmov 0.0   ;;  %vm108_vm0 = vcmask 392192   ;;  %vm6092_vm2 = vcmask 130048   ;;  %vm19907_vm7 = vmmov 0   ;;  %s26254_s1 = inlined_call_operand.vmem [shape: f32[48,1920], index: 1, kind: input, shape index: {}]   ;;  %s26255_s0 = inlined_call_operand.vmem [shape: f32[32,48], index: 0, kind: input, shape index: {}]   ;;  %s26256_s2 = inlined_call_operand.vmem [shape: f32[1,640], index: 2, kind: input, shape index: {}]   ;;  %s26257_s3 = inlined_call_operand.vmem [shape: f32[2,33,640], index: 3, kind: output, shape index: {}]  }
   0x1   :  { %v94_v0 = vld [vmem:[%s26254_s1 + $0x260] sm:$0xff]  ;;  %v93_v1 = vld [vmem:[%s26254_s1 + $0x258] sm:$0xff]  ;;  %v79_v2 = vld [vmem:[%s26254_s1 + $0x1e8] sm:$0xff]  ;;  %197 = vmatprep.mubr.f32.mxu0 %v26262_v3  ;;  %366 = vmatprep.mubr.f32.mxu1 %v26262_v3 }
   0x2   :  { %v19939_v4 = vand.u32 4294901760, %v94_v0  ;;  %v19941_v5 = vand.u32 4294901760, %v93_v1  ;;  %v19943_v6 = vand.u32 4294901760, %v79_v2  ;;  %v78_v7 = vld [vmem:[%s26254_s1 + $0x1e0] sm:$0xff]  ;;  %v64_v8 = vld [vmem:[%s26254_s1 + $0x170] sm:$0xff]  ;;  %v63_v9 = vld [vmem:[%s26254_s1 + $0x168] sm:$0xff] }
   0x3   :  { %v19954_v10 = vand.u32 4294901760, %v78_v7  ;;  %v19956_v11 = vand.u32 4294901760, %v64_v8  ;;  %v19958_v12 = vand.u32 4294901760, %v63_v9  ;;  %v49_v13 = vld [vmem:[%s26254_s1 + $0xf8] sm:$0xff]  ;;  %v48_v14 = vld [vmem:[%s26254_s1 + $0xf0] sm:$0xff]  ;;  %v34_v15 = vld [vmem:[%s26254_s1 + $0x80] sm:$0xff] }
   0x4   :  { %142 = vmatprep.subr.mxu0 %v19939_v4  ;;  %v19970_v16 = vand.u32 4294901760, %v49_v13  ;;  %v19972_v17 = vand.u32 4294901760, %v48_v14  ;;  %v19974_v18 = vand.u32 4294901760, %v34_v15  ;;  %v19977_v19 = vsub.f32 %v94_v0, %v19939_v4  ;;  %v19982_v20 = vld [vmem:[%s26254_s1 + $0x78] sm:$0xff]  ;;  %v19987_v21 = vld [vmem:[%s26254_s1 + $0x8] sm:$0xff]  ;;  %v19992_v22 = vld [vmem:[%s26254_s1] sm:$0xff] }
   0x5   :  { %144 = vmatpush1.msra.mxu0 %v19941_v5  ;;  %v19996_v23 = vand.u32 4294901760, %v19982_v20  ;;  %v19999_v24 = vsub.f32 %v93_v1, %v19941_v5  ;;  %v20002_v25 = vand.u32 4294901760, %v19987_v21  ;;  %v20005_v26 = vsub.f32 %v79_v2, %v19943_v6  ;;  %v14_v27 = vld [vmem:[%s26255_s0] sm:$0xff]  ;;  %v15_v48 = vld [vmem:[%s26255_s0 + $0x8] sm:$0xff]  ;;  %v16_v61 = vld [vmem:[%s26255_s0 + $0x10] sm:$0xff] }
   0x6   :  { %146 = vmatprep.subr.mxu0 %v19943_v6  ;;  %v264_v28 = vand.u32 4294901760, %v19977_v19  ;;  %v20013_v29 = vand.u32 4294901760, %v19992_v22  ;;  %v20016_v30 = vsub.f32 %v78_v7, %v19954_v10  ;;  %v110_v31 = vsel %vm108_vm0, %v14_v27, 0 }
   0x7   :  { %148 = vmatpush1.msra.mxu0 %v19954_v10  ;;  %v270_v32 = vand.u32 4294901760, %v19999_v24  ;;  %v276_v33 = vand.u32 4294901760, %v20005_v26  ;;  %v20022_v34 = vand.u32 4294901760, %v110_v31  ;;  %v20025_v35 = vsub.f32 %v64_v8, %v19956_v11 }
   0x8   :  { %150 = vmatprep.subr.mxu0 %v19956_v11  ;;  %v265_v36 = vsub.f32 %v19977_v19, %v264_v28  ;;  %v282_v37 = vand.u32 4294901760, %v20016_v30  ;;  %v20033_v38 = vsub.f32 %v63_v9, %v19958_v12  ;;  %v20036_v39 = vsub.f32 %v49_v13, %v19970_v16  ;;  %v17_v13 = vld [vmem:[%s26255_s0 + $0x18] sm:$0xff] }
   0x9   :  { %152 = vmatpush1.msra.mxu0 %v19958_v12  ;;  %v271_v40 = vsub.f32 %v19999_v24, %v270_v32  ;;  %v277_v41 = vsub.f32 %v20005_v26, %v276_v33  ;;  %v20046_v42 = vsub.f32 %v110_v31, %v20022_v34  ;;  %v288_v43 = vand.u32 4294901760, %v20025_v35 }
   0xa   :  { %154 = vmatprep.subr.mxu0 %v19970_v16  ;;  %v266_v44 = vand.u32 4294901760, %v265_v36  ;;  %v283_v45 = vsub.f32 %v20016_v30, %v282_v37  ;;  %v294_v46 = vand.u32 4294901760, %v20033_v38  ;;  %v300_v47 = vand.u32 4294901760, %v20036_v39 }
   0xb   :  { %156 = vmatpush1.msra.mxu0 %v19972_v17  ;;  %v272_v49 = vand.u32 4294901760, %v271_v40  ;;  %v278_v50 = vand.u32 4294901760, %v277_v41  ;;  %v20060_v51 = vand.u32 4294901760, %v20046_v42  ;;  %v289_v52 = vsub.f32 %v20025_v35, %v288_v43 }
   0xc   :  { %158 = vmatprep.subr.mxu0 %v19974_v18  ;;  %267 = vmatprep.subr.mxu1 %v266_v44  ;;  %v284_v53 = vand.u32 4294901760, %v283_v45  ;;  %v295_v54 = vsub.f32 %v20033_v38, %v294_v46  ;;  %v301_v55 = vsub.f32 %v20036_v39, %v300_v47  ;;  %v20073_v56 = vsub.f32 %v48_v14, %v19972_v17 }
   0xd   :  { %160 = vmatpush1.msra.mxu0 %v19996_v23  ;;  %273 = vmatpush1.msra.mxu1 %v272_v49  ;;  %v201_v57 = vsub.f32 %v20046_v42, %v20060_v51  ;;  %v290_v58 = vand.u32 4294901760, %v289_v52  ;;  %v113_v59 = vsel %vm108_vm0, %v15_v48, 0  ;;  %v20080_v60 = vsub.f32 %v34_v15, %v19974_v18 }
   0xe   :  { %162 = vmatprep.subr.mxu0 %v20002_v25  ;;  %279 = vmatprep.subr.mxu1 %v278_v50  ;;  %v296_v62 = vand.u32 4294901760, %v295_v54  ;;  %v302_v63 = vand.u32 4294901760, %v301_v55  ;;  %v306_v0 = vand.u32 4294901760, %v20073_v56  ;;  %v20087_v1 = vand.u32 4294901760, %v113_v59 }
   0xf   :  { %164 = vmatpush1.msra.mxu0 %v20013_v29  ;;  %285 = vmatpush1.msra.mxu1 %v284_v53  ;;  %v20090_v2 = vand.u32 4294901760, %v201_v57  ;;  %v312_v7 = vand.u32 4294901760, %v20080_v60  ;;  %v20095_v8 = vsub.f32 %v19982_v20, %v19996_v23  ;;  %v20099_v9 = vsub.f32 %v19987_v21, %v20002_v25 }
  0x10   :  { %291 = vmatprep.subr.mxu1 %v290_v58  ;;  %v307_v14 = vsub.f32 %v20073_v56, %v306_v0  ;;  %v20108_v15 = vsub.f32 %v113_v59, %v20087_v1  ;;  %417 = vmatprep.subr.mxu0 %v19977_v19  ;;  %v20113_v20 = vsub.f32 %v19992_v22, %v20013_v29  ;;  %v116_v21 = vsel %vm108_vm0, %v16_v61, 0  ;;  %v96_v19 = vld [vmem:[%s26254_s1 + $0x270] sm:$0xff] }
  0x11   :  { %203 = vmatmul.mubr.f32.vlgmr.msra.gmra.mxu0 %v20090_v2  ;;  %297 = vmatpush1.msra.mxu1 %v296_v62  ;;  %v313_v27 = vsub.f32 %v20080_v60, %v312_v7  ;;  %v318_v31 = vand.u32 4294901760, %v20095_v8  ;;  %v324_v36 = vand.u32 4294901760, %v20099_v9  ;;  %v20122_v40 = vand.u32 4294901760, %v116_v21 }
  0x12   :  { %303 = vmatprep.subr.mxu1 %v302_v63  ;;  %208 = vmatprep.mubr.f32.mxu0 %v26262_v3  ;;  %v308_v22 = vand.u32 4294901760, %v307_v14  ;;  %v20126_v41 = vand.u32 4294901760, %v20108_v15  ;;  %v330_v44 = vand.u32 4294901760, %v20113_v20  ;;  %v119_v45 = vsel %vm108_vm0, %v17_v13, 0 }
  0x13   :  { %v314_v48 = vand.u32 4294901760, %v313_v27  ;;  %v319_v49 = vsub.f32 %v20095_v8, %v318_v31  ;;  %420 = vmatpush1.msra.mxu0 %v19999_v24  ;;  %v325_v50 = vsub.f32 %v20099_v9, %v324_v36  ;;  %v20138_v52 = vsub.f32 %v116_v21, %v20122_v40 }
  0x14   :  { %309 = vmatpush1.msra.mxu1 %v308_v22  ;;  %v212_v53 = vsub.f32 %v20108_v15, %v20126_v41  ;;  %423 = vmatprep.subr.mxu0 %v20005_v26  ;;  %v331_v54 = vsub.f32 %v20113_v20, %v330_v44  ;;  %v20146_v55 = vand.u32 4294901760, %v119_v45  ;;  %v20228_v24 = vand.u32 4294901760, %v96_v19  ;;  %v95_v26 = vld [vmem:[%s26254_s1 + $0x268] sm:$0xff] }
  0x15   :  { %315 = vmatprep.subr.mxu1 %v314_v48  ;;  %v320_v57 = vand.u32 4294901760, %v319_v49  ;;  %v326_v58 = vand.u32 4294901760, %v325_v50  ;;  %426 = vmatpush1.msra.mxu0 %v20016_v30  ;;  %v20150_v59 = vand.u32 4294901760, %v20138_v52  ;;  %v80_v30 = vld [vmem:[%s26254_s1 + $0x1f0] sm:$0xff] }
  0x16   :  { %v20152_v61 = vand.u32 4294901760, %v212_v53  ;;  %v332_v62 = vand.u32 4294901760, %v331_v54  ;;  %429 = vmatprep.subr.mxu0 %v20025_v35  ;;  %v20156_v63 = vsub.f32 %v119_v45, %v20146_v55  ;;  %v20266_v35 = vand.u32 4294901760, %v80_v30 }
  0x17   :  { %321 = vmatpush1.msra.mxu1 %v320_v57  ;;  %v223_v13 = vsub.f32 %v20138_v52, %v20150_v59  ;;  %432 = vmatpush1.msra.mxu0 %v20033_v38  ;;  %v51_v38 = vld [vmem:[%s26254_s1 + $0x108] sm:$0xff] }
  0x18   :  { %214 = vmatmul.mubr.f32.gmra.mxu0 %v20152_v61  ;;  %327 = vmatprep.subr.mxu1 %v326_v58  ;;  %v20163_v14 = vand.u32 4294901760, %v20156_v63 }
  0x19   :  { %219 = vmatprep.mubr.f32.mxu0 %v26262_v3  ;;  %333 = vmatpush1.msra.mxu1 %v332_v62  ;;  %v20166_v21 = vand.u32 4294901760, %v223_v13 }
  0x1a   :  { %368 = vmatmul.mubr.f32.vlgmr.msra.gmra.mxu1 %v20022_v34  ;;  %435 = vmatprep.subr.mxu0 %v20036_v39  ;;  %v234_v27 = vsub.f32 %v20156_v63, %v20163_v14  ;;  %v50_v39 = vld [vmem:[%s26254_s1 + $0x100] sm:$0xff] }
  0x1b   :  { %373 = vmatprep.mubr.f32.mxu1 %v26262_v3  ;;  %438 = vmatpush1.msra.mxu0 %v20073_v56  ;;  %v20300_v56 = vsub.f32 %v80_v30, %v20266_v35 }
  0x1c   :  { %225 = vmatmul.mubr.f32.gmra.mxu0 %v20166_v21  ;;  %v20175_v22 = vand.u32 4294901760, %v234_v27  ;;  %441 = vmatprep.subr.mxu0 %v20080_v60  ;;  %v20302_v60 = vand.u32 4294901760, %v51_v38 }
  0x1d   :  { %230 = vmatprep.mubr.f32.mxu0 %v26262_v3  ;;  %537 = vmatprep.subr.mxu1 %v19939_v4  ;;  %v1024_v45 = vand.u32 4294901760, %v20300_v56 }
  0x1e   :  { %375 = vmatmul.mubr.f32.gmra.mxu1 %v20087_v1  ;;  %444 = vmatpush1.msra.mxu0 %v20095_v8  ;;  %v20342_v48 = vsub.f32 %v51_v38, %v20302_v60 }
  0x1f   :  { %539 = vmatpush1.msra.mxu1 %v19941_v5  ;;  %447 = vmatprep.subr.mxu0 %v20099_v9  ;;  %v1025_v62 = vsub.f32 %v20300_v56, %v1024_v45 }
  0x20   :  { %236 = vmatmul.mubr.f32.gmra.mxu0 %v20175_v22  ;;  %541 = vmatprep.subr.mxu1 %v19943_v6  ;;  %v1042_v13 = vand.u32 4294901760, %v20342_v48 }
  0x21   :  { %380 = vmatprep.mubr.f32.mxu1 %v26262_v3  ;;  %450 = vmatpush1.msra.mxu0 %v20113_v20  ;;  %v20_v20 = vld [vmem:[%s26254_s1 + $0x10] sm:$0xff] }
  0x22   :  { %483 = vmatprep.mubr.f32.mxu0 %v26262_v3  ;;  %543 = vmatpush1.msra.mxu1 %v19954_v10  ;;  %v20352_v49 = vand.u32 4294901760, %v20_v20 }
  0x23   :  { %382 = vmatmul.mubr.f32.gmra.mxu1 %v20122_v40  ;;  %545 = vmatprep.subr.mxu1 %v19956_v11 }
  0x24   :  { %486 = vmatmul.mubr.f32.vlgmr.msra.gmra.mxu0 %v20046_v42  ;;  %547 = vmatpush1.msra.mxu1 %v19958_v12 }
  0x25   :  { %549 = vmatprep.subr.mxu1 %v19970_v16  ;;  %387 = vmatprep.mubr.f32.mxu1 %v26262_v3 }
  0x26   :  { %491 = vmatprep.mubr.f32.mxu0 %v26262_v3  ;;  %551 = vmatpush1.msra.mxu1 %v19972_v17 }
  0x27   :  { %389 = vmatmul.mubr.f32.gmra.mxu1 %v20146_v55  ;;  %553 = vmatprep.subr.mxu1 %v19974_v18 }
  0x28   :  { %494 = vmatmul.mubr.f32.gmra.mxu0 %v20108_v15  ;;  %652 = vmatprep.subr.mxu0 %v264_v28  ;;  %v81_v28 = vld [vmem:[%s26254_s1 + $0x1f8] sm:$0xff] }
  0x29   :  { %555 = vmatpush1.msra.mxu1 %v19996_v23  ;;  %656 = vmatpush1.msra.mxu0 %v270_v32  ;;  %v20253_v32 = vand.u32 4294901760, %v81_v28 }
  0x2a   :  { %557 = vmatprep.subr.mxu1 %v20002_v25  ;;  %660 = vmatprep.subr.mxu0 %v276_v33  ;;  %v20256_v33 = vsub.f32 %v96_v19, %v20228_v24 }
  0x2b   :  { %499 = vmatprep.mubr.f32.mxu0 %v26262_v3  ;;  %559 = vmatpush1.msra.mxu1 %v20013_v29 }
  0x2c   :  { %592 = vmatprep.mubr.f32.mxu1 %v26262_v3  ;;  %664 = vmatpush1.msra.mxu0 %v282_v37 }
  0x2d   :  { %502 = vmatmul.mubr.f32.gmra.mxu0 %v20138_v52  ;;  %596 = vmatmul.mubr.f32.vlgmr.msra.gmra.mxu1 %v20060_v51 }
  0x2e   :  { %668 = vmatprep.subr.mxu0 %v288_v43  ;;  %507 = vmatprep.mubr.f32.mxu0 %v26262_v3  ;;  %v1006_v43 = vand.u32 4294901760, %v20256_v33 }
  0x2f   :  { %672 = vmatpush1.msra.mxu0 %v294_v46  ;;  %601 = vmatprep.mubr.f32.mxu1 %v26262_v3  ;;  %v20288_v46 = vsub.f32 %v81_v28, %v20253_v32 }
  0x30   :  { %676 = vmatprep.subr.mxu0 %v300_v47  ;;  %779 = vmatprep.subr.mxu1 %v19939_v4  ;;  %v20245_v4 = vand.u32 4294901760, %v95_v26 }
  0x31   :  { %680 = vmatpush1.msra.mxu0 %v306_v0  ;;  %605 = vmatmul.mubr.f32.gmra.mxu1 %v20126_v41  ;;  %v20309_v0 = vand.u32 4294901760, %v50_v39  ;;  %v1018_v9 = vand.u32 4294901760, %v20288_v46 }
  0x32   :  { %510 = vmatmul.mubr.f32.gmra.mxu0 %v20156_v63  ;;  %684 = vmatprep.subr.mxu0 %v312_v7  ;;  %v20274_v37 = vsub.f32 %v95_v26, %v20245_v4  ;;  %v20381_v26 = vsub.f32 %v20_v20, %v20352_v49 }
  0x33   :  { %688 = vmatpush1.msra.mxu0 %v318_v31  ;;  %781 = vmatpush1.msra.mxu1 %v19941_v5  ;;  %v66_v5 = vld [vmem:[%s26254_s1 + $0x180] sm:$0xff]  ;;  %v1019_v53 = vsub.f32 %v20288_v46, %v1018_v9 }
  0x34   :  { %692 = vmatprep.subr.mxu0 %v324_v36  ;;  %783 = vmatprep.subr.mxu1 %v19943_v6  ;;  %v65_v6 = vld [vmem:[%s26254_s1 + $0x178] sm:$0xff]  ;;  %v1012_v7 = vand.u32 4294901760, %v20274_v37  ;;  %v1072_v20 = vand.u32 4294901760, %v20381_v26 }
  0x35   :  { %610 = vmatprep.mubr.f32.mxu1 %v26262_v3  ;;  %696 = vmatpush1.msra.mxu0 %v330_v44  ;;  %v20292_v47 = vand.u32 4294901760, %v65_v6  ;;  %v1020_v30 = vand.u32 4294901760, %v1019_v53 }
  0x36   :  { %729 = vmatprep.mubr.f32.mxu0 %v26262_v3  ;;  %785 = vmatpush1.msra.mxu1 %v19954_v10  ;;  %v20281_v10 = vand.u32 4294901760, %v66_v5 }
  0x37   :  { %614 = vmatmul.mubr.f32.gmra.mxu1 %v20150_v59  ;;  %731 = vmatmul.mubr.f32.vlgmr.msra.gmra.mxu0 %v20022_v34 }
  0x38   :  { %787 = vmatprep.subr.mxu1 %v19956_v11  ;;  %619 = vmatprep.mubr.f32.mxu1 %v26262_v3  ;;  %v36_v11 = vld [vmem:[%s26254_s1 + $0x90] sm:$0xff]  ;;  %v20327_v31 = vsub.f32 %v66_v5, %v20281_v10 }
  0x39   :  { %789 = vmatpush1.msra.mxu1 %v19958_v12  ;;  %736 = vmatprep.mubr.f32.mxu0 %v26262_v3  ;;  %v35_v12 = vld [vmem:[%s26254_s1 + $0x88] sm:$0xff]  ;;  %v20317_v8 = vand.u32 4294901760, %v36_v11 }
  0x3a   :  { %791 = vmatprep.subr.mxu1 %v19970_v16  ;;  %884 = vmatprep.subr.mxu0 %v20228_v24  ;;  %v21_v16 = vld [vmem:[%s26254_s1 + $0x18] sm:$0xff]  ;;  %v20334_v36 = vand.u32 4294901760, %v35_v12 }
  0x3b   :  { %793 = vmatpush1.msra.mxu1 %v19972_v17  ;;  %738 = vmatmul.mubr.f32.gmra.mxu0 %v20087_v1  ;;  %v1007_v17 = vsub.f32 %v20256_v33, %v1006_v43  ;;  %v20338_v44 = vand.u32 4294901760, %v21_v16  ;;  %v20361_v54 = vsub.f32 %v36_v11, %v20317_v8  ;;  %v1026_v11 = vand.u32 4294901760, %v1025_v62 }
  0x3c   :  { %623 = vmatmul.mubr.f32.gmra.mxu1 %v20163_v14  ;;  %795 = vmatprep.subr.mxu1 %v19974_v18  ;;  %v20332_v18 = vsub.f32 %v65_v6, %v20292_v47  ;;  %v20366_v57 = vsub.f32 %v35_v12, %v20334_v36  ;;  %v1043_v12 = vsub.f32 %v20342_v48, %v1042_v13 }
  0x3d   :  { %797 = vmatpush1.msra.mxu1 %v19996_v23  ;;  %886 = vmatpush1.msra.mxu0 %v20245_v4  ;;  %v20347_v23 = vsub.f32 %v50_v39, %v20309_v0  ;;  %v1008_v50 = vand.u32 4294901760, %v1007_v17  ;;  %v20376_v27 = vsub.f32 %v21_v16, %v20338_v44  ;;  %v1054_v6 = vand.u32 4294901760, %v20361_v54 }
  0x3e   :  { %799 = vmatprep.subr.mxu1 %v20002_v25  ;;  %888 = vmatprep.subr.mxu0 %v20253_v32  ;;  %v1013_v25 = vsub.f32 %v20274_v37, %v1012_v7  ;;  %v1036_v58 = vand.u32 4294901760, %v20332_v18  ;;  %v26258_v39 = vand.u32 4294901760, %v20366_v57 }
  0x3f   :  { %743 = vmatprep.mubr.f32.mxu0 %v26262_v3  ;;  %801 = vmatpush1.msra.mxu1 %v20013_v29  ;;  %v1030_v29 = vand.u32 4294901760, %v20327_v31  ;;  %v1048_v28 = vand.u32 4294901760, %v20347_v23  ;;  %v1066_v16 = vand.u32 4294901760, %v20376_v27 }
  0x40   :  { %834 = vmatprep.mubr.f32.mxu1 %v26262_v3  ;;  %890 = vmatpush1.msra.mxu0 %v20266_v35  ;;  %v1014_v19 = vand.u32 4294901760, %v1013_v25  ;;  %v1037_v38 = vsub.f32 %v20332_v18, %v1036_v58  ;;  %v1061_v62 = vsub.f32 %v20366_v57, %v26258_v39 }
  0x41   :  { %745 = vmatmul.mubr.f32.gmra.mxu0 %v20122_v40  ;;  %836 = vmatmul.mubr.f32.vlgmr.msra.gmra.mxu1 %v20022_v34  ;;  %v1031_v5 = vsub.f32 %v20327_v31, %v1030_v29  ;;  %v1049_v17 = vsub.f32 %v20347_v23, %v1048_v28 }
  0x42   :  { %892 = vmatprep.subr.mxu0 %v20281_v10  ;;  %750 = vmatprep.mubr.f32.mxu0 %v26262_v3  ;;  %v1038_v53 = vand.u32 4294901760, %v1037_v38  ;;  %v1073_v38 = vsub.f32 %v20381_v26, %v1072_v20 }
  0x43   :  { %894 = vmatpush1.msra.mxu0 %v20292_v47  ;;  %841 = vmatprep.mubr.f32.mxu1 %v26262_v3  ;;  %v1032_v25 = vand.u32 4294901760, %v1031_v5  ;;  %v1050_v5 = vand.u32 4294901760, %v1049_v17 }
  0x44   :  { %896 = vmatprep.subr.mxu0 %v20302_v60  ;;  %1009 = vmatprep.subr.mxu1 %v1008_v50  ;;  %v1055_v50 = vsub.f32 %v20361_v54, %v1054_v6  ;;  %v1074_v17 = vand.u32 4294901760, %v1073_v38 }
  0x45   :  { %898 = vmatpush1.msra.mxu0 %v20309_v0  ;;  %843 = vmatmul.mubr.f32.gmra.mxu1 %v20087_v1 }
  0x46   :  { %752 = vmatmul.mubr.f32.gmra.mxu0 %v20146_v55  ;;  %900 = vmatprep.subr.mxu0 %v20317_v8  ;;  %v1056_v39 = vand.u32 4294901760, %v1055_v50 }
  0x47   :  { %902 = vmatpush1.msra.mxu0 %v20334_v36  ;;  %1015 = vmatpush1.msra.mxu1 %v1014_v19  ;;  %v1044_v19 = vand.u32 4294901760, %v1043_v12 }
  0x48   :  { %904 = vmatprep.subr.mxu0 %v20338_v44  ;;  %1021 = vmatprep.subr.mxu1 %v1020_v30  ;;  %v1067_v30 = vsub.f32 %v20376_v27, %v1066_v16 }
  0x49   :  { %848 = vmatprep.mubr.f32.mxu1 %v26262_v3  ;;  %906 = vmatpush1.msra.mxu0 %v20352_v49 }
  0x4a   :  { %939 = vmatprep.mubr.f32.mxu0 %v26262_v3  ;;  %1027 = vmatpush1.msra.mxu1 %v1026_v11  ;;  %v1062_v11 = vand.u32 4294901760, %v1061_v62  ;;  %v1068_v12 = vand.u32 4294901760, %v1067_v30 }
  0x4b   :  { %850 = vmatmul.mubr.f32.gmra.mxu1 %v20122_v40  ;;  %945 = vmatmul.mubr.f32.vlgmr.msra.gmra.mxu0 %v20090_v2 }
  0x4c   :  { %1033 = vmatprep.subr.mxu1 %v1032_v25  ;;  %855 = vmatprep.mubr.f32.mxu1 %v26262_v3 }
  0x4d   :  { %1039 = vmatpush1.msra.mxu1 %v1038_v53  ;;  %950 = vmatprep.mubr.f32.mxu0 %v26262_v3 }
  0x4e   :  { %1045 = vmatprep.subr.mxu1 %v1044_v19  ;;  %1159 = vmatprep.subr.mxu0 %v20256_v33  ;;  %v98_v33 = vld [vmem:[%s26254_s1 + $0x280] sm:$0xff] }
  0x4f   :  { %1051 = vmatpush1.msra.mxu1 %v1050_v5  ;;  %956 = vmatmul.mubr.f32.gmra.mxu0 %v20152_v61 }
  0x50   :  { %857 = vmatmul.mubr.f32.gmra.mxu1 %v20146_v55  ;;  %1057 = vmatprep.subr.mxu1 %v1056_v39  ;;  %v22_v39 = vld [vmem:[%s26254_s1 + $0x20] sm:$0xff] }
  0x51   :  { %1063 = vmatpush1.msra.mxu1 %v1062_v11  ;;  %1162 = vmatpush1.msra.mxu0 %v20274_v37  ;;  %v20492_v37 = vand.u32 4294901760, %v98_v33  ;;  %v20616_v62 = vand.u32 4294901760, %v22_v39 }
  0x52   :  { %1069 = vmatprep.subr.mxu1 %v1068_v12  ;;  %1165 = vmatprep.subr.mxu0 %v20288_v46  ;;  %v83_v46 = vld [vmem:[%s26254_s1 + $0x208] sm:$0xff] }
  0x53   :  { %961 = vmatprep.mubr.f32.mxu0 %v26262_v3  ;;  %1075 = vmatpush1.msra.mxu1 %v1074_v17 }
  0x54   :  { %1108 = vmatprep.mubr.f32.mxu1 %v26262_v3  ;;  %1168 = vmatpush1.msra.mxu0 %v20300_v56 }
  0x55   :  { %967 = vmatmul.mubr.f32.gmra.mxu0 %v20166_v21  ;;  %1110 = vmatmul.mubr.f32.vlgmr.msra.gmra.mxu1 %v20022_v34 }
  0x56   :  { %1171 = vmatprep.subr.mxu0 %v20327_v31  ;;  %972 = vmatprep.mubr.f32.mxu0 %v26262_v3  ;;  %v20520_v31 = vsub.f32 %v98_v33, %v20492_v37 }
  0x57   :  { %1174 = vmatpush1.msra.mxu0 %v20332_v18  ;;  %1115 = vmatprep.mubr.f32.mxu1 %v26262_v3 }
  0x58   :  { %1177 = vmatprep.subr.mxu0 %v20342_v48  ;;  %1279 = vmatprep.subr.mxu1 %v20228_v24  ;;  %v53_v48 = vld [vmem:[%s26254_s1 + $0x118] sm:$0xff] }
  0x59   :  { %1180 = vmatpush1.msra.mxu0 %v20347_v23  ;;  %1117 = vmatmul.mubr.f32.gmra.mxu1 %v20087_v1  ;;  %v52_v23 = vld [vmem:[%s26254_s1 + $0x110] sm:$0xff] }
  0x5a   :  { %978 = vmatmul.mubr.f32.gmra.mxu0 %v20175_v22  ;;  %1183 = vmatprep.subr.mxu0 %v20361_v54 }
  0x5b   :  { %1186 = vmatpush1.msra.mxu0 %v20366_v57  ;;  %1281 = vmatpush1.msra.mxu1 %v20245_v4 }
  0x5c   :  { %1189 = vmatprep.subr.mxu0 %v20376_v27  ;;  %1283 = vmatprep.subr.mxu1 %v20253_v32  ;;  %v20573_v27 = vand.u32 4294901760, %v52_v23 }
  0x5d   :  { %1122 = vmatprep.mubr.f32.mxu1 %v26262_v3  ;;  %1192 = vmatpush1.msra.mxu0 %v20381_v26 }
  0x5e   :  { %1225 = vmatprep.mubr.f32.mxu0 %v26262_v3  ;;  %1285 = vmatpush1.msra.mxu1 %v20266_v35 }
  0x5f   :  { %1124 = vmatmul.mubr.f32.gmra.mxu1 %v20122_v40  ;;  %1228 = vmatmul.mubr.f32.vlgmr.msra.gmra.mxu0 %v20046_v42 }
  0x60   :  { %1287 = vmatprep.subr.mxu1 %v20281_v10  ;;  %1129 = vmatprep.mubr.f32.mxu1 %v26262_v3 }
  0x61   :  { %1289 = vmatpush1.msra.mxu1 %v20292_v47  ;;  %1233 = vmatprep.mubr.f32.mxu0 %v26262_v3 }
  0x62   :  { %1291 = vmatprep.subr.mxu1 %v20302_v60  ;;  %1394 = vmatprep.subr.mxu0 %v1006_v43  ;;  %v97_v43 = vld [vmem:[%s26254_s1 + $0x278] sm:$0xff] }
  0x63   :  { %1293 = vmatpush1.msra.mxu1 %v20309_v0  ;;  %1236 = vmatmul.mubr.f32.gmra.mxu0 %v20108_v15  ;;  %v20509_v56 = vand.u32 4294901760, %v97_v43 }
  0x64   :  { %1131 = vmatmul.mubr.f32.gmra.mxu1 %v20146_v55  ;;  %1295 = vmatprep.subr.mxu1 %v20317_v8 }
  0x65   :  { %1297 = vmatpush1.msra.mxu1 %v20334_v36  ;;  %1398 = vmatpush1.msra.mxu0 %v1012_v7  ;;  %v82_v7 = vld [vmem:[%s26254_s1 + $0x200] sm:$0xff] }
  0x66   :  { %1299 = vmatprep.subr.mxu1 %v20338_v44  ;;  %1402 = vmatprep.subr.mxu0 %v1018_v9  ;;  %v20517_v9 = vand.u32 4294901760, %v83_v46  ;;  %v20530_v18 = vand.u32 4294901760, %v82_v7 }
  0x67   :  { %1241 = vmatprep.mubr.f32.mxu0 %v26262_v3  ;;  %1301 = vmatpush1.msra.mxu1 %v20352_v49 }
  0x68   :  { %1334 = vmatprep.mubr.f32.mxu1 %v26262_v3  ;;  %1406 = vmatpush1.msra.mxu0 %v1024_v45  ;;  %v20538_v45 = vsub.f32 %v97_v43, %v20509_v56  ;;  %v20552_v54 = vsub.f32 %v83_v46, %v20517_v9  ;;  %v20645_v46 = vsub.f32 %v22_v39, %v20616_v62 }
  0x69   :  { %1244 = vmatmul.mubr.f32.gmra.mxu0 %v20138_v52  ;;  %1338 = vmatmul.mubr.f32.vlgmr.msra.gmra.mxu1 %v20060_v51 }
  0x6a   :  { %1410 = vmatprep.subr.mxu0 %v1030_v29  ;;  %1249 = vmatprep.mubr.f32.mxu0 %v26262_v3  ;;  %v1748_v29 = vand.u32 4294901760, %v20520_v31  ;;  %v1754_v26 = vand.u32 4294901760, %v20538_v45  ;;  %v1814_v39 = vand.u32 4294901760, %v20645_v46 }
  0x6b   :  { %1414 = vmatpush1.msra.mxu0 %v1036_v58  ;;  %1343 = vmatprep.mubr.f32.mxu1 %v26262_v3  ;;  %v20564_v58 = vsub.f32 %v82_v7, %v20530_v18 }
  0x6c   :  { %1418 = vmatprep.subr.mxu0 %v1042_v13  ;;  %1521 = vmatprep.subr.mxu1 %v20228_v24  ;;  %v26490_v24 = vand.u32 4294901760, %v20366_v57  ;;  %v20566_v13 = vand.u32 4294901760, %v53_v48 }
  0x6d   :  { %1422 = vmatpush1.msra.mxu0 %v1048_v28  ;;  %1347 = vmatmul.mubr.f32.gmra.mxu1 %v20126_v41  ;;  %v1766_v50 = vand.u32 4294901760, %v20564_v58 }
  0x6e   :  { %1252 = vmatmul.mubr.f32.gmra.mxu0 %v20156_v63  ;;  %1426 = vmatprep.subr.mxu0 %v1054_v6  ;;  %v1760_v6 = vand.u32 4294901760, %v20552_v54  ;;  %v20606_v53 = vsub.f32 %v53_v48, %v20566_v13 }
  0x6f   :  { %1430 = vmatpush1.msra.mxu0 %v26490_v24  ;;  %1523 = vmatpush1.msra.mxu1 %v20245_v4  ;;  %v68_v4 = vld [vmem:[%s26254_s1 + $0x190] sm:$0xff]  ;;  %v1767_v12 = vsub.f32 %v20564_v58, %v1766_v50 }
  0x70   :  { %1434 = vmatprep.subr.mxu0 %v1066_v16  ;;  %1525 = vmatprep.subr.mxu1 %v20253_v32  ;;  %v67_v32 = vld [vmem:[%s26254_s1 + $0x188] sm:$0xff]  ;;  %v1761_v30 = vsub.f32 %v20552_v54, %v1760_v6  ;;  %v1784_v17 = vand.u32 4294901760, %v20606_v53 }
  0x71   :  { %1352 = vmatprep.mubr.f32.mxu1 %v26262_v3  ;;  %1438 = vmatpush1.msra.mxu0 %v1072_v20  ;;  %v20556_v57 = vand.u32 4294901760, %v67_v32 }
  0x72   :  { %1471 = vmatprep.mubr.f32.mxu0 %v26262_v3  ;;  %1527 = vmatpush1.msra.mxu1 %v20266_v35  ;;  %v20545_v35 = vand.u32 4294901760, %v68_v4  ;;  %v1762_v7 = vand.u32 4294901760, %v1761_v30 }
  0x73   :  { %1356 = vmatmul.mubr.f32.gmra.mxu1 %v20150_v59  ;;  %1473 = vmatmul.mubr.f32.vlgmr.msra.gmra.mxu0 %v20022_v34 }
  0x74   :  { %1529 = vmatprep.subr.mxu1 %v20281_v10  ;;  %1361 = vmatprep.mubr.f32.mxu1 %v26262_v3  ;;  %v38_v10 = vld [vmem:[%s26254_s1 + $0xa0] sm:$0xff]  ;;  %v20591_v16 = vsub.f32 %v68_v4, %v20545_v35 }
  0x75   :  { %1531 = vmatpush1.msra.mxu1 %v20292_v47  ;;  %1478 = vmatprep.mubr.f32.mxu0 %v26262_v3  ;;  %v37_v47 = vld [vmem:[%s26254_s1 + $0x98] sm:$0xff]  ;;  %v20581_v28 = vand.u32 4294901760, %v38_v10 }
  0x76   :  { %1533 = vmatprep.subr.mxu1 %v20302_v60  ;;  %1626 = vmatprep.subr.mxu0 %v20492_v37  ;;  %v23_v60 = vld [vmem:[%s26254_s1 + $0x28] sm:$0xff]  ;;  %v20598_v20 = vand.u32 4294901760, %v37_v47 }
  0x77   :  { %1535 = vmatpush1.msra.mxu1 %v20309_v0  ;;  %1480 = vmatmul.mubr.f32.gmra.mxu0 %v20087_v1  ;;  %v1749_v0 = vsub.f32 %v20520_v31, %v1748_v29  ;;  %v20602_v25 = vand.u32 4294901760, %v23_v60  ;;  %v20625_v5 = vsub.f32 %v38_v10, %v20581_v28  ;;  %v1768_v10 = vand.u32 4294901760, %v1767_v12 }
  0x78   :  { %1365 = vmatmul.mubr.f32.gmra.mxu1 %v20163_v14  ;;  %1537 = vmatprep.subr.mxu1 %v20317_v8  ;;  %v20596_v8 = vsub.f32 %v67_v32, %v20556_v57  ;;  %v20630_v38 = vsub.f32 %v37_v47, %v20598_v20  ;;  %v1785_v47 = vsub.f32 %v20606_v53, %v1784_v17 }
  0x79   :  { %1539 = vmatpush1.msra.mxu1 %v20334_v36  ;;  %1628 = vmatpush1.msra.mxu0 %v20509_v56  ;;  %v20611_v36 = vsub.f32 %v52_v23, %v20573_v27  ;;  %v1750_v19 = vand.u32 4294901760, %v1749_v0  ;;  %v20640_v33 = vsub.f32 %v23_v60, %v20602_v25  ;;  %v1796_v32 = vand.u32 4294901760, %v20625_v5 }
  0x7a   :  { %1541 = vmatprep.subr.mxu1 %v20338_v44  ;;  %1630 = vmatprep.subr.mxu0 %v20517_v9  ;;  %v1755_v44 = vsub.f32 %v20538_v45, %v1754_v26  ;;  %v1778_v11 = vand.u32 4294901760, %v20596_v8  ;;  %v26259_v23 = vand.u32 4294901760, %v20630_v38 }
  0x7b   :  { %1485 = vmatprep.mubr.f32.mxu0 %v26262_v3  ;;  %1543 = vmatpush1.msra.mxu1 %v20352_v49  ;;  %v1772_v49 = vand.u32 4294901760, %v20591_v16  ;;  %v1790_v24 = vand.u32 4294901760, %v20611_v36  ;;  %v1808_v60 = vand.u32 4294901760, %v20640_v33 }
  0x7c   :  { %1576 = vmatprep.mubr.f32.mxu1 %v26262_v3  ;;  %1632 = vmatpush1.msra.mxu0 %v20530_v18  ;;  %v1756_v43 = vand.u32 4294901760, %v1755_v44  ;;  %v1779_v48 = vsub.f32 %v20596_v8, %v1778_v11  ;;  %v1803_v12 = vsub.f32 %v20630_v38, %v26259_v23 }
  0x7d   :  { %1487 = vmatmul.mubr.f32.gmra.mxu0 %v20122_v40  ;;  %1578 = vmatmul.mubr.f32.vlgmr.msra.gmra.mxu1 %v20022_v34  ;;  %v1773_v4 = vsub.f32 %v20591_v16, %v1772_v49  ;;  %v1791_v0 = vsub.f32 %v20611_v36, %v1790_v24 }
  0x7e   :  { %1634 = vmatprep.subr.mxu0 %v20545_v35  ;;  %1492 = vmatprep.mubr.f32.mxu0 %v26262_v3  ;;  %v1780_v30 = vand.u32 4294901760, %v1779_v48  ;;  %v1815_v48 = vsub.f32 %v20645_v46, %v1814_v39 }
  0x7f   :  { %1636 = vmatpush1.msra.mxu0 %v20556_v57  ;;  %1583 = vmatprep.mubr.f32.mxu1 %v26262_v3  ;;  %v1774_v44 = vand.u32 4294901760, %v1773_v4  ;;  %v1792_v4 = vand.u32 4294901760, %v1791_v0 }
  0x80   :  { %1638 = vmatprep.subr.mxu0 %v20566_v13  ;;  %1751 = vmatprep.subr.mxu1 %v1750_v19  ;;  %v1797_v19 = vsub.f32 %v20625_v5, %v1796_v32  ;;  %v1816_v0 = vand.u32 4294901760, %v1815_v48 }
  0x81   :  { %1640 = vmatpush1.msra.mxu0 %v20573_v27  ;;  %1585 = vmatmul.mubr.f32.gmra.mxu1 %v20087_v1 }
  0x82   :  { %1494 = vmatmul.mubr.f32.gmra.mxu0 %v20146_v55  ;;  %1642 = vmatprep.subr.mxu0 %v20581_v28  ;;  %v1798_v23 = vand.u32 4294901760, %v1797_v19 }
  0x83   :  { %1644 = vmatpush1.msra.mxu0 %v20598_v20  ;;  %1757 = vmatpush1.msra.mxu1 %v1756_v43  ;;  %v1786_v43 = vand.u32 4294901760, %v1785_v47 }
  0x84   :  { %1646 = vmatprep.subr.mxu0 %v20602_v25  ;;  %1763 = vmatprep.subr.mxu1 %v1762_v7  ;;  %v1809_v7 = vsub.f32 %v20640_v33, %v1808_v60 }
  0x85   :  { %1590 = vmatprep.mubr.f32.mxu1 %v26262_v3  ;;  %1648 = vmatpush1.msra.mxu0 %v20616_v62 }
  0x86   :  { %1681 = vmatprep.mubr.f32.mxu0 %v26262_v3  ;;  %1769 = vmatpush1.msra.mxu1 %v1768_v10  ;;  %v1804_v10 = vand.u32 4294901760, %v1803_v12  ;;  %v1810_v47 = vand.u32 4294901760, %v1809_v7 }
  0x87   :  { %1592 = vmatmul.mubr.f32.gmra.mxu1 %v20122_v40  ;;  %1687 = vmatmul.mubr.f32.vlgmr.msra.gmra.mxu0 %v20090_v2 }
  0x88   :  { %1775 = vmatprep.subr.mxu1 %v1774_v44  ;;  %1597 = vmatprep.mubr.f32.mxu1 %v26262_v3 }
  0x89   :  { %1781 = vmatpush1.msra.mxu1 %v1780_v30  ;;  %1692 = vmatprep.mubr.f32.mxu0 %v26262_v3 }
  0x8a   :  { %1787 = vmatprep.subr.mxu1 %v1786_v43  ;;  %1901 = vmatprep.subr.mxu0 %v20520_v31  ;;  %v100_v31 = vld [vmem:[%s26254_s1 + $0x290] sm:$0xff] }
  0x8b   :  { %1793 = vmatpush1.msra.mxu1 %v1792_v4  ;;  %1698 = vmatmul.mubr.f32.gmra.mxu0 %v20152_v61 }
  0x8c   :  { %1599 = vmatmul.mubr.f32.gmra.mxu1 %v20146_v55  ;;  %1799 = vmatprep.subr.mxu1 %v1798_v23  ;;  %v24_v23 = vld [vmem:[%s26254_s1 + $0x30] sm:$0xff] }
  0x8d   :  { %1805 = vmatpush1.msra.mxu1 %v1804_v10  ;;  %1904 = vmatpush1.msra.mxu0 %v20538_v45  ;;  %v20756_v45 = vand.u32 4294901760, %v100_v31  ;;  %v20880_v12 = vand.u32 4294901760, %v24_v23 }
  0x8e   :  { %1811 = vmatprep.subr.mxu1 %v1810_v47  ;;  %1907 = vmatprep.subr.mxu0 %v20552_v54  ;;  %v85_v54 = vld [vmem:[%s26254_s1 + $0x218] sm:$0xff] }
  0x8f   :  { %1703 = vmatprep.mubr.f32.mxu0 %v26262_v3  ;;  %1817 = vmatpush1.msra.mxu1 %v1816_v0 }
  0x90   :  { %1850 = vmatprep.mubr.f32.mxu1 %v26262_v3  ;;  %1910 = vmatpush1.msra.mxu0 %v20564_v58 }
  0x91   :  { %1709 = vmatmul.mubr.f32.gmra.mxu0 %v20166_v21  ;;  %1852 = vmatmul.mubr.f32.vlgmr.msra.gmra.mxu1 %v20022_v34 }
  0x92   :  { %1913 = vmatprep.subr.mxu0 %v20591_v16  ;;  %1714 = vmatprep.mubr.f32.mxu0 %v26262_v3  ;;  %v20784_v16 = vsub.f32 %v100_v31, %v20756_v45 }
  0x93   :  { %1916 = vmatpush1.msra.mxu0 %v20596_v8  ;;  %1857 = vmatprep.mubr.f32.mxu1 %v26262_v3 }
  0x94   :  { %1919 = vmatprep.subr.mxu0 %v20606_v53  ;;  %2021 = vmatprep.subr.mxu1 %v20492_v37  ;;  %v55_v53 = vld [vmem:[%s26254_s1 + $0x128] sm:$0xff] }
  0x95   :  { %1922 = vmatpush1.msra.mxu0 %v20611_v36  ;;  %1859 = vmatmul.mubr.f32.gmra.mxu1 %v20087_v1  ;;  %v54_v36 = vld [vmem:[%s26254_s1 + $0x120] sm:$0xff] }
  0x96   :  { %1720 = vmatmul.mubr.f32.gmra.mxu0 %v20175_v22  ;;  %1925 = vmatprep.subr.mxu0 %v20625_v5 }
  0x97   :  { %1928 = vmatpush1.msra.mxu0 %v20630_v38  ;;  %2023 = vmatpush1.msra.mxu1 %v20509_v56 }
  0x98   :  { %1931 = vmatprep.subr.mxu0 %v20640_v33  ;;  %2025 = vmatprep.subr.mxu1 %v20517_v9  ;;  %v20837_v33 = vand.u32 4294901760, %v54_v36 }
  0x99   :  { %1864 = vmatprep.mubr.f32.mxu1 %v26262_v3  ;;  %1934 = vmatpush1.msra.mxu0 %v20645_v46 }
  0x9a   :  { %1967 = vmatprep.mubr.f32.mxu0 %v26262_v3  ;;  %2027 = vmatpush1.msra.mxu1 %v20530_v18 }
  0x9b   :  { %1866 = vmatmul.mubr.f32.gmra.mxu1 %v20122_v40  ;;  %1970 = vmatmul.mubr.f32.vlgmr.msra.gmra.mxu0 %v20046_v42 }
  0x9c   :  { %2029 = vmatprep.subr.mxu1 %v20545_v35  ;;  %1871 = vmatprep.mubr.f32.mxu1 %v26262_v3 }
  0x9d   :  { %2031 = vmatpush1.msra.mxu1 %v20556_v57  ;;  %1975 = vmatprep.mubr.f32.mxu0 %v26262_v3 }
  0x9e   :  { %2033 = vmatprep.subr.mxu1 %v20566_v13  ;;  %2136 = vmatprep.subr.mxu0 %v1748_v29  ;;  %v99_v29 = vld [vmem:[%s26254_s1 + $0x288] sm:$0xff] }
  0x9f   :  { %2035 = vmatpush1.msra.mxu1 %v20573_v27  ;;  %1978 = vmatmul.mubr.f32.gmra.mxu0 %v20108_v15  ;;  %v20773_v58 = vand.u32 4294901760, %v99_v29 }
  0xa0   :  { %1873 = vmatmul.mubr.f32.gmra.mxu1 %v20146_v55  ;;  %2037 = vmatprep.subr.mxu1 %v20581_v28 }
  0xa1   :  { %2039 = vmatpush1.msra.mxu1 %v20598_v20  ;;  %2140 = vmatpush1.msra.mxu0 %v1754_v26  ;;  %v84_v26 = vld [vmem:[%s26254_s1 + $0x210] sm:$0xff] }
  0xa2   :  { %2041 = vmatprep.subr.mxu1 %v20602_v25  ;;  %2144 = vmatprep.subr.mxu0 %v1760_v6  ;;  %v20781_v6 = vand.u32 4294901760, %v85_v54  ;;  %v20794_v8 = vand.u32 4294901760, %v84_v26 }
  0xa3   :  { %1983 = vmatprep.mubr.f32.mxu0 %v26262_v3  ;;  %2043 = vmatpush1.msra.mxu1 %v20616_v62 }
  0xa4   :  { %2076 = vmatprep.mubr.f32.mxu1 %v26262_v3  ;;  %2148 = vmatpush1.msra.mxu0 %v1766_v50  ;;  %v20802_v50 = vsub.f32 %v99_v29, %v20773_v58  ;;  %v20816_v5 = vsub.f32 %v85_v54, %v20781_v6  ;;  %v20909_v54 = vsub.f32 %v24_v23, %v20880_v12 }
  0xa5   :  { %1986 = vmatmul.mubr.f32.gmra.mxu0 %v20138_v52  ;;  %2080 = vmatmul.mubr.f32.vlgmr.msra.gmra.mxu1 %v20060_v51 }
  0xa6   :  { %2152 = vmatprep.subr.mxu0 %v1772_v49  ;;  %1991 = vmatprep.mubr.f32.mxu0 %v26262_v3  ;;  %v2490_v49 = vand.u32 4294901760, %v20784_v16  ;;  %v2496_v46 = vand.u32 4294901760, %v20802_v50  ;;  %v2556_v23 = vand.u32 4294901760, %v20909_v54 }
  0xa7   :  { %2156 = vmatpush1.msra.mxu0 %v1778_v11  ;;  %2085 = vmatprep.mubr.f32.mxu1 %v26262_v3  ;;  %v20828_v11 = vsub.f32 %v84_v26, %v20794_v8 }
  0xa8   :  { %2160 = vmatprep.subr.mxu0 %v1784_v17  ;;  %2263 = vmatprep.subr.mxu1 %v20492_v37  ;;  %v26491_v37 = vand.u32 4294901760, %v20630_v38  ;;  %v20830_v17 = vand.u32 4294901760, %v55_v53 }
  0xa9   :  { %2164 = vmatpush1.msra.mxu0 %v1790_v24  ;;  %2089 = vmatmul.mubr.f32.gmra.mxu1 %v20126_v41  ;;  %v2508_v19 = vand.u32 4294901760, %v20828_v11 }
  0xaa   :  { %1994 = vmatmul.mubr.f32.gmra.mxu0 %v20156_v63  ;;  %2168 = vmatprep.subr.mxu0 %v1796_v32  ;;  %v2502_v32 = vand.u32 4294901760, %v20816_v5  ;;  %v20870_v30 = vsub.f32 %v55_v53, %v20830_v17 }
  0xab   :  { %2172 = vmatpush1.msra.mxu0 %v26491_v37  ;;  %2265 = vmatpush1.msra.mxu1 %v20509_v56  ;;  %v70_v56 = vld [vmem:[%s26254_s1 + $0x1a0] sm:$0xff]  ;;  %v2509_v47 = vsub.f32 %v20828_v11, %v2508_v19 }
  0xac   :  { %2176 = vmatprep.subr.mxu0 %v1808_v60  ;;  %2267 = vmatprep.subr.mxu1 %v20517_v9  ;;  %v69_v9 = vld [vmem:[%s26254_s1 + $0x198] sm:$0xff]  ;;  %v2503_v7 = vsub.f32 %v20816_v5, %v2502_v32  ;;  %v2526_v0 = vand.u32 4294901760, %v20870_v30 }
  0xad   :  { %2094 = vmatprep.mubr.f32.mxu1 %v26262_v3  ;;  %2180 = vmatpush1.msra.mxu0 %v1814_v39  ;;  %v20820_v38 = vand.u32 4294901760, %v69_v9 }
  0xae   :  { %2213 = vmatprep.mubr.f32.mxu0 %v26262_v3  ;;  %2269 = vmatpush1.msra.mxu1 %v20530_v18  ;;  %v20809_v18 = vand.u32 4294901760, %v70_v56  ;;  %v2504_v26 = vand.u32 4294901760, %v2503_v7 }
  0xaf   :  { %2098 = vmatmul.mubr.f32.gmra.mxu1 %v20150_v59  ;;  %2215 = vmatmul.mubr.f32.vlgmr.msra.gmra.mxu0 %v20022_v34 }
  0xb0   :  { %2271 = vmatprep.subr.mxu1 %v20545_v35  ;;  %2103 = vmatprep.mubr.f32.mxu1 %v26262_v3  ;;  %v40_v35 = vld [vmem:[%s26254_s1 + $0xb0] sm:$0xff]  ;;  %v20855_v60 = vsub.f32 %v70_v56, %v20809_v18 }
  0xb1   :  { %2273 = vmatpush1.msra.mxu1 %v20556_v57  ;;  %2220 = vmatprep.mubr.f32.mxu0 %v26262_v3  ;;  %v39_v57 = vld [vmem:[%s26254_s1 + $0xa8] sm:$0xff]  ;;  %v20845_v24 = vand.u32 4294901760, %v40_v35 }
  0xb2   :  { %2275 = vmatprep.subr.mxu1 %v20566_v13  ;;  %2368 = vmatprep.subr.mxu0 %v20756_v45  ;;  %v25_v13 = vld [vmem:[%s26254_s1 + $0x38] sm:$0xff]  ;;  %v20862_v39 = vand.u32 4294901760, %v39_v57 }
  0xb3   :  { %2277 = vmatpush1.msra.mxu1 %v20573_v27  ;;  %2222 = vmatmul.mubr.f32.gmra.mxu0 %v20087_v1  ;;  %v2491_v27 = vsub.f32 %v20784_v16, %v2490_v49  ;;  %v20866_v44 = vand.u32 4294901760, %v25_v13  ;;  %v20889_v4 = vsub.f32 %v40_v35, %v20845_v24  ;;  %v2510_v35 = vand.u32 4294901760, %v2509_v47 }
  0xb4   :  { %2107 = vmatmul.mubr.f32.gmra.mxu1 %v20163_v14  ;;  %2279 = vmatprep.subr.mxu1 %v20581_v28  ;;  %v20860_v28 = vsub.f32 %v69_v9, %v20820_v38  ;;  %v20894_v48 = vsub.f32 %v39_v57, %v20862_v39  ;;  %v2527_v57 = vsub.f32 %v20870_v30, %v2526_v0 }
  0xb5   :  { %2281 = vmatpush1.msra.mxu1 %v20598_v20  ;;  %2370 = vmatpush1.msra.mxu0 %v20773_v58  ;;  %v20875_v20 = vsub.f32 %v54_v36, %v20837_v33  ;;  %v2492_v43 = vand.u32 4294901760, %v2491_v27  ;;  %v20904_v31 = vsub.f32 %v25_v13, %v20866_v44  ;;  %v2538_v9 = vand.u32 4294901760, %v20889_v4 }
  0xb6   :  { %2283 = vmatprep.subr.mxu1 %v20602_v25  ;;  %2372 = vmatprep.subr.mxu0 %v20781_v6  ;;  %v2497_v25 = vsub.f32 %v20802_v50, %v2496_v46  ;;  %v2520_v10 = vand.u32 4294901760, %v20860_v28  ;;  %v26260_v36 = vand.u32 4294901760, %v20894_v48 }
  0xb7   :  { %2227 = vmatprep.mubr.f32.mxu0 %v26262_v3  ;;  %2285 = vmatpush1.msra.mxu1 %v20616_v62  ;;  %v2514_v62 = vand.u32 4294901760, %v20855_v60  ;;  %v2532_v37 = vand.u32 4294901760, %v20875_v20  ;;  %v2550_v13 = vand.u32 4294901760, %v20904_v31 }
  0xb8   :  { %2318 = vmatprep.mubr.f32.mxu1 %v26262_v3  ;;  %2374 = vmatpush1.msra.mxu0 %v20794_v8  ;;  %v2498_v29 = vand.u32 4294901760, %v2497_v25  ;;  %v2521_v53 = vsub.f32 %v20860_v28, %v2520_v10  ;;  %v2545_v47 = vsub.f32 %v20894_v48, %v26260_v36 }
  0xb9   :  { %2229 = vmatmul.mubr.f32.gmra.mxu0 %v20122_v40  ;;  %2320 = vmatmul.mubr.f32.vlgmr.msra.gmra.mxu1 %v20022_v34  ;;  %v2515_v56 = vsub.f32 %v20855_v60, %v2514_v62  ;;  %v2533_v27 = vsub.f32 %v20875_v20, %v2532_v37 }
  0xba   :  { %2376 = vmatprep.subr.mxu0 %v20809_v18  ;;  %2234 = vmatprep.mubr.f32.mxu0 %v26262_v3  ;;  %v2522_v7 = vand.u32 4294901760, %v2521_v53  ;;  %v2557_v53 = vsub.f32 %v20909_v54, %v2556_v23 }
  0xbb   :  { %2378 = vmatpush1.msra.mxu0 %v20820_v38  ;;  %2325 = vmatprep.mubr.f32.mxu1 %v26262_v3  ;;  %v2516_v25 = vand.u32 4294901760, %v2515_v56  ;;  %v2534_v56 = vand.u32 4294901760, %v2533_v27 }
  0xbc   :  { %2380 = vmatprep.subr.mxu0 %v20830_v17  ;;  %2493 = vmatprep.subr.mxu1 %v2492_v43  ;;  %v2539_v43 = vsub.f32 %v20889_v4, %v2538_v9  ;;  %v2558_v27 = vand.u32 4294901760, %v2557_v53 }
  0xbd   :  { %2382 = vmatpush1.msra.mxu0 %v20837_v33  ;;  %2327 = vmatmul.mubr.f32.gmra.mxu1 %v20087_v1 }
  0xbe   :  { %2236 = vmatmul.mubr.f32.gmra.mxu0 %v20146_v55  ;;  %2384 = vmatprep.subr.mxu0 %v20845_v24  ;;  %v2540_v36 = vand.u32 4294901760, %v2539_v43 }
  0xbf   :  { %2386 = vmatpush1.msra.mxu0 %v20862_v39  ;;  %2499 = vmatpush1.msra.mxu1 %v2498_v29  ;;  %v2528_v29 = vand.u32 4294901760, %v2527_v57 }
  0xc0   :  { %2388 = vmatprep.subr.mxu0 %v20866_v44  ;;  %2505 = vmatprep.subr.mxu1 %v2504_v26  ;;  %v2551_v26 = vsub.f32 %v20904_v31, %v2550_v13 }
  0xc1   :  { %2332 = vmatprep.mubr.f32.mxu1 %v26262_v3  ;;  %2390 = vmatpush1.msra.mxu0 %v20880_v12 }
  0xc2   :  { %2423 = vmatprep.mubr.f32.mxu0 %v26262_v3  ;;  %2511 = vmatpush1.msra.mxu1 %v2510_v35  ;;  %v2546_v35 = vand.u32 4294901760, %v2545_v47  ;;  %v2552_v57 = vand.u32 4294901760, %v2551_v26 }
  0xc3   :  { %2334 = vmatmul.mubr.f32.gmra.mxu1 %v20122_v40  ;;  %2429 = vmatmul.mubr.f32.vlgmr.msra.gmra.mxu0 %v20090_v2 }
  0xc4   :  { %2517 = vmatprep.subr.mxu1 %v2516_v25  ;;  %2339 = vmatprep.mubr.f32.mxu1 %v26262_v3 }
  0xc5   :  { %2523 = vmatpush1.msra.mxu1 %v2522_v7  ;;  %2434 = vmatprep.mubr.f32.mxu0 %v26262_v3 }
  0xc6   :  { %2529 = vmatprep.subr.mxu1 %v2528_v29  ;;  %2643 = vmatprep.subr.mxu0 %v20784_v16 }
  0xc7   :  { %2535 = vmatpush1.msra.mxu1 %v2534_v56  ;;  %2440 = vmatmul.mubr.f32.gmra.mxu0 %v20152_v61 }
  0xc8   :  { %2341 = vmatmul.mubr.f32.gmra.mxu1 %v20146_v55  ;;  %2541 = vmatprep.subr.mxu1 %v2540_v36 }
  0xc9   :  { %2547 = vmatpush1.msra.mxu1 %v2546_v35  ;;  %2646 = vmatpush1.msra.mxu0 %v20802_v50 }
  0xca   :  { %2553 = vmatprep.subr.mxu1 %v2552_v57  ;;  %2649 = vmatprep.subr.mxu0 %v20816_v5  ;;  %v102_v5 = vld [vmem:[%s26254_s1 + $0x2a0] sm:$0xff] }
  0xcb   :  { %2445 = vmatprep.mubr.f32.mxu0 %v26262_v3  ;;  %2559 = vmatpush1.msra.mxu1 %v2558_v27 }
  0xcc   :  { %2592 = vmatprep.mubr.f32.mxu1 %v26262_v3  ;;  %2652 = vmatpush1.msra.mxu0 %v20828_v11  ;;  %v101_v11 = vld [vmem:[%s26254_s1 + $0x298] sm:$0xff] }
  0xcd   :  { %2451 = vmatmul.mubr.f32.gmra.mxu0 %v20166_v21  ;;  %2594 = vmatmul.mubr.f32.vlgmr.msra.gmra.mxu1 %v20022_v34 }
  0xce   :  { %2655 = vmatprep.subr.mxu0 %v20855_v60  ;;  %2456 = vmatprep.mubr.f32.mxu0 %v26262_v3  ;;  %v21035_v60 = vand.u32 4294901760, %v102_v5 }
  0xcf   :  { %2658 = vmatpush1.msra.mxu0 %v20860_v28  ;;  %2599 = vmatprep.mubr.f32.mxu1 %v26262_v3  ;;  %v21043_v28 = vand.u32 4294901760, %v101_v11 }
  0xd0   :  { %2661 = vmatprep.subr.mxu0 %v20870_v30  ;;  %2763 = vmatprep.subr.mxu1 %v20756_v45 }
  0xd1   :  { %2664 = vmatpush1.msra.mxu0 %v20875_v20  ;;  %2601 = vmatmul.mubr.f32.gmra.mxu1 %v20087_v1  ;;  %v204_v36 = vpop.f32.mrf.mxu0 }
  0xd2   :  { %2462 = vmatmul.mubr.f32.gmra.mxu0 %v20175_v22  ;;  %2667 = vmatprep.subr.mxu0 %v20889_v4  ;;  %v21064_v4 = vsub.f32 %v102_v5, %v21035_v60 }
  0xd3   :  { %2670 = vmatpush1.msra.mxu0 %v20894_v48  ;;  %2765 = vmatpush1.msra.mxu1 %v20773_v58  ;;  %v20978_v25 = vpop.f32.mrf.mxu0 }
  0xd4   :  { %2673 = vmatprep.subr.mxu0 %v20904_v31  ;;  %2767 = vmatprep.subr.mxu1 %v20781_v6  ;;  %26492 = vst [vmem:[#allocation3_spill] sm:$0xff] %v20978_v25  ;;  %v72_v31 = vld [vmem:[%s26254_s1 + $0x1b0] sm:$0xff] }
  0xd5   :  { %2606 = vmatprep.mubr.f32.mxu1 %v26262_v3  ;;  %2676 = vmatpush1.msra.mxu0 %v20909_v54  ;;  %v71_v54 = vld [vmem:[%s26254_s1 + $0x1a8] sm:$0xff] }
  0xd6   :  { %2709 = vmatprep.mubr.f32.mxu0 %v26262_v3  ;;  %2769 = vmatpush1.msra.mxu1 %v20794_v8 }
  0xd7   :  { %2608 = vmatmul.mubr.f32.gmra.mxu1 %v20122_v40  ;;  %2712 = vmatmul.mubr.f32.vlgmr.msra.gmra.mxu0 %v20046_v42 }
  0xd8   :  { %2771 = vmatprep.subr.mxu1 %v20809_v18  ;;  %2613 = vmatprep.mubr.f32.mxu1 %v26262_v3  ;;  %v215_v43 = vpop.f32.mrf.mxu0 }
  0xd9   :  { %2773 = vmatpush1.msra.mxu1 %v20820_v38  ;;  %2717 = vmatprep.mubr.f32.mxu0 %v26262_v3 }
  0xda   :  { %2775 = vmatprep.subr.mxu1 %v20830_v17  ;;  %2878 = vmatprep.subr.mxu0 %v2490_v49  ;;  %v20993_v7 = vpop.f32.mrf.mxu0  ;;  %v369_v47 = vpop.f32.mrf.mxu1 }
  0xdb   :  { %26493 = vst [vmem:[#allocation4_spill] sm:$0xff] %v20993_v7  ;;  %2777 = vmatpush1.msra.mxu1 %v20837_v33  ;;  %2720 = vmatmul.mubr.f32.gmra.mxu0 %v20108_v15  ;;  %v370_v29 = vadd.f32 %v369_v47, %v204_v36 }
  0xdc   :  { %2615 = vmatmul.mubr.f32.gmra.mxu1 %v20146_v55  ;;  %2779 = vmatprep.subr.mxu1 %v20845_v24  ;;  %v226_v26 = vpop.f32.mrf.mxu0  ;;  %v20999_v56 = vpop.f32.mrf.mxu1 }
  0xdd   :  { %26494 = vst [vmem:[#allocation5_spill] sm:$0xff] %v20999_v56  ;;  %2781 = vmatpush1.msra.mxu1 %v20862_v39  ;;  %2882 = vmatpush1.msra.mxu0 %v2496_v46 }
  0xde   :  { %2783 = vmatprep.subr.mxu1 %v20866_v44  ;;  %2886 = vmatprep.subr.mxu0 %v2502_v32  ;;  %v21007_v16 = vpop.f32.mrf.mxu0  ;;  %v376_v49 = vpop.f32.mrf.mxu1 }
  0xdf   :  { %26495 = vst [vmem:[#allocation6_spill] sm:$0xff] %v21007_v16  ;;  %2725 = vmatprep.mubr.f32.mxu0 %v26262_v3  ;;  %2785 = vmatpush1.msra.mxu1 %v20880_v12  ;;  %v377_v53 = vadd.f32 %v376_v49, %v215_v43  ;;  %v57_v43 = vld [vmem:[%s26254_s1 + $0x138] sm:$0xff]  ;;  %v21106_v49 = vand.u32 4294901760, %v71_v54 }
  0xe0   :  { %2818 = vmatprep.mubr.f32.mxu1 %v26262_v3  ;;  %2890 = vmatpush1.msra.mxu0 %v2508_v19  ;;  %v237_v50 = vpop.f32.mrf.mxu0  ;;  %v21014_v46 = vpop.f32.mrf.mxu1 }
  0xe1   :  { %26496 = vst [vmem:[#allocation7_spill] sm:$0xff] %v21014_v46  ;;  %2728 = vmatmul.mubr.f32.gmra.mxu0 %v20138_v52  ;;  %2822 = vmatmul.mubr.f32.vlgmr.msra.gmra.mxu1 %v20060_v51 }
  0xe2   :  { %2894 = vmatprep.subr.mxu0 %v2514_v62  ;;  %2733 = vmatprep.mubr.f32.mxu0 %v26262_v3  ;;  %v21027_v32 = vpop.f32.mrf.mxu0  ;;  %v87_v62 = vld [vmem:[%s26254_s1 + $0x228] sm:$0xff] }
  0xe3   :  { %26497 = vst [vmem:[#allocation8_spill] sm:$0xff] %v21027_v32  ;;  %2898 = vmatpush1.msra.mxu0 %v2520_v10  ;;  %2827 = vmatprep.mubr.f32.mxu1 %v26262_v3  ;;  %v383_v19 = vpop.f32.mrf.mxu1  ;;  %v21055_v20 = vand.u32 4294901760, %v87_v62 }
  0xe4   :  { %2902 = vmatprep.subr.mxu0 %v2526_v0  ;;  %3005 = vmatprep.subr.mxu1 %v20756_v45  ;;  %v384_v35 = vadd.f32 %v383_v19, %v226_v26  ;;  %v487_v57 = vpop.f32.mrf.mxu0  ;;  %v26500_v0 = vand.u32 4294901760, %v20894_v48  ;;  %v26261_v26 = vand.u32 4294901760, %v21064_v4  ;;  %v41_v19 = vld [vmem:[%s26254_s1 + $0xb8] sm:$0xff] }
  0xe5   :  { %2906 = vmatpush1.msra.mxu0 %v2532_v37  ;;  %2831 = vmatmul.mubr.f32.gmra.mxu1 %v20126_v41  ;;  %v488_v10 = vadd.f32 %v487_v57, %v370_v29  ;;  %v21045_v30 = vpop.f32.mrf.mxu1  ;;  %v86_v37 = vld [vmem:[%s26254_s1 + $0x220] sm:$0xff]  ;;  %v21094_v47 = vsub.f32 %v87_v62, %v21055_v20  ;;  %v56_v29 = vld [vmem:[%s26254_s1 + $0x130] sm:$0xff] }
  0xe6   :  { %26498 = vst [vmem:[#allocation9_spill] sm:$0xff] %v21045_v30  ;;  %2736 = vmatmul.mubr.f32.gmra.mxu0 %v20156_v63  ;;  %2910 = vmatprep.subr.mxu0 %v2538_v9  ;;  %v21050_v45 = vpop.f32.mrf.mxu0  ;;  %v21081_v36 = vand.u32 4294901760, %v86_v37  ;;  %v26505_v30 = vmov 0.0  }
  0xe7   :  { %26499 = vst [vmem:[#allocation10_spill] sm:$0xff] %v21050_v45  ;;  %2914 = vmatpush1.msra.mxu0 %v26500_v0  ;;  %3007 = vmatpush1.msra.mxu1 %v20773_v58  ;;  %v390_v27 = vpop.f32.mrf.mxu1  ;;  %v21072_v58 = vsub.f32 %v101_v11, %v21043_v28  ;;  %v21124_v0 = vand.u32 4294901760, %v56_v29 }
  0xe8   :  { %2918 = vmatprep.subr.mxu0 %v2550_v13  ;;  %3009 = vmatprep.subr.mxu1 %v20781_v6  ;;  %v21066_v9 = vadd.f32 %v390_v27, %v237_v50  ;;  %v495_v48 = vpop.f32.mrf.mxu0  ;;  %v21115_v11 = vsub.f32 %v86_v37, %v21081_v36 }
  0xe9   :  { %2836 = vmatprep.mubr.f32.mxu1 %v26262_v3  ;;  %2922 = vmatpush1.msra.mxu0 %v2556_v23  ;;  %v496_v13 = vadd.f32 %v495_v48, %v377_v53  ;;  %v21077_v6 = vpop.f32.mrf.mxu1  ;;  %v26264_v53 = vand.u32 4294901760, %v21072_v58 }
  0xea   :  { %26501 = vst [vmem:[#allocation11_spill] sm:$0xff] %v21077_v6  ;;  %2955 = vmatprep.mubr.f32.mxu0 %v26262_v3  ;;  %3011 = vmatpush1.msra.mxu1 %v20794_v8  ;;  %v21086_v23 = vpop.f32.mrf.mxu0  ;;  %v21098_v8 = vand.u32 4294901760, %v72_v31 }
  0xeb   :  { %26502 = vst [vmem:[#allocation12_spill] sm:$0xff] %v21086_v23  ;;  %2840 = vmatmul.mubr.f32.gmra.mxu1 %v20150_v59  ;;  %2957 = vmatmul.mubr.f32.vlgmr.msra.gmra.mxu0 %v20022_v34 }
  0xec   :  { %3013 = vmatprep.subr.mxu1 %v20809_v18  ;;  %2845 = vmatprep.mubr.f32.mxu1 %v26262_v3  ;;  %v42_v18 = vld [vmem:[%s26254_s1 + $0xc0] sm:$0xff] }
  0xed   :  { %3015 = vmatpush1.msra.mxu1 %v20820_v38  ;;  %2962 = vmatprep.mubr.f32.mxu0 %v26262_v3  ;;  %v503_v50 = vpop.f32.mrf.mxu0  ;;  %v597_v5 = vpop.f32.mrf.mxu1  ;;  %v21117_v38 = vand.u32 4294901760, %v57_v43 }
  0xee   :  { %3017 = vmatprep.subr.mxu1 %v20830_v17  ;;  %3110 = vmatprep.subr.mxu0 %v21035_v60  ;;  %v504_v62 = vadd.f32 %v503_v50, %v384_v35  ;;  %v598_v57 = vadd.f32 %v597_v5, %v488_v10  ;;  %v27_v17 = vld [vmem:[%s26254_s1 + $0x48] sm:$0xff]  ;;  %v21136_v35 = vand.u32 4294901760, %v42_v18  ;;  %v26_v10 = vld [vmem:[%s26254_s1 + $0x40] sm:$0xff]  ;;  %v21145_v50 = vsub.f32 %v72_v31, %v21098_v8 }
  0xef   :  { %3019 = vmatpush1.msra.mxu1 %v20837_v33  ;;  %2964 = vmatmul.mubr.f32.gmra.mxu0 %v20087_v1  ;;  %v21130_v27 = vpop.f32.mrf.mxu0  ;;  %v21132_v48 = vpop.f32.mrf.mxu1  ;;  %v3233_v33 = vsub.f32 %v21064_v4, %v26261_v26  ;;  %v21150_v5 = vsub.f32 %v71_v54, %v21106_v49  ;;  %v3239_v26 = vsub.f32 %v21072_v58, %v26264_v53  ;;  %v21159_v31 = vand.u32 4294901760, %v27_v17 }
  0xf0   :  { %26503 = vst [vmem:[#allocation13_spill] sm:$0xff] %v21130_v27  ;;  %26504 = vst [vmem:[#allocation14_spill] sm:$0xff] %v21132_v48  ;;  %2849 = vmatmul.mubr.f32.gmra.mxu1 %v20163_v14  ;;  %3021 = vmatprep.subr.mxu1 %v20845_v24  ;;  %v21152_v24 = vand.u32 4294901760, %v41_v19  ;;  %v21163_v3 = vsub.f32 %v57_v43, %v21117_v38  ;;  %v21168_v53 = vsub.f32 %v56_v29, %v21124_v0 }
  0xf1   :  { %3023 = vmatpush1.msra.mxu1 %v20862_v39  ;;  %3112 = vmatpush1.msra.mxu0 %v21043_v28  ;;  %v606_v37 = vpop.f32.mrf.mxu1  ;;  %v21173_v6 = vand.u32 4294901760, %v26_v10  ;;  %v21182_v43 = vsub.f32 %v42_v18, %v21136_v35 }
  0xf2   :  { %3025 = vmatprep.subr.mxu1 %v20866_v44  ;;  %3114 = vmatprep.subr.mxu0 %v21055_v20  ;;  %v511_v54 = vpop.f32.mrf.mxu0  ;;  %v607_v27 = vadd.f32 %v606_v37, %v496_v13  ;;  %v26506_v44 = vand.u32 4294901760, %v21094_v47  ;;  %v3234_v13 = vand.u32 4294901760, %v3233_v33  ;;  %v26509_v33 = vand.u32 4294901760, %v21115_v11 }
  0xf3   :  { %2969 = vmatprep.mubr.f32.mxu0 %v26505_v30  ;;  %3027 = vmatpush1.msra.mxu1 %v20880_v12  ;;  %v512_v39 = vadd.f32 %v511_v54, %v21066_v9  ;;  %v21176_v32 = vpop.f32.mrf.mxu1  ;;  %v21189_v9 = vsub.f32 %v41_v19, %v21152_v24  ;;  %v3240_v19 = vand.u32 4294901760, %v3239_v26  ;;  %v21204_v37 = vsub.f32 %v26_v10, %v21173_v6 }
  0xf4   :  { %v3245_v16 = vsub.f32 %v21094_v47, %v26506_v44  ;;  %26507 = vst [vmem:[#allocation15_spill] sm:$0xff] %v21176_v32  ;;  %3060 = vmatprep.mubr.f32.mxu1 %v26505_v30  ;;  %3116 = vmatpush1.msra.mxu0 %v21081_v36  ;;  %v21184_v29 = vpop.f32.mrf.mxu0  ;;  %v3251_v18 = vsub.f32 %v21115_v11, %v26509_v33  ;;  %v26510_v33 = vand.u32 4294901760, %v21145_v50 }
  0xf5   :  { %26508 = vst [vmem:[#allocation16_spill] sm:$0xff] %v21184_v29  ;;  %2971 = vmatmul.mubr.f32.gmra.mxu0 %v20122_v40  ;;  %3062 = vmatmul.mubr.f32.vlgmr.msra.gmra.mxu1 %v20022_v34  ;;  %v21199_v44 = vsub.f32 %v27_v17, %v21159_v31 }
  0xf6   :  { %3118 = vmatprep.subr.mxu0 %v21098_v8  ;;  %2976 = vmatprep.mubr.f32.mxu0 %v26505_v30  ;;  %v3246_v12 = vand.u32 4294901760, %v3245_v16  ;;  %v3257_v17 = vsub.f32 %v21145_v50, %v26510_v33  ;;  %v26511_v16 = vand.u32 4294901760, %v21150_v5  ;;  %v26515_v33 = vand.u32 4294901760, %v21168_v53 }
  0xf7   :  { %3120 = vmatpush1.msra.mxu0 %v21106_v49  ;;  %3067 = vmatprep.mubr.f32.mxu1 %v26505_v30  ;;  %v615_v48 = vpop.f32.mrf.mxu1  ;;  %v732_v45 = vpop.f32.mrf.mxu0 }
  0xf8   :  { %3122 = vmatprep.subr.mxu0 %v21117_v38  ;;  %3235 = vmatprep.subr.mxu1 %v3234_v13  ;;  %v616_v56 = vadd.f32 %v615_v48, %v504_v62  ;;  %v733_v25 = vadd.f32 %v732_v45, %v598_v57  ;;  %v3263_v26 = vsub.f32 %v21150_v5, %v26511_v16  ;;  %v3252_v62 = vand.u32 4294901760, %v3251_v18 }
  0xf9   :  { %3124 = vmatpush1.msra.mxu0 %v21124_v0  ;;  %3069 = vmatmul.mubr.f32.gmra.mxu1 %v20087_v1  ;;  %v21218_v29 = vpop.f32.mrf.mxu1  ;;  %v21220_v13 = vpop.f32.mrf.mxu0  ;;  %v26514_v45 = vand.u32 4294901760, %v21163_v3  ;;  %v3275_v16 = vsub.f32 %v21168_v53, %v26515_v33  ;;  %v3258_v18 = vand.u32 4294901760, %v3257_v17  ;;  %v26517_v33 = vand.u32 4294901760, %v21189_v9 }
  0xfa   :  { %26512 = vst [vmem:[#allocation17_spill] sm:$0xff] %v21218_v29  ;;  %26513 = vst [vmem:[#allocation18_spill] sm:$0xff] %v21220_v13  ;;  %2978 = vmatmul.mubr.f32.gmra.mxu0 %v20146_v55  ;;  %3126 = vmatprep.subr.mxu0 %v21136_v35  ;;  %v26516_v29 = vand.u32 4294901760, %v21182_v43 }
  0xfb   :  { %v3269_v57 = vsub.f32 %v21163_v3, %v26514_v45  ;;  %3128 = vmatpush1.msra.mxu0 %v21152_v24  ;;  %3241 = vmatpush1.msra.mxu1 %v3240_v19  ;;  %v739_v54 = vpop.f32.mrf.mxu0  ;;  %v3264_v19 = vand.u32 4294901760, %v3263_v26  ;;  %v3287_v10 = vsub.f32 %v21189_v9, %v26517_v33  ;;  %v3276_v17 = vand.u32 4294901760, %v3275_v16 }
  0xfc   :  { %3130 = vmatprep.subr.mxu0 %v21159_v31  ;;  %3247 = vmatprep.subr.mxu1 %v3246_v12  ;;  %v3281_v45 = vsub.f32 %v21182_v43, %v26516_v29  ;;  %v624_v13 = vpop.f32.mrf.mxu1  ;;  %v740_v48 = vadd.f32 %v739_v54, %v607_v27  ;;  %v26519_v29 = vand.u32 4294901760, %v21199_v44  ;;  %v26521_v26 = vand.u32 4294901760, %v21204_v37 }
  0xfd   :  { %3074 = vmatprep.mubr.f32.mxu1 %v26505_v30  ;;  %3132 = vmatpush1.msra.mxu0 %v21173_v6  ;;  %v625_v32 = vadd.f32 %v624_v13, %v512_v39  ;;  %v21242_v23 = vpop.f32.mrf.mxu0  ;;  %v3270_v12 = vand.u32 4294901760, %v3269_v57 }
  0xfe   :  { %26518 = vst [vmem:[#allocation19_spill] sm:$0xff] %v21242_v23  ;;  %3165 = vmatprep.mubr.f32.mxu0 %v26505_v30  ;;  %3253 = vmatpush1.msra.mxu1 %v3252_v62  ;;  %v3293_v27 = vsub.f32 %v21199_v44, %v26519_v29  ;;  %v21248_v54 = vpop.f32.mrf.mxu1  ;;  %v3299_v39 = vsub.f32 %v21204_v37, %v26521_v26  ;;  %v3282_v13 = vand.u32 4294901760, %v3281_v45  ;;  %v3288_v62 = vand.u32 4294901760, %v3287_v10 }
  0xff   :  { %26520 = vst [vmem:[#allocation20_spill] sm:$0xff] %v21248_v54  ;;  %3076 = vmatmul.mubr.f32.gmra.mxu1 %v20122_v40  ;;  %3171 = vmatmul.mubr.f32.vlgmr.msra.gmra.mxu0 %v20090_v2 }
 0x100   :  { %3259 = vmatprep.subr.mxu1 %v3258_v18  ;;  %3081 = vmatprep.mubr.f32.mxu1 %v26505_v30  ;;  %v3294_v29 = vand.u32 4294901760, %v3293_v27  ;;  %v3300_v18 = vand.u32 4294901760, %v3299_v39 }
 0x101   :  { %3265 = vmatpush1.msra.mxu1 %v3264_v19  ;;  %3176 = vmatprep.mubr.f32.mxu0 %v26505_v30  ;;  %v746_v57 = vpop.f32.mrf.mxu0  ;;  %v837_v33 = vpop.f32.mrf.mxu1 }
 0x102   :  { %3271 = vmatprep.subr.mxu1 %v3270_v12  ;;  %3385 = vmatprep.subr.mxu0 %v21064_v4  ;;  %v747_v54 = vadd.f32 %v746_v57, %v616_v56  ;;  %v21258_v16 = vadd.f32 %v837_v33, %v733_v25 }
 0x103   :  { %3277 = vmatpush1.msra.mxu1 %v3276_v17  ;;  %3182 = vmatmul.mubr.f32.gmra.mxu0 %v20152_v61  ;;  %v21261_v26 = vpop.f32.mrf.mxu0  ;;  %v21263_v45 = vpop.f32.mrf.mxu1 }
 0x104   :  { %26522 = vst [vmem:[#allocation21_spill] sm:$0xff] %v21258_v16  ;;  %26523 = vst [vmem:[#allocation22_spill] sm:$0xff] %v21261_v26  ;;  %3083 = vmatmul.mubr.f32.gmra.mxu1 %v20146_v55  ;;  %3283 = vmatprep.subr.mxu1 %v3282_v13  ;;  %v88_v26 = vld [vmem:[%s26254_s1 + $0x230] sm:$0xff] }
 0x105   :  { %26524 = vst [vmem:[#allocation23_spill] sm:$0xff] %v21263_v45  ;;  %3289 = vmatpush1.msra.mxu1 %v3288_v62  ;;  %3388 = vmatpush1.msra.mxu0 %v21072_v58  ;;  %v844_v10 = vpop.f32.mrf.mxu1 }
 0x106   :  { %3295 = vmatprep.subr.mxu1 %v3294_v29  ;;  %3391 = vmatprep.subr.mxu0 %v21094_v47  ;;  %v753_v25 = vpop.f32.mrf.mxu0  ;;  %v21268_v56 = vadd.f32 %v844_v10, %v740_v48 }
 0x107   :  { %3187 = vmatprep.mubr.f32.mxu0 %v26505_v30  ;;  %3301 = vmatpush1.msra.mxu1 %v3300_v18  ;;  %v754_v19 = vadd.f32 %v753_v25, %v625_v32  ;;  %v21271_v12 = vpop.f32.mrf.mxu1  ;;  %v26534_v25 = vand.u32 4294901760, %v21064_v4 }
 0x108   :  { %26525 = vst [vmem:[#allocation24_spill] sm:$0xff] %v21268_v56  ;;  %26526 = vst [vmem:[#allocation25_spill] sm:$0xff] %v21271_v12  ;;  %3334 = vmatprep.mubr.f32.mxu1 %v26505_v30  ;;  %3394 = vmatpush1.msra.mxu0 %v21115_v11  ;;  %v21275_v27 = vpop.f32.mrf.mxu0 }
 0x109   :  { %26527 = vst [vmem:[#allocation26_spill] sm:$0xff] %v21275_v27  ;;  %3193 = vmatmul.mubr.f32.gmra.mxu0 %v20166_v21  ;;  %3336 = vmatmul.mubr.f32.vlgmr.msra.gmra.mxu1 %v20022_v34 }
 0x10a   :  { %3397 = vmatprep.subr.mxu0 %v21145_v50  ;;  %3198 = vmatprep.mubr.f32.mxu0 %v26505_v30 }
 0x10b   :  { %3400 = vmatpush1.msra.mxu0 %v21150_v5  ;;  %3341 = vmatprep.mubr.f32.mxu1 %v26505_v30  ;;  %v851_v32 = vpop.f32.mrf.mxu1  ;;  %v946_v48 = vpop.f32.mrf.mxu0 }
 0x10c   :  { %3403 = vmatprep.subr.mxu0 %v21163_v3  ;;  %3505 = vmatprep.subr.mxu1 %v21035_v60  ;;  %v21285_v17 = vadd.f32 %v851_v32, %v747_v54 }
 0x10d   :  { %3406 = vmatpush1.msra.mxu0 %v21168_v53  ;;  %3343 = vmatmul.mubr.f32.gmra.mxu1 %v20087_v1  ;;  %v21289_v39 = vpop.f32.mrf.mxu1  ;;  %v21291_v13 = vpop.f32.mrf.mxu0 }
 0x10e   :  { %26528 = vst [vmem:[#allocation27_spill] sm:$0xff] %v21285_v17  ;;  %26529 = vst [vmem:[#allocation28_spill] sm:$0xff] %v21289_v39  ;;  %3204 = vmatmul.mubr.f32.gmra.mxu0 %v20175_v22  ;;  %3409 = vmatprep.subr.mxu0 %v21182_v43  ;;  %v26537_v17 = vand.u32 4294901760, %v21072_v58 }
 0x10f   :  { %26530 = vst [vmem:[#allocation29_spill] sm:$0xff] %v21291_v13  ;;  %3412 = vmatpush1.msra.mxu0 %v21189_v9  ;;  %3507 = vmatpush1.msra.mxu1 %v21043_v28  ;;  %v957_v62 = vpop.f32.mrf.mxu0 }
 0x110   :  { %3415 = vmatprep.subr.mxu0 %v21199_v44  ;;  %3509 = vmatprep.subr.mxu1 %v21055_v20  ;;  %v858_v54 = vpop.f32.mrf.mxu1 }
 0x111   :  { %3348 = vmatprep.mubr.f32.mxu1 %v26505_v30  ;;  %3418 = vmatpush1.msra.mxu0 %v21204_v37  ;;  %v21301_v57 = vadd.f32 %v858_v54, %v754_v19  ;;  %v21303_v33 = vpop.f32.mrf.mxu0 }
 0x112   :  { %26532 = vst [vmem:[#allocation31_spill] sm:$0xff] %v21303_v33  ;;  %3451 = vmatprep.mubr.f32.mxu0 %v26505_v30  ;;  %3511 = vmatpush1.msra.mxu1 %v21081_v36  ;;  %v21307_v29 = vpop.f32.mrf.mxu1 }
 0x113   :  { %26531 = vst [vmem:[#allocation30_spill] sm:$0xff] %v21301_v57  ;;  %26533 = vst [vmem:[#allocation32_spill] sm:$0xff] %v21307_v29  ;;  %3350 = vmatmul.mubr.f32.gmra.mxu1 %v20122_v40  ;;  %3454 = vmatmul.mubr.f32.vlgmr.msra.gmra.mxu0 %v20046_v42  ;;  %v26540_v57 = vand.u32 4294901760, %v21115_v11  ;;  %v103_v11 = vld [vmem:[%s26254_s1 + $0x2a8] sm:$0xff] }
 0x114   :  { %3513 = vmatprep.subr.mxu1 %v21098_v8  ;;  %3355 = vmatprep.mubr.f32.mxu1 %v26505_v30 }
 0x115   :  { %3515 = vmatpush1.msra.mxu1 %v21106_v49  ;;  %3459 = vmatprep.mubr.f32.mxu0 %v26505_v30  ;;  %v968_v18 = vpop.f32.mrf.mxu0  ;;  %v1111_v10 = vpop.f32.mrf.mxu1 }
 0x116   :  { %3517 = vmatprep.subr.mxu1 %v21117_v38  ;;  %3620 = vmatprep.subr.mxu0 %v26534_v25  ;;  %v1112_v19 = vadd.f32 %v1111_v10, %v946_v48  ;;  %v26538_v48 = vand.u32 4294901760, %v21094_v47  ;;  %v104_v47 = vld [vmem:[%s26254_s1 + $0x2b0] sm:$0xff] }
 0x117   :  { %3519 = vmatpush1.msra.mxu1 %v21124_v0  ;;  %3462 = vmatmul.mubr.f32.gmra.mxu0 %v20108_v15  ;;  %v21320_v32 = vpop.f32.mrf.mxu0  ;;  %v21322_v54 = vpop.f32.mrf.mxu1 }
 0x118   :  { %26535 = vst [vmem:[#allocation33_spill] sm:$0xff] %v21320_v32  ;;  %26536 = vst [vmem:[#allocation34_spill] sm:$0xff] %v21322_v54  ;;  %3357 = vmatmul.mubr.f32.gmra.mxu1 %v20146_v55  ;;  %3521 = vmatprep.subr.mxu1 %v21136_v35 }
 0x119   :  { %3523 = vmatpush1.msra.mxu1 %v21152_v24  ;;  %3624 = vmatpush1.msra.mxu0 %v26537_v17  ;;  %v1118_v4 = vpop.f32.mrf.mxu1  ;;  %v26542_v17 = vand.u32 4294901760, %v21145_v50  ;;  %v26544_v50 = vand.u32 4294901760, %v21163_v3 }
 0x11a   :  { %3525 = vmatprep.subr.mxu1 %v21159_v31  ;;  %3628 = vmatprep.subr.mxu0 %v26538_v48  ;;  %v979_v10 = vpop.f32.mrf.mxu0  ;;  %v1119_v25 = vadd.f32 %v1118_v4, %v957_v62  ;;  %v26543_v62 = vand.u32 4294901760, %v21150_v5  ;;  %v26545_v5 = vand.u32 4294901760, %v21168_v53  ;;  %v74_v53 = vld [vmem:[%s26254_s1 + $0x1c0] sm:$0xff] }
 0x11b   :  { %3467 = vmatprep.mubr.f32.mxu0 %v26505_v30  ;;  %3527 = vmatpush1.msra.mxu1 %v21173_v6  ;;  %v21334_v32 = vpop.f32.mrf.mxu1 }
 0x11c   :  { %26539 = vst [vmem:[#allocation35_spill] sm:$0xff] %v21334_v32  ;;  %3560 = vmatprep.mubr.f32.mxu1 %v26505_v30  ;;  %3632 = vmatpush1.msra.mxu0 %v26540_v57  ;;  %v21339_v58 = vpop.f32.mrf.mxu0  ;;  %v89_v57 = vld [vmem:[%s26254_s1 + $0x238] sm:$0xff] }
 0x11d   :  { %26541 = vst [vmem:[#allocation36_spill] sm:$0xff] %v21339_v58  ;;  %3470 = vmatmul.mubr.f32.gmra.mxu0 %v20138_v52  ;;  %3564 = vmatmul.mubr.f32.vlgmr.msra.gmra.mxu1 %v20060_v51 }
 0x11e   :  { %3636 = vmatprep.subr.mxu0 %v26542_v17  ;;  %3475 = vmatprep.mubr.f32.mxu0 %v26505_v30  ;;  %v21361_v17 = vand.u32 4294901760, %v104_v47 }
 0x11f   :  { %3640 = vmatpush1.msra.mxu0 %v26543_v62  ;;  %3569 = vmatprep.mubr.f32.mxu1 %v26505_v30  ;;  %v1125_v4 = vpop.f32.mrf.mxu1  ;;  %v1229_v48 = vpop.f32.mrf.mxu0  ;;  %v21366_v62 = vand.u32 4294901760, %v103_v11 }
 0x120   :  { %3644 = vmatprep.subr.mxu0 %v26544_v50  ;;  %3747 = vmatprep.subr.mxu1 %v21035_v60  ;;  %v1126_v58 = vadd.f32 %v1125_v4, %v968_v18  ;;  %v1230_v39 = vadd.f32 %v1229_v48, %v1112_v19  ;;  %v26548_v60 = vand.u32 4294901760, %v21182_v43  ;;  %v21378_v18 = vand.u32 4294901760, %v89_v57  ;;  %v73_v4 = vld [vmem:[%s26254_s1 + $0x1b8] sm:$0xff] }
 0x121   :  { %3648 = vmatpush1.msra.mxu0 %v26545_v5  ;;  %3573 = vmatmul.mubr.f32.gmra.mxu1 %v20126_v41  ;;  %v21371_v29 = vpop.f32.mrf.mxu1  ;;  %v21373_v3 = vpop.f32.mrf.mxu0  ;;  %v26549_v19 = vand.u32 4294901760, %v21189_v9  ;;  %v26550_v50 = vand.u32 4294901760, %v21199_v44  ;;  %v21392_v43 = vand.u32 4294901760, %v88_v26  ;;  %v21395_v5 = vsub.f32 %v104_v47, %v21361_v17  ;;  %v59_v9 = vld [vmem:[%s26254_s1 + $0x148] sm:$0xff] }
 0x122   :  { %26546 = vst [vmem:[#allocation37_spill] sm:$0xff] %v21371_v29  ;;  %26547 = vst [vmem:[#allocation38_spill] sm:$0xff] %v21373_v3  ;;  %3478 = vmatmul.mubr.f32.gmra.mxu0 %v20156_v63  ;;  %3652 = vmatprep.subr.mxu0 %v26548_v60  ;;  %v21404_v44 = vsub.f32 %v103_v11, %v21366_v62  ;;  %v21412_v47 = vand.u32 4294901760, %v73_v4 }
 0x123   :  { %3656 = vmatpush1.msra.mxu0 %v26549_v19  ;;  %3749 = vmatpush1.msra.mxu1 %v21043_v28  ;;  %v1237_v48 = vpop.f32.mrf.mxu0  ;;  %v26551_v19 = vand.u32 4294901760, %v21204_v37  ;;  %v58_v37 = vld [vmem:[%s26254_s1 + $0x140] sm:$0xff] }
 0x124   :  { %3660 = vmatprep.subr.mxu0 %v26550_v50  ;;  %3751 = vmatprep.subr.mxu1 %v21055_v20  ;;  %v1132_v28 = vpop.f32.mrf.mxu1  ;;  %v1238_v60 = vadd.f32 %v1237_v48, %v1119_v25  ;;  %v21406_v20 = vand.u32 4294901760, %v74_v53  ;;  %v21415_v25 = vsub.f32 %v89_v57, %v21378_v18  ;;  %v44_v48 = vld [vmem:[%s26254_s1 + $0xd0] sm:$0xff] }
 0x125   :  { %3578 = vmatprep.mubr.f32.mxu1 %v26505_v30  ;;  %3664 = vmatpush1.msra.mxu0 %v26551_v19  ;;  %v1133_v50 = vadd.f32 %v1132_v28, %v979_v10  ;;  %v21408_v29 = vpop.f32.mrf.mxu0  ;;  %v21424_v10 = vand.u32 4294901760, %v59_v9  ;;  %v21438_v19 = vand.u32 4294901760, %v58_v37  ;;  %v21457_v54 = vand.u32 4294901760, %v44_v48 }
 0x126   :  { %26552 = vst [vmem:[#allocation39_spill] sm:$0xff] %v21408_v29  ;;  %3697 = vmatprep.mubr.f32.mxu0 %v26505_v30  ;;  %3753 = vmatpush1.msra.mxu1 %v21081_v36  ;;  %v21420_v11 = vpop.f32.mrf.mxu1  ;;  %v21429_v36 = vsub.f32 %v88_v26, %v21392_v43  ;;  %v43_v26 = vld [vmem:[%s26254_s1 + $0xc8] sm:$0xff] }
 0x127   :  { %26553 = vst [vmem:[#allocation40_spill] sm:$0xff] %v21420_v11  ;;  %3582 = vmatmul.mubr.f32.gmra.mxu1 %v20150_v59  ;;  %3699 = vmatmul.mubr.f32.vlgmr.msra.gmra.mxu0 %v20022_v34 }
 0x128   :  { %3755 = vmatprep.subr.mxu1 %v21098_v8  ;;  %3587 = vmatprep.mubr.f32.mxu1 %v26505_v30  ;;  %v21441_v8 = vsub.f32 %v74_v53, %v21406_v20  ;;  %v29_v53 = vld [vmem:[%s26254_s1 + $0x58] sm:$0xff]  ;;  %v26560_v29 = vand.u32 4294901760, %v21429_v36 }
 0x129   :  { %3757 = vmatpush1.msra.mxu1 %v21106_v49  ;;  %3704 = vmatprep.mubr.f32.mxu0 %v26505_v30  ;;  %v1245_v57 = vpop.f32.mrf.mxu0  ;;  %v1339_v11 = vpop.f32.mrf.mxu1  ;;  %v21449_v49 = vsub.f32 %v73_v4, %v21412_v47  ;;  %v28_v4 = vld [vmem:[%s26254_s1 + $0x50] sm:$0xff] }
 0x12a   :  { %3759 = vmatprep.subr.mxu1 %v21117_v38  ;;  %3852 = vmatprep.subr.mxu0 %v21361_v17  ;;  %v1246_v27 = vadd.f32 %v1245_v57, %v1126_v58  ;;  %v1340_v3 = vadd.f32 %v1339_v11, %v1230_v39  ;;  %v21460_v38 = vsub.f32 %v59_v9, %v21424_v10  ;;  %v21475_v9 = vand.u32 4294901760, %v43_v26 }
 0x12b   :  { %3761 = vmatpush1.msra.mxu1 %v21124_v0  ;;  %3706 = vmatmul.mubr.f32.gmra.mxu0 %v20087_v1  ;;  %v21465_v28 = vpop.f32.mrf.mxu0  ;;  %v21467_v13 = vpop.f32.mrf.mxu1  ;;  %v26556_v0 = vand.u32 4294901760, %v21395_v5  ;;  %v26557_v11 = vand.u32 4294901760, %v21404_v44  ;;  %v21494_v32 = vand.u32 4294901760, %v28_v4 }
 0x12c   :  { %26554 = vst [vmem:[#allocation41_spill] sm:$0xff] %v21465_v28  ;;  %26555 = vst [vmem:[#allocation42_spill] sm:$0xff] %v21467_v13  ;;  %3591 = vmatmul.mubr.f32.gmra.mxu1 %v20163_v14  ;;  %3763 = vmatprep.subr.mxu1 %v21136_v35  ;;  %v21483_v28 = vsub.f32 %v58_v37, %v21438_v19  ;;  %v21486_v13 = vand.u32 4294901760, %v29_v53 }
 0x12d   :  { %v3975_v39 = vsub.f32 %v21395_v5, %v26556_v0  ;;  %3765 = vmatpush1.msra.mxu1 %v21152_v24  ;;  %3711 = vmatprep.mubr.f32.mxu0 %v26505_v30  ;;  %v3981_v57 = vsub.f32 %v21404_v44, %v26557_v11  ;;  %v1348_v0 = vpop.f32.mrf.mxu1  ;;  %v26558_v24 = vand.u32 4294901760, %v21415_v25 }
 0x12e   :  { %3767 = vmatprep.subr.mxu1 %v21159_v31  ;;  %3802 = vmatprep.mubr.f32.mxu1 %v26505_v30  ;;  %v1253_v11 = vpop.f32.mrf.mxu0  ;;  %v1349_v37 = vadd.f32 %v1348_v0, %v1238_v60  ;;  %v21500_v31 = vsub.f32 %v44_v48, %v21457_v54  ;;  %v3993_v60 = vsub.f32 %v21429_v36, %v26560_v29  ;;  %v26562_v48 = vand.u32 4294901760, %v21441_v8 }
 0x12f   :  { %v3987_v58 = vsub.f32 %v21415_v25, %v26558_v24  ;;  %3769 = vmatpush1.msra.mxu1 %v21173_v6  ;;  %3713 = vmatmul.mubr.f32.gmra.mxu0 %v20122_v40  ;;  %v1254_v33 = vadd.f32 %v1253_v11, %v1133_v50  ;;  %v21502_v16 = vpop.f32.mrf.mxu1  ;;  %v3976_v24 = vand.u32 4294901760, %v3975_v39  ;;  %v21510_v6 = vsub.f32 %v43_v26, %v21475_v9 }
 0x130   :  { %26559 = vst [vmem:[#allocation43_spill] sm:$0xff] %v21502_v16  ;;  %3804 = vmatmul.mubr.f32.vlgmr.msra.gmra.mxu1 %v20022_v34  ;;  %3854 = vmatpush1.msra.mxu0 %v21366_v62  ;;  %v21512_v0 = vpop.f32.mrf.mxu0  ;;  %v3982_v50 = vand.u32 4294901760, %v3981_v57  ;;  %v3999_v11 = vsub.f32 %v21441_v8, %v26562_v48  ;;  %v21521_v35 = vsub.f32 %v29_v53, %v21486_v13  ;;  %v26563_v26 = vand.u32 4294901760, %v21449_v49 }
 0x131   :  { %26561 = vst [vmem:[#allocation44_spill] sm:$0xff] %v21512_v0  ;;  %3856 = vmatprep.subr.mxu0 %v21378_v18  ;;  %3718 = vmatprep.mubr.f32.mxu0 %v26505_v30  ;;  %v3988_v29 = vand.u32 4294901760, %v3987_v58  ;;  %v21529_v57 = vsub.f32 %v28_v4, %v21494_v32  ;;  %v26564_v48 = vand.u32 4294901760, %v21460_v38  ;;  %v3994_v58 = vand.u32 4294901760, %v3993_v60 }
 0x132   :  { %3809 = vmatprep.mubr.f32.mxu1 %v26505_v30  ;;  %3858 = vmatpush1.msra.mxu0 %v21392_v43  ;;  %v4005_v0 = vsub.f32 %v21449_v49, %v26563_v26  ;;  %v26269_v26 = vand.u32 4294901760, %v21510_v6  ;;  %v4000_v12 = vand.u32 4294901760, %v3999_v11  ;;  %v26565_v23 = vand.u32 4294901760, %v21483_v28 }
 0x133   :  { %3720 = vmatmul.mubr.f32.gmra.mxu0 %v20146_v55  ;;  %3860 = vmatprep.subr.mxu0 %v21406_v20  ;;  %v4011_v53 = vsub.f32 %v21460_v38, %v26564_v48  ;;  %v1357_v16 = vpop.f32.mrf.mxu1  ;;  %v1474_v56 = vpop.f32.mrf.mxu0  ;;  %v26271_v39 = vand.u32 4294901760, %v21521_v35 }
 0x134   :  { %3811 = vmatmul.mubr.f32.gmra.mxu1 %v20087_v1  ;;  %3977 = vmatprep.subr.mxu1 %v3976_v24  ;;  %v1358_v4 = vadd.f32 %v1357_v16, %v1246_v27  ;;  %v1475_v45 = vadd.f32 %v1474_v56, %v1340_v3  ;;  %v4017_v48 = vsub.f32 %v21483_v28, %v26565_v23  ;;  %v4006_v24 = vand.u32 4294901760, %v4005_v0 }
 0x135   :  { %3862 = vmatpush1.msra.mxu0 %v21412_v47  ;;  %3983 = vmatpush1.msra.mxu1 %v3982_v50  ;;  %v21544_v46 = vpop.f32.mrf.mxu1  ;;  %v21546_v7 = vpop.f32.mrf.mxu0  ;;  %v26270_v16 = vand.u32 4294901760, %v21529_v57  ;;  %v4012_v56 = vand.u32 4294901760, %v4011_v53  ;;  %v26568_v27 = vand.u32 4294901760, %v21500_v31  ;;  %v4029_v60 = vsub.f32 %v21510_v6, %v26269_v26 }
 0x136   :  { %26566 = vst [vmem:[#allocation45_spill] sm:$0xff] %v21544_v46  ;;  %26567 = vst [vmem:[#allocation46_spill] sm:$0xff] %v21546_v7  ;;  %3864 = vmatprep.subr.mxu0 %v21424_v10  ;;  %3989 = vmatprep.subr.mxu1 %v3988_v29  ;;  %v4018_v11 = vand.u32 4294901760, %v4017_v48  ;;  %v4035_v29 = vsub.f32 %v21521_v35, %v26271_v39 }
 0x137   :  { %3816 = vmatprep.mubr.f32.mxu1 %v26505_v30  ;;  %3866 = vmatpush1.msra.mxu0 %v21438_v19  ;;  %v4023_v23 = vsub.f32 %v21500_v31, %v26568_v27  ;;  %v1481_v3 = vpop.f32.mrf.mxu0 }
 0x138   :  { %3995 = vmatpush1.msra.mxu1 %v3994_v58  ;;  %3868 = vmatprep.subr.mxu0 %v21457_v54  ;;  %v1366_v0 = vpop.f32.mrf.mxu1  ;;  %v1482_v50 = vadd.f32 %v1481_v3, %v1349_v37  ;;  %v4041_v58 = vsub.f32 %v21529_v57, %v26270_v16  ;;  %v4036_v37 = vand.u32 4294901760, %v4035_v29 }
 0x139   :  { %3818 = vmatmul.mubr.f32.gmra.mxu1 %v20122_v40  ;;  %4001 = vmatprep.subr.mxu1 %v4000_v12  ;;  %v1367_v53 = vadd.f32 %v1366_v0, %v1254_v33  ;;  %v21563_v27 = vpop.f32.mrf.mxu0  ;;  %v4024_v12 = vand.u32 4294901760, %v4023_v23  ;;  %v4030_v33 = vand.u32 4294901760, %v4029_v60 }
 0x13a   :  { %26569 = vst [vmem:[#allocation47_spill] sm:$0xff] %v21563_v27  ;;  %3870 = vmatpush1.msra.mxu0 %v21475_v9  ;;  %4007 = vmatpush1.msra.mxu1 %v4006_v24  ;;  %v21569_v26 = vpop.f32.mrf.mxu1  ;;  %v4042_v3 = vand.u32 4294901760, %v4041_v58 }
 0x13b   :  { %26570 = vst [vmem:[#allocation48_spill] sm:$0xff] %v21569_v26  ;;  %3872 = vmatprep.subr.mxu0 %v21486_v13  ;;  %4013 = vmatprep.subr.mxu1 %v4012_v56  ;;  %v26591_v26 = vand.u32 4294901760, %v21460_v38 }
 0x13c   :  { %3823 = vmatprep.mubr.f32.mxu1 %v26505_v30  ;;  %3874 = vmatpush1.msra.mxu0 %v21494_v32 }
 0x13d   :  { %3907 = vmatprep.mubr.f32.mxu0 %v26505_v30  ;;  %4019 = vmatpush1.msra.mxu1 %v4018_v11  ;;  %v1488_v48 = vpop.f32.mrf.mxu0  ;;  %v1579_v24 = vpop.f32.mrf.mxu1 }
 0x13e   :  { %3825 = vmatmul.mubr.f32.gmra.mxu1 %v20146_v55  ;;  %3913 = vmatmul.mubr.f32.vlgmr.msra.gmra.mxu0 %v20090_v2  ;;  %v1489_v0 = vadd.f32 %v1488_v48, %v1358_v4  ;;  %v21577_v16 = vadd.f32 %v1579_v24, %v1475_v45 }
 0x13f   :  { %4025 = vmatprep.subr.mxu1 %v4024_v12  ;;  %3918 = vmatprep.mubr.f32.mxu0 %v26505_v30  ;;  %v21580_v56 = vpop.f32.mrf.mxu0  ;;  %v21582_v23 = vpop.f32.mrf.mxu1 }
 0x140   :  { %26571 = vst [vmem:[#allocation49_spill] sm:$0xff] %v21577_v16  ;;  %26572 = vst [vmem:[#allocation50_spill] sm:$0xff] %v21580_v56  ;;  %4031 = vmatpush1.msra.mxu1 %v4030_v33  ;;  %4076 = vmatprep.mubr.f32.mxu1 %v26505_v30  ;;  %v26585_v56 = vand.u32 4294901760, %v21404_v44  ;;  %v26597_v16 = vand.u32 4294901760, %v21510_v6 }
 0x141   :  { %26573 = vst [vmem:[#allocation51_spill] sm:$0xff] %v21582_v23  ;;  %4037 = vmatprep.subr.mxu1 %v4036_v37  ;;  %4127 = vmatprep.subr.mxu0 %v21395_v5  ;;  %v1586_v60 = vpop.f32.mrf.mxu1 }
 0x142   :  { %4043 = vmatpush1.msra.mxu1 %v4042_v3  ;;  %3924 = vmatmul.mubr.f32.gmra.mxu0 %v20152_v61  ;;  %v1495_v4 = vpop.f32.mrf.mxu0  ;;  %v21587_v45 = vadd.f32 %v1586_v60, %v1482_v50 }
 0x143   :  { %4078 = vmatmul.mubr.f32.vlgmr.msra.gmra.mxu1 %v20022_v34  ;;  %4130 = vmatpush1.msra.mxu0 %v21404_v44  ;;  %v1496_v11 = vadd.f32 %v1495_v4, %v1367_v53  ;;  %v21591_v29 = vpop.f32.mrf.mxu1  ;;  %v105_v44 = vld [vmem:[%s26254_s1 + $0x2b8] sm:$0xff] }
 0x144   :  { %26574 = vst [vmem:[#allocation52_spill] sm:$0xff] %v21587_v45  ;;  %26575 = vst [vmem:[#allocation53_spill] sm:$0xff] %v21591_v29  ;;  %4133 = vmatprep.subr.mxu0 %v21415_v25  ;;  %3929 = vmatprep.mubr.f32.mxu0 %v26505_v30  ;;  %v21595_v58 = vpop.f32.mrf.mxu0 }
 0x145   :  { %26576 = vst [vmem:[#allocation54_spill] sm:$0xff] %v21595_v58  ;;  %4083 = vmatprep.mubr.f32.mxu1 %v26505_v30  ;;  %4136 = vmatpush1.msra.mxu0 %v21429_v36 }
 0x146   :  { %3935 = vmatmul.mubr.f32.gmra.mxu0 %v20166_v21  ;;  %4139 = vmatprep.subr.mxu0 %v21441_v8 }
 0x147   :  { %4085 = vmatmul.mubr.f32.gmra.mxu1 %v20087_v1  ;;  %4247 = vmatprep.subr.mxu1 %v21361_v17  ;;  %v1593_v50 = vpop.f32.mrf.mxu1  ;;  %v1688_v53 = vpop.f32.mrf.mxu0 }
 0x148   :  { %4142 = vmatpush1.msra.mxu0 %v21449_v49  ;;  %4249 = vmatpush1.msra.mxu1 %v21366_v62  ;;  %v21605_v12 = vadd.f32 %v1593_v50, %v1489_v0 }
 0x149   :  { %4145 = vmatprep.subr.mxu0 %v21460_v38  ;;  %4251 = vmatprep.subr.mxu1 %v21378_v18  ;;  %v21609_v33 = vpop.f32.mrf.mxu1  ;;  %v21611_v37 = vpop.f32.mrf.mxu0  ;;  %v76_v38 = vld [vmem:[%s26254_s1 + $0x1d0] sm:$0xff] }
 0x14a   :  { %26577 = vst [vmem:[#allocation55_spill] sm:$0xff] %v21605_v12  ;;  %26578 = vst [vmem:[#allocation56_spill] sm:$0xff] %v21609_v33  ;;  %3940 = vmatprep.mubr.f32.mxu0 %v26505_v30  ;;  %4090 = vmatprep.mubr.f32.mxu1 %v26505_v30  ;;  %v26584_v12 = vand.u32 4294901760, %v21395_v5  ;;  %v26586_v5 = vand.u32 4294901760, %v21415_v25  ;;  %v26589_v25 = vand.u32 4294901760, %v21441_v8  ;;  %v90_v8 = vld [vmem:[%s26254_s1 + $0x240] sm:$0xff] }
 0x14b   :  { %26579 = vst [vmem:[#allocation57_spill] sm:$0xff] %v21611_v37  ;;  %4148 = vmatpush1.msra.mxu0 %v21483_v28  ;;  %4253 = vmatpush1.msra.mxu1 %v21392_v43  ;;  %v1699_v48 = vpop.f32.mrf.mxu0 }
 0x14c   :  { %3946 = vmatmul.mubr.f32.gmra.mxu0 %v20175_v22  ;;  %4092 = vmatmul.mubr.f32.gmra.mxu1 %v20122_v40  ;;  %v1600_v24 = vpop.f32.mrf.mxu1 }
 0x14d   :  { %4151 = vmatprep.subr.mxu0 %v21500_v31  ;;  %4255 = vmatprep.subr.mxu1 %v21406_v20  ;;  %v21621_v3 = vadd.f32 %v1600_v24, %v1496_v11  ;;  %v21623_v0 = vpop.f32.mrf.mxu0 }
 0x14e   :  { %4154 = vmatpush1.msra.mxu0 %v21510_v6  ;;  %4257 = vmatpush1.msra.mxu1 %v21412_v47  ;;  %v21627_v60 = vpop.f32.mrf.mxu1 }
 0x14f   :  { %26580 = vst [vmem:[#allocation58_spill] sm:$0xff] %v21621_v3  ;;  %26581 = vst [vmem:[#allocation59_spill] sm:$0xff] %v21627_v60  ;;  %4157 = vmatprep.subr.mxu0 %v21521_v35  ;;  %4259 = vmatprep.subr.mxu1 %v21424_v10  ;;  %v26588_v60 = vand.u32 4294901760, %v21429_v36 }
 0x150   :  { %4097 = vmatprep.mubr.f32.mxu1 %v26505_v30  ;;  %4160 = vmatpush1.msra.mxu0 %v21529_v57 }
 0x151   :  { %4193 = vmatprep.mubr.f32.mxu0 %v26505_v30  ;;  %4261 = vmatpush1.msra.mxu1 %v21438_v19  ;;  %v1710_v4 = vpop.f32.mrf.mxu0  ;;  %v1853_v11 = vpop.f32.mrf.mxu1 }
 0x152   :  { %4099 = vmatmul.mubr.f32.gmra.mxu1 %v20146_v55  ;;  %4196 = vmatmul.mubr.f32.vlgmr.msra.gmra.mxu0 %v20046_v42  ;;  %v1854_v50 = vadd.f32 %v1853_v11, %v1688_v53  ;;  %v106_v53 = vld [vmem:[%s26254_s1 + $0x2c0] sm:$0xff] }
 0x153   :  { %4263 = vmatprep.subr.mxu1 %v21457_v54  ;;  %4201 = vmatprep.mubr.f32.mxu0 %v26505_v30  ;;  %v21639_v24 = vpop.f32.mrf.mxu0  ;;  %v21641_v39 = vpop.f32.mrf.mxu1 }
 0x154   :  { %26582 = vst [vmem:[#allocation60_spill] sm:$0xff] %v21639_v24  ;;  %26583 = vst [vmem:[#allocation61_spill] sm:$0xff] %v21641_v39  ;;  %4265 = vmatpush1.msra.mxu1 %v21475_v9  ;;  %4302 = vmatprep.mubr.f32.mxu1 %v26505_v30 }
 0x155   :  { %4267 = vmatprep.subr.mxu1 %v21486_v13  ;;  %4362 = vmatprep.subr.mxu0 %v26584_v12  ;;  %v1860_v3 = vpop.f32.mrf.mxu1 }
 0x156   :  { %4269 = vmatpush1.msra.mxu1 %v21494_v32  ;;  %4204 = vmatmul.mubr.f32.gmra.mxu0 %v20108_v15  ;;  %v1721_v11 = vpop.f32.mrf.mxu0  ;;  %v1861_v33 = vadd.f32 %v1860_v3, %v1699_v48  ;;  %v21666_v48 = vand.u32 4294901760, %v106_v53 }
 0x157   :  { %4306 = vmatmul.mubr.f32.vlgmr.msra.gmra.mxu1 %v20060_v51  ;;  %4366 = vmatpush1.msra.mxu0 %v26585_v56  ;;  %v21656_v46 = vpop.f32.mrf.mxu1  ;;  %v91_v56 = vld [vmem:[%s26254_s1 + $0x248] sm:$0xff] }
 0x158   :  { %4370 = vmatprep.subr.mxu0 %v26586_v5  ;;  %4209 = vmatprep.mubr.f32.mxu0 %v26505_v30  ;;  %v21661_v12 = vpop.f32.mrf.mxu0  ;;  %v21682_v5 = vand.u32 4294901760, %v105_v44 }
 0x159   :  { %26587 = vst [vmem:[#allocation62_spill] sm:$0xff] %v21661_v12  ;;  %4311 = vmatprep.mubr.f32.mxu1 %v26505_v30  ;;  %4374 = vmatpush1.msra.mxu0 %v26588_v60  ;;  %v26590_v60 = vand.u32 4294901760, %v21449_v49  ;;  %v21693_v49 = vsub.f32 %v106_v53, %v21666_v48 }
 0x15a   :  { %4212 = vmatmul.mubr.f32.gmra.mxu0 %v20138_v52  ;;  %4378 = vmatprep.subr.mxu0 %v26589_v25  ;;  %v21715_v53 = vsub.f32 %v105_v44, %v21682_v5 }
 0x15b   :  { %4315 = vmatmul.mubr.f32.gmra.mxu1 %v20126_v41  ;;  %4489 = vmatprep.subr.mxu1 %v21361_v17  ;;  %v1867_v36 = vpop.f32.mrf.mxu1  ;;  %v1971_v3 = vpop.f32.mrf.mxu0  ;;  %v21690_v17 = vand.u32 4294901760, %v91_v56 }
 0x15c   :  { %4382 = vmatpush1.msra.mxu0 %v26590_v60  ;;  %4491 = vmatpush1.msra.mxu1 %v21366_v62  ;;  %v1868_v25 = vadd.f32 %v1867_v36, %v1710_v4  ;;  %v1972_v58 = vadd.f32 %v1971_v3, %v1854_v50  ;;  %v75_v4 = vld [vmem:[%s26254_s1 + $0x1c8] sm:$0xff]  ;;  %v26595_v3 = vand.u32 4294901760, %v21500_v31 }
 0x15d   :  { %4386 = vmatprep.subr.mxu0 %v26591_v26  ;;  %4493 = vmatprep.subr.mxu1 %v21378_v18  ;;  %v21695_v60 = vpop.f32.mrf.mxu1  ;;  %v21697_v62 = vpop.f32.mrf.mxu0  ;;  %v26594_v26 = vand.u32 4294901760, %v21483_v28  ;;  %v21707_v18 = vand.u32 4294901760, %v90_v8  ;;  %v61_v28 = vld [vmem:[%s26254_s1 + $0x158] sm:$0xff]  ;;  %v21727_v24 = vsub.f32 %v91_v56, %v21690_v17  ;;  %v46_v56 = vld [vmem:[%s26254_s1 + $0xe0] sm:$0xff] }
 0x15e   :  { %26592 = vst [vmem:[#allocation63_spill] sm:$0xff] %v21695_v60  ;;  %26593 = vst [vmem:[#allocation64_spill] sm:$0xff] %v21697_v62  ;;  %4217 = vmatprep.mubr.f32.mxu0 %v26505_v30  ;;  %4320 = vmatprep.mubr.f32.mxu1 %v26505_v30  ;;  %v26275_v60 = vand.u32 4294901760, %v21693_v49  ;;  %v21747_v6 = vand.u32 4294901760, %v61_v28 }
 0x15f   :  { %4390 = vmatpush1.msra.mxu0 %v26594_v26  ;;  %4495 = vmatpush1.msra.mxu1 %v21392_v43  ;;  %v1979_v50 = vpop.f32.mrf.mxu0  ;;  %v21723_v26 = vand.u32 4294901760, %v76_v38 }
 0x160   :  { %4220 = vmatmul.mubr.f32.gmra.mxu0 %v20156_v63  ;;  %4324 = vmatmul.mubr.f32.gmra.mxu1 %v20150_v59  ;;  %v1874_v36 = vpop.f32.mrf.mxu1  ;;  %v1980_v43 = vadd.f32 %v1979_v50, %v1861_v33  ;;  %v21734_v33 = vand.u32 4294901760, %v75_v4  ;;  %v26599_v50 = vand.u32 4294901760, %v21521_v35 }
 0x161   :  { %4394 = vmatprep.subr.mxu0 %v26595_v3  ;;  %4497 = vmatprep.subr.mxu1 %v21406_v20  ;;  %v1875_v44 = vadd.f32 %v1874_v36, %v1721_v11  ;;  %v21729_v12 = vpop.f32.mrf.mxu0  ;;  %v60_v20 = vld [vmem:[%s26254_s1 + $0x150] sm:$0xff]  ;;  %v21745_v11 = vsub.f32 %v90_v8, %v21707_v18  ;;  %v45_v36 = vld [vmem:[%s26254_s1 + $0xd8] sm:$0xff] }
 0x162   :  { %26596 = vst [vmem:[#allocation65_spill] sm:$0xff] %v21729_v12  ;;  %4398 = vmatpush1.msra.mxu0 %v26597_v16  ;;  %4499 = vmatpush1.msra.mxu1 %v21412_v47  ;;  %v21739_v31 = vpop.f32.mrf.mxu1  ;;  %v26600_v47 = vand.u32 4294901760, %v21529_v57  ;;  %v21762_v8 = vand.u32 4294901760, %v60_v20  ;;  %v21765_v57 = vsub.f32 %v76_v38, %v21723_v26  ;;  %v21781_v16 = vand.u32 4294901760, %v46_v56 }
 0x163   :  { %26598 = vst [vmem:[#allocation66_spill] sm:$0xff] %v21739_v31  ;;  %4402 = vmatprep.subr.mxu0 %v26599_v50  ;;  %4501 = vmatprep.subr.mxu1 %v21424_v10  ;;  %v4717_v10 = vsub.f32 %v21693_v49, %v26275_v60  ;;  %v21784_v31 = vsub.f32 %v61_v28, %v21747_v6  ;;  %v26604_v28 = vand.u32 4294901760, %v21727_v24 }
 0x164   :  { %4329 = vmatprep.mubr.f32.mxu1 %v26505_v30  ;;  %4406 = vmatpush1.msra.mxu0 %v26600_v47  ;;  %v31_v47 = vld [vmem:[%s26254_s1 + $0x68] sm:$0xff] }
 0x165   :  { %4439 = vmatprep.mubr.f32.mxu0 %v26505_v30  ;;  %4503 = vmatpush1.msra.mxu1 %v21438_v19  ;;  %v1987_v3 = vpop.f32.mrf.mxu0  ;;  %v2081_v50 = vpop.f32.mrf.mxu1  ;;  %v21773_v19 = vsub.f32 %v75_v4, %v21734_v33  ;;  %v30_v4 = vld [vmem:[%s26254_s1 + $0x60] sm:$0xff]  ;;  %v21809_v35 = vand.u32 4294901760, %v31_v47 }
 0x166   :  { %4333 = vmatmul.mubr.f32.gmra.mxu1 %v20163_v14  ;;  %4441 = vmatmul.mubr.f32.vlgmr.msra.gmra.mxu0 %v20022_v34  ;;  %v1988_v60 = vadd.f32 %v1987_v3, %v1868_v25  ;;  %v2082_v38 = vadd.f32 %v2081_v50, %v1972_v58  ;;  %v21798_v25 = vand.u32 4294901760, %v45_v36  ;;  %v4729_v3 = vsub.f32 %v21727_v24, %v26604_v28 }
 0x167   :  { %4505 = vmatprep.subr.mxu1 %v21457_v54  ;;  %4446 = vmatprep.mubr.f32.mxu0 %v26505_v30  ;;  %v21789_v45 = vpop.f32.mrf.mxu0  ;;  %v21791_v23 = vpop.f32.mrf.mxu1  ;;  %v26603_v54 = vand.u32 4294901760, %v21715_v53  ;;  %v21806_v50 = vsub.f32 %v60_v20, %v21762_v8  ;;  %v21814_v7 = vand.u32 4294901760, %v30_v4  ;;  %v26605_v20 = vand.u32 4294901760, %v21745_v11 }
 0x168   :  { %26601 = vst [vmem:[#allocation67_spill] sm:$0xff] %v21789_v45  ;;  %26602 = vst [vmem:[#allocation68_spill] sm:$0xff] %v21791_v23  ;;  %4507 = vmatpush1.msra.mxu1 %v21475_v9  ;;  %4544 = vmatprep.mubr.f32.mxu1 %v26505_v30  ;;  %v21841_v9 = vsub.f32 %v31_v47, %v21809_v35 }
 0x169   :  { %v4723_v58 = vsub.f32 %v21715_v53, %v26603_v54  ;;  %4509 = vmatprep.subr.mxu1 %v21486_v13  ;;  %4594 = vmatprep.subr.mxu0 %v21666_v48  ;;  %v2090_v45 = vpop.f32.mrf.mxu1  ;;  %v4718_v54 = vand.u32 4294901760, %v4717_v10  ;;  %v4735_v28 = vsub.f32 %v21745_v11, %v26605_v20  ;;  %v4730_v20 = vand.u32 4294901760, %v4729_v3 }
 0x16a   :  { %4511 = vmatpush1.msra.mxu1 %v21494_v32  ;;  %4448 = vmatmul.mubr.f32.gmra.mxu0 %v20087_v1  ;;  %v1995_v29 = vpop.f32.mrf.mxu0  ;;  %v2091_v27 = vadd.f32 %v2090_v45, %v1980_v43  ;;  %v21823_v32 = vsub.f32 %v46_v56, %v21781_v16  ;;  %v21830_v43 = vsub.f32 %v45_v36, %v21798_v25  ;;  %v26608_v56 = vand.u32 4294901760, %v21765_v57 }
 0x16b   :  { %4546 = vmatmul.mubr.f32.vlgmr.msra.gmra.mxu1 %v20022_v34  ;;  %4596 = vmatpush1.msra.mxu0 %v21682_v5  ;;  %v1996_v10 = vadd.f32 %v1995_v29, %v1875_v44  ;;  %v21825_v23 = vpop.f32.mrf.mxu1  ;;  %v4724_v45 = vand.u32 4294901760, %v4723_v58  ;;  %v26609_v36 = vand.u32 4294901760, %v21773_v19  ;;  %v4736_v3 = vand.u32 4294901760, %v4735_v28 }
 0x16c   :  { %26606 = vst [vmem:[#allocation69_spill] sm:$0xff] %v21825_v23  ;;  %4598 = vmatprep.subr.mxu0 %v21690_v17  ;;  %4453 = vmatprep.mubr.f32.mxu0 %v26505_v30  ;;  %v21832_v13 = vpop.f32.mrf.mxu0  ;;  %v4741_v29 = vsub.f32 %v21765_v57, %v26608_v56  ;;  %v26610_v56 = vand.u32 4294901760, %v21784_v31  ;;  %v26611_v28 = vand.u32 4294901760, %v21806_v50 }
 0x16d   :  { %26607 = vst [vmem:[#allocation70_spill] sm:$0xff] %v21832_v13  ;;  %4551 = vmatprep.mubr.f32.mxu1 %v26505_v30  ;;  %4600 = vmatpush1.msra.mxu0 %v21707_v18  ;;  %v4747_v58 = vsub.f32 %v21773_v19, %v26609_v36  ;;  %v21849_v13 = vsub.f32 %v30_v4, %v21814_v7  ;;  %v26277_v36 = vand.u32 4294901760, %v21830_v43 }
 0x16e   :  { %4455 = vmatmul.mubr.f32.gmra.mxu0 %v20122_v40  ;;  %4602 = vmatprep.subr.mxu0 %v21723_v26  ;;  %v4753_v47 = vsub.f32 %v21784_v31, %v26610_v56  ;;  %v4759_v37 = vsub.f32 %v21806_v50, %v26611_v28  ;;  %v26278_v56 = vand.u32 4294901760, %v21841_v9 }
 0x16f   :  { %4553 = vmatmul.mubr.f32.gmra.mxu1 %v20087_v1  ;;  %4719 = vmatprep.subr.mxu1 %v4718_v54  ;;  %v2099_v62 = vpop.f32.mrf.mxu1  ;;  %v2216_v23 = vpop.f32.mrf.mxu0  ;;  %v4742_v54 = vand.u32 4294901760, %v4741_v29  ;;  %v4771_v29 = vsub.f32 %v21830_v43, %v26277_v36 }
 0x170   :  { %4604 = vmatpush1.msra.mxu0 %v21734_v33  ;;  %4725 = vmatpush1.msra.mxu1 %v4724_v45  ;;  %v2100_v39 = vadd.f32 %v2099_v62, %v1988_v60  ;;  %v2217_v4 = vadd.f32 %v2216_v23, %v2082_v38  ;;  %v4748_v60 = vand.u32 4294901760, %v4747_v58  ;;  %v4754_v62 = vand.u32 4294901760, %v4753_v47 }
 0x171   :  { %4606 = vmatprep.subr.mxu0 %v21747_v6  ;;  %4731 = vmatprep.subr.mxu1 %v4730_v20  ;;  %v21863_v44 = vpop.f32.mrf.mxu1  ;;  %v21865_v12 = vpop.f32.mrf.mxu0  ;;  %v26614_v38 = vand.u32 4294901760, %v21823_v32  ;;  %v4777_v47 = vsub.f32 %v21841_v9, %v26278_v56  ;;  %v26628_v56 = vand.u32 4294901760, %v21693_v49 }
 0x172   :  { %26612 = vst [vmem:[#allocation71_spill] sm:$0xff] %v21863_v44  ;;  %26613 = vst [vmem:[#allocation72_spill] sm:$0xff] %v21865_v12  ;;  %4460 = vmatprep.mubr.f32.mxu0 %v26505_v30  ;;  %4558 = vmatprep.mubr.f32.mxu1 %v26505_v30  ;;  %v26615_v44 = vand.u32 4294901760, %v21849_v13 }
 0x173   :  { %4608 = vmatpush1.msra.mxu0 %v21762_v8  ;;  %4737 = vmatpush1.msra.mxu1 %v4736_v3  ;;  %v4765_v45 = vsub.f32 %v21823_v32, %v26614_v38  ;;  %v2223_v20 = vpop.f32.mrf.mxu0  ;;  %v4760_v3 = vand.u32 4294901760, %v4759_v37  ;;  %v4772_v37 = vand.u32 4294901760, %v4771_v29 }
 0x174   :  { %4462 = vmatmul.mubr.f32.gmra.mxu0 %v20146_v55  ;;  %4560 = vmatmul.mubr.f32.gmra.mxu1 %v20122_v40  ;;  %v2108_v58 = vpop.f32.mrf.mxu1  ;;  %v2224_v28 = vadd.f32 %v2223_v20, %v2091_v27  ;;  %v4783_v36 = vsub.f32 %v21849_v13, %v26615_v44 }
 0x175   :  { %4610 = vmatprep.subr.mxu0 %v21781_v16  ;;  %4743 = vmatprep.subr.mxu1 %v4742_v54  ;;  %v2109_v38 = vadd.f32 %v2108_v58, %v1996_v10  ;;  %v21883_v23 = vpop.f32.mrf.mxu0  ;;  %v4766_v27 = vand.u32 4294901760, %v4765_v45  ;;  %v4778_v10 = vand.u32 4294901760, %v4777_v47 }
 0x176   :  { %4612 = vmatpush1.msra.mxu0 %v21798_v25  ;;  %4749 = vmatpush1.msra.mxu1 %v4748_v60  ;;  %v21889_v12 = vpop.f32.mrf.mxu1  ;;  %v4784_v44 = vand.u32 4294901760, %v4783_v36 }
 0x177   :  { %26616 = vst [vmem:[#allocation73_spill] sm:$0xff] %v21889_v12  ;;  %4614 = vmatprep.subr.mxu0 %v21809_v35  ;;  %4755 = vmatprep.subr.mxu1 %v4754_v62 }
 0x178   :  { %4565 = vmatprep.mubr.f32.mxu1 %v26505_v30  ;;  %4616 = vmatpush1.msra.mxu0 %v21814_v7 }
 0x179   :  { %4649 = vmatprep.mubr.f32.mxu0 %v26505_v30  ;;  %4761 = vmatpush1.msra.mxu1 %v4760_v3  ;;  %v2230_v54 = vpop.f32.mrf.mxu0  ;;  %v2321_v60 = vpop.f32.mrf.mxu1 }
 0x17a   :  { %4567 = vmatmul.mubr.f32.gmra.mxu1 %v20146_v55  ;;  %4655 = vmatmul.mubr.f32.vlgmr.msra.gmra.mxu0 %v20090_v2  ;;  %v2231_v20 = vadd.f32 %v2230_v54, %v2100_v39  ;;  %v21897_v58 = vadd.f32 %v2321_v60, %v2217_v4 }
 0x17b   :  { %4767 = vmatprep.subr.mxu1 %v4766_v27  ;;  %4660 = vmatprep.mubr.f32.mxu0 %v26505_v30  ;;  %v21900_v62 = vpop.f32.mrf.mxu0  ;;  %v21902_v45 = vpop.f32.mrf.mxu1 }
 0x17c   :  { %26617 = vst [vmem:[#allocation74_spill] sm:$0xff] %v21897_v58  ;;  %26618 = vst [vmem:[#allocation75_spill] sm:$0xff] %v21900_v62  ;;  %4773 = vmatpush1.msra.mxu1 %v4772_v37  ;;  %4818 = vmatprep.mubr.f32.mxu1 %v26505_v30  ;;  %v26633_v62 = vand.u32 4294901760, %v21745_v11 }
 0x17d   :  { %4779 = vmatprep.subr.mxu1 %v4778_v10  ;;  %4869 = vmatprep.subr.mxu0 %v21693_v49  ;;  %v2328_v29 = vpop.f32.mrf.mxu1  ;;  %v26631_v49 = vand.u32 4294901760, %v21727_v24 }
 0x17e   :  { %4785 = vmatpush1.msra.mxu1 %v4784_v44  ;;  %4666 = vmatmul.mubr.f32.gmra.mxu0 %v20152_v61  ;;  %v2237_v39 = vpop.f32.mrf.mxu0  ;;  %v21907_v36 = vadd.f32 %v2328_v29, %v2224_v28 }
 0x17f   :  { %4820 = vmatmul.mubr.f32.vlgmr.msra.gmra.mxu1 %v20022_v34  ;;  %4872 = vmatpush1.msra.mxu0 %v21715_v53  ;;  %v2238_v4 = vadd.f32 %v2237_v39, %v2109_v38  ;;  %v21911_v3 = vpop.f32.mrf.mxu1 }
 0x180   :  { %26619 = vst [vmem:[#allocation76_spill] sm:$0xff] %v21907_v36  ;;  %4875 = vmatprep.subr.mxu0 %v21727_v24  ;;  %4671 = vmatprep.mubr.f32.mxu0 %v26505_v30  ;;  %v21915_v47 = vpop.f32.mrf.mxu0  ;;  %v92_v24 = vld [vmem:[%s26254_s1 + $0x250] sm:$0xff] }
 0x181   :  { %26620 = vst [vmem:[#allocation77_spill] sm:$0xff] %v21915_v47  ;;  %4825 = vmatprep.mubr.f32.mxu1 %v26505_v30  ;;  %4878 = vmatpush1.msra.mxu0 %v21745_v11  ;;  %v26635_v11 = vand.u32 4294901760, %v21773_v19 }
 0x182   :  { %4677 = vmatmul.mubr.f32.gmra.mxu0 %v20166_v21  ;;  %4881 = vmatprep.subr.mxu0 %v21765_v57 }
 0x183   :  { %4827 = vmatmul.mubr.f32.gmra.mxu1 %v20087_v1  ;;  %4989 = vmatprep.subr.mxu1 %v21666_v48  ;;  %v2335_v28 = vpop.f32.mrf.mxu1  ;;  %v21923_v38 = vpop.f32.mrf.mxu0 }
 0x184   :  { %4884 = vmatpush1.msra.mxu0 %v21773_v19  ;;  %4991 = vmatpush1.msra.mxu1 %v21682_v5  ;;  %v21927_v27 = vadd.f32 %v2335_v28, %v2231_v20 }
 0x185   :  { %4887 = vmatprep.subr.mxu0 %v21784_v31  ;;  %4993 = vmatprep.subr.mxu1 %v21690_v17  ;;  %v21931_v37 = vpop.f32.mrf.mxu1  ;;  %v21933_v10 = vpop.f32.mrf.mxu0 }
 0x186   :  { %26621 = vst [vmem:[#allocation78_spill] sm:$0xff] %v21927_v27  ;;  %26622 = vst [vmem:[#allocation79_spill] sm:$0xff] %v21931_v37  ;;  %4682 = vmatprep.mubr.f32.mxu0 %v26505_v30  ;;  %4832 = vmatprep.mubr.f32.mxu1 %v26505_v30  ;;  %v26629_v37 = vand.u32 4294901760, %v21715_v53  ;;  %v26634_v53 = vand.u32 4294901760, %v21765_v57  ;;  %v26636_v57 = vand.u32 4294901760, %v21784_v31 }
 0x187   :  { %26623 = vst [vmem:[#allocation80_spill] sm:$0xff] %v21933_v10  ;;  %4890 = vmatpush1.msra.mxu0 %v21806_v50  ;;  %4995 = vmatpush1.msra.mxu1 %v21707_v18  ;;  %v21939_v54 = vpop.f32.mrf.mxu0 }
 0x188   :  { %4688 = vmatmul.mubr.f32.gmra.mxu0 %v20175_v22  ;;  %4834 = vmatmul.mubr.f32.gmra.mxu1 %v20122_v40  ;;  %v2342_v60 = vpop.f32.mrf.mxu1 }
 0x189   :  { %4893 = vmatprep.subr.mxu0 %v21823_v32  ;;  %4997 = vmatprep.subr.mxu1 %v21723_v26  ;;  %v21945_v44 = vadd.f32 %v2342_v60, %v2238_v4  ;;  %v21947_v20 = vpop.f32.mrf.mxu0 }
 0x18a   :  { %4896 = vmatpush1.msra.mxu0 %v21830_v43  ;;  %4999 = vmatpush1.msra.mxu1 %v21734_v33  ;;  %v21951_v29 = vpop.f32.mrf.mxu1 }
 0x18b   :  { %26624 = vst [vmem:[#allocation81_spill] sm:$0xff] %v21945_v44  ;;  %26625 = vst [vmem:[#allocation82_spill] sm:$0xff] %v21951_v29  ;;  %4899 = vmatprep.subr.mxu0 %v21841_v9  ;;  %5001 = vmatprep.subr.mxu1 %v21747_v6  ;;  %v107_v44 = vld [vmem:[%s26254_s1 + $0x2c8] sm:$0xff] }
 0x18c   :  { %4839 = vmatprep.mubr.f32.mxu1 %v26505_v30  ;;  %4902 = vmatpush1.msra.mxu0 %v21849_v13  ;;  %v21994_v47 = vand.u32 4294901760, %v107_v44 }
 0x18d   :  { %4935 = vmatprep.mubr.f32.mxu0 %v26505_v30  ;;  %5003 = vmatpush1.msra.mxu1 %v21762_v8  ;;  %v2452_v39 = vpop.f32.mrf.mxu0  ;;  %v21959_v4 = vpop.f32.mrf.mxu1 }
 0x18e   :  { %4841 = vmatmul.mubr.f32.gmra.mxu1 %v20146_v55  ;;  %4938 = vmatmul.mubr.f32.vlgmr.msra.gmra.mxu0 %v20046_v42 }
 0x18f   :  { %5005 = vmatprep.subr.mxu1 %v21781_v16  ;;  %4943 = vmatprep.mubr.f32.mxu0 %v26505_v30  ;;  %v21965_v28 = vpop.f32.mrf.mxu0  ;;  %v21967_v60 = vpop.f32.mrf.mxu1 }
 0x190   :  { %26626 = vst [vmem:[#allocation83_spill] sm:$0xff] %v21965_v28  ;;  %26627 = vst [vmem:[#allocation84_spill] sm:$0xff] %v21967_v60  ;;  %5007 = vmatpush1.msra.mxu1 %v21798_v25  ;;  %5044 = vmatprep.mubr.f32.mxu1 %v26505_v30 }
 0x191   :  { %5009 = vmatprep.subr.mxu1 %v21809_v35  ;;  %5104 = vmatprep.subr.mxu0 %v26628_v56  ;;  %v21974_v27 = vpop.f32.mrf.mxu1 }
 0x192   :  { %5011 = vmatpush1.msra.mxu1 %v21814_v7  ;;  %4946 = vmatmul.mubr.f32.gmra.mxu0 %v20108_v15  ;;  %v2463_v28 = vpop.f32.mrf.mxu0 }
 0x193   :  { %5048 = vmatmul.mubr.f32.vlgmr.msra.gmra.mxu1 %v20060_v51  ;;  %5108 = vmatpush1.msra.mxu0 %v26629_v37  ;;  %v21984_v29 = vpop.f32.mrf.mxu1 }
 0x194   :  { %26630 = vst [vmem:[#allocation85_spill] sm:$0xff] %v21984_v29  ;;  %5112 = vmatprep.subr.mxu0 %v26631_v49  ;;  %4951 = vmatprep.mubr.f32.mxu0 %v26505_v30  ;;  %v21989_v56 = vpop.f32.mrf.mxu0 }
 0x195   :  { %26632 = vst [vmem:[#allocation86_spill] sm:$0xff] %v21989_v56  ;;  %5053 = vmatprep.mubr.f32.mxu1 %v26505_v30  ;;  %5116 = vmatpush1.msra.mxu0 %v26633_v62  ;;  %v22015_v56 = vsub.f32 %v107_v44, %v21994_v47  ;;  %v62_v44 = vld [vmem:[%s26254_s1 + $0x160] sm:$0xff] }
 0x196   :  { %4954 = vmatmul.mubr.f32.gmra.mxu0 %v20138_v52  ;;  %5120 = vmatprep.subr.mxu0 %v26634_v53  ;;  %v22012_v53 = vand.u32 4294901760, %v92_v24 }
 0x197   :  { %5057 = vmatmul.mubr.f32.gmra.mxu1 %v20126_v41  ;;  %5231 = vmatprep.subr.mxu1 %v21666_v48  ;;  %v2609_v37 = vpop.f32.mrf.mxu1  ;;  %v22004_v49 = vpop.f32.mrf.mxu0  ;;  %v77_v48 = vld [vmem:[%s26254_s1 + $0x1d8] sm:$0xff] }
 0x198   :  { %5124 = vmatpush1.msra.mxu0 %v26635_v11  ;;  %5233 = vmatpush1.msra.mxu1 %v21682_v5  ;;  %v2610_v62 = vadd.f32 %v2609_v37, %v2452_v39  ;;  %v26639_v5 = vand.u32 4294901760, %v21806_v50  ;;  %v22033_v31 = vand.u32 4294901760, %v77_v48  ;;  %v26640_v37 = vand.u32 4294901760, %v21823_v32  ;;  %v47_v32 = vld [vmem:[%s26254_s1 + $0xe8] sm:$0xff] }
 0x199   :  { %5128 = vmatprep.subr.mxu0 %v26636_v57  ;;  %5235 = vmatprep.subr.mxu1 %v21690_v17  ;;  %v22020_v12 = vpop.f32.mrf.mxu1  ;;  %v22022_v19 = vpop.f32.mrf.mxu0  ;;  %v22045_v50 = vsub.f32 %v92_v24, %v22012_v53  ;;  %v22060_v24 = vand.u32 4294901760, %v62_v44 }
 0x19a   :  { %26637 = vst [vmem:[#allocation87_spill] sm:$0xff] %v22020_v12  ;;  %26638 = vst [vmem:[#allocation88_spill] sm:$0xff] %v22022_v19  ;;  %4959 = vmatprep.mubr.f32.mxu0 %v26505_v30  ;;  %5062 = vmatprep.mubr.f32.mxu1 %v26505_v30 }
 0x19b   :  { %5132 = vmatpush1.msra.mxu0 %v26639_v5  ;;  %5237 = vmatpush1.msra.mxu1 %v21707_v18  ;;  %v22029_v17 = vpop.f32.mrf.mxu0  ;;  %v22042_v18 = vand.u32 4294901760, %v22015_v56  ;;  %v26642_v5 = vand.u32 4294901760, %v21830_v43  ;;  %v26645_v43 = vand.u32 4294901760, %v21849_v13 }
 0x19c   :  { %4962 = vmatmul.mubr.f32.gmra.mxu0 %v20156_v63  ;;  %5066 = vmatmul.mubr.f32.gmra.mxu1 %v20150_v59  ;;  %v2616_v39 = vpop.f32.mrf.mxu1 }
 0x19d   :  { %5136 = vmatprep.subr.mxu0 %v26640_v37  ;;  %5239 = vmatprep.subr.mxu1 %v21723_v26  ;;  %v2617_v11 = vadd.f32 %v2616_v39, %v2463_v28  ;;  %v22047_v57 = vpop.f32.mrf.mxu0  ;;  %v26644_v26 = vand.u32 4294901760, %v21841_v9  ;;  %v32_v28 = vld [vmem:[%s26254_s1 + $0x70] sm:$0xff]  ;;  %v22076_v9 = vand.u32 4294901760, %v22045_v50  ;;  %v22078_v39 = vand.u32 4294901760, %v47_v32 }
 0x19e   :  { %26641 = vst [vmem:[#allocation89_spill] sm:$0xff] %v22047_v57  ;;  %5140 = vmatpush1.msra.mxu0 %v26642_v5  ;;  %5241 = vmatpush1.msra.mxu1 %v21734_v33  ;;  %v22055_v37 = vpop.f32.mrf.mxu1  ;;  %v22066_v33 = vsub.f32 %v77_v48, %v22033_v31 }
 0x19f   :  { %26643 = vst [vmem:[#allocation90_spill] sm:$0xff] %v22055_v37  ;;  %5144 = vmatprep.subr.mxu0 %v26644_v26  ;;  %5243 = vmatprep.subr.mxu1 %v21747_v6  ;;  %v5450_v6 = vsub.f32 %v22015_v56, %v22042_v18  ;;  %v22089_v26 = vand.u32 4294901760, %v32_v28 }
 0x1a0   :  { %5071 = vmatprep.mubr.f32.mxu1 %v26505_v30  ;;  %5148 = vmatpush1.msra.mxu0 %v26645_v43  ;;  %v22098_v37 = vand.u32 4294901760, %v22066_v33 }
 0x1a1   :  { %5181 = vmatprep.mubr.f32.mxu0 %v26505_v30  ;;  %5245 = vmatpush1.msra.mxu1 %v21762_v8  ;;  %v2729_v13 = vpop.f32.mrf.mxu0  ;;  %v22080_v5 = vpop.f32.mrf.mxu1  ;;  %v22087_v8 = vsub.f32 %v62_v44, %v22060_v24  ;;  %v22105_v44 = vsub.f32 %v47_v32, %v22078_v39 }
 0x1a2   :  { %5075 = vmatmul.mubr.f32.gmra.mxu1 %v20163_v14  ;;  %5183 = vmatmul.mubr.f32.vlgmr.msra.gmra.mxu0 %v20022_v34  ;;  %v2730_v48 = vadd.f32 %v2729_v13, %v2610_v62  ;;  %v5457_v62 = vsub.f32 %v22045_v50, %v22076_v9 }
 0x1a3   :  { %5247 = vmatprep.subr.mxu1 %v21781_v16  ;;  %5188 = vmatprep.mubr.f32.mxu0 %v26505_v30  ;;  %v22091_v43 = vpop.f32.mrf.mxu0  ;;  %v22093_v12 = vpop.f32.mrf.mxu1  ;;  %v5451_v16 = vand.u32 4294901760, %v5450_v6  ;;  %v22117_v6 = vsub.f32 %v32_v28, %v22089_v26 }
 0x1a4   :  { %26646 = vst [vmem:[#allocation91_spill] sm:$0xff] %v22091_v43  ;;  %26647 = vst [vmem:[#allocation92_spill] sm:$0xff] %v22093_v12  ;;  %5249 = vmatpush1.msra.mxu1 %v21798_v25  ;;  %5286 = vmatprep.mubr.f32.mxu1 %v26505_v30  ;;  %v5458_v36 = vand.u32 4294901760, %v5457_v62  ;;  %v22129_v12 = vand.u32 4294901760, %v22105_v44 }
 0x1a5   :  { %5251 = vmatprep.subr.mxu1 %v21809_v35  ;;  %19111 = vmatprep.subr.mxu0 %v21994_v47  ;;  %v22107_v13 = vpop.f32.mrf.mxu1  ;;  %v22114_v35 = vand.u32 4294901760, %v22087_v8  ;;  %v22137_v28 = vand.u32 4294901760, %v22117_v6 }
 0x1a6   :  { %5253 = vmatpush1.msra.mxu1 %v21814_v7  ;;  %5190 = vmatmul.mubr.f32.gmra.mxu0 %v20087_v1  ;;  %v2737_v25 = vpop.f32.mrf.mxu0  ;;  %v5464_v7 = vsub.f32 %v22066_v33, %v22098_v37 }
 0x1a7   :  { %5288 = vmatmul.mubr.f32.vlgmr.msra.gmra.mxu1 %v20022_v34  ;;  %5195 = vmatprep.mubr.f32.mxu0 %v26505_v30  ;;  %v2738_v43 = vadd.f32 %v2737_v25, %v2617_v11  ;;  %v22119_v32 = vpop.f32.mrf.mxu1  ;;  %v5471_v11 = vsub.f32 %v22087_v8, %v22114_v35 }
 0x1a8   :  { %26648 = vst [vmem:[#allocation93_spill] sm:$0xff] %v22119_v32  ;;  %5293 = vmatprep.mubr.f32.mxu1 %v26505_v30  ;;  %19112 = vmatpush3.msra.mxu0 %v21994_v47  ;;  %v22125_v58 = vpop.f32.mrf.mxu0  ;;  %v5465_v62 = vand.u32 4294901760, %v5464_v7 }
 0x1a9   :  { %26649 = vst [vmem:[#allocation94_spill] sm:$0xff] %v22125_v58  ;;  %19113 = vmatprep.subr.mxu0 %v22012_v53  ;;  %19129 = vmatprep.subr.mxu1 %v5451_v16  ;;  %v5472_v10 = vand.u32 4294901760, %v5471_v11 }
 0x1aa   :  { %5197 = vmatmul.mubr.f32.gmra.mxu0 %v20122_v40  ;;  %19130 = vmatpush3.msra.mxu1 %v5451_v16  ;;  %v5478_v16 = vsub.f32 %v22105_v44, %v22129_v12 }
 0x1ab   :  { %5295 = vmatmul.mubr.f32.gmra.mxu1 %v20087_v1  ;;  %5202 = vmatprep.mubr.f32.mxu0 %v26505_v30  ;;  %v2841_v25 = vpop.f32.mrf.mxu1  ;;  %v22139_v58 = vpop.f32.mrf.mxu0 }
 0x1ac   :  { %5300 = vmatprep.mubr.f32.mxu1 %v26505_v30  ;;  %19114 = vmatpush3.msra.mxu0 %v22012_v53  ;;  %v2842_v19 = vadd.f32 %v2841_v25, %v2730_v48  ;;  %v5485_v48 = vsub.f32 %v22117_v6, %v22137_v28 }
 0x1ad   :  { %19115 = vmatprep.subr.mxu0 %v22033_v31  ;;  %19131 = vmatprep.subr.mxu1 %v5458_v36  ;;  %v22146_v32 = vpop.f32.mrf.mxu1  ;;  %v22148_v60 = vpop.f32.mrf.mxu0 }
 0x1ae   :  { %26650 = vst [vmem:[#allocation95_spill] sm:$0xff] %v22146_v32  ;;  %26651 = vst [vmem:[#allocation96_spill] sm:$0xff] %v22148_v60  ;;  %5204 = vmatmul.mubr.f32.gmra.mxu0 %v20146_v55  ;;  %19132 = vmatpush3.msra.mxu1 %v5458_v36  ;;  %v5479_v32 = vand.u32 4294901760, %v5478_v16  ;;  %v5486_v57 = vand.u32 4294901760, %v5485_v48 }
 0x1af   :  { %5302 = vmatmul.mubr.f32.gmra.mxu1 %v20122_v40  ;;  %19116 = vmatpush3.msra.mxu0 %v22033_v31  ;;  %v22155_v7 = vpop.f32.mrf.mxu0 }
 0x1b0   :  { %19117 = vmatprep.subr.mxu0 %v22060_v24  ;;  %19133 = vmatprep.subr.mxu1 %v5465_v62  ;;  %v2850_v25 = vpop.f32.mrf.mxu1 }
 0x1b1   :  { %5307 = vmatprep.mubr.f32.mxu1 %v26505_v30  ;;  %19118 = vmatpush3.msra.mxu0 %v22060_v24  ;;  %v2851_v36 = vadd.f32 %v2850_v25, %v2738_v43  ;;  %v22160_v60 = vpop.f32.mrf.mxu0 }
 0x1b2   :  { %19134 = vmatpush3.msra.mxu1 %v5465_v62  ;;  %19119 = vmatprep.subr.mxu0 %v22078_v39  ;;  %v22163_v11 = vpop.f32.mrf.mxu1  ;;  %v6015_v62 = vlaneseq }
 0x1b3   :  { %26652 = vst [vmem:[#allocation97_spill] sm:$0xff] %v22163_v11  ;;  %5309 = vmatmul.mubr.f32.gmra.mxu1 %v20146_v55  ;;  %19135 = vmatprep.subr.mxu1 %v5472_v10 }
 0x1b4   :  { %19120 = vmatpush3.msra.mxu0 %v22078_v39  ;;  %19136 = vmatpush3.msra.mxu1 %v5472_v10 }
 0x1b5   :  { %19121 = vmatprep.subr.mxu0 %v22089_v26  ;;  %19137 = vmatprep.subr.mxu1 %v5479_v32  ;;  %v2972_v29 = vpop.f32.mrf.mxu0  ;;  %v22168_v16 = vpop.f32.mrf.mxu1 }
 0x1b6   :  { %19122 = vmatpush3.msra.mxu0 %v22089_v26  ;;  %19138 = vmatpush3.msra.mxu1 %v5479_v32  ;;  %v2973_v43 = vadd.f32 %v2972_v29, %v2842_v19  ;;  %v6022_v19 = vand.u32 127, %v6015_v62 }
 0x1b7   :  { %19123 = vmatprep.mubr.f32.mxu0 %v20090_v2  ;;  %19139 = vmatprep.subr.mxu1 %v5486_v57  ;;  %v22172_v25 = vpop.f32.mrf.mxu0  ;;  %v22174_v48 = vpop.f32.mrf.mxu1 }
 0x1b8   :  { %26653 = vst [vmem:[#allocation98_spill] sm:$0xff] %v22172_v25  ;;  %19147 = vmatprep.subr.mxu0 %v22015_v56  ;;  %19124 = vmatmul.mubr.f32.vlgmr.msra.gmra.mxu0 %v20152_v61 }
 0x1b9   :  { %19140 = vmatpush3.msra.mxu1 %v5486_v57  ;;  %19148 = vmatpush3.msra.mxu0 %v22015_v56  ;;  %v3070_v10 = vpop.f32.mrf.mxu1  ;;  %v2603_v56 = vadd.f32 %v21974_v27, %v21939_v54  ;;  %v22195_v57 = vmul.u32 2, %v6022_v19 }
 0x1ba   :  { %19141 = vmatprep.mubr.f32.mxu1 %v20022_v34  ;;  %19149 = vmatprep.subr.mxu0 %v22045_v50  ;;  %v2979_v29 = vpop.f32.mrf.mxu0 }
 0x1bb   :  { %19165 = vmatprep.subr.mxu1 %v21994_v47  ;;  %19142 = vmatmul.mubr.f32.vlgmr.msra.gmra.mxu1 %v20087_v1  ;;  %v2980_v2 = vadd.f32 %v2979_v29, %v2851_v36  ;;  %v22183_v32 = vpop.f32.mrf.mxu1  ;;  %26655 = vst [vmem:[#allocation100_spill] sm:$0xff] %v22195_v57 }
 0x1bc   :  { %19150 = vmatpush3.msra.mxu0 %v22045_v50  ;;  %19166 = vmatpush3.msra.mxu1 %v21994_v47  ;;  %v22187_v61 = vpop.f32.mrf.mxu0  ;;  %v2722_v50 = vadd.f32 %v22029_v17, %v2603_v56  ;;  %v22215_v17 = vshrl.u32 %v6015_v62, 7  ;;  %v2596_v56 = vadd.f32 %v21959_v4, %v21923_v38  ;;  %v26659_v62 = vld [vmem:[#allocation65_spill] sm:$0xff] }
 0x1bd   :  { %26654 = vst [vmem:[#allocation99_spill] sm:$0xff] %v22187_v61  ;;  %19151 = vmatprep.subr.mxu0 %v22066_v33  ;;  %19167 = vmatprep.subr.mxu1 %v22012_v53 }
 0x1be   :  { %19152 = vmatpush3.msra.mxu0 %v22066_v33  ;;  %19168 = vmatpush3.msra.mxu1 %v22012_v53  ;;  %v2833_v54 = vadd.f32 %v22107_v13, %v2722_v50  ;;  %26658 = vst [vmem:[#allocation103_spill] sm:$0xff] %v22215_v17  ;;  %v2714_v38 = vadd.f32 %v22004_v49, %v2596_v56 }
 0x1bf   :  { %19153 = vmatprep.subr.mxu0 %v22087_v8  ;;  %19169 = vmatprep.subr.mxu1 %v22033_v31  ;;  %v3077_v36 = vpop.f32.mrf.mxu1  ;;  %v22200_v29 = vpop.f32.mrf.mxu0 }
 0x1c0   :  { %19154 = vmatpush3.msra.mxu0 %v22087_v8  ;;  %19170 = vmatpush3.msra.mxu1 %v22033_v31  ;;  %v22204_v27 = vadd.f32 %v3077_v36, %v2973_v43  ;;  %v22218_v8 = vadd.s32 1, %v22195_v57  ;;  %v2966_v13 = vadd.f32 %v22155_v7, %v2833_v54  ;;  %v26661_v7 = vld [vmem:[#allocation57_spill] sm:$0xff] }
 0x1c1   :  { %19126 = vmatprep.mubr.f32.mxu0 %v20166_v21  ;;  %19155 = vmatprep.subr.mxu0 %v22105_v44  ;;  %v22209_v33 = vpop.f32.mrf.mxu1  ;;  %v22211_v19 = vpop.f32.mrf.mxu0  ;;  %v1863_v21 = vadd.f32 %v21656_v46, %v21623_v0  ;;  %v26662_v36 = vld [vmem:[#allocation61_spill] sm:$0xff] }
 0x1c2   :  { %26656 = vst [vmem:[#allocation101_spill] sm:$0xff] %v22204_v27  ;;  %26657 = vst [vmem:[#allocation102_spill] sm:$0xff] %v22209_v33  ;;  %19171 = vmatprep.subr.mxu1 %v22060_v24  ;;  %19127 = vmatmul.mubr.f32.gmra.mxu0 %v20175_v22  ;;  %v3071_v46 = vadd.f32 %v3070_v10, %v2966_v13  ;;  %v1856_v54 = vadd.f32 %v26662_v36, %v26661_v7  ;;  %v22248_v10 = vadd.s32 8, %v22215_v17  ;;  %v26666_v13 = vld [vmem:[#allocation64_spill] sm:$0xff] }
 0x1c3   :  { %19156 = vmatpush3.msra.mxu0 %v22105_v44  ;;  %19172 = vmatpush3.msra.mxu1 %v22060_v24  ;;  %v22225_v43 = vpop.f32.mrf.mxu0  ;;  %v1982_v50 = vadd.f32 %v26659_v62, %v1863_v21  ;;  %vm6040_vm1 = vcmp.eq.s32.totalorder %v22215_v17, %v22218_v8  ;;  %v22268_v7 = vadd.s32 16, %v22215_v17 }
 0x1c4   :  { %19144 = vmatprep.mubr.f32.mxu1 %v20122_v40  ;;  %19157 = vmatprep.subr.mxu0 %v22117_v6  ;;  %v3084_v22 = vpop.f32.mrf.mxu1  ;;  %26664 = vst [vmem:[#allocation61_spill] sm:$0xff] %v22248_v10  ;;  %v1974_v49 = vadd.f32 %v26666_v13, %v1856_v54  ;;  %vm6041_vm3 = vcmp.eq.s32.totalorder %v22248_v10, %v22218_v8 }
 0x1c5   :  { %19173 = vmatprep.subr.mxu1 %v22078_v39  ;;  %19145 = vmatmul.mubr.f32.gmra.mxu1 %v20146_v55  ;;  %v22234_v0 = vadd.f32 %v3084_v22, %v2980_v2  ;;  %v22236_v44 = vpop.f32.mrf.mxu0  ;;  %v26665_v2 = vld [vmem:[#allocation69_spill] sm:$0xff]  ;;  %v22260_v22 = vand.u32 4294901760, %v3071_v46  ;;  %26668 = vst [vmem:[#allocation64_spill] sm:$0xff] %v22268_v7  ;;  %vm6042_vm4 = vcmp.eq.s32.totalorder %v22268_v7, %v22218_v8 }
 0x1c6   :  { %19158 = vmatpush3.msra.mxu0 %v22117_v6  ;;  %19174 = vmatpush3.msra.mxu1 %v22078_v39  ;;  %v22245_v4 = vpop.f32.mrf.mxu1  ;;  %v2093_v21 = vadd.f32 %v26665_v2, %v1982_v50  ;;  %v2824_v6 = vadd.f32 %v22080_v5, %v2714_v38  ;;  %v26671_v38 = vld [vmem:[#allocation72_spill] sm:$0xff]  ;;  %v26705_v7 = vld [vmem:[#allocation85_spill] sm:$0xff] }
 0x1c7   :  { %26660 = vst [vmem:[#allocation65_spill] sm:$0xff] %v22234_v0  ;;  %26663 = vst [vmem:[#allocation57_spill] sm:$0xff] %v22245_v4  ;;  %19159 = vmatprep.mubr.f32.mxu0 %v20046_v42  ;;  %19175 = vmatprep.subr.mxu1 %v22089_v26  ;;  %v22263_v42 = vsel %vm6040_vm1, 1.0, %v26505_v30 }
 0x1c8   :  { %19183 = vmatprep.subr.mxu0 %v22042_v18  ;;  %19160 = vmatmul.mubr.f32.vlgmr.msra.gmra.mxu0 %v20108_v15  ;;  %v2226_v56 = vadd.f32 %v21883_v23, %v2093_v21  ;;  %26667 = vst [vmem:[#allocation69_spill] sm:$0xff] %v22263_v42  ;;  %v26669_v15 = vld [vmem:[#allocation68_spill] sm:$0xff]  ;;  %v2959_v23 = vadd.f32 %v22139_v58, %v2824_v6  ;;  %v6094_v58 = vsel %vm6092_vm2, %v22263_v42, 0 }
 0x1c9   :  { %19176 = vmatpush3.msra.mxu1 %v22089_v26  ;;  %19184 = vmatpush3.msra.mxu0 %v22042_v18  ;;  %v3194_v62 = vpop.f32.mrf.mxu0  ;;  %v22265_v50 = vpop.f32.mrf.mxu1  ;;  %v2084_v5 = vadd.f32 %v26669_v15, %v1974_v49  ;;  %v22311_v13 = vsub.f32 %v6094_v58, %v6094_v58 }
 0x1ca   :  { %19177 = vmatprep.mubr.f32.mxu1 %v20060_v51  ;;  %19185 = vmatprep.subr.mxu0 %v22076_v9  ;;  %v2331_v18 = vadd.f32 %v21911_v3, %v2226_v56  ;;  %v3064_v51 = vadd.f32 %v22168_v16, %v2959_v23  ;;  %v22295_v3 = vsel %vm6041_vm3, 1.0, %v26505_v30  ;;  %v22305_v16 = vadd.s32 24, %v22215_v17 }
 0x1cb   :  { %19201 = vmatprep.subr.mxu1 %v21994_v47  ;;  %19178 = vmatmul.mubr.f32.vlgmr.msra.gmra.mxu1 %v20126_v41  ;;  %v22279_v36 = vpop.f32.mrf.mxu0  ;;  %v22281_v54 = vpop.f32.mrf.mxu1  ;;  %v2219_v2 = vadd.f32 %v26671_v38, %v2084_v5  ;;  %v22292_v41 = vsub.f32 %v3071_v46, %v22260_v22  ;;  %26672 = vst [vmem:[#allocation72_spill] sm:$0xff] %v22295_v3  ;;  %26674 = vst [vmem:[#allocation105_spill] sm:$0xff] %v22311_v13 }
 0x1cc   :  { %26670 = vst [vmem:[#allocation68_spill] sm:$0xff] %v22279_v36  ;;  %19186 = vmatpush3.msra.mxu0 %v22076_v9  ;;  %19202 = vmatpush3.msra.mxu1 %v21994_v47  ;;  %26673 = vst [vmem:[#allocation104_spill] sm:$0xff] %v22305_v16  ;;  %v22307_v46 = vand.u32 4294901760, %v2331_v18  ;;  %vm6043_vm5 = vcmp.eq.s32.totalorder %v22305_v16, %v22218_v8 }
 0x1cd   :  { %19187 = vmatprep.subr.mxu0 %v22098_v37  ;;  %19203 = vmatprep.subr.mxu1 %v22012_v53  ;;  %v22297_v21 = vpop.f32.mrf.mxu1  ;;  %v2324_v47 = vadd.f32 %v21902_v45, %v2219_v2  ;;  %v22317_v45 = vand.u32 4294901760, %v3064_v51  ;;  %v26283_v56 = vand.u32 4294901760, %v22292_v41  ;;  %v22366_v2 = vsel %vm6043_vm5, 1.0, %v26505_v30 }
 0x1ce   :  { %19188 = vmatpush3.msra.mxu0 %v22098_v37  ;;  %19204 = vmatpush3.msra.mxu1 %v22012_v53  ;;  %v3205_v9 = vpop.f32.mrf.mxu0  ;;  %v6097_v53 = vsel %vm6092_vm2, %v22295_v3, 0  ;;  %v22322_v37 = vsel %vm6042_vm4, 1.0, %v26505_v30  ;;  %26680 = vst [vmem:[#allocation111_spill] sm:$0xff] %v22366_v2 }
 0x1cf   :  { %19189 = vmatprep.subr.mxu0 %v22114_v35  ;;  %19205 = vmatprep.subr.mxu1 %v22033_v31  ;;  %v22313_v49 = vpop.f32.mrf.mxu1  ;;  %26675 = vst [vmem:[#allocation106_spill] sm:$0xff] %v22322_v37  ;;  %v22329_v15 = vand.u32 4294901760, %v2324_v47  ;;  %v6100_v5 = vsel %vm6092_vm2, %v22322_v37, 0 }
 0x1d0   :  { %19162 = vmatprep.mubr.f32.mxu0 %v20138_v52  ;;  %19190 = vmatpush3.msra.mxu0 %v22114_v35  ;;  %v22324_v6 = vpop.f32.mrf.mxu0  ;;  %v22336_v52 = vadd.s32 32, %v22215_v17  ;;  %v22339_v35 = vsub.f32 %v2331_v18, %v22307_v46  ;;  %v22355_v18 = vsub.f32 %v3064_v51, %v22317_v45  ;;  %v26710_v17 = vld [vmem:[#allocation84_spill] sm:$0xff] }
 0x1d1   :  { %26676 = vst [vmem:[#allocation107_spill] sm:$0xff] %v22324_v6  ;;  %19206 = vmatpush3.msra.mxu1 %v22033_v31  ;;  %19163 = vmatmul.mubr.f32.gmra.mxu0 %v20156_v63  ;;  %v22344_v63 = vand.u32 4294901760, %v22311_v13  ;;  %v22346_v31 = vsub.f32 %v6097_v53, %v6097_v53 }
 0x1d2   :  { %19191 = vmatprep.subr.mxu0 %v22129_v12  ;;  %19207 = vmatprep.subr.mxu1 %v22060_v24  ;;  %26677 = vst [vmem:[#allocation108_spill] sm:$0xff] %v22336_v52  ;;  %vm6044_vm6 = vcmp.eq.s32.totalorder %v22336_v52, %v22218_v8 }
 0x1d3   :  { %19180 = vmatprep.mubr.f32.mxu1 %v20150_v59  ;;  %19192 = vmatpush3.msra.mxu0 %v22129_v12  ;;  %26678 = vst [vmem:[#allocation109_spill] sm:$0xff] %v22344_v63  ;;  %26679 = vst [vmem:[#allocation110_spill] sm:$0xff] %v22346_v31  ;;  %v3351_v23 = vpop.f32.mrf.mxu1  ;;  %v22350_v38 = vpop.f32.mrf.mxu0  ;;  %v6263_v12 = vsub.f32 %v22292_v41, %v26283_v56  ;;  %v6180_v53 = vsub.f32 %v22311_v13, %v22344_v63 }
 0x1d4   :  { %19208 = vmatpush3.msra.mxu1 %v22060_v24  ;;  %19193 = vmatprep.subr.mxu0 %v22137_v28  ;;  %v3352_v59 = vadd.f32 %v3351_v23, %v3194_v62  ;;  %v22373_v62 = vsub.f32 %v2324_v47, %v22329_v15  ;;  %v22387_v47 = vand.u32 4294901760, %v22346_v31  ;;  %v6103_v23 = vsel %vm6092_vm2, %v22366_v2, 0 }
 0x1d5   :  { %19181 = vmatmul.mubr.f32.gmra.mxu1 %v20163_v14  ;;  %19209 = vmatprep.subr.mxu1 %v22078_v39  ;;  %v22368_v24 = vpop.f32.mrf.mxu1  ;;  %v22370_v58 = vpop.f32.mrf.mxu0  ;;  %v22377_v14 = vsub.f32 %v6100_v5, %v6100_v5  ;;  %v6264_v56 = vand.u32 4294901760, %v6263_v12  ;;  %v22416_v8 = vand.u32 4294901760, %v6180_v53  ;;  %v26688_v12 = vand.u32 4294901760, %v22339_v35 }
 0x1d6   :  { %26681 = vst [vmem:[#allocation112_spill] sm:$0xff] %v22368_v24  ;;  %19194 = vmatpush3.msra.mxu0 %v22137_v28  ;;  %19195 = vmatprep.mubr.f32.mxu0 %v20022_v34  ;;  %26683 = vst [vmem:[#allocation114_spill] sm:$0xff] %v22387_v47  ;;  %v22402_v24 = vsel %vm6044_vm6, 1.0, %v26505_v30 }
 0x1d7   :  { %26682 = vst [vmem:[#allocation113_spill] sm:$0xff] %v22377_v14  ;;  %19210 = vmatpush3.msra.mxu1 %v22078_v39  ;;  %19196 = vmatmul.mubr.f32.vlgmr.msra.gmra.mxu0 %v20087_v1  ;;  %v22389_v28 = vpop.f32.mrf.mxu0  ;;  %26684 = vst [vmem:[#allocation115_spill] sm:$0xff] %v22402_v24 }
 0x1d8   :  { %19211 = vmatprep.subr.mxu1 %v22089_v26  ;;  %19213 = vmatprep.mubr.f32.mxu1 %v20022_v34  ;;  %v3358_v39 = vpop.f32.mrf.mxu1  ;;  %26687 = vst [vmem:[#allocation118_spill] sm:$0xff] %v22416_v8  ;;  %v26690_v34 = vand.u32 4294901760, %v22355_v18 }
 0x1d9   :  { %19212 = vmatpush3.msra.mxu1 %v22089_v26  ;;  %19198 = vmatprep.mubr.f32.mxu0 %v20122_v40  ;;  %v3359_v51 = vadd.f32 %v3358_v39, %v3205_v9  ;;  %v22404_v36 = vpop.f32.mrf.mxu0  ;;  %v22410_v26 = vand.u32 4294901760, %v22377_v14  ;;  %v6191_v9 = vsub.f32 %v22346_v31, %v22387_v47  ;;  %v22423_v39 = vsub.f32 %v6103_v23, %v6103_v23 }
 0x1da   :  { %19214 = vmatmul.mubr.f32.vlgmr.msra.gmra.mxu1 %v20087_v1  ;;  %6137 = vmatprep.subr.mxu0 %v22260_v22  ;;  %v22412_v5 = vpop.f32.mrf.mxu1  ;;  %v6269_v1 = vsub.f32 %v22339_v35, %v26688_v12  ;;  %v26691_v23 = vand.u32 4294901760, %v22373_v62 }
 0x1db   :  { %26685 = vst [vmem:[#allocation116_spill] sm:$0xff] %v22410_v26  ;;  %26686 = vst [vmem:[#allocation117_spill] sm:$0xff] %v22412_v5  ;;  %19199 = vmatmul.mubr.f32.gmra.mxu0 %v20146_v55  ;;  %19216 = vmatprep.mubr.f32.mxu1 %v20122_v40  ;;  %v6275_v5 = vsub.f32 %v22355_v18, %v26690_v34  ;;  %v6106_v40 = vsel %vm6092_vm2, %v22402_v24, 0  ;;  %v6202_v34 = vsub.f32 %v22377_v14, %v22410_v26 }
 0x1dc   :  { %26689 = vst [vmem:[#allocation119_spill] sm:$0xff] %v22423_v39  ;;  %6139 = vmatpush1.msra.mxu0 %v22307_v46  ;;  %6176 = vmatprep.mubr.f32.mxu0 %v26505_v30  ;;  %v6281_v12 = vsub.f32 %v22373_v62, %v26691_v23  ;;  %v6270_v4 = vand.u32 4294901760, %v6269_v1  ;;  %v22447_v25 = vand.u32 4294901760, %v22423_v39 }
 0x1dd   :  { %6141 = vmatprep.subr.mxu0 %v22317_v45  ;;  %6265 = vmatprep.subr.mxu1 %v6264_v56  ;;  %v3471_v53 = vpop.f32.mrf.mxu0  ;;  %v22433_v6 = vpop.f32.mrf.mxu1  ;;  %v22444_v56 = vand.u32 4294901760, %v6191_v9  ;;  %v22462_v23 = vand.u32 4294901760, %v6202_v34 }
 0x1de   :  { %19217 = vmatmul.mubr.f32.gmra.mxu1 %v20146_v55  ;;  %6143 = vmatpush1.msra.mxu0 %v22329_v15  ;;  %v3472_v33 = vadd.f32 %v3471_v53, %v3352_v59  ;;  %26693 = vst [vmem:[#allocation121_spill] sm:$0xff] %v22447_v25  ;;  %v22449_v55 = vsub.f32 %v6106_v40, %v6106_v40  ;;  %v6276_v59 = vand.u32 4294901760, %v6275_v5  ;;  %v6282_v1 = vand.u32 4294901760, %v6281_v12 }
 0x1df   :  { %6182 = vmatmul.mubr.f32.vlgmr.msra.gmra.mxu0 %v22416_v8  ;;  %6382 = vmatprep.subr.mxu0 %v22292_v41  ;;  %26692 = vst [vmem:[#allocation120_spill] sm:$0xff] %v22444_v56  ;;  %v22451_v61 = vpop.f32.mrf.mxu0  ;;  %v22453_v11 = vpop.f32.mrf.mxu1  ;;  %v26696_v40 = vand.u32 4294901760, %v22292_v41  ;;  %26697 = vst [vmem:[#allocation124_spill] sm:$0xff] %v22462_v23 }
 0x1e0   :  { %26694 = vst [vmem:[#allocation122_spill] sm:$0xff] %v22449_v55  ;;  %26695 = vst [vmem:[#allocation123_spill] sm:$0xff] %v22451_v61  ;;  %6385 = vmatpush1.msra.mxu0 %v22339_v35  ;;  %6187 = vmatprep.mubr.f32.mxu0 %v26505_v30  ;;  %v6213_v61 = vsub.f32 %v22423_v39, %v22447_v25  ;;  %v22467_v5 = vand.u32 4294901760, %v22449_v55 }
 0x1e1   :  { %6388 = vmatprep.subr.mxu0 %v22355_v18  ;;  %6271 = vmatpush1.msra.mxu1 %v6270_v4  ;;  %v3574_v9 = vpop.f32.mrf.mxu1 }
 0x1e2   :  { %6391 = vmatpush1.msra.mxu0 %v22373_v62  ;;  %6277 = vmatprep.subr.mxu1 %v6276_v59  ;;  %v3479_v53 = vpop.f32.mrf.mxu0  ;;  %26698 = vst [vmem:[#allocation125_spill] sm:$0xff] %v22467_v5  ;;  %v22480_v41 = vand.u32 4294901760, %v6213_v61  ;;  %v3345_v61 = vadd.f32 %v22297_v21, %v22225_v43 }
 0x1e3   :  { %6193 = vmatmul.mubr.f32.gmra.mxu0 %v22444_v56  ;;  %6610 = vmatprep.subr.mxu0 %v26696_v40  ;;  %v3480_v4 = vadd.f32 %v3479_v53, %v3359_v51  ;;  %v22469_v27 = vpop.f32.mrf.mxu1  ;;  %v6224_v51 = vsub.f32 %v22449_v55, %v22467_v5 }
 0x1e4   :  { %6198 = vmatprep.mubr.f32.mxu0 %v26505_v30  ;;  %6283 = vmatpush1.msra.mxu1 %v6282_v1  ;;  %v22472_v12 = vpop.f32.mrf.mxu0  ;;  %26700 = vst [vmem:[#allocation127_spill] sm:$0xff] %v22480_v41  ;;  %v3464_v43 = vadd.f32 %v22389_v28, %v3345_v61 }
 0x1e5   :  { %26699 = vst [vmem:[#allocation126_spill] sm:$0xff] %v22472_v12  ;;  %6316 = vmatprep.mubr.f32.mxu1 %v26505_v30  ;;  %6494 = vmatprep.subr.mxu1 %v22260_v22 }
 0x1e6   :  { %18504 = vmatmul.mubr.msk.f32.vlgmr.msra.gmra.mxu1 %vm6092_vm2, %v22263_v42 }
 0x1e7   :  { %6204 = vmatmul.mubr.f32.gmra.mxu0 %v22462_v23  ;;  %6496 = vmatpush1.msra.mxu1 %v22307_v46  ;;  %v3583_v34 = vpop.f32.mrf.mxu1  ;;  %v3700_v59 = vpop.f32.mrf.mxu0 }
 0x1e8   :  { %6498 = vmatprep.subr.mxu1 %v22317_v45  ;;  %6209 = vmatprep.mubr.f32.mxu0 %v26505_v30  ;;  %v3584_v1 = vadd.f32 %v3583_v34, %v3472_v33  ;;  %v22499_v33 = vand.u32 4294901760, %v6224_v51 }
 0x1e9   :  { %6323 = vmatprep.mubr.f32.mxu1 %v26505_v30  ;;  %6500 = vmatpush1.msra.mxu1 %v22329_v15  ;;  %v22488_v53 = vpop.f32.mrf.mxu1  ;;  %v22490_v40 = vpop.f32.mrf.mxu0 }
 0x1ea   :  { %26701 = vst [vmem:[#allocation128_spill] sm:$0xff] %v22488_v53  ;;  %18505 = vmatmul.mubr.msk.f32.gmra.mxu1 %vm6092_vm2, %v22295_v3  ;;  %6720 = vmatprep.subr.mxu1 %v22260_v22  ;;  %26702 = vst [vmem:[#allocation129_spill] sm:$0xff] %v22499_v33 }
 0x1eb   :  { %6215 = vmatmul.mubr.f32.gmra.mxu0 %v22480_v41  ;;  %6330 = vmatprep.mubr.f32.mxu1 %v26505_v30  ;;  %v3707_v34 = vpop.f32.mrf.mxu0 }
 0x1ec   :  { %6220 = vmatprep.mubr.f32.mxu0 %v26505_v30  ;;  %v3592_v53 = vpop.f32.mrf.mxu1 }
 0x1ed   :  { %v3593_v12 = vadd.f32 %v3592_v53, %v3480_v4  ;;  %v22502_v0 = vpop.f32.mrf.mxu0  ;;  %v3338_v4 = vadd.f32 %v22265_v50, %v22200_v29  ;;  %v3575_v53 = vadd.f32 %v3574_v9, %v3464_v43  ;;  %v26707_v29 = vand.u32 4294901760, %v22339_v35 }
 0x1ee   :  { %18506 = vmatmul.mubr.msk.f32.gmra.mxu1 %vm6092_vm2, %v22322_v37  ;;  %v22506_v22 = vpop.f32.mrf.mxu1  ;;  %v26708_v9 = vand.u32 4294901760, %v22355_v18  ;;  %v26713_v18 = vld [vmem:[#allocation88_spill] sm:$0xff] }
 0x1ef   :  { %26703 = vst [vmem:[#allocation130_spill] sm:$0xff] %v22506_v22  ;;  %6226 = vmatmul.mubr.f32.gmra.mxu0 %v22499_v33  ;;  %6337 = vmatprep.mubr.f32.mxu1 %v26505_v30  ;;  %v3714_v21 = vpop.f32.mrf.mxu0  ;;  %v2605_v22 = vadd.f32 %v26705_v7, %v21947_v20  ;;  %v3456_v7 = vadd.f32 %v22350_v38, %v3338_v4 }
 0x1f0   :  { %6424 = vmatprep.mubr.f32.mxu0 %v26505_v30  ;;  %v3715_v51 = vadd.f32 %v3714_v21, %v3584_v1  ;;  %v3805_v52 = vpop.f32.mrf.mxu1  ;;  %v3708_v1 = vadd.f32 %v3707_v34, %v3575_v53  ;;  %v26706_v21 = vld [vmem:[#allocation89_spill] sm:$0xff] }
 0x1f1   :  { %v22514_v16 = vpop.f32.mrf.mxu0  ;;  %v2724_v10 = vadd.f32 %v26706_v21, %v2605_v22  ;;  %v26711_v34 = vld [vmem:[#allocation93_spill] sm:$0xff]  ;;  %v26712_v22 = vand.u32 4294901760, %v22373_v62 }
 0x1f2   :  { %26704 = vst [vmem:[#allocation131_spill] sm:$0xff] %v22514_v16  ;;  %18507 = vmatmul.mubr.msk.f32.gmra.mxu1 %vm6092_vm2, %v22366_v2  ;;  %v22520_v28 = vpop.f32.mrf.mxu1  ;;  %v26709_v16 = vld [vmem:[#allocation80_spill] sm:$0xff] }
 0x1f3   :  { %6427 = vmatmul.mubr.f32.vlgmr.msra.gmra.mxu0 %v22311_v13  ;;  %6344 = vmatprep.mubr.f32.mxu1 %v26505_v30  ;;  %v3721_v61 = vpop.f32.mrf.mxu0  ;;  %v2598_v57 = vadd.f32 %v26710_v17, %v26709_v16  ;;  %v2835_v53 = vadd.f32 %v26711_v34, %v2724_v10 }
 0x1f4   :  { %6614 = vmatpush1.msra.mxu0 %v26707_v29  ;;  %6432 = vmatprep.mubr.f32.mxu0 %v26505_v30  ;;  %v3722_v50 = vadd.f32 %v3721_v61, %v3593_v12  ;;  %v3812_v20 = vpop.f32.mrf.mxu1  ;;  %v3566_v12 = vadd.f32 %v22433_v6, %v3456_v7  ;;  %v26714_v6 = vld [vmem:[#allocation92_spill] sm:$0xff] }
 0x1f5   :  { %6618 = vmatprep.subr.mxu0 %v26708_v9  ;;  %v3813_v43 = vadd.f32 %v3812_v20, %v3708_v1  ;;  %v2716_v17 = vadd.f32 %v26713_v18, %v2598_v57  ;;  %v2968_v10 = vadd.f32 %v22160_v60, %v2835_v53  ;;  %v22555_v21 = vpop.f32.mrf.mxu0  ;;  %v26718_v20 = vld [vmem:[#allocation96_spill] sm:$0xff] }
 0x1f6   :  { %6622 = vmatpush1.msra.mxu0 %v26712_v22  ;;  %18508 = vmatmul.mubr.msk.f32.gmra.mxu1 %vm6092_vm2, %v22402_v24  ;;  %v22538_v35 = vpop.f32.mrf.mxu1  ;;  %v3701_v16 = vadd.f32 %v3700_v59, %v3566_v12  ;;  %26715 = vst [vmem:[#allocation85_spill] sm:$0xff] %v22555_v21 }
 0x1f7   :  { %6435 = vmatmul.mubr.f32.gmra.mxu0 %v22346_v31  ;;  %6533 = vmatprep.mubr.f32.mxu1 %v26505_v30  ;;  %v22543_v38 = vand.u32 4294901760, %v3813_v43  ;;  %v2826_v1 = vadd.f32 %v26714_v6, %v2716_v17  ;;  %v3073_v61 = vadd.f32 %v22183_v32, %v2968_v10 }
 0x1f8   :  { %6440 = vmatprep.mubr.f32.mxu0 %v26505_v30  ;;  %v3806_v60 = vadd.f32 %v3805_v52, %v3701_v16 }
 0x1f9   :  { %v22549_v62 = vsub.f32 %v3813_v43, %v22543_v38  ;;  %v3819_v4 = vpop.f32.mrf.mxu1  ;;  %6824 = vmatprep.subr.mxu0 %v22543_v38  ;;  %v2961_v7 = vadd.f32 %v26718_v20, %v2826_v1  ;;  %v22573_v52 = vand.u32 4294901760, %v3073_v61 }
 0x1fa   :  { %6537 = vmatmul.mubr.f32.vlgmr.msra.gmra.mxu1 %v22344_v63  ;;  %v22557_v57 = vadd.f32 %v3819_v4, %v3715_v51 }
 0x1fb   :  { %6443 = vmatmul.mubr.f32.gmra.mxu0 %v22377_v14  ;;  %6722 = vmatpush1.msra.mxu1 %v22307_v46  ;;  %v22561_v59 = vpop.f32.mrf.mxu1  ;;  %v26299_v29 = vand.u32 4294901760, %v22549_v62  ;;  %v3066_v46 = vadd.f32 %v22174_v48, %v2961_v7  ;;  %v22590_v22 = vsub.f32 %v3073_v61, %v22573_v52 }
 0x1fc   :  { %26716 = vst [vmem:[#allocation89_spill] sm:$0xff] %v22557_v57  ;;  %26717 = vst [vmem:[#allocation80_spill] sm:$0xff] %v22561_v59  ;;  %6724 = vmatprep.subr.mxu1 %v22317_v45  ;;  %6448 = vmatprep.mubr.f32.mxu0 %v26505_v30  ;;  %v22577_v45 = vand.u32 4294901760, %v3806_v60 }
 0x1fd   :  { %6726 = vmatpush1.msra.mxu1 %v22329_v15  ;;  %6542 = vmatprep.mubr.f32.mxu1 %v26505_v30  ;;  %v6950_v32 = vsub.f32 %v22549_v62, %v26299_v29  ;;  %v22587_v53 = vand.u32 4294901760, %v3066_v46  ;;  %v26298_v6 = vand.u32 4294901760, %v22590_v22 }
 0x1fe   :  { %6546 = vmatmul.mubr.f32.gmra.mxu1 %v22387_v47  ;;  %v3826_v51 = vpop.f32.mrf.mxu1  ;;  %v3914_v9 = vpop.f32.mrf.mxu0  ;;  %v22594_v18 = vsub.f32 %v3806_v60, %v22577_v45 }
 0x1ff   :  { %6451 = vmatmul.mubr.f32.gmra.mxu0 %v22423_v39  ;;  %6551 = vmatprep.mubr.f32.mxu1 %v26505_v30  ;;  %v22580_v15 = vadd.f32 %v3826_v51, %v3722_v50  ;;  %v6951_v43 = vand.u32 4294901760, %v6950_v32  ;;  %v22604_v4 = vsub.f32 %v3066_v46, %v22587_v53  ;;  %v6956_v51 = vsub.f32 %v22590_v22, %v26298_v6 }
 0x200   :  { %6456 = vmatprep.mubr.f32.mxu0 %v26505_v30  ;;  %v22583_v34 = vpop.f32.mrf.mxu1  ;;  %v22585_v48 = vpop.f32.mrf.mxu0  ;;  %v26300_v61 = vand.u32 4294901760, %v22594_v18 }
 0x201   :  { %26719 = vst [vmem:[#allocation84_spill] sm:$0xff] %v22580_v15  ;;  %26720 = vst [vmem:[#allocation93_spill] sm:$0xff] %v22583_v34  ;;  %6952 = vmatprep.subr.mxu1 %v6951_v43  ;;  %v26301_v46 = vand.u32 4294901760, %v22604_v4 }
 0x202   :  { %6555 = vmatmul.mubr.f32.gmra.mxu1 %v22410_v26  ;;  %v3925_v12 = vpop.f32.mrf.mxu0 }
 0x203   :  { %6459 = vmatmul.mubr.f32.gmra.mxu0 %v22449_v55  ;;  %6560 = vmatprep.mubr.f32.mxu1 %v26505_v30  ;;  %v4079_v50 = vpop.f32.mrf.mxu1  ;;  %v6968_v6 = vsub.f32 %v22604_v4, %v26301_v46 }
 0x204   :  { %6655 = vmatprep.mubr.f32.mxu0 %v26505_v30  ;;  %v4080_v17 = vadd.f32 %v4079_v50, %v3914_v9  ;;  %v22599_v10 = vpop.f32.mrf.mxu0  ;;  %v6962_v9 = vsub.f32 %v22594_v18, %v26300_v61 }
 0x205   :  { %v22601_v16 = vpop.f32.mrf.mxu1 }
 0x206   :  { %6564 = vmatmul.mubr.f32.gmra.mxu1 %v22447_v25  ;;  %v3936_v1 = vpop.f32.mrf.mxu0  ;;  %v6963_v61 = vand.u32 4294901760, %v6962_v9 }
 0x207   :  { %18509 = vmatmul.mubr.msk.f32.vlgmr.msra.gmra.mxu0 %vm6092_vm2, %v22263_v42  ;;  %6569 = vmatprep.mubr.f32.mxu1 %v26505_v30  ;;  %v4086_v60 = vpop.f32.mrf.mxu1 }
 0x208   :  { %6662 = vmatprep.mubr.f32.mxu0 %v26505_v30  ;;  %6826 = vmatpush1.msra.mxu0 %v22573_v52  ;;  %v4087_v20 = vadd.f32 %v4086_v60, %v3925_v12  ;;  %v22614_v7 = vpop.f32.mrf.mxu0  ;;  %v6957_v60 = vand.u32 4294901760, %v6956_v51 }
 0x209   :  { %6828 = vmatprep.subr.mxu0 %v22577_v45  ;;  %v22617_v32 = vpop.f32.mrf.mxu1 }
 0x20a   :  { %6573 = vmatmul.mubr.f32.gmra.mxu1 %v22467_v5  ;;  %6830 = vmatpush1.msra.mxu0 %v22587_v53 }
 0x20b   :  { %18510 = vmatmul.mubr.msk.f32.gmra.mxu0 %vm6092_vm2, %v22295_v3  ;;  %6759 = vmatprep.mubr.f32.mxu1 %v26505_v30 }
 0x20c   :  { %6669 = vmatprep.mubr.f32.mxu0 %v26505_v30  ;;  %7069 = vmatprep.subr.mxu0 %v22549_v62  ;;  %v3947_v43 = vpop.f32.mrf.mxu0  ;;  %v4093_v12 = vpop.f32.mrf.mxu1 }
 0x20d   :  { %v4094_v50 = vadd.f32 %v4093_v12, %v3936_v1  ;;  %v6969_v1 = vand.u32 4294901760, %v6968_v6 }
 0x20e   :  { %18514 = vmatmul.mubr.msk.f32.vlgmr.msra.gmra.mxu1 %vm6092_vm2, %v22263_v42  ;;  %v22638_v29 = vpop.f32.mrf.mxu0  ;;  %v22640_v59 = vpop.f32.mrf.mxu1 }
 0x20f   :  { %18511 = vmatmul.mubr.msk.f32.gmra.mxu0 %vm6092_vm2, %v22322_v37  ;;  %6766 = vmatprep.mubr.f32.mxu1 %v26505_v30 }
 0x210   :  { %6676 = vmatprep.mubr.f32.mxu0 %v26505_v30  ;;  %6958 = vmatpush1.msra.mxu1 %v6957_v60 }
 0x211   :  { %6964 = vmatprep.subr.mxu1 %v6963_v61 }
 0x212   :  { %18515 = vmatmul.mubr.msk.f32.gmra.mxu1 %vm6092_vm2, %v22295_v3  ;;  %v4100_v51 = vpop.f32.mrf.mxu1  ;;  %v4197_v12 = vpop.f32.mrf.mxu0 }
 0x213   :  { %18512 = vmatmul.mubr.msk.f32.gmra.mxu0 %vm6092_vm2, %v22366_v2  ;;  %6773 = vmatprep.mubr.f32.mxu1 %v26505_v30  ;;  %v4101_v46 = vadd.f32 %v4100_v51, %v3947_v43  ;;  %v4198_v34 = vadd.f32 %v4197_v12, %v4080_v17 }
 0x214   :  { %6683 = vmatprep.mubr.f32.mxu0 %v26505_v30  ;;  %6970 = vmatpush1.msra.mxu1 %v6969_v1  ;;  %v22652_v9 = vpop.f32.mrf.mxu1  ;;  %v4199_v60 = vpop.f32.mrf.mxu0 }
 0x215   :  { %7181 = vmatprep.subr.mxu1 %v22543_v38 }
 0x216   :  { %18516 = vmatmul.mubr.msk.f32.gmra.mxu1 %vm6092_vm2, %v22322_v37  ;;  %v4205_v6 = vpop.f32.mrf.mxu0 }
 0x217   :  { %18513 = vmatmul.mubr.msk.f32.gmra.mxu0 %vm6092_vm2, %v22402_v24  ;;  %6780 = vmatprep.mubr.f32.mxu1 %v26505_v30  ;;  %v4206_v61 = vadd.f32 %v4205_v6, %v4087_v20  ;;  %v4307_v43 = vpop.f32.mrf.mxu1 }
 0x218   :  { %6863 = vmatprep.mubr.f32.mxu0 %v26505_v30  ;;  %v4308_v17 = vadd.f32 %v4307_v43, %v4198_v34  ;;  %v4207_v1 = vpop.f32.mrf.mxu0  ;;  %v26721_v43 = vand.u32 4294901760, %v22549_v62  ;;  %v4089_v62 = vadd.f32 %v22617_v32, %v22599_v10 }
 0x219   :  { %v4309_v51 = vpop.f32.mrf.mxu1 }
 0x21a   :  { %18517 = vmatmul.mubr.msk.f32.gmra.mxu1 %vm6092_vm2, %v22366_v2  ;;  %v4213_v12 = vpop.f32.mrf.mxu0 }
 0x21b   :  { %6869 = vmatmul.mubr.f32.vlgmr.msra.gmra.mxu0 %v22416_v8  ;;  %6787 = vmatprep.mubr.f32.mxu1 %v26505_v30  ;;  %v4214_v21 = vadd.f32 %v4213_v12, %v4094_v50  ;;  %v4316_v57 = vpop.f32.mrf.mxu1  ;;  %v4082_v50 = vadd.f32 %v22601_v16, %v22585_v48 }
 0x21c   :  { %7072 = vmatpush1.msra.mxu0 %v22590_v22  ;;  %6874 = vmatprep.mubr.f32.mxu0 %v26505_v30  ;;  %v4317_v20 = vadd.f32 %v4316_v57, %v4206_v61  ;;  %v4215_v6 = vpop.f32.mrf.mxu0 }
 0x21d   :  { %7075 = vmatprep.subr.mxu0 %v22594_v18  ;;  %v4318_v34 = vpop.f32.mrf.mxu1  ;;  %v4200_v48 = vadd.f32 %v4199_v60, %v4082_v50 }
 0x21e   :  { %7078 = vmatpush1.msra.mxu0 %v22604_v4  ;;  %18518 = vmatmul.mubr.msk.f32.gmra.mxu1 %vm6092_vm2, %v22402_v24 }
 0x21f   :  { %7297 = vmatprep.subr.mxu0 %v26721_v43  ;;  %6880 = vmatmul.mubr.f32.gmra.mxu0 %v22444_v56  ;;  %v4310_v60 = vadd.f32 %v4309_v51, %v4200_v48  ;;  %v3340_v51 = vadd.f32 %v22281_v54, %v22211_v19 }
 0x220   :  { %6885 = vmatprep.mubr.f32.mxu0 %v26505_v30  ;;  %7003 = vmatprep.mubr.f32.mxu1 %v26505_v30  ;;  %v4221_v57 = vpop.f32.mrf.mxu0  ;;  %v4325_v61 = vpop.f32.mrf.mxu1 }
 0x221   :  { %v4222_v12 = vadd.f32 %v4221_v57, %v4101_v46  ;;  %v4326_v15 = vadd.f32 %v4325_v61, %v4214_v21  ;;  %v4208_v46 = vadd.f32 %v4207_v1, %v4089_v62  ;;  %v3347_v61 = vadd.f32 %v22313_v49, %v22236_v44 }
 0x222   :  { %18519 = vmatmul.mubr.msk.f32.vlgmr.msra.gmra.mxu1 %vm6092_vm2, %v22263_v42  ;;  %v4223_v8 = vpop.f32.mrf.mxu0  ;;  %v4327_v5 = vpop.f32.mrf.mxu1 }
 0x223   :  { %6891 = vmatmul.mubr.f32.gmra.mxu0 %v22462_v23  ;;  %7183 = vmatpush1.msra.mxu1 %v22573_v52 }
 0x224   :  { %7185 = vmatprep.subr.mxu1 %v22577_v45  ;;  %6896 = vmatprep.mubr.f32.mxu0 %v26505_v30 }
 0x225   :  { %7187 = vmatpush1.msra.mxu1 %v22587_v53  ;;  %7010 = vmatprep.mubr.f32.mxu1 %v26505_v30 }
 0x226   :  { %7407 = vmatprep.subr.mxu1 %v22543_v38  ;;  %18520 = vmatmul.mubr.msk.f32.gmra.mxu1 %vm6092_vm2, %v22295_v3  ;;  %v4334_v21 = vpop.f32.mrf.mxu1  ;;  %v4442_v16 = vpop.f32.mrf.mxu0  ;;  %v4096_v38 = vadd.f32 %v22640_v59, %v22614_v7  ;;  %v4319_v59 = vadd.f32 %v4318_v34, %v4208_v46  ;;  %v3458_v34 = vadd.f32 %v22370_v58, %v3340_v51  ;;  %v26724_v58 = vand.u32 4294901760, %v22604_v4 }
 0x227   :  { %6902 = vmatmul.mubr.f32.gmra.mxu0 %v22480_v41  ;;  %7017 = vmatprep.mubr.f32.mxu1 %v26505_v30  ;;  %v4335_v10 = vadd.f32 %v4334_v21, %v4222_v12  ;;  %v4443_v32 = vadd.f32 %v4442_v16, %v4308_v17  ;;  %v4103_v12 = vadd.f32 %v22652_v9, %v22638_v29 }
 0x228   :  { %6907 = vmatprep.mubr.f32.mxu0 %v26505_v30  ;;  %v4336_v43 = vpop.f32.mrf.mxu1  ;;  %v4444_v50 = vpop.f32.mrf.mxu0  ;;  %v4216_v44 = vadd.f32 %v4215_v6, %v4096_v38  ;;  %v26722_v6 = vand.u32 4294901760, %v22590_v22 }
 0x229   :  { %v4445_v7 = vadd.f32 %v4444_v50, %v4310_v60  ;;  %v4224_v21 = vadd.f32 %v4223_v8, %v4103_v12  ;;  %v26723_v60 = vand.u32 4294901760, %v22594_v18 }
 0x22a   :  { %18521 = vmatmul.mubr.msk.f32.gmra.mxu1 %vm6092_vm2, %v22322_v37  ;;  %v4449_v57 = vpop.f32.mrf.mxu0  ;;  %v4328_v8 = vadd.f32 %v4327_v5, %v4216_v44 }
 0x22b   :  { %6913 = vmatmul.mubr.f32.gmra.mxu0 %v22499_v33  ;;  %7024 = vmatprep.mubr.f32.mxu1 %v26505_v30  ;;  %v4450_v17 = vadd.f32 %v4449_v57, %v4317_v20  ;;  %v4547_v1 = vpop.f32.mrf.mxu1  ;;  %v3466_v20 = vadd.f32 %v22404_v36, %v3347_v61  ;;  %v4337_v57 = vadd.f32 %v4336_v43, %v4224_v21 }
 0x22c   :  { %7111 = vmatprep.mubr.f32.mxu0 %v26505_v30  ;;  %v22707_v62 = vadd.f32 %v4547_v1, %v4443_v32  ;;  %v4451_v48 = vpop.f32.mrf.mxu0 }
 0x22d   :  { %v4549_v49 = vpop.f32.mrf.mxu1  ;;  %v4452_v16 = vadd.f32 %v4451_v48, %v4319_v59  ;;  %v3577_v36 = vadd.f32 %v22469_v27, %v3466_v20 }
 0x22e   :  { %18522 = vmatmul.mubr.msk.f32.gmra.mxu1 %vm6092_vm2, %v22366_v2  ;;  %v22711_v29 = vadd.f32 %v4549_v49, %v4445_v7  ;;  %v4456_v9 = vpop.f32.mrf.mxu0 }
 0x22f   :  { %7114 = vmatmul.mubr.f32.vlgmr.msra.gmra.mxu0 %v22311_v13  ;;  %7031 = vmatprep.mubr.f32.mxu1 %v26505_v30  ;;  %v4457_v19 = vadd.f32 %v4456_v9, %v4326_v15  ;;  %v4554_v54 = vpop.f32.mrf.mxu1  ;;  %v3568_v15 = vadd.f32 %v22453_v11, %v3458_v34  ;;  %v3710_v38 = vadd.f32 %v22502_v0, %v3577_v36 }
 0x230   :  { %7301 = vmatpush1.msra.mxu0 %v26722_v6  ;;  %7119 = vmatprep.mubr.f32.mxu0 %v26505_v30  ;;  %v22720_v32 = vadd.f32 %v4554_v54, %v4450_v17  ;;  %v4458_v46 = vpop.f32.mrf.mxu0 }
 0x231   :  { %7305 = vmatprep.subr.mxu0 %v26723_v60  ;;  %v4556_v50 = vpop.f32.mrf.mxu1  ;;  %v3703_v27 = vadd.f32 %v22490_v40, %v3568_v15  ;;  %v3815_v18 = vadd.f32 %v22538_v35, %v3710_v38  ;;  %v4459_v4 = vadd.f32 %v4458_v46, %v4328_v8 }
 0x232   :  { %7309 = vmatpush1.msra.mxu0 %v26724_v58  ;;  %18523 = vmatmul.mubr.msk.f32.gmra.mxu1 %vm6092_vm2, %v22402_v24  ;;  %v22730_v22 = vadd.f32 %v4556_v50, %v4452_v16  ;;  %v26729_v50 = vld [vmem:[#allocation125_spill] sm:$0xff] }
 0x233   :  { %7122 = vmatmul.mubr.f32.gmra.mxu0 %v22346_v31  ;;  %7220 = vmatprep.mubr.f32.mxu1 %v26505_v30  ;;  %v3808_v17 = vadd.f32 %v22520_v28, %v3703_v27  ;;  %v22749_v35 = vand.u32 4294901760, %v3815_v18 }
 0x234   :  { %7127 = vmatprep.mubr.f32.mxu0 %v26505_v30  ;;  %v4463_v11 = vpop.f32.mrf.mxu0  ;;  %v4561_v5 = vpop.f32.mrf.mxu1  ;;  %19219 = vmatprep.subr.mxu0 %v26505_v30 }
 0x235   :  { %v4464_v61 = vadd.f32 %v4463_v11, %v4335_v10  ;;  %v22739_v12 = vadd.f32 %v4561_v5, %v4457_v19  ;;  %v22763_v59 = vsub.f32 %v3815_v18, %v22749_v35 }
 0x236   :  { %7224 = vmatmul.mubr.f32.vlgmr.msra.gmra.mxu1 %v22344_v63  ;;  %v4465_v0 = vpop.f32.mrf.mxu0  ;;  %v4563_v43 = vpop.f32.mrf.mxu1 }
 0x237   :  { %26725 = vst [vmem:[#allocation88_spill] sm:$0xff] %v22739_v12  ;;  %7130 = vmatmul.mubr.f32.gmra.mxu0 %v22377_v14  ;;  %7409 = vmatpush1.msra.mxu1 %v22573_v52  ;;  %v4466_v40 = vadd.f32 %v4465_v0, %v4337_v57  ;;  %v22745_v1 = vadd.f32 %v4563_v43, %v4459_v4  ;;  %v22755_v52 = vand.u32 4294901760, %v3808_v17  ;;  %v7630_v21 = vand.u32 4294901760, %v22763_v59 }
 0x238   :  { %7411 = vmatprep.subr.mxu1 %v22577_v45  ;;  %7135 = vmatprep.mubr.f32.mxu0 %v26505_v30 }
 0x239   :  { %26726 = vst [vmem:[#allocation92_spill] sm:$0xff] %v22745_v1  ;;  %7413 = vmatpush1.msra.mxu1 %v22587_v53  ;;  %7229 = vmatprep.mubr.f32.mxu1 %v26505_v30  ;;  %v22769_v44 = vsub.f32 %v3808_v17, %v22755_v52  ;;  %v7631_v60 = vsub.f32 %v22763_v59, %v7630_v21 }
 0x23a   :  { %7233 = vmatmul.mubr.f32.gmra.mxu1 %v22387_v47  ;;  %v4568_v28 = vpop.f32.mrf.mxu1  ;;  %v4656_v10 = vpop.f32.mrf.mxu0  ;;  %19238 = vmatprep.subr.mxu1 %v26505_v30 }
 0x23b   :  { %7138 = vmatmul.mubr.f32.gmra.mxu0 %v22423_v39  ;;  %v22758_v51 = vadd.f32 %v4568_v28, %v4464_v61  ;;  %7238 = vmatprep.mubr.f32.mxu1 %v26505_v30  ;;  %v7637_v6 = vand.u32 4294901760, %v22769_v44  ;;  %v7632_v11 = vand.u32 4294901760, %v7631_v60  ;;  %v26730_v60 = vld [vmem:[#allocation118_spill] sm:$0xff] }
 0x23c   :  { %7143 = vmatprep.mubr.f32.mxu0 %v26505_v30  ;;  %v4570_v45 = vpop.f32.mrf.mxu1  ;;  %v4658_v53 = vpop.f32.mrf.mxu0 }
 0x23d   :  { %26727 = vst [vmem:[#allocation96_spill] sm:$0xff] %v22758_v51  ;;  %v22765_v7 = vadd.f32 %v4570_v45, %v4466_v40  ;;  %v7638_v58 = vsub.f32 %v22769_v44, %v7637_v6 }
 0x23e   :  { %7242 = vmatmul.mubr.f32.gmra.mxu1 %v22410_v26  ;;  %v4667_v48 = vpop.f32.mrf.mxu0 }
 0x23f   :  { %26728 = vst [vmem:[#allocation132_spill] sm:$0xff] %v22765_v7  ;;  %7146 = vmatmul.mubr.f32.gmra.mxu0 %v22449_v55  ;;  %v4821_v49 = vpop.f32.mrf.mxu1  ;;  %7247 = vmatprep.mubr.f32.mxu1 %v26505_v30  ;;  %v7639_v61 = vand.u32 4294901760, %v7638_v58  ;;  %v26731_v58 = vld [vmem:[#allocation4_spill] sm:$0xff] }
 0x240   :  { %v4822_v9 = vadd.f32 %v4821_v49, %v4656_v10  ;;  %7342 = vmatprep.mubr.f32.mxu0 %v26505_v30  ;;  %v4669_v20 = vpop.f32.mrf.mxu0 }
 0x241   :  { %v4823_v19 = vpop.f32.mrf.mxu1 }
 0x242   :  { %7251 = vmatmul.mubr.f32.gmra.mxu1 %v22447_v25  ;;  %v4824_v54 = vadd.f32 %v4823_v19, %v4658_v53  ;;  %v4678_v34 = vpop.f32.mrf.mxu0 }
 0x243   :  { %18524 = vmatmul.mubr.msk.f32.vlgmr.msra.gmra.mxu0 %vm6092_vm2, %v22263_v42  ;;  %v4828_v16 = vpop.f32.mrf.mxu1  ;;  %7256 = vmatprep.mubr.f32.mxu1 %v26505_v30 }
 0x244   :  { %19220 = vmatpush3.msra.mxu0 %v22749_v35  ;;  %v4829_v46 = vadd.f32 %v4828_v16, %v4667_v48  ;;  %7349 = vmatprep.mubr.f32.mxu0 %v26505_v30  ;;  %v4680_v36 = vpop.f32.mrf.mxu0 }
 0x245   :  { %19221 = vmatprep.subr.mxu0 %v26505_v30  ;;  %v4830_v8 = vpop.f32.mrf.mxu1 }
 0x246   :  { %19222 = vmatpush3.msra.mxu0 %v22755_v52  ;;  %7260 = vmatmul.mubr.f32.gmra.mxu1 %v26729_v50  ;;  %v4831_v15 = vadd.f32 %v4830_v8, %v4669_v20 }
 0x247   :  { %18525 = vmatmul.mubr.msk.f32.gmra.mxu0 %vm6092_vm2, %v22295_v3  ;;  %7446 = vmatprep.mubr.f32.mxu1 %v26505_v30 }
 0x248   :  { %v4689_v38 = vpop.f32.mrf.mxu0  ;;  %v4835_v57 = vpop.f32.mrf.mxu1  ;;  %7356 = vmatprep.mubr.f32.mxu0 %v26505_v30  ;;  %19257 = vmatprep.subr.mxu0 %v26505_v30 }
 0x249   :  { %v4836_v27 = vadd.f32 %v4835_v57, %v4678_v34 }
 0x24a   :  { %18529 = vmatmul.mubr.msk.f32.vlgmr.msra.gmra.mxu1 %vm6092_vm2, %v22263_v42  ;;  %v4691_v5 = vpop.f32.mrf.mxu0  ;;  %v4837_v18 = vpop.f32.mrf.mxu1 }
 0x24b   :  { %18526 = vmatmul.mubr.msk.f32.gmra.mxu0 %vm6092_vm2, %v22322_v37  ;;  %19239 = vmatpush3.msra.mxu1 %v7632_v11  ;;  %v4838_v4 = vadd.f32 %v4837_v18, %v4680_v36 }
 0x24c   :  { %19240 = vmatprep.subr.mxu1 %v26505_v30  ;;  %7363 = vmatprep.mubr.f32.mxu0 %v26505_v30 }
 0x24d   :  { %19241 = vmatpush3.msra.mxu1 %v7639_v61  ;;  %7453 = vmatprep.mubr.f32.mxu1 %v26505_v30 }
 0x24e   :  { %v4842_v0 = vpop.f32.mrf.mxu1  ;;  %v4939_v43 = vpop.f32.mrf.mxu0  ;;  %18530 = vmatmul.mubr.msk.f32.gmra.mxu1 %vm6092_vm2, %v22295_v3  ;;  %19276 = vmatprep.subr.mxu1 %v26505_v30 }
 0x24f   :  { %v4843_v17 = vadd.f32 %v4842_v0, %v4689_v38  ;;  %v4940_v40 = vadd.f32 %v4939_v43, %v4822_v9  ;;  %18527 = vmatmul.mubr.msk.f32.gmra.mxu0 %vm6092_vm2, %v22366_v2  ;;  %7460 = vmatprep.mubr.f32.mxu1 %v26505_v30  ;;  %v26732_v38 = vld [vmem:[#allocation7_spill] sm:$0xff] }
 0x250   :  { %v4844_v28 = vpop.f32.mrf.mxu1  ;;  %v4941_v10 = vpop.f32.mrf.mxu0  ;;  %7370 = vmatprep.mubr.f32.mxu0 %v26505_v30  ;;  %v379_v57 = vadd.f32 %v26732_v38, %v26731_v58  ;;  %v26734_v43 = vld [vmem:[#allocation15_spill] sm:$0xff] }
 0x251   :  { %v4845_v45 = vadd.f32 %v4844_v28, %v4691_v5  ;;  %v4942_v53 = vadd.f32 %v4941_v10, %v4824_v54 }
 0x252   :  { %v4947_v48 = vpop.f32.mrf.mxu0  ;;  %18531 = vmatmul.mubr.msk.f32.gmra.mxu1 %vm6092_vm2, %v22322_v37 }
 0x253   :  { %v4948_v49 = vadd.f32 %v4947_v48, %v4829_v46  ;;  %v5049_v20 = vpop.f32.mrf.mxu1  ;;  %18528 = vmatmul.mubr.msk.f32.gmra.mxu0 %vm6092_vm2, %v22402_v24  ;;  %7467 = vmatprep.mubr.f32.mxu1 %v26505_v30  ;;  %v26735_v48 = vld [vmem:[#allocation19_spill] sm:$0xff] }
 0x254   :  { %v5050_v9 = vadd.f32 %v5049_v20, %v4940_v40  ;;  %v4949_v19 = vpop.f32.mrf.mxu0  ;;  %19223 = vmatprep.mubr.msk.f32.mxu0 %vm19907_vm7, %v26505_v30 }
 0x255   :  { %v4950_v34 = vadd.f32 %v4949_v19, %v4831_v15  ;;  %v5051_v16 = vpop.f32.mrf.mxu1 }
 0x256   :  { %v5052_v54 = vadd.f32 %v5051_v16, %v4942_v53  ;;  %v4955_v36 = vpop.f32.mrf.mxu0  ;;  %18532 = vmatmul.mubr.msk.f32.gmra.mxu1 %vm6092_vm2, %v22366_v2 }
 0x257   :  { %v4956_v46 = vadd.f32 %v4955_v36, %v4836_v27  ;;  %v5058_v8 = vpop.f32.mrf.mxu1  ;;  %19224 = vmatmul.mubr.f32.vlgmr.msra.gmra.mxu0 %v26730_v60  ;;  %7474 = vmatprep.mubr.f32.mxu1 %v26505_v30  ;;  %v26733_v27 = vld [vmem:[#allocation12_spill] sm:$0xff]  ;;  %v26736_v36 = vld [vmem:[#allocation25_spill] sm:$0xff] }
 0x258   :  { %v5059_v11 = vadd.f32 %v5058_v8, %v4948_v49  ;;  %19258 = vmatpush3.msra.mxu0 %v22763_v59  ;;  %v4957_v5 = vpop.f32.mrf.mxu0  ;;  %19226 = vmatprep.mubr.msk.f32.mxu0 %vm19907_vm7, %v26505_v30  ;;  %v498_v61 = vadd.f32 %v26733_v27, %v379_v57 }
 0x259   :  { %v4958_v15 = vadd.f32 %v4957_v5, %v4838_v4  ;;  %v5060_v18 = vpop.f32.mrf.mxu1  ;;  %19259 = vmatprep.subr.mxu0 %v26505_v30 }
 0x25a   :  { %v5061_v0 = vadd.f32 %v5060_v18, %v4950_v34  ;;  %19260 = vmatpush3.msra.mxu0 %v22769_v44  ;;  %18533 = vmatmul.mubr.msk.f32.gmra.mxu1 %vm6092_vm2, %v22402_v24  ;;  %v609_v40 = vadd.f32 %v26734_v43, %v498_v61 }
 0x25b   :  { %19227 = vmatmul.mubr.f32.gmra.mxu0 %v22444_v56  ;;  %19242 = vmatprep.mubr.msk.f32.mxu1 %vm19907_vm7, %v26505_v30 }
 0x25c   :  { %v4963_v28 = vpop.f32.mrf.mxu0  ;;  %v5067_v4 = vpop.f32.mrf.mxu1  ;;  %19229 = vmatprep.mubr.msk.f32.mxu0 %vm19907_vm7, %v26505_v30  ;;  %19295 = vmatprep.subr.mxu0 %v26505_v30  ;;  %v742_v49 = vadd.f32 %v26735_v48, %v609_v40  ;;  %v26739_v48 = vld [vmem:[#allocation5_spill] sm:$0xff] }
 0x25d   :  { %v4964_v10 = vadd.f32 %v4963_v28, %v4843_v17  ;;  %v5068_v53 = vadd.f32 %v5067_v4, %v4956_v46 }
 0x25e   :  { %v4965_v20 = vpop.f32.mrf.mxu0  ;;  %v5069_v19 = vpop.f32.mrf.mxu1  ;;  %19243 = vmatmul.mubr.msk.f32.vlgmr.msra.gmra.mxu1 %vm6092_vm2, %v22263_v42  ;;  %v847_v8 = vadd.f32 %v26736_v36, %v742_v49  ;;  %v26741_v36 = vld [vmem:[#allocation10_spill] sm:$0xff] }
 0x25f   :  { %v4966_v34 = vadd.f32 %v4965_v20, %v4845_v45  ;;  %v5070_v16 = vadd.f32 %v5069_v19, %v4958_v15  ;;  %19230 = vmatmul.mubr.f32.gmra.mxu0 %v22462_v23  ;;  %19277 = vmatpush3.msra.mxu1 %v22749_v35 }
 0x260   :  { %19278 = vmatprep.subr.mxu1 %v26505_v30  ;;  %19232 = vmatprep.mubr.msk.f32.mxu0 %vm19907_vm7, %v26505_v30  ;;  %v22856_v38 = vand.u32 4294901760, %v847_v8 }
 0x261   :  { %19279 = vmatpush3.msra.mxu1 %v22755_v52  ;;  %19245 = vmatprep.mubr.msk.f32.mxu1 %vm19907_vm7, %v26505_v30 }
 0x262   :  { %v5076_v17 = vpop.f32.mrf.mxu1  ;;  %v5184_v46 = vpop.f32.mrf.mxu0  ;;  %19246 = vmatmul.mubr.msk.f32.gmra.mxu1 %vm6092_vm2, %v22295_v3  ;;  %19314 = vmatprep.subr.mxu1 %v26505_v30  ;;  %v22866_v43 = vsub.f32 %v847_v8, %v22856_v38 }
 0x263   :  { %v5077_v45 = vadd.f32 %v5076_v17, %v4964_v10  ;;  %v5185_v58 = vadd.f32 %v5184_v46, %v5050_v9  ;;  %19233 = vmatmul.mubr.f32.gmra.mxu0 %v22480_v41  ;;  %19248 = vmatprep.mubr.msk.f32.mxu1 %vm19907_vm7, %v26505_v30  ;;  %v26738_v10 = vld [vmem:[#allocation3_spill] sm:$0xff] }
 0x264   :  { %v5078_v57 = vpop.f32.mrf.mxu1  ;;  %v5186_v5 = vpop.f32.mrf.mxu0  ;;  %19235 = vmatprep.mubr.msk.f32.mxu0 %vm19907_vm7, %v26505_v30  ;;  %v26310_v46 = vand.u32 4294901760, %v22866_v43 }
 0x265   :  { %v5079_v15 = vadd.f32 %v5078_v57, %v4966_v34  ;;  %v5187_v18 = vadd.f32 %v5186_v5, %v5052_v54  ;;  %v26743_v57 = vld [vmem:[#allocation14_spill] sm:$0xff] }
 0x266   :  { %v5191_v27 = vpop.f32.mrf.mxu0  ;;  %19249 = vmatmul.mubr.msk.f32.gmra.mxu1 %vm6092_vm2, %v22322_v37  ;;  %v8283_v44 = vsub.f32 %v22866_v43, %v26310_v46 }
 0x267   :  { %v5192_v61 = vadd.f32 %v5191_v27, %v5059_v11  ;;  %v5289_v9 = vpop.f32.mrf.mxu1  ;;  %19236 = vmatmul.mubr.f32.gmra.mxu0 %v22499_v33  ;;  %19251 = vmatprep.mubr.msk.f32.mxu1 %vm19907_vm7, %v26505_v30  ;;  %v372_v11 = vadd.f32 %v26739_v48, %v26738_v10 }
 0x268   :  { %v22868_v40 = vadd.f32 %v5289_v9, %v5185_v58  ;;  %v5193_v28 = vpop.f32.mrf.mxu0  ;;  %19261 = vmatprep.mubr.msk.f32.mxu0 %vm19907_vm7, %v26505_v30 }
 0x269   :  { %v5194_v54 = vadd.f32 %v5193_v28, %v5061_v0  ;;  %v5291_v4 = vpop.f32.mrf.mxu1  ;;  %v490_v8 = vadd.f32 %v26741_v36, %v372_v11 }
 0x26a   :  { %26737 = vst [vmem:[#allocation4_spill] sm:$0xff] %v22868_v40  ;;  %v22874_v49 = vadd.f32 %v5291_v4, %v5187_v18  ;;  %v5198_v20 = vpop.f32.mrf.mxu0  ;;  %19252 = vmatmul.mubr.msk.f32.gmra.mxu1 %vm6092_vm2, %v22366_v2 }
 0x26b   :  { %v5199_v19 = vadd.f32 %v5198_v20, %v5068_v53  ;;  %v5296_v34 = vpop.f32.mrf.mxu1  ;;  %19262 = vmatmul.mubr.f32.vlgmr.msra.gmra.mxu0 %v22311_v13  ;;  %19254 = vmatprep.mubr.msk.f32.mxu1 %vm19907_vm7, %v26505_v30  ;;  %v600_v5 = vadd.f32 %v26743_v57, %v490_v8  ;;  %v26750_v20 = vld [vmem:[#allocation24_spill] sm:$0xff]  ;;  %v26752_v8 = vld [vmem:[#allocation21_spill] sm:$0xff] }
 0x26c   :  { %26740 = vst [vmem:[#allocation7_spill] sm:$0xff] %v22874_v49  ;;  %v22882_v0 = vadd.f32 %v5296_v34, %v5192_v61  ;;  %v5200_v17 = vpop.f32.mrf.mxu0  ;;  %19296 = vmatpush3.msra.mxu0 %v7630_v21  ;;  %19264 = vmatprep.mubr.msk.f32.mxu0 %vm19907_vm7, %v26505_v30  ;;  %v26753_v57 = vld [vmem:[#allocation100_spill] sm:$0xff] }
 0x26d   :  { %v5201_v53 = vadd.f32 %v5200_v17, %v5070_v16  ;;  %v5298_v58 = vpop.f32.mrf.mxu1  ;;  %19297 = vmatprep.subr.mxu0 %v26505_v30  ;;  %v26745_v16 = vld [vmem:[#allocation18_spill] sm:$0xff]  ;;  %v22932_v17 = vand.u32 4294901760, %v26752_v8 }
 0x26e   :  { %26742 = vst [vmem:[#allocation12_spill] sm:$0xff] %v22882_v0  ;;  %v22891_v18 = vadd.f32 %v5298_v58, %v5194_v54  ;;  %v5205_v27 = vpop.f32.mrf.mxu0  ;;  %19298 = vmatpush3.msra.mxu0 %v7637_v6  ;;  %19255 = vmatmul.mubr.msk.f32.gmra.mxu1 %vm6092_vm2, %v22402_v24  ;;  %v735_v61 = vadd.f32 %v26745_v16, %v600_v5  ;;  %v26747_v54 = vld [vmem:[#allocation23_spill] sm:$0xff] }
 0x26f   :  { %v5206_v59 = vadd.f32 %v5205_v27, %v5077_v45  ;;  %v5303_v21 = vpop.f32.mrf.mxu1  ;;  %8157 = vmatprep.subr.mxu0 %v22856_v38  ;;  %19265 = vmatmul.mubr.f32.gmra.mxu0 %v22346_v31  ;;  %v26754_v5 = vld [vmem:[#allocation103_spill] sm:$0xff]  ;;  %v22951_v27 = vsub.f32 %v26752_v8, %v22932_v17 }
 0x270   :  { %26744 = vst [vmem:[#allocation15_spill] sm:$0xff] %v22891_v18  ;;  %v22900_v9 = vadd.f32 %v5303_v21, %v5199_v19  ;;  %v5207_v28 = vpop.f32.mrf.mxu0  ;;  %19267 = vmatprep.mubr.msk.f32.mxu0 %vm19907_vm7, %v26505_v30  ;;  %19280 = vmatprep.mubr.msk.f32.mxu1 %vm19907_vm7, %v26505_v30  ;;  %v840_v4 = vadd.f32 %v26747_v54, %v735_v61  ;;  %v22921_v19 = vand.u32 4294901760, %v26750_v20  ;;  %v26756_v54 = vld [vmem:[#allocation61_spill] sm:$0xff] }
 0x271   :  { %v5208_v6 = vadd.f32 %v5207_v28, %v5079_v15  ;;  %v5305_v45 = vpop.f32.mrf.mxu1  ;;  %v8284_v15 = vand.u32 4294901760, %v8283_v44  ;;  %vm6024_vm8 = vcmp.eq.s32.totalorder %v26754_v5, %v26753_v57  ;;  %vm6025_vm9 = vcmp.eq.s32.totalorder %v26756_v54, %v26753_v57 }
 0x272   :  { %26746 = vst [vmem:[#allocation19_spill] sm:$0xff] %v22900_v9  ;;  %v22910_v10 = vadd.f32 %v5305_v45, %v5201_v53  ;;  %19281 = vmatmul.mubr.f32.vlgmr.msra.gmra.mxu1 %v22344_v63  ;;  %v22926_v36 = vand.u32 4294901760, %v840_v4  ;;  %v22960_v44 = vsel %vm6024_vm8, 1.0, %v26505_v30 }
 0x273   :  { %v5310_v48 = vpop.f32.mrf.mxu1  ;;  %19268 = vmatmul.mubr.f32.gmra.mxu0 %v22377_v14  ;;  %19315 = vmatpush3.msra.mxu1 %v22749_v35  ;;  %26755 = vst [vmem:[#allocation10_spill] sm:$0xff] %v22960_v44 }
 0x274   :  { %26748 = vst [vmem:[#allocation25_spill] sm:$0xff] %v22910_v10  ;;  %v22915_v11 = vadd.f32 %v5310_v48, %v5206_v59  ;;  %19316 = vmatprep.subr.mxu1 %v26505_v30  ;;  %19270 = vmatprep.mubr.msk.f32.mxu0 %vm19907_vm7, %v26505_v30  ;;  %v22944_v58 = vsub.f32 %v840_v4, %v22926_v36  ;;  %v26311_v4 = vand.u32 4294901760, %v22951_v27  ;;  %v8114_v48 = vsel %vm6092_vm2, %v22960_v44, 0  ;;  %v26761_v10 = vld [vmem:[#allocation104_spill] sm:$0xff] }
 0x275   :  { %v5312_v34 = vpop.f32.mrf.mxu1  ;;  %19317 = vmatpush3.msra.mxu1 %v22755_v52  ;;  %19283 = vmatprep.mubr.msk.f32.mxu1 %vm19907_vm7, %v26505_v30  ;;  %v22941_v52 = vsub.f32 %v26750_v20, %v22921_v19  ;;  %v22981_v20 = vsel %vm6025_vm9, 1.0, %v26505_v30  ;;  %vm6027_vm11 = vcmp.eq.s32.totalorder %v26761_v10, %v26753_v57 }
 0x276   :  { %26749 = vst [vmem:[#allocation3_spill] sm:$0xff] %v22915_v11  ;;  %v22928_v35 = vadd.f32 %v5312_v34, %v5208_v6  ;;  %8285 = vmatprep.subr.mxu1 %v8284_v15  ;;  %19284 = vmatmul.mubr.f32.gmra.mxu1 %v22387_v47  ;;  %v26308_v45 = vand.u32 4294901760, %v22944_v58  ;;  %26757 = vst [vmem:[#allocation14_spill] sm:$0xff] %v22981_v20 }
 0x277   :  { %19271 = vmatmul.mubr.f32.gmra.mxu0 %v22423_v39  ;;  %19286 = vmatprep.mubr.msk.f32.mxu1 %vm19907_vm7, %v26505_v30  ;;  %v26309_v16 = vand.u32 4294901760, %v22941_v52 }
 0x278   :  { %26751 = vst [vmem:[#allocation5_spill] sm:$0xff] %v22928_v35  ;;  %19273 = vmatprep.mubr.msk.f32.mxu0 %vm19907_vm7, %v26505_v30  ;;  %v19125_v53 = vpop.f32.mrf.mxu0  ;;  %v8295_v8 = vsub.f32 %v22944_v58, %v26308_v45  ;;  %v8117_v45 = vsel %vm6092_vm2, %v22981_v20, 0 }
 0x279   :  { %v8289_v15 = vsub.f32 %v22941_v52, %v26309_v16 }
 0x27a   :  { %19287 = vmatmul.mubr.f32.gmra.mxu1 %v22410_v26  ;;  %v5392_v61 = vpop.f32.mrf.mxu0 }
 0x27b   :  { %19274 = vmatmul.mubr.f32.gmra.mxu0 %v22449_v55  ;;  %v19143_v59 = vpop.f32.mrf.mxu1  ;;  %19289 = vmatprep.mubr.msk.f32.mxu1 %vm19907_vm7, %v26505_v30  ;;  %v8290_v46 = vand.u32 4294901760, %v8289_v15  ;;  %v23016_v15 = vsub.f32 %v8117_v45, %v8117_v45 }
 0x27c   :  { %v5530_v21 = vadd.f32 %v19143_v59, %v19125_v53  ;;  %19299 = vmatprep.mubr.msk.f32.mxu0 %vm19907_vm7, %v26505_v30  ;;  %v26758_v53 = vld [vmem:[#allocation64_spill] sm:$0xff]  ;;  %v8301_v59 = vsub.f32 %v22951_v27, %v26311_v4 }
 0x27d   :  { %v5523_v28 = vpop.f32.mrf.mxu1  ;;  %vm6026_vm10 = vcmp.eq.s32.totalorder %v26758_v53, %v26753_v57  ;;  %26763 = vst [vmem:[#allocation21_spill] sm:$0xff] %v23016_v15 }
 0x27e   :  { %v5524_v6 = vadd.f32 %v5523_v28, %v5392_v61  ;;  %19290 = vmatmul.mubr.f32.gmra.mxu1 %v22447_v25  ;;  %v22996_v61 = vsub.f32 %v8114_v48, %v8114_v48  ;;  %v23005_v4 = vsel %vm6026_vm10, 1.0, %v26505_v30  ;;  %v8296_v48 = vand.u32 4294901760, %v8295_v8 }
 0x27f   :  { %19300 = vmatmul.mubr.msk.f32.vlgmr.msra.gmra.mxu0 %vm6092_vm2, %v22263_v42  ;;  %19292 = vmatprep.mubr.msk.f32.mxu1 %vm19907_vm7, %v26505_v30  ;;  %26760 = vst [vmem:[#allocation23_spill] sm:$0xff] %v23005_v4  ;;  %v8302_v35 = vand.u32 4294901760, %v8301_v59 }
 0x280   :  { %8159 = vmatpush1.msra.mxu0 %v22921_v19  ;;  %19302 = vmatprep.mubr.msk.f32.mxu0 %vm19907_vm7, %v26505_v30  ;;  %26759 = vst [vmem:[#allocation18_spill] sm:$0xff] %v22996_v61  ;;  %v23014_v12 = vand.u32 4294901760, %v22996_v61 }
 0x281   :  { %8161 = vmatprep.subr.mxu0 %v22926_v36 }
 0x282   :  { %v19128_v34 = vpop.f32.mrf.mxu0  ;;  %8163 = vmatpush1.msra.mxu0 %v22932_v17  ;;  %19293 = vmatmul.mubr.f32.gmra.mxu1 %v26729_v50  ;;  %26762 = vst [vmem:[#allocation24_spill] sm:$0xff] %v23014_v12 }
 0x283   :  { %8402 = vmatprep.subr.mxu0 %v22866_v43  ;;  %19303 = vmatmul.mubr.msk.f32.gmra.mxu0 %vm6092_vm2, %v22295_v3 }
 0x284   :  { %v5412_v28 = vpop.f32.mrf.mxu0  ;;  %19305 = vmatprep.mubr.msk.f32.mxu0 %vm19907_vm7, %v26505_v30  ;;  %19318 = vmatprep.mubr.msk.f32.mxu1 %vm19907_vm7, %v26505_v30 }
 0x285   :  { %v19146_v16 = vpop.f32.mrf.mxu1 }
 0x286   :  { %v5542_v9 = vadd.f32 %v19146_v16, %v19128_v34  ;;  %19319 = vmatmul.mubr.msk.f32.vlgmr.msra.gmra.mxu1 %vm6092_vm2, %v22263_v42  ;;  %v8120_v34 = vsel %vm6092_vm2, %v23005_v4, 0  ;;  %v26796_v42 = vand.u32 4294901760, %v22951_v27 }
 0x287   :  { %v5535_v11 = vpop.f32.mrf.mxu1  ;;  %19306 = vmatmul.mubr.msk.f32.gmra.mxu0 %vm6092_vm2, %v22322_v37  ;;  %8291 = vmatpush1.msra.mxu1 %v8290_v46  ;;  %v23025_v46 = vsel %vm6027_vm11, 1.0, %v26505_v30 }
 0x288   :  { %v5536_v1 = vadd.f32 %v5535_v11, %v5412_v28  ;;  %v19161_v16 = vpop.f32.mrf.mxu0  ;;  %8297 = vmatprep.subr.mxu1 %v8296_v48  ;;  %19308 = vmatprep.mubr.msk.f32.mxu0 %vm19907_vm7, %v26505_v30  ;;  %26764 = vst [vmem:[#allocation100_spill] sm:$0xff] %v23025_v46  ;;  %v26765_v11 = vld [vmem:[#allocation108_spill] sm:$0xff]  ;;  %v23041_v48 = vsub.f32 %v8120_v34, %v8120_v34 }
 0x289   :  { %v5633_v8 = vadd.f32 %v19161_v16, %v5530_v21  ;;  %8303 = vmatpush1.msra.mxu1 %v8302_v35  ;;  %19321 = vmatprep.mubr.msk.f32.mxu1 %vm19907_vm7, %v26505_v30  ;;  %vm6028_vm12 = vcmp.eq.s32.totalorder %v26765_v11, %v26753_v57  ;;  %v8200_v35 = vsub.f32 %v22996_v61, %v23014_v12  ;;  %v23039_v21 = vand.u32 4294901760, %v23016_v15 }
 0x28a   :  { %v5625_v59 = vpop.f32.mrf.mxu0  ;;  %8514 = vmatprep.subr.mxu1 %v22856_v38  ;;  %19322 = vmatmul.mubr.msk.f32.gmra.mxu1 %vm6092_vm2, %v22295_v3  ;;  %26767 = vst [vmem:[#allocation64_spill] sm:$0xff] %v23041_v48  ;;  %v23048_v51 = vsel %vm6028_vm12, 1.0, %v26505_v30 }
 0x28b   :  { %v5626_v45 = vadd.f32 %v5625_v59, %v5524_v6  ;;  %v19179_v28 = vpop.f32.mrf.mxu1  ;;  %19309 = vmatmul.mubr.msk.f32.gmra.mxu0 %vm6092_vm2, %v22366_v2  ;;  %19324 = vmatprep.mubr.msk.f32.mxu1 %vm19907_vm7, %v26505_v30  ;;  %26766 = vst [vmem:[#allocation61_spill] sm:$0xff] %v23039_v21  ;;  %v8123_v6 = vsel %vm6092_vm2, %v23025_v46, 0  ;;  %26768 = vst [vmem:[#allocation104_spill] sm:$0xff] %v23048_v51  ;;  %v23056_v34 = vand.u32 4294901760, %v8200_v35 }
 0x28c   :  { %v5734_v16 = vadd.f32 %v19179_v28, %v5633_v8  ;;  %19311 = vmatprep.mubr.msk.f32.mxu0 %vm19907_vm7, %v26505_v30  ;;  %v8211_v8 = vsub.f32 %v23016_v15, %v23039_v21  ;;  %v23061_v28 = vand.u32 4294901760, %v23041_v48  ;;  %v23063_v50 = vsub.f32 %v8123_v6, %v8123_v6 }
 0x28d   :  { %v5725_v59 = vpop.f32.mrf.mxu1  ;;  %26769 = vst [vmem:[#allocation108_spill] sm:$0xff] %v23056_v34 }
 0x28e   :  { %v5726_v7 = vadd.f32 %v5725_v59, %v5626_v45  ;;  %19325 = vmatmul.mubr.msk.f32.gmra.mxu1 %vm6092_vm2, %v22322_v37  ;;  %26770 = vst [vmem:[#allocation133_spill] sm:$0xff] %v23061_v28  ;;  %26771 = vst [vmem:[#allocation134_spill] sm:$0xff] %v23063_v50  ;;  %v8126_v45 = vsel %vm6092_vm2, %v23048_v51, 0  ;;  %v23073_v55 = vand.u32 4294901760, %v8211_v8  ;;  %v8222_v6 = vsub.f32 %v23041_v48, %v23061_v28  ;;  %v26777_v8 = vld [vmem:[#allocation39_spill] sm:$0xff] }
 0x28f   :  { %19312 = vmatmul.mubr.msk.f32.gmra.mxu0 %vm6092_vm2, %v22402_v24  ;;  %19327 = vmatprep.mubr.msk.f32.mxu1 %vm19907_vm7, %v26505_v30  ;;  %v23078_v26 = vand.u32 4294901760, %v23063_v50  ;;  %v23080_v39 = vsub.f32 %v8126_v45, %v8126_v45 }
 0x290   :  { %8196 = vmatprep.mubr.f32.mxu0 %v26505_v30  ;;  %26772 = vst [vmem:[#allocation135_spill] sm:$0xff] %v23073_v55 }
 0x291   :  { %v19164_v59 = vpop.f32.mrf.mxu0  ;;  %26773 = vst [vmem:[#allocation136_spill] sm:$0xff] %v23078_v26  ;;  %26774 = vst [vmem:[#allocation137_spill] sm:$0xff] %v23080_v39 }
 0x292   :  { %v5647_v25 = vadd.f32 %v19164_v59, %v5542_v9  ;;  %19328 = vmatmul.mubr.msk.f32.gmra.mxu1 %vm6092_vm2, %v22366_v2  ;;  %v26775_v9 = vld [vmem:[#allocation31_spill] sm:$0xff] }
 0x293   :  { %v5639_v35 = vpop.f32.mrf.mxu0  ;;  %8202 = vmatmul.mubr.f32.vlgmr.msra.gmra.mxu0 %v23056_v34  ;;  %19330 = vmatprep.mubr.msk.f32.mxu1 %vm19907_vm7, %v26505_v30  ;;  %v26776_v59 = vld [vmem:[#allocation35_spill] sm:$0xff] }
 0x294   :  { %v1121_v47 = vadd.f32 %v26776_v59, %v26775_v9  ;;  %v5640_v14 = vadd.f32 %v5639_v35, %v5536_v1  ;;  %8405 = vmatpush1.msra.mxu0 %v22941_v52  ;;  %8207 = vmatprep.mubr.f32.mxu0 %v26505_v30  ;;  %v26778_v9 = vand.u32 4294901760, %v22866_v43  ;;  %v23094_v1 = vand.u32 4294901760, %v8222_v6 }
 0x295   :  { %v19182_v63 = vpop.f32.mrf.mxu1  ;;  %8408 = vmatprep.subr.mxu0 %v22944_v58  ;;  %v8233_v35 = vsub.f32 %v23063_v50, %v23078_v26 }
 0x296   :  { %v1240_v31 = vadd.f32 %v26777_v8, %v1121_v47  ;;  %v5750_v13 = vadd.f32 %v19182_v63, %v5647_v25  ;;  %8411 = vmatpush1.msra.mxu0 %v22951_v27  ;;  %19331 = vmatmul.mubr.msk.f32.gmra.mxu1 %vm6092_vm2, %v22402_v24  ;;  %26779 = vst [vmem:[#allocation31_spill] sm:$0xff] %v23094_v1  ;;  %v23099_v47 = vand.u32 4294901760, %v23080_v39  ;;  %v26781_v25 = vld [vmem:[#allocation43_spill] sm:$0xff] }
 0x297   :  { %v5741_v45 = vpop.f32.mrf.mxu1  ;;  %v19197_v2 = vpop.f32.mrf.mxu0  ;;  %8630 = vmatprep.subr.mxu0 %v26778_v9  ;;  %8213 = vmatmul.mubr.f32.gmra.mxu0 %v23073_v55  ;;  %v26782_v9 = vld [vmem:[#allocation47_spill] sm:$0xff] }
 0x298   :  { %26780 = vst [vmem:[#allocation35_spill] sm:$0xff] %v23099_v47  ;;  %v1351_v63 = vadd.f32 %v26781_v25, %v1240_v31  ;;  %v5742_v59 = vadd.f32 %v5741_v45, %v5640_v14  ;;  %v5845_v8 = vadd.f32 %v19197_v2, %v5734_v16  ;;  %8218 = vmatprep.mubr.f32.mxu0 %v26505_v30  ;;  %v23111_v31 = vand.u32 4294901760, %v8233_v35  ;;  %v26785_v14 = vld [vmem:[#allocation53_spill] sm:$0xff] }
 0x299   :  { %8336 = vmatprep.mubr.f32.mxu1 %v26505_v30  ;;  %v5838_v43 = vpop.f32.mrf.mxu0  ;;  %v8244_v2 = vsub.f32 %v23080_v39, %v23099_v47 }
 0x29a   :  { %v1484_v24 = vadd.f32 %v26782_v9, %v1351_v63  ;;  %v5839_v33 = vadd.f32 %v5838_v43, %v5726_v7  ;;  %v19215_v6 = vpop.f32.mrf.mxu1  ;;  %18549 = vmatmul.mubr.msk.f32.vlgmr.msra.gmra.mxu1 %vm6092_vm2, %v22960_v44  ;;  %26784 = vst [vmem:[#allocation43_spill] sm:$0xff] %v23111_v31 }
 0x29b   :  { %v23107_v37 = vadd.f32 %v19215_v6, %v5845_v8  ;;  %v19200_v41 = vpop.f32.mrf.mxu0  ;;  %8224 = vmatmul.mubr.f32.gmra.mxu0 %v23094_v1  ;;  %8516 = vmatpush1.msra.mxu1 %v22921_v19 }
 0x29c   :  { %v1589_v16 = vadd.f32 %v26785_v14, %v1484_v24  ;;  %v5933_v45 = vpop.f32.mrf.mxu1  ;;  %v5857_v7 = vadd.f32 %v19200_v41, %v5750_v13  ;;  %8518 = vmatprep.subr.mxu1 %v22926_v36  ;;  %8229 = vmatprep.mubr.f32.mxu0 %v26505_v30  ;;  %v23129_v41 = vand.u32 4294901760, %v8244_v2  ;;  %v26790_v14 = vld [vmem:[#allocation29_spill] sm:$0xff] }
 0x29d   :  { %26783 = vst [vmem:[#allocation39_spill] sm:$0xff] %v23107_v37  ;;  %v23118_v25 = vadd.f32 %v5933_v45, %v5839_v33  ;;  %v5850_v63 = vpop.f32.mrf.mxu0  ;;  %8520 = vmatpush1.msra.mxu1 %v22932_v17  ;;  %8343 = vmatprep.mubr.f32.mxu1 %v26505_v30  ;;  %v26791_v45 = vld [vmem:[#allocation34_spill] sm:$0xff] }
 0x29e   :  { %v5851_v35 = vadd.f32 %v5850_v63, %v5742_v59  ;;  %v19218_v8 = vpop.f32.mrf.mxu1  ;;  %8740 = vmatprep.subr.mxu1 %v22856_v38  ;;  %18550 = vmatmul.mubr.msk.f32.gmra.mxu1 %vm6092_vm2, %v22981_v20  ;;  %26788 = vst [vmem:[#allocation138_spill] sm:$0xff] %v23129_v41  ;;  %v23131_v33 = vand.u32 4294901760, %v1589_v16 }
 0x29f   :  { %26786 = vst [vmem:[#allocation47_spill] sm:$0xff] %v23118_v25  ;;  %v23125_v24 = vadd.f32 %v19218_v8, %v5857_v7  ;;  %v6183_v13 = vpop.f32.mrf.mxu0  ;;  %8235 = vmatmul.mubr.f32.gmra.mxu0 %v23111_v31  ;;  %8350 = vmatprep.mubr.f32.mxu1 %v26505_v30  ;;  %v1114_v7 = vadd.f32 %v26791_v45, %v26790_v14  ;;  %v26794_v45 = vand.u32 4294901760, %v22944_v58 }
 0x2a0   :  { %v5945_v43 = vpop.f32.mrf.mxu1  ;;  %8240 = vmatprep.mubr.f32.mxu0 %v26505_v30  ;;  %v23141_v6 = vsub.f32 %v1589_v16, %v23131_v33  ;;  %v26793_v16 = vand.u32 4294901760, %v22941_v52 }
 0x2a1   :  { %26787 = vst [vmem:[#allocation53_spill] sm:$0xff] %v23125_v24  ;;  %v23134_v59 = vadd.f32 %v5945_v43, %v5851_v35  ;;  %v6185_v38 = vpop.f32.mrf.mxu0  ;;  %v26792_v43 = vld [vmem:[#allocation38_spill] sm:$0xff] }
 0x2a2   :  { %18551 = vmatmul.mubr.msk.f32.gmra.mxu1 %vm6092_vm2, %v23005_v4  ;;  %v26359_v14 = vand.u32 4294901760, %v23141_v6 }
 0x2a3   :  { %26789 = vst [vmem:[#allocation139_spill] sm:$0xff] %v23134_v59  ;;  %v6194_v9 = vpop.f32.mrf.mxu0  ;;  %8246 = vmatmul.mubr.f32.gmra.mxu0 %v23129_v41  ;;  %8357 = vmatprep.mubr.f32.mxu1 %v26505_v30  ;;  %v1232_v59 = vadd.f32 %v26792_v43, %v1114_v7  ;;  %v26797_v43 = vld [vmem:[#allocation46_spill] sm:$0xff] }
 0x2a4   :  { %8444 = vmatprep.mubr.f32.mxu0 %v26505_v30 }
 0x2a5   :  { %v6196_v2 = vpop.f32.mrf.mxu0 }
 0x2a6   :  { %v6319_v63 = vpop.f32.mrf.mxu1  ;;  %18552 = vmatmul.mubr.msk.f32.gmra.mxu1 %vm6092_vm2, %v23025_v46 }
 0x2a7   :  { %v6205_v35 = vpop.f32.mrf.mxu0  ;;  %v6320_v8 = vadd.f32 %v6319_v63, %v6183_v13  ;;  %8447 = vmatmul.mubr.f32.vlgmr.msra.gmra.mxu0 %v22996_v61  ;;  %8364 = vmatprep.mubr.f32.mxu1 %v26505_v30  ;;  %v26795_v13 = vld [vmem:[#allocation42_spill] sm:$0xff] }
 0x2a8   :  { %8634 = vmatpush1.msra.mxu0 %v26793_v16  ;;  %v6321_v24 = vpop.f32.mrf.mxu1  ;;  %8452 = vmatprep.mubr.f32.mxu0 %v26505_v30  ;;  %v1342_v63 = vadd.f32 %v26795_v13, %v1232_v59  ;;  %v26798_v59 = vld [vmem:[#allocation51_spill] sm:$0xff] }
 0x2a9   :  { %8638 = vmatprep.subr.mxu0 %v26794_v45  ;;  %v6207_v3 = vpop.f32.mrf.mxu0  ;;  %v6322_v23 = vadd.f32 %v6321_v24, %v6185_v38 }
 0x2aa   :  { %8642 = vmatpush1.msra.mxu0 %v26796_v42  ;;  %v6326_v56 = vpop.f32.mrf.mxu1  ;;  %18553 = vmatmul.mubr.msk.f32.gmra.mxu1 %vm6092_vm2, %v23048_v51  ;;  %v1477_v58 = vadd.f32 %v26797_v43, %v1342_v63  ;;  %v8970_v42 = vsub.f32 %v23141_v6, %v26359_v14  ;;  %v26799_v43 = vld [vmem:[#allocation52_spill] sm:$0xff] }
 0x2ab   :  { %8844 = vmatprep.subr.mxu0 %v23131_v33  ;;  %v6216_v52 = vpop.f32.mrf.mxu0  ;;  %v6327_v7 = vadd.f32 %v6326_v56, %v6194_v9  ;;  %8455 = vmatmul.mubr.f32.gmra.mxu0 %v23016_v15  ;;  %v23177_v14 = vand.u32 4294901760, %v26799_v43 }
 0x2ac   :  { %v6328_v16 = vpop.f32.mrf.mxu1  ;;  %8460 = vmatprep.mubr.f32.mxu0 %v26505_v30  ;;  %8553 = vmatprep.mubr.f32.mxu1 %v26505_v30  ;;  %v1582_v38 = vadd.f32 %v26798_v59, %v1477_v58  ;;  %v8971_v63 = vand.u32 4294901760, %v8970_v42 }
 0x2ad   :  { %v6218_v27 = vpop.f32.mrf.mxu0  ;;  %v6329_v24 = vadd.f32 %v6328_v16, %v6196_v2 }
 0x2ae   :  { %v6333_v45 = vpop.f32.mrf.mxu1  ;;  %8557 = vmatmul.mubr.f32.vlgmr.msra.gmra.mxu1 %v23014_v12 }
 0x2af   :  { %v6227_v56 = vpop.f32.mrf.mxu0  ;;  %v6334_v9 = vadd.f32 %v6333_v45, %v6205_v35  ;;  %8463 = vmatmul.mubr.f32.gmra.mxu0 %v23041_v48  ;;  %8742 = vmatpush1.msra.mxu1 %v22921_v19  ;;  %v23181_v35 = vand.u32 4294901760, %v1582_v38  ;;  %v26800_v19 = vld [vmem:[#allocation49_spill] sm:$0xff] }
 0x2b0   :  { %8744 = vmatprep.subr.mxu1 %v22926_v36  ;;  %v6335_v13 = vpop.f32.mrf.mxu1  ;;  %8468 = vmatprep.mubr.f32.mxu0 %v26505_v30  ;;  %v23185_v36 = vand.u32 4294901760, %v26800_v19 }
 0x2b1   :  { %v6229_v2 = vpop.f32.mrf.mxu0  ;;  %v6336_v58 = vadd.f32 %v6335_v13, %v6207_v3  ;;  %8746 = vmatpush1.msra.mxu1 %v22932_v17  ;;  %8562 = vmatprep.mubr.f32.mxu1 %v26505_v30  ;;  %v23192_v17 = vsub.f32 %v26799_v43, %v23177_v14  ;;  %v23195_v60 = vsub.f32 %v1582_v38, %v23181_v35 }
 0x2b2   :  { %8972 = vmatprep.subr.mxu1 %v8971_v63  ;;  %v6340_v16 = vpop.f32.mrf.mxu1  ;;  %8566 = vmatmul.mubr.f32.gmra.mxu1 %v23039_v21 }
 0x2b3   :  { %v6341_v59 = vadd.f32 %v6340_v16, %v6216_v52  ;;  %v6428_v42 = vpop.f32.mrf.mxu0  ;;  %8471 = vmatmul.mubr.f32.gmra.mxu0 %v23063_v50  ;;  %8571 = vmatprep.mubr.f32.mxu1 %v26505_v30  ;;  %v23200_v16 = vsub.f32 %v26800_v19, %v23185_v36  ;;  %v26363_v38 = vand.u32 4294901760, %v23192_v17  ;;  %v26364_v19 = vand.u32 4294901760, %v23195_v60 }
 0x2b4   :  { %v6429_v3 = vadd.f32 %v6428_v42, %v6320_v8  ;;  %v6342_v45 = vpop.f32.mrf.mxu1  ;;  %8476 = vmatprep.mubr.f32.mxu0 %v26505_v30 }
 0x2b5   :  { %v6343_v13 = vadd.f32 %v6342_v45, %v6218_v27  ;;  %v6430_v63 = vpop.f32.mrf.mxu0 }
 0x2b6   :  { %v6431_v25 = vadd.f32 %v6430_v63, %v6322_v23  ;;  %v6347_v52 = vpop.f32.mrf.mxu1  ;;  %8575 = vmatmul.mubr.f32.gmra.mxu1 %v23061_v28 }
 0x2b7   :  { %v6348_v8 = vadd.f32 %v6347_v52, %v6227_v56  ;;  %v6436_v42 = vpop.f32.mrf.mxu0  ;;  %8479 = vmatmul.mubr.f32.gmra.mxu0 %v23080_v39  ;;  %8580 = vmatprep.mubr.f32.mxu1 %v26505_v30  ;;  %v26367_v56 = vand.u32 4294901760, %v23200_v16 }
 0x2b8   :  { %v6437_v43 = vadd.f32 %v6436_v42, %v6327_v7  ;;  %v6349_v27 = vpop.f32.mrf.mxu1  ;;  %8675 = vmatprep.mubr.f32.mxu0 %v26505_v30 }
 0x2b9   :  { %v6350_v23 = vadd.f32 %v6349_v27, %v6229_v2  ;;  %v6438_v45 = vpop.f32.mrf.mxu0 }
 0x2ba   :  { %v6439_v63 = vadd.f32 %v6438_v45, %v6329_v24  ;;  %v6538_v37 = vpop.f32.mrf.mxu1  ;;  %8584 = vmatmul.mubr.f32.gmra.mxu1 %v23078_v26  ;;  %v8976_v24 = vsub.f32 %v23192_v17, %v26363_v38  ;;  %v8988_v45 = vsub.f32 %v23200_v16, %v26367_v56 }
 0x2bb   :  { %v6444_v52 = vpop.f32.mrf.mxu0  ;;  %v6539_v40 = vadd.f32 %v6538_v37, %v6429_v3  ;;  %18554 = vmatmul.mubr.msk.f32.vlgmr.msra.gmra.mxu0 %vm6092_vm2, %v22960_v44  ;;  %8589 = vmatprep.mubr.f32.mxu1 %v26505_v30 }
 0x2bc   :  { %v6445_v7 = vadd.f32 %v6444_v52, %v6334_v9  ;;  %8846 = vmatpush1.msra.mxu0 %v23177_v14  ;;  %v6540_v2 = vpop.f32.mrf.mxu1  ;;  %8682 = vmatprep.mubr.f32.mxu0 %v26505_v30  ;;  %v8982_v9 = vsub.f32 %v23195_v60, %v26364_v19  ;;  %v8977_v19 = vand.u32 4294901760, %v8976_v24 }
 0x2bd   :  { %8848 = vmatprep.subr.mxu0 %v23181_v35  ;;  %v6446_v42 = vpop.f32.mrf.mxu0  ;;  %v6541_v27 = vadd.f32 %v6540_v2, %v6431_v25 }
 0x2be   :  { %v6447_v37 = vadd.f32 %v6446_v42, %v6336_v58  ;;  %8850 = vmatpush1.msra.mxu0 %v23185_v36  ;;  %v6547_v3 = vpop.f32.mrf.mxu1  ;;  %8593 = vmatmul.mubr.f32.gmra.mxu1 %v23099_v47  ;;  %v8983_v56 = vand.u32 4294901760, %v8982_v9 }
 0x2bf   :  { %9089 = vmatprep.subr.mxu0 %v23141_v6  ;;  %v6452_v52 = vpop.f32.mrf.mxu0  ;;  %v6548_v38 = vadd.f32 %v6547_v3, %v6437_v43  ;;  %18555 = vmatmul.mubr.msk.f32.gmra.mxu0 %vm6092_vm2, %v22981_v20 }
 0x2c0   :  { %v6453_v25 = vadd.f32 %v6452_v52, %v6341_v59  ;;  %v6549_v58 = vpop.f32.mrf.mxu1  ;;  %8689 = vmatprep.mubr.f32.mxu0 %v26505_v30  ;;  %8779 = vmatprep.mubr.f32.mxu1 %v26505_v30  ;;  %v8989_v59 = vand.u32 4294901760, %v8988_v45 }
 0x2c1   :  { %v6454_v2 = vpop.f32.mrf.mxu0  ;;  %v6550_v42 = vadd.f32 %v6549_v58, %v6439_v63 }
 0x2c2   :  { %v6455_v49 = vadd.f32 %v6454_v2, %v6343_v13  ;;  %v6556_v0 = vpop.f32.mrf.mxu1  ;;  %18559 = vmatmul.mubr.msk.f32.vlgmr.msra.gmra.mxu1 %vm6092_vm2, %v22960_v44 }
 0x2c3   :  { %v6460_v18 = vpop.f32.mrf.mxu0  ;;  %v6557_v43 = vadd.f32 %v6556_v0, %v6445_v7  ;;  %18556 = vmatmul.mubr.msk.f32.gmra.mxu0 %vm6092_vm2, %v23005_v4  ;;  %8978 = vmatpush1.msra.mxu1 %v8977_v19 }
 0x2c4   :  { %v6461_v3 = vadd.f32 %v6460_v18, %v6348_v8  ;;  %8984 = vmatprep.subr.mxu1 %v8983_v56  ;;  %v6558_v52 = vpop.f32.mrf.mxu1  ;;  %8696 = vmatprep.mubr.f32.mxu0 %v26505_v30 }
 0x2c5   :  { %v6462_v63 = vpop.f32.mrf.mxu0  ;;  %v6559_v24 = vadd.f32 %v6558_v52, %v6447_v37  ;;  %8990 = vmatpush1.msra.mxu1 %v8989_v59  ;;  %8786 = vmatprep.mubr.f32.mxu1 %v26505_v30 }
 0x2c6   :  { %v6463_v13 = vadd.f32 %v6462_v63, %v6350_v23  ;;  %9201 = vmatprep.subr.mxu1 %v23131_v33  ;;  %v6565_v9 = vpop.f32.mrf.mxu1  ;;  %18560 = vmatmul.mubr.msk.f32.gmra.mxu1 %vm6092_vm2, %v22981_v20 }
 0x2c7   :  { %v6566_v0 = vadd.f32 %v6565_v9, %v6453_v25  ;;  %v6658_v19 = vpop.f32.mrf.mxu0  ;;  %18557 = vmatmul.mubr.msk.f32.gmra.mxu0 %vm6092_vm2, %v23025_v46  ;;  %8793 = vmatprep.mubr.f32.mxu1 %v26505_v30 }
 0x2c8   :  { %v6659_v18 = vadd.f32 %v6658_v19, %v6539_v40  ;;  %v6567_v8 = vpop.f32.mrf.mxu1  ;;  %8703 = vmatprep.mubr.f32.mxu0 %v26505_v30 }
 0x2c9   :  { %v6568_v56 = vadd.f32 %v6567_v8, %v6455_v49  ;;  %v6660_v7 = vpop.f32.mrf.mxu0 }
 0x2ca   :  { %v6661_v23 = vadd.f32 %v6660_v7, %v6541_v27  ;;  %v6574_v37 = vpop.f32.mrf.mxu1  ;;  %18561 = vmatmul.mubr.msk.f32.gmra.mxu1 %vm6092_vm2, %v23005_v4 }
 0x2cb   :  { %v6575_v45 = vadd.f32 %v6574_v37, %v6461_v3  ;;  %v6665_v58 = vpop.f32.mrf.mxu0  ;;  %18558 = vmatmul.mubr.msk.f32.gmra.mxu0 %vm6092_vm2, %v23048_v51  ;;  %8800 = vmatprep.mubr.f32.mxu1 %v26505_v30 }
 0x2cc   :  { %v6666_v25 = vadd.f32 %v6665_v58, %v6548_v38  ;;  %v6576_v2 = vpop.f32.mrf.mxu1  ;;  %8883 = vmatprep.mubr.f32.mxu0 %v26505_v30 }
 0x2cd   :  { %v6577_v40 = vadd.f32 %v6576_v2, %v6463_v13  ;;  %v6667_v59 = vpop.f32.mrf.mxu0 }
 0x2ce   :  { %v6668_v49 = vadd.f32 %v6667_v59, %v6550_v42  ;;  %v6762_v52 = vpop.f32.mrf.mxu1  ;;  %18562 = vmatmul.mubr.msk.f32.gmra.mxu1 %vm6092_vm2, %v23025_v46 }
 0x2cf   :  { %v6672_v27 = vpop.f32.mrf.mxu0  ;;  %v23252_v63 = vadd.f32 %v6762_v52, %v6659_v18  ;;  %8889 = vmatmul.mubr.f32.vlgmr.msra.gmra.mxu0 %v23056_v34  ;;  %8807 = vmatprep.mubr.f32.mxu1 %v26505_v30  ;;  %v26801_v18 = vand.u32 4294901760, %v23141_v6 }
 0x2d0   :  { %v6673_v3 = vadd.f32 %v6672_v27, %v6557_v43  ;;  %9092 = vmatpush1.msra.mxu0 %v23192_v17  ;;  %v6764_v38 = vpop.f32.mrf.mxu1  ;;  %8894 = vmatprep.mubr.f32.mxu0 %v26505_v30 }
 0x2d1   :  { %9095 = vmatprep.subr.mxu0 %v23195_v60  ;;  %v6674_v42 = vpop.f32.mrf.mxu0  ;;  %v23259_v13 = vadd.f32 %v6764_v38, %v6661_v23 }
 0x2d2   :  { %v6675_v9 = vadd.f32 %v6674_v42, %v6559_v24  ;;  %9098 = vmatpush1.msra.mxu0 %v23200_v16  ;;  %v6769_v19 = vpop.f32.mrf.mxu1  ;;  %18563 = vmatmul.mubr.msk.f32.gmra.mxu1 %vm6092_vm2, %v23048_v51 }
 0x2d3   :  { %9317 = vmatprep.subr.mxu0 %v26801_v18  ;;  %v6679_v43 = vpop.f32.mrf.mxu0  ;;  %v23266_v8 = vadd.f32 %v6769_v19, %v6666_v25  ;;  %8900 = vmatmul.mubr.f32.gmra.mxu0 %v23073_v55 }
 0x2d4   :  { %v6680_v7 = vadd.f32 %v6679_v43, %v6566_v0  ;;  %v6771_v37 = vpop.f32.mrf.mxu1  ;;  %8905 = vmatprep.mubr.f32.mxu0 %v26505_v30  ;;  %9023 = vmatprep.mubr.f32.mxu1 %v26505_v30 }
 0x2d5   :  { %v6681_v24 = vpop.f32.mrf.mxu0  ;;  %v23271_v23 = vadd.f32 %v6771_v37, %v6668_v49 }
 0x2d6   :  { %v6682_v58 = vadd.f32 %v6681_v24, %v6568_v56  ;;  %v6776_v2 = vpop.f32.mrf.mxu1  ;;  %18564 = vmatmul.mubr.msk.f32.vlgmr.msra.gmra.mxu1 %vm6092_vm2, %v22960_v44 }
 0x2d7   :  { %v6686_v6 = vpop.f32.mrf.mxu0  ;;  %v23275_v59 = vadd.f32 %v6776_v2, %v6673_v3  ;;  %8911 = vmatmul.mubr.f32.gmra.mxu0 %v23094_v1  ;;  %9203 = vmatpush1.msra.mxu1 %v23177_v14  ;;  %v26806_v2 = vand.u32 4294901760, %v23192_v17 }
 0x2d8   :  { %v6687_v0 = vadd.f32 %v6686_v6, %v6575_v45  ;;  %9205 = vmatprep.subr.mxu1 %v23181_v35  ;;  %v6778_v25 = vpop.f32.mrf.mxu1  ;;  %8916 = vmatprep.mubr.f32.mxu0 %v26505_v30 }
 0x2d9   :  { %v6688_v49 = vpop.f32.mrf.mxu0  ;;  %v23281_v52 = vadd.f32 %v6778_v25, %v6675_v9  ;;  %9207 = vmatpush1.msra.mxu1 %v23185_v36  ;;  %9030 = vmatprep.mubr.f32.mxu1 %v26505_v30 }
 0x2da   :  { %v6689_v56 = vadd.f32 %v6688_v49, %v6577_v40  ;;  %9427 = vmatprep.subr.mxu1 %v23131_v33  ;;  %v6783_v27 = vpop.f32.mrf.mxu1  ;;  %18565 = vmatmul.mubr.msk.f32.gmra.mxu1 %vm6092_vm2, %v22981_v20 }
 0x2db   :  { %v23288_v45 = vadd.f32 %v6783_v27, %v6680_v7  ;;  %v6870_v3 = vpop.f32.mrf.mxu0  ;;  %8922 = vmatmul.mubr.f32.gmra.mxu0 %v23111_v31  ;;  %9037 = vmatprep.mubr.f32.mxu1 %v26505_v30 }
 0x2dc   :  { %v6785_v38 = vpop.f32.mrf.mxu1  ;;  %8927 = vmatprep.mubr.f32.mxu0 %v26505_v30 }
 0x2dd   :  { %26802 = vst [vmem:[#allocation29_spill] sm:$0xff] %v23288_v45  ;;  %v23293_v42 = vadd.f32 %v6785_v38, %v6682_v58  ;;  %v6872_v9 = vpop.f32.mrf.mxu0 }
 0x2de   :  { %v6790_v40 = vpop.f32.mrf.mxu1  ;;  %18566 = vmatmul.mubr.msk.f32.gmra.mxu1 %vm6092_vm2, %v23005_v4 }
 0x2df   :  { %26803 = vst [vmem:[#allocation34_spill] sm:$0xff] %v23293_v42  ;;  %v23297_v33 = vadd.f32 %v6790_v40, %v6687_v0  ;;  %v6881_v19 = vpop.f32.mrf.mxu0  ;;  %8933 = vmatmul.mubr.f32.gmra.mxu0 %v23129_v41  ;;  %9044 = vmatprep.mubr.f32.mxu1 %v26505_v30  ;;  %v26807_v0 = vand.u32 4294901760, %v23195_v60 }
 0x2e0   :  { %v6792_v18 = vpop.f32.mrf.mxu1  ;;  %9131 = vmatprep.mubr.f32.mxu0 %v26505_v30 }
 0x2e1   :  { %26804 = vst [vmem:[#allocation38_spill] sm:$0xff] %v23297_v33  ;;  %v23302_v43 = vadd.f32 %v6792_v18, %v6689_v56  ;;  %v6883_v7 = vpop.f32.mrf.mxu0  ;;  %v26808_v56 = vand.u32 4294901760, %v23200_v16 }
 0x2e2   :  { %v7006_v37 = vpop.f32.mrf.mxu1  ;;  %18567 = vmatmul.mubr.msk.f32.gmra.mxu1 %vm6092_vm2, %v23025_v46 }
 0x2e3   :  { %26805 = vst [vmem:[#allocation42_spill] sm:$0xff] %v23302_v43  ;;  %v6892_v24 = vpop.f32.mrf.mxu0  ;;  %v7007_v58 = vadd.f32 %v7006_v37, %v6870_v3  ;;  %9134 = vmatmul.mubr.f32.vlgmr.msra.gmra.mxu0 %v22996_v61  ;;  %9051 = vmatprep.mubr.f32.mxu1 %v26505_v30  ;;  %v26809_v37 = vld [vmem:[#allocation76_spill] sm:$0xff] }
 0x2e4   :  { %9321 = vmatpush1.msra.mxu0 %v26806_v2  ;;  %v7008_v6 = vpop.f32.mrf.mxu1  ;;  %9139 = vmatprep.mubr.f32.mxu0 %v26505_v30  ;;  %v23327_v2 = vand.u32 4294901760, %v26809_v37 }
 0x2e5   :  { %9325 = vmatprep.subr.mxu0 %v26807_v0  ;;  %v6894_v25 = vpop.f32.mrf.mxu0  ;;  %v7009_v49 = vadd.f32 %v7008_v6, %v6872_v9 }
 0x2e6   :  { %9329 = vmatpush1.msra.mxu0 %v26808_v56  ;;  %v7013_v27 = vpop.f32.mrf.mxu1  ;;  %18568 = vmatmul.mubr.msk.f32.gmra.mxu1 %vm6092_vm2, %v23048_v51 }
 0x2e7   :  { %v6903_v3 = vpop.f32.mrf.mxu0  ;;  %v7014_v38 = vadd.f32 %v7013_v27, %v6881_v19  ;;  %9142 = vmatmul.mubr.f32.gmra.mxu0 %v23016_v15  ;;  %9240 = vmatprep.mubr.f32.mxu1 %v26505_v30 }
 0x2e8   :  { %v7015_v17 = vpop.f32.mrf.mxu1  ;;  %9147 = vmatprep.mubr.f32.mxu0 %v26505_v30  ;;  %19333 = vmatprep.subr.mxu0 %v26505_v30 }
 0x2e9   :  { %v6905_v60 = vpop.f32.mrf.mxu0  ;;  %v7016_v9 = vadd.f32 %v7015_v17, %v6883_v7 }
 0x2ea   :  { %v7020_v40 = vpop.f32.mrf.mxu1  ;;  %9244 = vmatmul.mubr.f32.vlgmr.msra.gmra.mxu1 %v23014_v12 }
 0x2eb   :  { %v6914_v16 = vpop.f32.mrf.mxu0  ;;  %v7021_v18 = vadd.f32 %v7020_v40, %v6892_v24  ;;  %9150 = vmatmul.mubr.f32.gmra.mxu0 %v23041_v48  ;;  %9429 = vmatpush1.msra.mxu1 %v23177_v14  ;;  %v26810_v14 = vld [vmem:[#allocation74_spill] sm:$0xff] }
 0x2ec   :  { %9431 = vmatprep.subr.mxu1 %v23181_v35  ;;  %v7022_v19 = vpop.f32.mrf.mxu1  ;;  %9155 = vmatprep.mubr.f32.mxu0 %v26505_v30  ;;  %v23334_v24 = vand.u32 4294901760, %v26810_v14 }
 0x2ed   :  { %v6916_v6 = vpop.f32.mrf.mxu0  ;;  %v7023_v0 = vadd.f32 %v7022_v19, %v6894_v25  ;;  %9433 = vmatpush1.msra.mxu1 %v23185_v36  ;;  %9249 = vmatprep.mubr.f32.mxu1 %v26505_v30  ;;  %v23341_v36 = vsub.f32 %v26809_v37, %v23327_v2 }
 0x2ee   :  { %v7027_v7 = vpop.f32.mrf.mxu1  ;;  %9253 = vmatmul.mubr.f32.gmra.mxu1 %v23039_v21  ;;  %19352 = vmatprep.subr.mxu1 %v26505_v30 }
 0x2ef   :  { %v7028_v35 = vadd.f32 %v7027_v7, %v6903_v3  ;;  %v7115_v56 = vpop.f32.mrf.mxu0  ;;  %9158 = vmatmul.mubr.f32.gmra.mxu0 %v23063_v50  ;;  %9258 = vmatprep.mubr.f32.mxu1 %v26505_v30  ;;  %v23346_v3 = vsub.f32 %v26810_v14, %v23334_v24 }
 0x2f0   :  { %v7116_v27 = vadd.f32 %v7115_v56, %v7007_v58  ;;  %v7029_v25 = vpop.f32.mrf.mxu1  ;;  %9163 = vmatprep.mubr.f32.mxu0 %v26505_v30 }
 0x2f1   :  { %v7030_v17 = vadd.f32 %v7029_v25, %v6905_v60  ;;  %v7117_v40 = vpop.f32.mrf.mxu0  ;;  %v26369_v60 = vand.u32 4294901760, %v23341_v36  ;;  %v26370_v14 = vand.u32 4294901760, %v23346_v3 }
 0x2f2   :  { %v7118_v19 = vadd.f32 %v7117_v40, %v7009_v49  ;;  %v7034_v43 = vpop.f32.mrf.mxu1  ;;  %9262 = vmatmul.mubr.f32.gmra.mxu1 %v23061_v28 }
 0x2f3   :  { %v7035_v7 = vadd.f32 %v7034_v43, %v6914_v16  ;;  %v7123_v33 = vpop.f32.mrf.mxu0  ;;  %9166 = vmatmul.mubr.f32.gmra.mxu0 %v23080_v39  ;;  %9267 = vmatprep.mubr.f32.mxu1 %v26505_v30 }
 0x2f4   :  { %v7124_v58 = vadd.f32 %v7123_v33, %v7014_v38  ;;  %v7036_v56 = vpop.f32.mrf.mxu1  ;;  %9362 = vmatprep.mubr.f32.mxu0 %v26505_v30 }
 0x2f5   :  { %v7037_v49 = vadd.f32 %v7036_v56, %v6916_v6  ;;  %v7125_v37 = vpop.f32.mrf.mxu0 }
 0x2f6   :  { %v7126_v25 = vadd.f32 %v7125_v37, %v7016_v9  ;;  %v7225_v40 = vpop.f32.mrf.mxu1  ;;  %9271 = vmatmul.mubr.f32.gmra.mxu1 %v23078_v26  ;;  %v9651_v9 = vsub.f32 %v23341_v36, %v26369_v60 }
 0x2f7   :  { %v7131_v43 = vpop.f32.mrf.mxu0  ;;  %v7226_v16 = vadd.f32 %v7225_v40, %v7116_v27  ;;  %18569 = vmatmul.mubr.msk.f32.vlgmr.msra.gmra.mxu0 %vm6092_vm2, %v22960_v44  ;;  %9276 = vmatprep.mubr.f32.mxu1 %v26505_v30 }
 0x2f8   :  { %v7132_v33 = vadd.f32 %v7131_v43, %v7021_v18  ;;  %19334 = vmatpush3.msra.mxu0 %v23327_v2  ;;  %v7227_v38 = vpop.f32.mrf.mxu1  ;;  %9369 = vmatprep.mubr.f32.mxu0 %v26505_v30  ;;  %v9658_v18 = vsub.f32 %v23346_v3, %v26370_v14 }
 0x2f9   :  { %19335 = vmatprep.subr.mxu0 %v26505_v30  ;;  %v7133_v6 = vpop.f32.mrf.mxu0  ;;  %v7228_v56 = vadd.f32 %v7227_v38, %v7118_v19  ;;  %v9652_v38 = vand.u32 4294901760, %v9651_v9 }
 0x2fa   :  { %v7134_v27 = vadd.f32 %v7133_v6, %v7023_v0  ;;  %19336 = vmatpush3.msra.mxu0 %v23334_v24  ;;  %v7234_v37 = vpop.f32.mrf.mxu1  ;;  %9280 = vmatmul.mubr.f32.gmra.mxu1 %v23099_v47 }
 0x2fb   :  { %v7139_v40 = vpop.f32.mrf.mxu0  ;;  %v7235_v43 = vadd.f32 %v7234_v37, %v7124_v58  ;;  %18570 = vmatmul.mubr.msk.f32.gmra.mxu0 %vm6092_vm2, %v22981_v20  ;;  %9466 = vmatprep.mubr.f32.mxu1 %v26505_v30 }
 0x2fc   :  { %v7140_v60 = vadd.f32 %v7139_v40, %v7028_v35  ;;  %v7236_v42 = vpop.f32.mrf.mxu1  ;;  %9376 = vmatprep.mubr.f32.mxu0 %v26505_v30  ;;  %19371 = vmatprep.subr.mxu0 %v26505_v30  ;;  %v9659_v35 = vand.u32 4294901760, %v9658_v18 }
 0x2fd   :  { %v7141_v0 = vpop.f32.mrf.mxu0  ;;  %v7237_v19 = vadd.f32 %v7236_v42, %v7126_v25 }
 0x2fe   :  { %v7142_v6 = vadd.f32 %v7141_v0, %v7030_v17  ;;  %v7243_v45 = vpop.f32.mrf.mxu1  ;;  %18574 = vmatmul.mubr.msk.f32.vlgmr.msra.gmra.mxu1 %vm6092_vm2, %v22960_v44 }
 0x2ff   :  { %v7147_v58 = vpop.f32.mrf.mxu0  ;;  %v7244_v37 = vadd.f32 %v7243_v45, %v7132_v33  ;;  %18571 = vmatmul.mubr.msk.f32.gmra.mxu0 %vm6092_vm2, %v23005_v4  ;;  %19353 = vmatpush3.msra.mxu1 %v9652_v38 }
 0x300   :  { %v7148_v40 = vadd.f32 %v7147_v58, %v7035_v7  ;;  %19354 = vmatprep.subr.mxu1 %v26505_v30  ;;  %v7245_v14 = vpop.f32.mrf.mxu1  ;;  %9383 = vmatprep.mubr.f32.mxu0 %v26505_v30 }
 0x301   :  { %v7149_v42 = vpop.f32.mrf.mxu0  ;;  %v7246_v25 = vadd.f32 %v7245_v14, %v7134_v27  ;;  %19355 = vmatpush3.msra.mxu1 %v9659_v35  ;;  %9473 = vmatprep.mubr.f32.mxu1 %v26505_v30 }
 0x302   :  { %v7150_v17 = vadd.f32 %v7149_v42, %v7037_v49  ;;  %v7252_v9 = vpop.f32.mrf.mxu1  ;;  %18575 = vmatmul.mubr.msk.f32.gmra.mxu1 %vm6092_vm2, %v22981_v20  ;;  %19390 = vmatprep.subr.mxu1 %v26505_v30 }
 0x303   :  { %v7253_v45 = vadd.f32 %v7252_v9, %v7140_v60  ;;  %v7345_v33 = vpop.f32.mrf.mxu0  ;;  %18572 = vmatmul.mubr.msk.f32.gmra.mxu0 %vm6092_vm2, %v23025_v46  ;;  %9480 = vmatprep.mubr.f32.mxu1 %v26505_v30 }
 0x304   :  { %v7346_v7 = vadd.f32 %v7345_v33, %v7226_v16  ;;  %v7254_v18 = vpop.f32.mrf.mxu1  ;;  %9390 = vmatprep.mubr.f32.mxu0 %v26505_v30 }
 0x305   :  { %v7255_v14 = vadd.f32 %v7254_v18, %v7142_v6  ;;  %v7347_v27 = vpop.f32.mrf.mxu0 }
 0x306   :  { %v7348_v49 = vadd.f32 %v7347_v27, %v7228_v56  ;;  %v7261_v0 = vpop.f32.mrf.mxu1  ;;  %18576 = vmatmul.mubr.msk.f32.gmra.mxu1 %vm6092_vm2, %v23005_v4 }
 0x307   :  { %v7262_v38 = vadd.f32 %v7261_v0, %v7148_v40  ;;  %v7352_v58 = vpop.f32.mrf.mxu0  ;;  %18573 = vmatmul.mubr.msk.f32.gmra.mxu0 %vm6092_vm2, %v23048_v51  ;;  %9487 = vmatprep.mubr.f32.mxu1 %v26505_v30 }
 0x308   :  { %v7353_v60 = vadd.f32 %v7352_v58, %v7235_v43  ;;  %v7263_v35 = vpop.f32.mrf.mxu1  ;;  %19337 = vmatprep.mubr.msk.f32.mxu0 %vm19907_vm7, %v26505_v30 }
 0x309   :  { %v7264_v16 = vadd.f32 %v7263_v35, %v7150_v17  ;;  %v7354_v6 = vpop.f32.mrf.mxu0 }
 0x30a   :  { %v7355_v42 = vadd.f32 %v7354_v6, %v7237_v19  ;;  %v7449_v56 = vpop.f32.mrf.mxu1  ;;  %18577 = vmatmul.mubr.msk.f32.gmra.mxu1 %vm6092_vm2, %v23025_v46 }
 0x30b   :  { %v7359_v9 = vpop.f32.mrf.mxu0  ;;  %v23396_v40 = vadd.f32 %v7449_v56, %v7346_v7  ;;  %19338 = vmatmul.mubr.f32.vlgmr.msra.gmra.mxu0 %v23056_v34  ;;  %9494 = vmatprep.mubr.f32.mxu1 %v26505_v30 }
 0x30c   :  { %v7360_v33 = vadd.f32 %v7359_v9, %v7244_v37  ;;  %19372 = vmatpush3.msra.mxu0 %v23341_v36  ;;  %v7451_v43 = vpop.f32.mrf.mxu1  ;;  %19340 = vmatprep.mubr.msk.f32.mxu0 %vm19907_vm7, %v26505_v30 }
 0x30d   :  { %19373 = vmatprep.subr.mxu0 %v26505_v30  ;;  %v7361_v19 = vpop.f32.mrf.mxu0  ;;  %v23404_v17 = vadd.f32 %v7451_v43, %v7348_v49 }
 0x30e   :  { %v7362_v18 = vadd.f32 %v7361_v19, %v7246_v25  ;;  %19374 = vmatpush3.msra.mxu0 %v23346_v3  ;;  %v7456_v7 = vpop.f32.mrf.mxu1  ;;  %18578 = vmatmul.mubr.msk.f32.gmra.mxu1 %vm6092_vm2, %v23048_v51 }
 0x30f   :  { %v7366_v27 = vpop.f32.mrf.mxu0  ;;  %v23409_v37 = vadd.f32 %v7456_v7, %v7353_v60  ;;  %19341 = vmatmul.mubr.f32.gmra.mxu0 %v23073_v55  ;;  %19356 = vmatprep.mubr.msk.f32.mxu1 %vm19907_vm7, %v26505_v30 }
 0x310   :  { %v7367_v0 = vadd.f32 %v7366_v27, %v7253_v45  ;;  %v7458_v58 = vpop.f32.mrf.mxu1  ;;  %19343 = vmatprep.mubr.msk.f32.mxu0 %vm19907_vm7, %v26505_v30  ;;  %19409 = vmatprep.subr.mxu0 %v26505_v30 }
 0x311   :  { %v7368_v25 = vpop.f32.mrf.mxu0  ;;  %v23417_v49 = vadd.f32 %v7458_v58, %v7355_v42 }
 0x312   :  { %v7369_v35 = vadd.f32 %v7368_v25, %v7255_v14  ;;  %v7463_v6 = vpop.f32.mrf.mxu1  ;;  %19357 = vmatmul.mubr.msk.f32.vlgmr.msra.gmra.mxu1 %vm6092_vm2, %v22960_v44 }
 0x313   :  { %v7373_v60 = vpop.f32.mrf.mxu0  ;;  %v23421_v56 = vadd.f32 %v7463_v6, %v7360_v33  ;;  %19344 = vmatmul.mubr.f32.gmra.mxu0 %v23094_v1  ;;  %19391 = vmatpush3.msra.mxu1 %v23327_v2 }
 0x314   :  { %v7374_v45 = vadd.f32 %v7373_v60, %v7262_v38  ;;  %19392 = vmatprep.subr.mxu1 %v26505_v30  ;;  %v7465_v9 = vpop.f32.mrf.mxu1  ;;  %19346 = vmatprep.mubr.msk.f32.mxu0 %vm19907_vm7, %v26505_v30 }
 0x315   :  { %v7375_v42 = vpop.f32.mrf.mxu0  ;;  %v23428_v14 = vadd.f32 %v7465_v9, %v7362_v18  ;;  %19393 = vmatpush3.msra.mxu1 %v23334_v24  ;;  %19359 = vmatprep.mubr.msk.f32.mxu1 %vm19907_vm7, %v26505_v30  ;;  %v23442_v18 = vand.u32 4294901760, %v22730_v22 }
 0x316   :  { %v7376_v33 = vadd.f32 %v7375_v42, %v7264_v16  ;;  %v7470_v43 = vpop.f32.mrf.mxu1  ;;  %19360 = vmatmul.mubr.msk.f32.gmra.mxu1 %vm6092_vm2, %v22981_v20  ;;  %19428 = vmatprep.subr.mxu1 %v26505_v30 }
 0x317   :  { %v23436_v38 = vadd.f32 %v7470_v43, %v7367_v0  ;;  %v7555_v19 = vpop.f32.mrf.mxu0  ;;  %19347 = vmatmul.mubr.f32.gmra.mxu0 %v23111_v31  ;;  %19362 = vmatprep.mubr.msk.f32.mxu1 %vm19907_vm7, %v26505_v30  ;;  %v23457_v6 = vsub.f32 %v22730_v22, %v23442_v18  ;;  %v26811_v22 = vand.u32 4294901760, %v23341_v36 }
 0x318   :  { %v7472_v7 = vpop.f32.mrf.mxu1  ;;  %19349 = vmatprep.mubr.msk.f32.mxu0 %vm19907_vm7, %v26505_v30 }
 0x319   :  { %v23446_v16 = vadd.f32 %v7472_v7, %v7369_v35  ;;  %v19225_v27 = vpop.f32.mrf.mxu0 }
 0x31a   :  { %v7477_v58 = vpop.f32.mrf.mxu1  ;;  %19363 = vmatmul.mubr.msk.f32.gmra.mxu1 %vm6092_vm2, %v23005_v4 }
 0x31b   :  { %v23450_v0 = vadd.f32 %v7477_v58, %v7374_v45  ;;  %v7565_v25 = vpop.f32.mrf.mxu0  ;;  %19350 = vmatmul.mubr.f32.gmra.mxu0 %v23129_v41  ;;  %19365 = vmatprep.mubr.msk.f32.mxu1 %vm19907_vm7, %v26505_v30  ;;  %v26812_v58 = vand.u32 4294901760, %v23346_v3 }
 0x31c   :  { %v7479_v60 = vpop.f32.mrf.mxu1  ;;  %19375 = vmatprep.mubr.msk.f32.mxu0 %vm19907_vm7, %v26505_v30 }
 0x31d   :  { %v23461_v35 = vadd.f32 %v7479_v60, %v7376_v33  ;;  %v19228_v9 = vpop.f32.mrf.mxu0  ;;  %v26371_v33 = vand.u32 4294901760, %v23457_v6 }
 0x31e   :  { %v7676_v42 = vpop.f32.mrf.mxu1  ;;  %19366 = vmatmul.mubr.msk.f32.gmra.mxu1 %vm6092_vm2, %v23025_v46 }
 0x31f   :  { %v7575_v45 = vpop.f32.mrf.mxu0  ;;  %v7677_v43 = vadd.f32 %v7676_v42, %v7555_v19  ;;  %19376 = vmatmul.mubr.f32.vlgmr.msra.gmra.mxu0 %v22996_v61  ;;  %19368 = vmatprep.mubr.msk.f32.mxu1 %vm19907_vm7, %v26505_v30  ;;  %v10313_v3 = vsub.f32 %v23457_v6, %v26371_v33 }
 0x320   :  { %19410 = vmatpush3.msra.mxu0 %v26811_v22  ;;  %v19244_v7 = vpop.f32.mrf.mxu1  ;;  %19378 = vmatprep.mubr.msk.f32.mxu0 %vm19907_vm7, %v26505_v30 }
 0x321   :  { %19411 = vmatprep.subr.mxu0 %v26505_v30  ;;  %v19231_v27 = vpop.f32.mrf.mxu0 }
 0x322   :  { %19412 = vmatpush3.msra.mxu0 %v26812_v58  ;;  %v7682_v19 = vpop.f32.mrf.mxu1  ;;  %19369 = vmatmul.mubr.msk.f32.gmra.mxu1 %vm6092_vm2, %v23048_v51  ;;  %v10314_v58 = vand.u32 4294901760, %v10313_v3  ;;  %v23507_v3 = vand.u32 4294901760, %v22707_v62 }
 0x323   :  { %10187 = vmatprep.subr.mxu0 %v23442_v18  ;;  %v7585_v36 = vpop.f32.mrf.mxu0  ;;  %v7683_v60 = vadd.f32 %v7682_v19, %v7565_v25  ;;  %19379 = vmatmul.mubr.f32.gmra.mxu0 %v23016_v15  ;;  %v23494_v19 = vand.u32 4294901760, %v22720_v32 }
 0x324   :  { %v19247_v9 = vpop.f32.mrf.mxu1  ;;  %19381 = vmatprep.mubr.msk.f32.mxu0 %vm19907_vm7, %v26505_v30  ;;  %19394 = vmatprep.mubr.msk.f32.mxu1 %vm19907_vm7, %v26505_v30 }
 0x325   :  { %v19234_v42 = vpop.f32.mrf.mxu0 }
 0x326   :  { %v7688_v22 = vpop.f32.mrf.mxu1  ;;  %19395 = vmatmul.mubr.f32.vlgmr.msra.gmra.mxu1 %v23014_v12  ;;  %v23504_v42 = vadd.s32 2, %v26753_v57 }
 0x327   :  { %v7595_v7 = vpop.f32.mrf.mxu0  ;;  %v7689_v27 = vadd.f32 %v7688_v22, %v7575_v45  ;;  %19382 = vmatmul.mubr.f32.gmra.mxu0 %v23041_v48  ;;  %19429 = vmatpush3.msra.mxu1 %v23327_v2  ;;  %v23500_v45 = vand.u32 4294901760, %v22711_v29 }
 0x328   :  { %19430 = vmatprep.subr.mxu1 %v26505_v30  ;;  %v19250_v25 = vpop.f32.mrf.mxu1  ;;  %19384 = vmatprep.mubr.msk.f32.mxu0 %vm19907_vm7, %v26505_v30  ;;  %vm6056_vm13 = vcmp.eq.s32.totalorder %v26754_v5, %v23504_v42  ;;  %vm6057_vm14 = vcmp.eq.s32.totalorder %v26756_v54, %v23504_v42  ;;  %vm6058_vm15 = vcmp.eq.s32.totalorder %v26758_v53, %v23504_v42 }
 0x329   :  { %v19237_v9 = vpop.f32.mrf.mxu0  ;;  %19431 = vmatpush3.msra.mxu1 %v23334_v24  ;;  %19397 = vmatprep.mubr.msk.f32.mxu1 %vm19907_vm7, %v26505_v30  ;;  %v23520_v33 = vsub.f32 %v22711_v29, %v23500_v45  ;;  %vm6059_vm0 = vcmp.eq.s32.totalorder %v26761_v10, %v23504_v42  ;;  %vm6060_vm1 = vcmp.eq.s32.totalorder %v26765_v11, %v23504_v42 }
 0x32a   :  { %10315 = vmatprep.subr.mxu1 %v10314_v58  ;;  %v7694_v2 = vpop.f32.mrf.mxu1  ;;  %19398 = vmatmul.mubr.f32.gmra.mxu1 %v23039_v21  ;;  %v23516_v58 = vsub.f32 %v22720_v32, %v23494_v19 }
 0x32b   :  { %v7695_v22 = vadd.f32 %v7694_v2, %v7585_v36  ;;  %v7776_v25 = vpop.f32.mrf.mxu0  ;;  %19385 = vmatmul.mubr.f32.gmra.mxu0 %v23063_v50  ;;  %19400 = vmatprep.mubr.msk.f32.mxu1 %vm19907_vm7, %v26505_v30 }
 0x32c   :  { %v7777_v24 = vadd.f32 %v7776_v25, %v7677_v43  ;;  %v19253_v9 = vpop.f32.mrf.mxu1  ;;  %19387 = vmatprep.mubr.msk.f32.mxu0 %vm19907_vm7, %v26505_v30  ;;  %v23527_v43 = vsub.f32 %v22707_v62, %v23507_v3 }
 0x32d   :  { %v19263_v57 = vpop.f32.mrf.mxu0  ;;  %v26376_v9 = vand.u32 4294901760, %v23516_v58 }
 0x32e   :  { %v7700_v36 = vpop.f32.mrf.mxu1  ;;  %19401 = vmatmul.mubr.f32.gmra.mxu1 %v23061_v28  ;;  %v23536_v28 = vsel %vm6056_vm13, 1.0, %v26505_v30 }
 0x32f   :  { %v7701_v2 = vadd.f32 %v7700_v36, %v7595_v7  ;;  %v7783_v25 = vpop.f32.mrf.mxu0  ;;  %19388 = vmatmul.mubr.f32.gmra.mxu0 %v23080_v39  ;;  %19403 = vmatprep.mubr.msk.f32.mxu1 %vm19907_vm7, %v26505_v30  ;;  %26813 = vst [vmem:[#allocation46_spill] sm:$0xff] %v23536_v28  ;;  %v26381_v7 = vand.u32 4294901760, %v23520_v33  ;;  %v10144_v54 = vsel %vm6092_vm2, %v23536_v28, 0 }
 0x330   :  { %v7784_v32 = vadd.f32 %v7783_v25, %v7683_v60  ;;  %v19256_v29 = vpop.f32.mrf.mxu1  ;;  %19413 = vmatprep.mubr.msk.f32.mxu0 %vm19907_vm7, %v26505_v30  ;;  %v23553_v60 = vsel %vm6057_vm14, 1.0, %v26505_v30  ;;  %v23572_v39 = vsub.f32 %v10144_v54, %v10144_v54 }
 0x331   :  { %v19266_v57 = vpop.f32.mrf.mxu0  ;;  %26814 = vst [vmem:[#allocation51_spill] sm:$0xff] %v23553_v60 }
 0x332   :  { %v7879_v62 = vpop.f32.mrf.mxu1  ;;  %19404 = vmatmul.mubr.f32.gmra.mxu1 %v23078_v26  ;;  %26816 = vst [vmem:[#allocation52_spill] sm:$0xff] %v23572_v39 }
 0x333   :  { %v7790_v36 = vpop.f32.mrf.mxu0  ;;  %v7880_v25 = vadd.f32 %v7879_v62, %v7777_v24  ;;  %19414 = vmatmul.mubr.msk.f32.vlgmr.msra.gmra.mxu0 %vm6092_vm2, %v22960_v44  ;;  %19406 = vmatprep.mubr.msk.f32.mxu1 %vm19907_vm7, %v26505_v30  ;;  %v10319_v24 = vsub.f32 %v23516_v58, %v26376_v9 }
 0x334   :  { %v7791_v29 = vadd.f32 %v7790_v36, %v7689_v27  ;;  %10189 = vmatpush1.msra.mxu0 %v23494_v19  ;;  %v19282_v57 = vpop.f32.mrf.mxu1  ;;  %19416 = vmatprep.mubr.msk.f32.mxu0 %vm19907_vm7, %v26505_v30  ;;  %v10325_v36 = vsub.f32 %v23520_v33, %v26381_v7 }
 0x335   :  { %10191 = vmatprep.subr.mxu0 %v23500_v45  ;;  %v19269_v62 = vpop.f32.mrf.mxu0  ;;  %v26815_v57 = vand.u32 4294901760, %v23527_v43 }
 0x336   :  { %10193 = vmatpush1.msra.mxu0 %v23507_v3  ;;  %v7887_v27 = vpop.f32.mrf.mxu1  ;;  %19407 = vmatmul.mubr.f32.gmra.mxu1 %v23099_v47  ;;  %v10147_v47 = vsel %vm6092_vm2, %v23553_v60, 0  ;;  %v10326_v54 = vand.u32 4294901760, %v10325_v36 }
 0x337   :  { %v10331_v26 = vsub.f32 %v23527_v43, %v26815_v57  ;;  %10432 = vmatprep.subr.mxu0 %v23457_v6  ;;  %v7797_v9 = vpop.f32.mrf.mxu0  ;;  %v7888_v62 = vadd.f32 %v7887_v27, %v7784_v32  ;;  %19417 = vmatmul.mubr.msk.f32.gmra.mxu0 %vm6092_vm2, %v22981_v20  ;;  %v10320_v57 = vand.u32 4294901760, %v10319_v24  ;;  %v23581_v32 = vsel %vm6058_vm15, 1.0, %v26505_v30 }
 0x338   :  { %v7798_v7 = vadd.f32 %v7797_v9, %v7695_v22  ;;  %v19285_v50 = vpop.f32.mrf.mxu1  ;;  %19419 = vmatprep.mubr.msk.f32.mxu0 %vm19907_vm7, %v26505_v30  ;;  %19432 = vmatprep.mubr.msk.f32.mxu1 %vm19907_vm7, %v26505_v30  ;;  %26817 = vst [vmem:[#allocation49_spill] sm:$0xff] %v23581_v32  ;;  %v23585_v21 = vsub.f32 %v10147_v47, %v10147_v47  ;;  %v23592_v24 = vand.u32 4294901760, %v23572_v39  ;;  %v10150_v47 = vsel %vm6092_vm2, %v23581_v32, 0 }
 0x339   :  { %v19272_v53 = vpop.f32.mrf.mxu0  ;;  %v10332_v9 = vand.u32 4294901760, %v10331_v26 }
 0x33a   :  { %v7895_v27 = vpop.f32.mrf.mxu1  ;;  %19433 = vmatmul.mubr.msk.f32.vlgmr.msra.gmra.mxu1 %vm6092_vm2, %v22960_v44  ;;  %26818 = vst [vmem:[#allocation76_spill] sm:$0xff] %v23585_v21  ;;  %26819 = vst [vmem:[#allocation74_spill] sm:$0xff] %v23592_v24 }
 0x33b   :  { %v7804_v50 = vpop.f32.mrf.mxu0  ;;  %v7896_v22 = vadd.f32 %v7895_v27, %v7791_v29  ;;  %19420 = vmatmul.mubr.msk.f32.gmra.mxu0 %vm6092_vm2, %v23005_v4  ;;  %10321 = vmatpush1.msra.mxu1 %v10320_v57  ;;  %v23601_v29 = vsel %vm6059_vm0, 1.0, %v26505_v30  ;;  %v10230_v57 = vsub.f32 %v23572_v39, %v23592_v24  ;;  %v23617_v27 = vsub.f32 %v10150_v47, %v10150_v47 }
 0x33c   :  { %v7805_v53 = vadd.f32 %v7804_v50, %v7701_v2  ;;  %10327 = vmatprep.subr.mxu1 %v10326_v54  ;;  %v19288_v48 = vpop.f32.mrf.mxu1  ;;  %19422 = vmatprep.mubr.msk.f32.mxu0 %vm19907_vm7, %v26505_v30  ;;  %26820 = vst [vmem:[#allocation140_spill] sm:$0xff] %v23601_v29  ;;  %v10153_v11 = vsel %vm6092_vm2, %v23601_v29, 0 }
 0x33d   :  { %v19275_v10 = vpop.f32.mrf.mxu0  ;;  %10333 = vmatpush1.msra.mxu1 %v10332_v9  ;;  %19435 = vmatprep.mubr.msk.f32.mxu1 %vm19907_vm7, %v26505_v30  ;;  %v23607_v48 = vand.u32 4294901760, %v23585_v21  ;;  %26822 = vst [vmem:[#allocation142_spill] sm:$0xff] %v23617_v27 }
 0x33e   :  { %10544 = vmatprep.subr.mxu1 %v23442_v18  ;;  %v7903_v26 = vpop.f32.mrf.mxu1  ;;  %19436 = vmatmul.mubr.msk.f32.gmra.mxu1 %vm6092_vm2, %v22981_v20 }
 0x33f   :  { %26821 = vst [vmem:[#allocation141_spill] sm:$0xff] %v23607_v48  ;;  %v7904_v2 = vadd.f32 %v7903_v26, %v7798_v7  ;;  %v7988_v36 = vpop.f32.mrf.mxu0  ;;  %19423 = vmatmul.mubr.msk.f32.gmra.mxu0 %vm6092_vm2, %v23025_v46  ;;  %19438 = vmatprep.mubr.msk.f32.mxu1 %vm19907_vm7, %v26505_v30  ;;  %v23624_v7 = vsel %vm6060_vm1, 1.0, %v26505_v30  ;;  %v10241_v47 = vsub.f32 %v23585_v21, %v23607_v48  ;;  %v23634_v26 = vand.u32 4294901760, %v10230_v57 }
 0x340   :  { %v7989_v54 = vadd.f32 %v7988_v36, %v7880_v25  ;;  %v19291_v50 = vpop.f32.mrf.mxu1  ;;  %19425 = vmatprep.mubr.msk.f32.mxu0 %vm19907_vm7, %v26505_v30  ;;  %26823 = vst [vmem:[#allocation143_spill] sm:$0xff] %v23624_v7  ;;  %v23637_v36 = vand.u32 4294901760, %v23617_v27 }
 0x341   :  { %v19301_v42 = vpop.f32.mrf.mxu0  ;;  %26824 = vst [vmem:[#allocation144_spill] sm:$0xff] %v23634_v26  ;;  %v23639_v50 = vsub.f32 %v10153_v11, %v10153_v11  ;;  %v23646_v61 = vand.u32 4294901760, %v10241_v47 }
 0x342   :  { %v7911_v9 = vpop.f32.mrf.mxu1  ;;  %19439 = vmatmul.mubr.msk.f32.gmra.mxu1 %vm6092_vm2, %v23005_v4  ;;  %26825 = vst [vmem:[#allocation145_spill] sm:$0xff] %v23637_v36 }
 0x343   :  { %v7912_v10 = vadd.f32 %v7911_v9, %v7805_v53  ;;  %v7994_v25 = vpop.f32.mrf.mxu0  ;;  %19426 = vmatmul.mubr.msk.f32.gmra.mxu0 %vm6092_vm2, %v23048_v51  ;;  %19441 = vmatprep.mubr.msk.f32.mxu1 %vm19907_vm7, %v26505_v30  ;;  %26826 = vst [vmem:[#allocation146_spill] sm:$0xff] %v23639_v50  ;;  %v10156_v53 = vsel %vm6092_vm2, %v23624_v7, 0  ;;  %26827 = vst [vmem:[#allocation147_spill] sm:$0xff] %v23646_v61 }
 0x344   :  { %v7995_v42 = vadd.f32 %v7994_v25, %v7888_v62  ;;  %v19294_v12 = vpop.f32.mrf.mxu1  ;;  %10226 = vmatprep.mubr.f32.mxu0 %v26505_v30  ;;  %v23656_v62 = vand.u32 4294901760, %v23639_v50  ;;  %v23658_v11 = vsub.f32 %v10156_v53, %v10156_v53 }
 0x345   :  { %v19304_v9 = vpop.f32.mrf.mxu0  ;;  %v10252_v12 = vsub.f32 %v23617_v27, %v23637_v36 }
 0x346   :  { %v8085_v15 = vpop.f32.mrf.mxu1  ;;  %19442 = vmatmul.mubr.msk.f32.gmra.mxu1 %vm6092_vm2, %v23025_v46  ;;  %26829 = vst [vmem:[#allocation149_spill] sm:$0xff] %v23656_v62  ;;  %26830 = vst [vmem:[#allocation150_spill] sm:$0xff] %v23658_v11  ;;  %v26831_v9 = vand.u32 4294901760, %v23457_v6 }
 0x347   :  { %v8000_v57 = vpop.f32.mrf.mxu0  ;;  %v23648_v41 = vadd.f32 %v8085_v15, %v7989_v54  ;;  %10232 = vmatmul.mubr.f32.vlgmr.msra.gmra.mxu0 %v23634_v26  ;;  %19444 = vmatprep.mubr.msk.f32.mxu1 %vm19907_vm7, %v26505_v30 }
 0x348   :  { %v8001_v25 = vadd.f32 %v8000_v57, %v7896_v22  ;;  %10435 = vmatpush1.msra.mxu0 %v23516_v58  ;;  %v19320_v47 = vpop.f32.mrf.mxu1  ;;  %10237 = vmatprep.mubr.f32.mxu0 %v26505_v30  ;;  %v23671_v22 = vand.u32 4294901760, %v10252_v12  ;;  %v10263_v57 = vsub.f32 %v23639_v50, %v23656_v62 }
 0x349   :  { %26828 = vst [vmem:[#allocation148_spill] sm:$0xff] %v23648_v41  ;;  %10438 = vmatprep.subr.mxu0 %v23520_v33  ;;  %v19307_v15 = vpop.f32.mrf.mxu0  ;;  %v23676_v47 = vand.u32 4294901760, %v23658_v11 }
 0x34a   :  { %10441 = vmatpush1.msra.mxu0 %v23527_v43  ;;  %v8091_v54 = vpop.f32.mrf.mxu1  ;;  %19445 = vmatmul.mubr.msk.f32.gmra.mxu1 %vm6092_vm2, %v23048_v51  ;;  %26833 = vst [vmem:[#allocation152_spill] sm:$0xff] %v23671_v22 }
 0x34b   :  { %10660 = vmatprep.subr.mxu0 %v26831_v9  ;;  %v8006_v53 = vpop.f32.mrf.mxu0  ;;  %v23668_v46 = vadd.f32 %v8091_v54, %v7995_v42  ;;  %10243 = vmatmul.mubr.f32.gmra.mxu0 %v23646_v61  ;;  %26834 = vst [vmem:[#allocation153_spill] sm:$0xff] %v23676_v47  ;;  %v23686_v54 = vand.u32 4294901760, %v10263_v57 }
 0x34c   :  { %v8007_v15 = vadd.f32 %v8006_v53, %v7904_v2  ;;  %v19323_v4 = vpop.f32.mrf.mxu1  ;;  %10248 = vmatprep.mubr.f32.mxu0 %v26505_v30  ;;  %10366 = vmatprep.mubr.f32.mxu1 %v26505_v30 }
 0x34d   :  { %26832 = vst [vmem:[#allocation151_spill] sm:$0xff] %v23668_v46  ;;  %v19310_v6 = vpop.f32.mrf.mxu0  ;;  %26836 = vst [vmem:[#allocation155_spill] sm:$0xff] %v23686_v54  ;;  %v10274_v4 = vsub.f32 %v23658_v11, %v23676_v47 }
 0x34e   :  { %v8097_v9 = vpop.f32.mrf.mxu1  ;;  %18594 = vmatmul.mubr.msk.f32.vlgmr.msra.gmra.mxu1 %vm6092_vm2, %v23536_v28 }
 0x34f   :  { %v8012_v42 = vpop.f32.mrf.mxu0  ;;  %v23682_v12 = vadd.f32 %v8097_v9, %v8001_v25  ;;  %10254 = vmatmul.mubr.f32.gmra.mxu0 %v23671_v22  ;;  %10546 = vmatpush1.msra.mxu1 %v23494_v19 }
 0x350   :  { %v8013_v2 = vadd.f32 %v8012_v42, %v7912_v10  ;;  %10548 = vmatprep.subr.mxu1 %v23500_v45  ;;  %v19326_v53 = vpop.f32.mrf.mxu1  ;;  %10259 = vmatprep.mubr.f32.mxu0 %v26505_v30  ;;  %v23701_v10 = vand.u32 4294901760, %v10274_v4  ;;  %v26839_v42 = vld [vmem:[#allocation15_spill] sm:$0xff] }
 0x351   :  { %26835 = vst [vmem:[#allocation154_spill] sm:$0xff] %v23682_v12  ;;  %v19313_v6 = vpop.f32.mrf.mxu0  ;;  %10550 = vmatpush1.msra.mxu1 %v23507_v3  ;;  %10373 = vmatprep.mubr.f32.mxu1 %v26505_v30  ;;  %v23704_v53 = vand.u32 4294901760, %v26839_v42 }
 0x352   :  { %10770 = vmatprep.subr.mxu1 %v23442_v18  ;;  %v8103_v25 = vpop.f32.mrf.mxu1  ;;  %18595 = vmatmul.mubr.msk.f32.gmra.mxu1 %vm6092_vm2, %v23553_v60  ;;  %26838 = vst [vmem:[#allocation157_spill] sm:$0xff] %v23701_v10 }
 0x353   :  { %v23697_v57 = vadd.f32 %v8103_v25, %v8007_v15  ;;  %v8203_v9 = vpop.f32.mrf.mxu0  ;;  %10265 = vmatmul.mubr.f32.gmra.mxu0 %v23686_v54  ;;  %10380 = vmatprep.mubr.f32.mxu1 %v26505_v30 }
 0x354   :  { %v8204_v6 = vadd.f32 %v8203_v9, %v23252_v63  ;;  %v19329_v51 = vpop.f32.mrf.mxu1  ;;  %10270 = vmatprep.mubr.f32.mxu0 %v26505_v30  ;;  %v23717_v63 = vsub.f32 %v26839_v42, %v23704_v53 }
 0x355   :  { %26837 = vst [vmem:[#allocation156_spill] sm:$0xff] %v23697_v57  ;;  %v8205_v18 = vpop.f32.mrf.mxu0 }
 0x356   :  { %v8206_v31 = vadd.f32 %v8205_v18, %v23259_v13  ;;  %v8109_v15 = vpop.f32.mrf.mxu1  ;;  %18596 = vmatmul.mubr.msk.f32.gmra.mxu1 %vm6092_vm2, %v23581_v32 }
 0x357   :  { %v23711_v25 = vadd.f32 %v8109_v15, %v8013_v2  ;;  %v8214_v20 = vpop.f32.mrf.mxu0  ;;  %10276 = vmatmul.mubr.f32.gmra.mxu0 %v23701_v10  ;;  %10387 = vmatprep.mubr.f32.mxu1 %v26505_v30 }
 0x358   :  { %v8215_v51 = vadd.f32 %v8214_v20, %v23266_v8  ;;  %v19332_v4 = vpop.f32.mrf.mxu1  ;;  %10474 = vmatprep.mubr.f32.mxu0 %v26505_v30  ;;  %v26841_v20 = vand.u32 4294901760, %v23516_v58 }
 0x359   :  { %26840 = vst [vmem:[#allocation15_spill] sm:$0xff] %v23711_v25  ;;  %v8216_v13 = vpop.f32.mrf.mxu0  ;;  %v26842_v4 = vand.u32 4294901760, %v23520_v33 }
 0x35a   :  { %v8217_v9 = vadd.f32 %v8216_v13, %v23271_v23  ;;  %v8339_v18 = vpop.f32.mrf.mxu1  ;;  %18597 = vmatmul.mubr.msk.f32.gmra.mxu1 %vm6092_vm2, %v23601_v29  ;;  %v26410_v23 = vand.u32 4294901760, %v23717_v63 }
 0x35b   :  { %v8225_v2 = vpop.f32.mrf.mxu0  ;;  %v8340_v15 = vadd.f32 %v8339_v18, %v8204_v6  ;;  %10477 = vmatmul.mubr.f32.vlgmr.msra.gmra.mxu0 %v23572_v39  ;;  %10394 = vmatprep.mubr.f32.mxu1 %v26505_v30  ;;  %v26843_v18 = vand.u32 4294901760, %v23527_v43 }
 0x35c   :  { %v8226_v42 = vadd.f32 %v8225_v2, %v23275_v59  ;;  %10664 = vmatpush1.msra.mxu0 %v26841_v20  ;;  %v8341_v8 = vpop.f32.mrf.mxu1  ;;  %10482 = vmatprep.mubr.f32.mxu0 %v26505_v30  ;;  %v26844_v2 = vld [vmem:[#allocation29_spill] sm:$0xff] }
 0x35d   :  { %10668 = vmatprep.subr.mxu0 %v26842_v4  ;;  %v8227_v13 = vpop.f32.mrf.mxu0  ;;  %v8342_v1 = vadd.f32 %v8341_v8, %v8206_v31  ;;  %v11000_v31 = vsub.f32 %v23717_v63, %v26410_v23  ;;  %v26845_v8 = vld [vmem:[#allocation34_spill] sm:$0xff] }
 0x35e   :  { %v8228_v6 = vadd.f32 %v8227_v13, %v23281_v52  ;;  %10672 = vmatpush1.msra.mxu0 %v26843_v18  ;;  %v8346_v44 = vpop.f32.mrf.mxu1  ;;  %18598 = vmatmul.mubr.msk.f32.gmra.mxu1 %vm6092_vm2, %v23624_v7  ;;  %v26846_v18 = vld [vmem:[#allocation38_spill] sm:$0xff] }
 0x35f   :  { %10874 = vmatprep.subr.mxu0 %v23704_v53  ;;  %v8236_v59 = vpop.f32.mrf.mxu0  ;;  %v8347_v58 = vadd.f32 %v8346_v44, %v8215_v51  ;;  %10485 = vmatmul.mubr.f32.gmra.mxu0 %v23585_v21  ;;  %v11001_v23 = vand.u32 4294901760, %v11000_v31 }
 0x360   :  { %v8237_v33 = vadd.f32 %v8236_v59, %v26844_v2  ;;  %v8348_v20 = vpop.f32.mrf.mxu1  ;;  %10490 = vmatprep.mubr.f32.mxu0 %v26505_v30  ;;  %10583 = vmatprep.mubr.f32.mxu1 %v26505_v30 }
 0x361   :  { %v8238_v52 = vpop.f32.mrf.mxu0  ;;  %v8349_v43 = vadd.f32 %v8348_v20, %v8217_v9  ;;  %v26847_v9 = vld [vmem:[#allocation12_spill] sm:$0xff] }
 0x362   :  { %v8239_v4 = vadd.f32 %v8238_v52, %v26845_v8  ;;  %v8353_v13 = vpop.f32.mrf.mxu1  ;;  %10587 = vmatmul.mubr.f32.vlgmr.msra.gmra.mxu1 %v23592_v24  ;;  %v23754_v20 = vand.u32 4294901760, %v26847_v9 }
 0x363   :  { %v8247_v44 = vpop.f32.mrf.mxu0  ;;  %v8354_v51 = vadd.f32 %v8353_v13, %v8226_v42  ;;  %10493 = vmatmul.mubr.f32.gmra.mxu0 %v23617_v27  ;;  %10772 = vmatpush1.msra.mxu1 %v23494_v19  ;;  %v26848_v42 = vld [vmem:[#allocation7_spill] sm:$0xff]  ;;  %v26849_v19 = vld [vmem:[#allocation42_spill] sm:$0xff] }
 0x364   :  { %v8248_v59 = vadd.f32 %v8247_v44, %v26846_v18  ;;  %10774 = vmatprep.subr.mxu1 %v23500_v45  ;;  %v8355_v2 = vpop.f32.mrf.mxu1  ;;  %10498 = vmatprep.mubr.f32.mxu0 %v26505_v30  ;;  %v23759_v13 = vand.u32 4294901760, %v26848_v42  ;;  %v26850_v18 = vld [vmem:[#allocation4_spill] sm:$0xff] }
 0x365   :  { %v8249_v52 = vpop.f32.mrf.mxu0  ;;  %v8356_v8 = vadd.f32 %v8355_v2, %v8228_v6  ;;  %10776 = vmatpush1.msra.mxu1 %v23507_v3  ;;  %10592 = vmatprep.mubr.f32.mxu1 %v26505_v30  ;;  %v23764_v31 = vand.u32 4294901760, %v26850_v18  ;;  %v23771_v2 = vsub.f32 %v26847_v9, %v23754_v20 }
 0x366   :  { %v8250_v44 = vadd.f32 %v8249_v52, %v26849_v19  ;;  %11002 = vmatprep.subr.mxu1 %v11001_v23  ;;  %v8360_v45 = vpop.f32.mrf.mxu1  ;;  %10596 = vmatmul.mubr.f32.gmra.mxu1 %v23607_v48  ;;  %v23775_v19 = vsub.f32 %v26848_v42, %v23759_v13 }
 0x367   :  { %v8361_v55 = vadd.f32 %v8360_v45, %v8237_v33  ;;  %v8448_v34 = vpop.f32.mrf.mxu0  ;;  %10501 = vmatmul.mubr.f32.gmra.mxu0 %v23639_v50  ;;  %10601 = vmatprep.mubr.f32.mxu1 %v26505_v30  ;;  %v26416_v42 = vand.u32 4294901760, %v23771_v2 }
 0x368   :  { %v8449_v3 = vadd.f32 %v8448_v34, %v8340_v15  ;;  %v8362_v6 = vpop.f32.mrf.mxu1  ;;  %10506 = vmatprep.mubr.f32.mxu0 %v26505_v30  ;;  %v23780_v34 = vsub.f32 %v26850_v18, %v23764_v31  ;;  %v26417_v18 = vand.u32 4294901760, %v23775_v19 }
 0x369   :  { %v8363_v23 = vadd.f32 %v8362_v6, %v8239_v4  ;;  %v8450_v52 = vpop.f32.mrf.mxu0 }
 0x36a   :  { %v8451_v33 = vadd.f32 %v8450_v52, %v8342_v1  ;;  %v8367_v45 = vpop.f32.mrf.mxu1  ;;  %10605 = vmatmul.mubr.f32.gmra.mxu1 %v23637_v36 }
 0x36b   :  { %v8368_v15 = vadd.f32 %v8367_v45, %v8248_v59  ;;  %v8456_v5 = vpop.f32.mrf.mxu0  ;;  %10509 = vmatmul.mubr.f32.gmra.mxu0 %v23658_v11  ;;  %10610 = vmatprep.mubr.f32.mxu1 %v26505_v30  ;;  %v26418_v59 = vand.u32 4294901760, %v23780_v34 }
 0x36c   :  { %v8457_v4 = vadd.f32 %v8456_v5, %v8347_v58  ;;  %v8369_v9 = vpop.f32.mrf.mxu1  ;;  %10705 = vmatprep.mubr.f32.mxu0 %v26505_v30 }
 0x36d   :  { %v8370_v1 = vadd.f32 %v8369_v9, %v8250_v44  ;;  %v8458_v6 = vpop.f32.mrf.mxu0 }
 0x36e   :  { %v8459_v52 = vadd.f32 %v8458_v6, %v8349_v43  ;;  %v8558_v25 = vpop.f32.mrf.mxu1  ;;  %10614 = vmatmul.mubr.f32.gmra.mxu1 %v23656_v62  ;;  %v11006_v43 = vsub.f32 %v23771_v2, %v26416_v42  ;;  %v11018_v6 = vsub.f32 %v23780_v34, %v26418_v59 }
 0x36f   :  { %v8464_v45 = vpop.f32.mrf.mxu0  ;;  %v8559_v57 = vadd.f32 %v8558_v25, %v8449_v3  ;;  %18599 = vmatmul.mubr.msk.f32.vlgmr.msra.gmra.mxu0 %vm6092_vm2, %v23536_v28  ;;  %10619 = vmatprep.mubr.f32.mxu1 %v26505_v30 }
 0x370   :  { %v8465_v5 = vadd.f32 %v8464_v45, %v8354_v51  ;;  %10876 = vmatpush1.msra.mxu0 %v23754_v20  ;;  %v8560_v58 = vpop.f32.mrf.mxu1  ;;  %10712 = vmatprep.mubr.f32.mxu0 %v26505_v30  ;;  %v11012_v51 = vsub.f32 %v23775_v19, %v26417_v18  ;;  %v11007_v18 = vand.u32 4294901760, %v11006_v43 }
 0x371   :  { %10878 = vmatprep.subr.mxu0 %v23759_v13  ;;  %v8466_v44 = vpop.f32.mrf.mxu0  ;;  %v8561_v9 = vadd.f32 %v8560_v58, %v8451_v33 }
 0x372   :  { %v8467_v25 = vadd.f32 %v8466_v44, %v8356_v8  ;;  %10880 = vmatpush1.msra.mxu0 %v23764_v31  ;;  %v8567_v3 = vpop.f32.mrf.mxu1  ;;  %10623 = vmatmul.mubr.f32.gmra.mxu1 %v23676_v47  ;;  %v11013_v59 = vand.u32 4294901760, %v11012_v51 }
 0x373   :  { %11119 = vmatprep.subr.mxu0 %v23717_v63  ;;  %v8472_v45 = vpop.f32.mrf.mxu0  ;;  %v8568_v42 = vadd.f32 %v8567_v3, %v8457_v4  ;;  %18600 = vmatmul.mubr.msk.f32.gmra.mxu0 %vm6092_vm2, %v23553_v60 }
 0x374   :  { %v8473_v8 = vadd.f32 %v8472_v45, %v8361_v55  ;;  %v8569_v33 = vpop.f32.mrf.mxu1  ;;  %10719 = vmatprep.mubr.f32.mxu0 %v26505_v30  ;;  %10809 = vmatprep.mubr.f32.mxu1 %v26505_v30  ;;  %v11019_v55 = vand.u32 4294901760, %v11018_v6 }
 0x375   :  { %v8474_v58 = vpop.f32.mrf.mxu0  ;;  %v8570_v44 = vadd.f32 %v8569_v33, %v8459_v52 }
 0x376   :  { %v8475_v12 = vadd.f32 %v8474_v58, %v8363_v23  ;;  %v8576_v46 = vpop.f32.mrf.mxu1  ;;  %18604 = vmatmul.mubr.msk.f32.vlgmr.msra.gmra.mxu1 %vm6092_vm2, %v23536_v28 }
 0x377   :  { %v8480_v41 = vpop.f32.mrf.mxu0  ;;  %v8577_v4 = vadd.f32 %v8576_v46, %v8465_v5  ;;  %18601 = vmatmul.mubr.msk.f32.gmra.mxu0 %vm6092_vm2, %v23581_v32  ;;  %11008 = vmatpush1.msra.mxu1 %v11007_v18 }
 0x378   :  { %v8481_v3 = vadd.f32 %v8480_v41, %v8368_v15  ;;  %11014 = vmatprep.subr.mxu1 %v11013_v59  ;;  %v8578_v45 = vpop.f32.mrf.mxu1  ;;  %10726 = vmatprep.mubr.f32.mxu0 %v26505_v30 }
 0x379   :  { %v8482_v52 = vpop.f32.mrf.mxu0  ;;  %v8579_v43 = vadd.f32 %v8578_v45, %v8467_v25  ;;  %11020 = vmatpush1.msra.mxu1 %v11019_v55  ;;  %10816 = vmatprep.mubr.f32.mxu1 %v26505_v30 }
 0x37a   :  { %v8483_v23 = vadd.f32 %v8482_v52, %v8370_v1  ;;  %11231 = vmatprep.subr.mxu1 %v23704_v53  ;;  %v8585_v51 = vpop.f32.mrf.mxu1  ;;  %18605 = vmatmul.mubr.msk.f32.gmra.mxu1 %vm6092_vm2, %v23553_v60 }
 0x37b   :  { %v8586_v46 = vadd.f32 %v8585_v51, %v8473_v8  ;;  %v8678_v18 = vpop.f32.mrf.mxu0  ;;  %18602 = vmatmul.mubr.msk.f32.gmra.mxu0 %vm6092_vm2, %v23601_v29  ;;  %10823 = vmatprep.mubr.f32.mxu1 %v26505_v30 }
 0x37c   :  { %v8679_v41 = vadd.f32 %v8678_v18, %v8559_v57  ;;  %v8587_v15 = vpop.f32.mrf.mxu1  ;;  %10733 = vmatprep.mubr.f32.mxu0 %v26505_v30 }
 0x37d   :  { %v8588_v59 = vadd.f32 %v8587_v15, %v8475_v12  ;;  %v8680_v5 = vpop.f32.mrf.mxu0 }
 0x37e   :  { %v8681_v1 = vadd.f32 %v8680_v5, %v8561_v9  ;;  %v8594_v25 = vpop.f32.mrf.mxu1  ;;  %18606 = vmatmul.mubr.msk.f32.gmra.mxu1 %vm6092_vm2, %v23581_v32 }
 0x37f   :  { %v8595_v6 = vadd.f32 %v8594_v25, %v8481_v3  ;;  %v8685_v33 = vpop.f32.mrf.mxu0  ;;  %18603 = vmatmul.mubr.msk.f32.gmra.mxu0 %vm6092_vm2, %v23624_v7  ;;  %10830 = vmatprep.mubr.f32.mxu1 %v26505_v30 }
 0x380   :  { %v8686_v8 = vadd.f32 %v8685_v33, %v8568_v42  ;;  %v8596_v58 = vpop.f32.mrf.mxu1  ;;  %10913 = vmatprep.mubr.f32.mxu0 %v26505_v30 }
 0x381   :  { %v8597_v57 = vadd.f32 %v8596_v58, %v8483_v23  ;;  %v8687_v55 = vpop.f32.mrf.mxu0 }
 0x382   :  { %v8688_v12 = vadd.f32 %v8687_v55, %v8570_v44  ;;  %v8782_v45 = vpop.f32.mrf.mxu1  ;;  %18607 = vmatmul.mubr.msk.f32.gmra.mxu1 %vm6092_vm2, %v23601_v29 }
 0x383   :  { %v8692_v9 = vpop.f32.mrf.mxu0  ;;  %v23832_v52 = vadd.f32 %v8782_v45, %v8679_v41  ;;  %10919 = vmatmul.mubr.f32.vlgmr.msra.gmra.mxu0 %v23634_v26  ;;  %10837 = vmatprep.mubr.f32.mxu1 %v26505_v30  ;;  %v26851_v41 = vand.u32 4294901760, %v23717_v63 }
 0x384   :  { %v8693_v3 = vadd.f32 %v8692_v9, %v8577_v4  ;;  %11122 = vmatpush1.msra.mxu0 %v23771_v2  ;;  %v8784_v42 = vpop.f32.mrf.mxu1  ;;  %10924 = vmatprep.mubr.f32.mxu0 %v26505_v30 }
 0x385   :  { %11125 = vmatprep.subr.mxu0 %v23775_v19  ;;  %v8694_v44 = vpop.f32.mrf.mxu0  ;;  %v23839_v23 = vadd.f32 %v8784_v42, %v8681_v1 }
 0x386   :  { %v8695_v51 = vadd.f32 %v8694_v44, %v8579_v43  ;;  %11128 = vmatpush1.msra.mxu0 %v23780_v34  ;;  %v8789_v18 = vpop.f32.mrf.mxu1  ;;  %18608 = vmatmul.mubr.msk.f32.gmra.mxu1 %vm6092_vm2, %v23624_v7 }
 0x387   :  { %11347 = vmatprep.subr.mxu0 %v26851_v41  ;;  %v8699_v4 = vpop.f32.mrf.mxu0  ;;  %v23846_v15 = vadd.f32 %v8789_v18, %v8686_v8  ;;  %10930 = vmatmul.mubr.f32.gmra.mxu0 %v23646_v61 }
 0x388   :  { %v8700_v5 = vadd.f32 %v8699_v4, %v8586_v46  ;;  %v8791_v25 = vpop.f32.mrf.mxu1  ;;  %10935 = vmatprep.mubr.f32.mxu0 %v26505_v30  ;;  %11053 = vmatprep.mubr.f32.mxu1 %v26505_v30 }
 0x389   :  { %v8701_v43 = vpop.f32.mrf.mxu0  ;;  %v23851_v1 = vadd.f32 %v8791_v25, %v8688_v12 }
 0x38a   :  { %v8702_v33 = vadd.f32 %v8701_v43, %v8588_v59  ;;  %v8796_v58 = vpop.f32.mrf.mxu1  ;;  %18609 = vmatmul.mubr.msk.f32.vlgmr.msra.gmra.mxu1 %vm6092_vm2, %v23536_v28 }
 0x38b   :  { %v8706_v63 = vpop.f32.mrf.mxu0  ;;  %v23855_v55 = vadd.f32 %v8796_v58, %v8693_v3  ;;  %10941 = vmatmul.mubr.f32.gmra.mxu0 %v23671_v22  ;;  %11233 = vmatpush1.msra.mxu1 %v23754_v20 }
 0x38c   :  { %v8707_v46 = vadd.f32 %v8706_v63, %v8595_v6  ;;  %11235 = vmatprep.subr.mxu1 %v23759_v13  ;;  %v8798_v8 = vpop.f32.mrf.mxu1  ;;  %10946 = vmatprep.mubr.f32.mxu0 %v26505_v30 }
 0x38d   :  { %26852 = vst [vmem:[#allocation29_spill] sm:$0xff] %v23855_v55  ;;  %v8708_v12 = vpop.f32.mrf.mxu0  ;;  %v23861_v45 = vadd.f32 %v8798_v8, %v8695_v51  ;;  %11237 = vmatpush1.msra.mxu1 %v23764_v31  ;;  %11060 = vmatprep.mubr.f32.mxu1 %v26505_v30 }
 0x38e   :  { %v8709_v59 = vadd.f32 %v8708_v12, %v8597_v57  ;;  %11457 = vmatprep.subr.mxu1 %v23704_v53  ;;  %v8803_v9 = vpop.f32.mrf.mxu1  ;;  %18610 = vmatmul.mubr.msk.f32.gmra.mxu1 %vm6092_vm2, %v23553_v60 }
 0x38f   :  { %26853 = vst [vmem:[#allocation34_spill] sm:$0xff] %v23861_v45  ;;  %v23868_v6 = vadd.f32 %v8803_v9, %v8700_v5  ;;  %v8890_v3 = vpop.f32.mrf.mxu0  ;;  %10952 = vmatmul.mubr.f32.gmra.mxu0 %v23686_v54  ;;  %11067 = vmatprep.mubr.f32.mxu1 %v26505_v30 }
 0x390   :  { %v8891_v42 = vadd.f32 %v8890_v3, %v23396_v40  ;;  %v8805_v44 = vpop.f32.mrf.mxu1  ;;  %10957 = vmatprep.mubr.f32.mxu0 %v26505_v30  ;;  %v26860_v3 = vand.u32 4294901760, %v23780_v34 }
 0x391   :  { %26854 = vst [vmem:[#allocation38_spill] sm:$0xff] %v23868_v6  ;;  %v23874_v51 = vadd.f32 %v8805_v44, %v8702_v33  ;;  %v8892_v57 = vpop.f32.mrf.mxu0 }
 0x392   :  { %v8893_v53 = vadd.f32 %v8892_v57, %v23404_v17  ;;  %v8810_v18 = vpop.f32.mrf.mxu1  ;;  %18611 = vmatmul.mubr.msk.f32.gmra.mxu1 %vm6092_vm2, %v23581_v32 }
 0x393   :  { %26855 = vst [vmem:[#allocation12_spill] sm:$0xff] %v23874_v51  ;;  %v23879_v41 = vadd.f32 %v8810_v18, %v8707_v46  ;;  %v8901_v4 = vpop.f32.mrf.mxu0  ;;  %10963 = vmatmul.mubr.f32.gmra.mxu0 %v23701_v10  ;;  %11074 = vmatprep.mubr.f32.mxu1 %v26505_v30  ;;  %v26858_v46 = vand.u32 4294901760, %v23771_v2 }
 0x394   :  { %v8902_v40 = vadd.f32 %v8901_v4, %v23409_v37  ;;  %v8812_v5 = vpop.f32.mrf.mxu1  ;;  %11161 = vmatprep.mubr.f32.mxu0 %v26505_v30 }
 0x395   :  { %26856 = vst [vmem:[#allocation7_spill] sm:$0xff] %v23879_v41  ;;  %v23885_v25 = vadd.f32 %v8812_v5, %v8709_v59  ;;  %v8903_v43 = vpop.f32.mrf.mxu0  ;;  %v26861_v5 = vld [vmem:[#allocation39_spill] sm:$0xff] }
 0x396   :  { %v8904_v17 = vadd.f32 %v8903_v43, %v23417_v49  ;;  %v9026_v33 = vpop.f32.mrf.mxu1  ;;  %18612 = vmatmul.mubr.msk.f32.gmra.mxu1 %vm6092_vm2, %v23601_v29  ;;  %v26859_v49 = vand.u32 4294901760, %v23775_v19  ;;  %v23916_v43 = vand.u32 4294901760, %v26861_v5 }
 0x397   :  { %26857 = vst [vmem:[#allocation42_spill] sm:$0xff] %v23885_v25  ;;  %v8912_v58 = vpop.f32.mrf.mxu0  ;;  %v9027_v63 = vadd.f32 %v9026_v33, %v8891_v42  ;;  %11164 = vmatmul.mubr.f32.vlgmr.msra.gmra.mxu0 %v23572_v39  ;;  %11081 = vmatprep.mubr.f32.mxu1 %v26505_v30 }
 0x398   :  { %v8913_v37 = vadd.f32 %v8912_v58, %v23421_v56  ;;  %11351 = vmatpush1.msra.mxu0 %v26858_v46  ;;  %v9028_v8 = vpop.f32.mrf.mxu1  ;;  %11169 = vmatprep.mubr.f32.mxu0 %v26505_v30 }
 0x399   :  { %11355 = vmatprep.subr.mxu0 %v26859_v49  ;;  %v8914_v12 = vpop.f32.mrf.mxu0  ;;  %v9029_v59 = vadd.f32 %v9028_v8, %v8893_v53 }
 0x39a   :  { %v8915_v9 = vadd.f32 %v8914_v12, %v23428_v14  ;;  %11359 = vmatpush1.msra.mxu0 %v26860_v3  ;;  %v9033_v42 = vpop.f32.mrf.mxu1  ;;  %18613 = vmatmul.mubr.msk.f32.gmra.mxu1 %vm6092_vm2, %v23624_v7 }
 0x39b   :  { %v8923_v56 = vpop.f32.mrf.mxu0  ;;  %v9034_v2 = vadd.f32 %v9033_v42, %v8902_v40  ;;  %11172 = vmatmul.mubr.f32.gmra.mxu0 %v23585_v21  ;;  %11270 = vmatprep.mubr.f32.mxu1 %v26505_v30 }
 0x39c   :  { %v8924_v19 = vadd.f32 %v8923_v56, %v23436_v38  ;;  %v9035_v44 = vpop.f32.mrf.mxu1  ;;  %11177 = vmatprep.mubr.f32.mxu0 %v26505_v30  ;;  %19447 = vmatprep.subr.mxu0 %v26505_v30 }
 0x39d   :  { %v8925_v14 = vpop.f32.mrf.mxu0  ;;  %v9036_v34 = vadd.f32 %v9035_v44, %v8904_v17 }
 0x39e   :  { %v8926_v57 = vadd.f32 %v8925_v14, %v23446_v16  ;;  %v9040_v53 = vpop.f32.mrf.mxu1  ;;  %11274 = vmatmul.mubr.f32.vlgmr.msra.gmra.mxu1 %v23592_v24 }
 0x39f   :  { %v8934_v18 = vpop.f32.mrf.mxu0  ;;  %v9041_v4 = vadd.f32 %v9040_v53, %v8913_v37  ;;  %11180 = vmatmul.mubr.f32.gmra.mxu0 %v23617_v27  ;;  %11459 = vmatpush1.msra.mxu1 %v23754_v20 }
 0x3a0   :  { %v8935_v38 = vadd.f32 %v8934_v18, %v23450_v0  ;;  %11461 = vmatprep.subr.mxu1 %v23759_v13  ;;  %v9042_v40 = vpop.f32.mrf.mxu1  ;;  %11185 = vmatprep.mubr.f32.mxu0 %v26505_v30  ;;  %v26862_v0 = vld [vmem:[#allocation47_spill] sm:$0xff] }
 0x3a1   :  { %v8936_v16 = vpop.f32.mrf.mxu0  ;;  %v9043_v17 = vadd.f32 %v9042_v40, %v8915_v9  ;;  %11463 = vmatpush1.msra.mxu1 %v23764_v31  ;;  %11279 = vmatprep.mubr.f32.mxu1 %v26505_v30  ;;  %v23924_v20 = vand.u32 4294901760, %v26862_v0 }
 0x3a2   :  { %v8937_v33 = vadd.f32 %v8936_v16, %v23461_v35  ;;  %v9047_v58 = vpop.f32.mrf.mxu1  ;;  %11283 = vmatmul.mubr.f32.gmra.mxu1 %v23607_v48  ;;  %19466 = vmatprep.subr.mxu1 %v26505_v30  ;;  %v23931_v35 = vsub.f32 %v26861_v5, %v23916_v43 }
 0x3a3   :  { %v9048_v13 = vadd.f32 %v9047_v58, %v8924_v19  ;;  %v9135_v37 = vpop.f32.mrf.mxu0  ;;  %11188 = vmatmul.mubr.f32.gmra.mxu0 %v23639_v50  ;;  %11288 = vmatprep.mubr.f32.mxu1 %v26505_v30  ;;  %v23936_v3 = vsub.f32 %v26862_v0, %v23924_v20 }
 0x3a4   :  { %v9136_v46 = vadd.f32 %v9135_v37, %v9027_v63  ;;  %v9049_v31 = vpop.f32.mrf.mxu1  ;;  %11193 = vmatprep.mubr.f32.mxu0 %v26505_v30  ;;  %v11680_v44 = vand.u32 4294901760, %v23931_v35 }
 0x3a5   :  { %v9050_v8 = vadd.f32 %v9049_v31, %v8926_v57  ;;  %v9137_v49 = vpop.f32.mrf.mxu0  ;;  %v26419_v18 = vand.u32 4294901760, %v23936_v3 }
 0x3a6   :  { %v9138_v12 = vadd.f32 %v9137_v49, %v9029_v59  ;;  %v9054_v9 = vpop.f32.mrf.mxu1  ;;  %11292 = vmatmul.mubr.f32.gmra.mxu1 %v23637_v36 }
 0x3a7   :  { %v9055_v42 = vadd.f32 %v9054_v9, %v8935_v38  ;;  %v9143_v56 = vpop.f32.mrf.mxu0  ;;  %11196 = vmatmul.mubr.f32.gmra.mxu0 %v23658_v11  ;;  %11297 = vmatprep.mubr.f32.mxu1 %v26505_v30 }
 0x3a8   :  { %v9144_v63 = vadd.f32 %v9143_v56, %v9034_v2  ;;  %v9056_v19 = vpop.f32.mrf.mxu1  ;;  %11392 = vmatprep.mubr.f32.mxu0 %v26505_v30 }
 0x3a9   :  { %v9057_v59 = vadd.f32 %v9056_v19, %v8937_v33  ;;  %v9145_v14 = vpop.f32.mrf.mxu0 }
 0x3aa   :  { %v9146_v57 = vadd.f32 %v9145_v14, %v9036_v34  ;;  %v9245_v53 = vpop.f32.mrf.mxu1  ;;  %11301 = vmatmul.mubr.f32.gmra.mxu1 %v23656_v62  ;;  %v11681_v34 = vsub.f32 %v23931_v35, %v11680_v44 }
 0x3ab   :  { %v9151_v38 = vpop.f32.mrf.mxu0  ;;  %v9246_v40 = vadd.f32 %v9245_v53, %v9136_v46  ;;  %18614 = vmatmul.mubr.msk.f32.vlgmr.msra.gmra.mxu0 %vm6092_vm2, %v23536_v28  ;;  %11306 = vmatprep.mubr.f32.mxu1 %v26505_v30  ;;  %v11688_v46 = vsub.f32 %v23936_v3, %v26419_v18 }
 0x3ac   :  { %v9152_v2 = vadd.f32 %v9151_v38, %v9041_v4  ;;  %19448 = vmatpush3.msra.mxu0 %v23916_v43  ;;  %v9247_v5 = vpop.f32.mrf.mxu1  ;;  %11399 = vmatprep.mubr.f32.mxu0 %v26505_v30  ;;  %v11682_v9 = vand.u32 4294901760, %v11681_v34 }
 0x3ad   :  { %19449 = vmatprep.subr.mxu0 %v26505_v30  ;;  %v9153_v16 = vpop.f32.mrf.mxu0  ;;  %v9248_v33 = vadd.f32 %v9247_v5, %v9138_v12 }
 0x3ae   :  { %v9154_v58 = vadd.f32 %v9153_v16, %v9043_v17  ;;  %19450 = vmatpush3.msra.mxu0 %v23924_v20  ;;  %v9254_v0 = vpop.f32.mrf.mxu1  ;;  %11310 = vmatmul.mubr.f32.gmra.mxu1 %v23676_v47 }
 0x3af   :  { %v9159_v4 = vpop.f32.mrf.mxu0  ;;  %v9255_v37 = vadd.f32 %v9254_v0, %v9144_v63  ;;  %18615 = vmatmul.mubr.msk.f32.gmra.mxu0 %vm6092_vm2, %v23553_v60  ;;  %11496 = vmatprep.mubr.f32.mxu1 %v26505_v30 }
 0x3b0   :  { %v9160_v31 = vadd.f32 %v9159_v4, %v9048_v13  ;;  %v9256_v49 = vpop.f32.mrf.mxu1  ;;  %11406 = vmatprep.mubr.f32.mxu0 %v26505_v30  ;;  %19485 = vmatprep.subr.mxu0 %v26505_v30  ;;  %v11689_v13 = vand.u32 4294901760, %v11688_v46 }
 0x3b1   :  { %v9161_v17 = vpop.f32.mrf.mxu0  ;;  %v9257_v12 = vadd.f32 %v9256_v49, %v9146_v57 }
 0x3b2   :  { %v9162_v56 = vadd.f32 %v9161_v17, %v9050_v8  ;;  %v9263_v63 = vpop.f32.mrf.mxu1  ;;  %18619 = vmatmul.mubr.msk.f32.vlgmr.msra.gmra.mxu1 %vm6092_vm2, %v23536_v28 }
 0x3b3   :  { %v9167_v19 = vpop.f32.mrf.mxu0  ;;  %v9264_v14 = vadd.f32 %v9263_v63, %v9152_v2  ;;  %18616 = vmatmul.mubr.msk.f32.gmra.mxu0 %vm6092_vm2, %v23581_v32  ;;  %19467 = vmatpush3.msra.mxu1 %v11682_v9 }
 0x3b4   :  { %v9168_v53 = vadd.f32 %v9167_v19, %v9055_v42  ;;  %19468 = vmatprep.subr.mxu1 %v26505_v30  ;;  %v9265_v38 = vpop.f32.mrf.mxu1  ;;  %11413 = vmatprep.mubr.f32.mxu0 %v26505_v30 }
 0x3b5   :  { %v9169_v57 = vpop.f32.mrf.mxu0  ;;  %v9266_v5 = vadd.f32 %v9265_v38, %v9154_v58  ;;  %19469 = vmatpush3.msra.mxu1 %v11689_v13  ;;  %11503 = vmatprep.mubr.f32.mxu1 %v26505_v30 }
 0x3b6   :  { %v9170_v8 = vadd.f32 %v9169_v57, %v9057_v59  ;;  %v9272_v34 = vpop.f32.mrf.mxu1  ;;  %18620 = vmatmul.mubr.msk.f32.gmra.mxu1 %vm6092_vm2, %v23553_v60  ;;  %19504 = vmatprep.subr.mxu1 %v26505_v30 }
 0x3b7   :  { %v9273_v2 = vadd.f32 %v9272_v34, %v9160_v31  ;;  %v9365_v16 = vpop.f32.mrf.mxu0  ;;  %18617 = vmatmul.mubr.msk.f32.gmra.mxu0 %vm6092_vm2, %v23601_v29  ;;  %11510 = vmatprep.mubr.f32.mxu1 %v26505_v30 }
 0x3b8   :  { %v9366_v42 = vadd.f32 %v9365_v16, %v9246_v40  ;;  %v9274_v0 = vpop.f32.mrf.mxu1  ;;  %11420 = vmatprep.mubr.f32.mxu0 %v26505_v30 }
 0x3b9   :  { %v9275_v58 = vadd.f32 %v9274_v0, %v9162_v56  ;;  %v9367_v4 = vpop.f32.mrf.mxu0 }
 0x3ba   :  { %v9368_v59 = vadd.f32 %v9367_v4, %v9248_v33  ;;  %v9281_v46 = vpop.f32.mrf.mxu1  ;;  %18621 = vmatmul.mubr.msk.f32.gmra.mxu1 %vm6092_vm2, %v23581_v32 }
 0x3bb   :  { %v9282_v49 = vadd.f32 %v9281_v46, %v9168_v53  ;;  %v9372_v17 = vpop.f32.mrf.mxu0  ;;  %18618 = vmatmul.mubr.msk.f32.gmra.mxu0 %vm6092_vm2, %v23624_v7  ;;  %11517 = vmatprep.mubr.f32.mxu1 %v26505_v30 }
 0x3bc   :  { %v9373_v31 = vadd.f32 %v9372_v17, %v9255_v37  ;;  %v9283_v9 = vpop.f32.mrf.mxu1  ;;  %19451 = vmatprep.mubr.msk.f32.mxu0 %vm19907_vm7, %v26505_v30 }
 0x3bd   :  { %v9284_v40 = vadd.f32 %v9283_v9, %v9170_v8  ;;  %v9374_v56 = vpop.f32.mrf.mxu0 }
 0x3be   :  { %v9375_v63 = vadd.f32 %v9374_v56, %v9257_v12  ;;  %v9469_v33 = vpop.f32.mrf.mxu1  ;;  %18622 = vmatmul.mubr.msk.f32.gmra.mxu1 %vm6092_vm2, %v23601_v29 }
 0x3bf   :  { %v9379_v19 = vpop.f32.mrf.mxu0  ;;  %v23986_v13 = vadd.f32 %v9469_v33, %v9366_v42  ;;  %19452 = vmatmul.mubr.f32.vlgmr.msra.gmra.mxu0 %v23634_v26  ;;  %11524 = vmatprep.mubr.f32.mxu1 %v26505_v30 }
 0x3c0   :  { %v9380_v53 = vadd.f32 %v9379_v19, %v9264_v14  ;;  %19486 = vmatpush3.msra.mxu0 %v23931_v35  ;;  %v9471_v37 = vpop.f32.mrf.mxu1  ;;  %19454 = vmatprep.mubr.msk.f32.mxu0 %vm19907_vm7, %v26505_v30  ;;  %v26870_v19 = vld [vmem:[#allocation65_spill] sm:$0xff]  ;;  %v26885_v35 = vld [vmem:[#allocation71_spill] sm:$0xff] }
 0x3c1   :  { %26863 = vst [vmem:[#allocation4_spill] sm:$0xff] %v23986_v13  ;;  %19487 = vmatprep.subr.mxu0 %v26505_v30  ;;  %v9381_v12 = vpop.f32.mrf.mxu0  ;;  %v23994_v38 = vadd.f32 %v9471_v37, %v9368_v59  ;;  %v26871_v37 = vld [vmem:[#allocation148_spill] sm:$0xff] }
 0x3c2   :  { %v9382_v57 = vadd.f32 %v9381_v12, %v9266_v5  ;;  %19488 = vmatpush3.msra.mxu0 %v23936_v3  ;;  %v9476_v8 = vpop.f32.mrf.mxu1  ;;  %18623 = vmatmul.mubr.msk.f32.gmra.mxu1 %vm6092_vm2, %v23624_v7 }
 0x3c3   :  { %26864 = vst [vmem:[#allocation39_spill] sm:$0xff] %v23994_v38  ;;  %v9386_v34 = vpop.f32.mrf.mxu0  ;;  %v23999_v14 = vadd.f32 %v9476_v8, %v9373_v31  ;;  %19455 = vmatmul.mubr.f32.gmra.mxu0 %v23646_v61  ;;  %19470 = vmatprep.mubr.msk.f32.mxu1 %vm19907_vm7, %v26505_v30  ;;  %v26922_v61 = vld [vmem:[#allocation95_spill] sm:$0xff] }
 0x3c4   :  { %v9387_v16 = vadd.f32 %v9386_v34, %v9273_v2  ;;  %v9478_v42 = vpop.f32.mrf.mxu1  ;;  %19457 = vmatprep.mubr.msk.f32.mxu0 %vm19907_vm7, %v26505_v30  ;;  %19523 = vmatprep.subr.mxu0 %v26505_v30 }
 0x3c5   :  { %26865 = vst [vmem:[#allocation47_spill] sm:$0xff] %v23999_v14  ;;  %v9388_v5 = vpop.f32.mrf.mxu0  ;;  %v24007_v0 = vadd.f32 %v9478_v42, %v9375_v63  ;;  %v26937_v14 = vld [vmem:[#allocation122_spill] sm:$0xff] }
 0x3c6   :  { %v9389_v4 = vadd.f32 %v9388_v5, %v9275_v58  ;;  %v9483_v59 = vpop.f32.mrf.mxu1  ;;  %19471 = vmatmul.mubr.msk.f32.vlgmr.msra.gmra.mxu1 %vm6092_vm2, %v23536_v28 }
 0x3c7   :  { %26866 = vst [vmem:[#allocation158_spill] sm:$0xff] %v24007_v0  ;;  %v9393_v46 = vpop.f32.mrf.mxu0  ;;  %v24011_v17 = vadd.f32 %v9483_v59, %v9380_v53  ;;  %19458 = vmatmul.mubr.f32.gmra.mxu0 %v23671_v22  ;;  %19505 = vmatpush3.msra.mxu1 %v23916_v43  ;;  %v24032_v53 = vand.u32 4294901760, %v26870_v19  ;;  %v26874_v59 = vld [vmem:[#allocation151_spill] sm:$0xff] }
 0x3c8   :  { %v9394_v2 = vadd.f32 %v9393_v46, %v9282_v49  ;;  %19506 = vmatprep.subr.mxu1 %v26505_v30  ;;  %v9485_v31 = vpop.f32.mrf.mxu1  ;;  %19460 = vmatprep.mubr.msk.f32.mxu0 %vm19907_vm7, %v26505_v30 }
 0x3c9   :  { %26867 = vst [vmem:[#allocation159_spill] sm:$0xff] %v24011_v17  ;;  %v9395_v9 = vpop.f32.mrf.mxu0  ;;  %v24018_v58 = vadd.f32 %v9485_v31, %v9382_v57  ;;  %19507 = vmatpush3.msra.mxu1 %v23924_v20  ;;  %19473 = vmatprep.mubr.msk.f32.mxu1 %vm19907_vm7, %v26505_v30  ;;  %v24048_v5 = vsub.f32 %v26870_v19, %v24032_v53  ;;  %v26875_v31 = vld [vmem:[#allocation62_spill] sm:$0xff] }
 0x3ca   :  { %v9396_v56 = vadd.f32 %v9395_v9, %v9284_v40  ;;  %v9490_v63 = vpop.f32.mrf.mxu1  ;;  %19474 = vmatmul.mubr.msk.f32.gmra.mxu1 %vm6092_vm2, %v23553_v60  ;;  %19542 = vmatprep.subr.mxu1 %v26505_v30  ;;  %v26876_v9 = vld [vmem:[#allocation66_spill] sm:$0xff] }
 0x3cb   :  { %26868 = vst [vmem:[#allocation160_spill] sm:$0xff] %v24018_v58  ;;  %v24026_v49 = vadd.f32 %v9490_v63, %v9387_v16  ;;  %v9575_v33 = vpop.f32.mrf.mxu0  ;;  %19461 = vmatmul.mubr.f32.gmra.mxu0 %v23686_v54  ;;  %19476 = vmatprep.mubr.msk.f32.mxu1 %vm19907_vm7, %v26505_v30  ;;  %v26923_v54 = vld [vmem:[#allocation99_spill] sm:$0xff]  ;;  %v26936_v58 = vld [vmem:[#allocation116_spill] sm:$0xff] }
 0x3cc   :  { %v9576_v12 = vadd.f32 %v9575_v33, %v26871_v37  ;;  %v9492_v40 = vpop.f32.mrf.mxu1  ;;  %19463 = vmatprep.mubr.msk.f32.mxu0 %vm19907_vm7, %v26505_v30 }
 0x3cd   :  { %26869 = vst [vmem:[#allocation161_spill] sm:$0xff] %v24026_v49  ;;  %v24037_v57 = vadd.f32 %v9492_v40, %v9389_v4  ;;  %v19339_v8 = vpop.f32.mrf.mxu0  ;;  %v26878_v40 = vld [vmem:[#allocation60_spill] sm:$0xff] }
 0x3ce   :  { %v9497_v34 = vpop.f32.mrf.mxu1  ;;  %19477 = vmatmul.mubr.msk.f32.gmra.mxu1 %vm6092_vm2, %v23581_v32  ;;  %v26879_v8 = vld [vmem:[#allocation63_spill] sm:$0xff] }
 0x3cf   :  { %26872 = vst [vmem:[#allocation65_spill] sm:$0xff] %v24037_v57  ;;  %v24041_v16 = vadd.f32 %v9497_v34, %v9394_v2  ;;  %v9585_v42 = vpop.f32.mrf.mxu0  ;;  %19464 = vmatmul.mubr.f32.gmra.mxu0 %v23701_v10  ;;  %19479 = vmatprep.mubr.msk.f32.mxu1 %vm19907_vm7, %v26505_v30  ;;  %v1877_v2 = vadd.f32 %v26876_v9, %v26875_v31  ;;  %v26880_v34 = vld [vmem:[#allocation70_spill] sm:$0xff]  ;;  %v26422_v9 = vand.u32 4294901760, %v24048_v5 }
 0x3d0   :  { %v9586_v4 = vadd.f32 %v9585_v42, %v26874_v59  ;;  %v9499_v46 = vpop.f32.mrf.mxu1  ;;  %19489 = vmatprep.mubr.msk.f32.mxu0 %vm19907_vm7, %v26505_v30  ;;  %v1870_v19 = vadd.f32 %v26879_v8, %v26878_v40  ;;  %v26881_v31 = vld [vmem:[#allocation154_spill] sm:$0xff]  ;;  %v26883_v40 = vld [vmem:[#allocation73_spill] sm:$0xff]  ;;  %v26884_v8 = vand.u32 4294901760, %v23936_v3 }
 0x3d1   :  { %26873 = vst [vmem:[#allocation148_spill] sm:$0xff] %v24041_v16  ;;  %v24055_v63 = vadd.f32 %v9499_v46, %v9396_v56  ;;  %v19342_v33 = vpop.f32.mrf.mxu0  ;;  %v1998_v18 = vadd.f32 %v26880_v34, %v1877_v2  ;;  %v12489_v3 = vsub.f32 %v24048_v5, %v26422_v9  ;;  %v26914_v10 = vld [vmem:[#allocation94_spill] sm:$0xff] }
 0x3d2   :  { %v9696_v37 = vpop.f32.mrf.mxu1  ;;  %19480 = vmatmul.mubr.msk.f32.gmra.mxu1 %vm6092_vm2, %v23601_v29  ;;  %v26882_v33 = vld [vmem:[#allocation67_spill] sm:$0xff] }
 0x3d3   :  { %26877 = vst [vmem:[#allocation151_spill] sm:$0xff] %v24055_v63  ;;  %v9595_v42 = vpop.f32.mrf.mxu0  ;;  %v9697_v59 = vadd.f32 %v9696_v37, %v9576_v12  ;;  %19490 = vmatmul.mubr.f32.vlgmr.msra.gmra.mxu0 %v23572_v39  ;;  %19482 = vmatprep.mubr.msk.f32.mxu1 %vm19907_vm7, %v26505_v30  ;;  %v1990_v2 = vadd.f32 %v26882_v33, %v1870_v19  ;;  %v26913_v39 = vld [vmem:[#allocation87_spill] sm:$0xff] }
 0x3d4   :  { %v9596_v56 = vadd.f32 %v9595_v42, %v26881_v31  ;;  %19524 = vmatpush3.msra.mxu0 %v11680_v44  ;;  %v19358_v46 = vpop.f32.mrf.mxu1  ;;  %19492 = vmatprep.mubr.msk.f32.mxu0 %vm19907_vm7, %v26505_v30  ;;  %v2111_v12 = vadd.f32 %v26883_v40, %v1998_v18  ;;  %v26886_v42 = vld [vmem:[#allocation77_spill] sm:$0xff]  ;;  %v26887_v18 = vld [vmem:[#allocation156_spill] sm:$0xff] }
 0x3d5   :  { %19525 = vmatprep.subr.mxu0 %v26505_v30  ;;  %v19345_v37 = vpop.f32.mrf.mxu0  ;;  %v2102_v44 = vadd.f32 %v26885_v35, %v1990_v2  ;;  %v26888_v2 = vld [vmem:[#allocation75_spill] sm:$0xff] }
 0x3d6   :  { %19526 = vmatpush3.msra.mxu0 %v26884_v8  ;;  %v9702_v34 = vpop.f32.mrf.mxu1  ;;  %19483 = vmatmul.mubr.msk.f32.gmra.mxu1 %vm6092_vm2, %v23624_v7  ;;  %v2240_v31 = vadd.f32 %v26886_v42, %v2111_v12  ;;  %v26889_v37 = vld [vmem:[#allocation82_spill] sm:$0xff]  ;;  %v26890_v35 = vld [vmem:[#allocation79_spill] sm:$0xff] }
 0x3d7   :  { %12363 = vmatprep.subr.mxu0 %v24032_v53  ;;  %v9605_v46 = vpop.f32.mrf.mxu0  ;;  %v9703_v19 = vadd.f32 %v9702_v34, %v9586_v4  ;;  %19493 = vmatmul.mubr.f32.gmra.mxu0 %v23585_v21  ;;  %v2233_v12 = vadd.f32 %v26888_v2, %v2102_v44  ;;  %v12490_v44 = vand.u32 4294901760, %v12489_v3 }
 0x3d8   :  { %v9606_v33 = vadd.f32 %v9605_v46, %v26887_v18  ;;  %v19361_v40 = vpop.f32.mrf.mxu1  ;;  %19495 = vmatprep.mubr.msk.f32.mxu0 %vm19907_vm7, %v26505_v30  ;;  %19508 = vmatprep.mubr.msk.f32.mxu1 %vm19907_vm7, %v26505_v30  ;;  %v2345_v8 = vadd.f32 %v26889_v37, %v2240_v31 }
 0x3d9   :  { %v19348_v4 = vpop.f32.mrf.mxu0  ;;  %v2338_v42 = vadd.f32 %v26890_v35, %v2233_v12  ;;  %v26891_v40 = vld [vmem:[#allocation15_spill] sm:$0xff] }
 0x3da   :  { %v9708_v34 = vpop.f32.mrf.mxu1  ;;  %19509 = vmatmul.mubr.f32.vlgmr.msra.gmra.mxu1 %v23592_v24  ;;  %v24100_v31 = vand.u32 4294901760, %v2345_v8 }
 0x3db   :  { %v9615_v46 = vpop.f32.mrf.mxu0  ;;  %v9709_v18 = vadd.f32 %v9708_v34, %v9596_v56  ;;  %19496 = vmatmul.mubr.f32.gmra.mxu0 %v23617_v27  ;;  %19543 = vmatpush3.msra.mxu1 %v23916_v43  ;;  %v26892_v56 = vld [vmem:[#allocation101_spill] sm:$0xff] }
 0x3dc   :  { %v9616_v21 = vadd.f32 %v9615_v46, %v26891_v40  ;;  %19544 = vmatprep.subr.mxu1 %v26505_v30  ;;  %v19364_v9 = vpop.f32.mrf.mxu1  ;;  %19498 = vmatprep.mubr.msk.f32.mxu0 %vm19907_vm7, %v26505_v30  ;;  %v24106_v12 = vand.u32 4294901760, %v26892_v56  ;;  %v24117_v34 = vsub.f32 %v2345_v8, %v24100_v31 }
 0x3dd   :  { %v19351_v2 = vpop.f32.mrf.mxu0  ;;  %19545 = vmatpush3.msra.mxu1 %v23924_v20  ;;  %19511 = vmatprep.mubr.msk.f32.mxu1 %vm19907_vm7, %v26505_v30  ;;  %v24109_v9 = vand.u32 4294901760, %v2338_v42 }
 0x3de   :  { %12491 = vmatprep.subr.mxu1 %v12490_v44  ;;  %v9714_v43 = vpop.f32.mrf.mxu1  ;;  %19512 = vmatmul.mubr.f32.gmra.mxu1 %v23607_v48  ;;  %v24121_v46 = vsub.f32 %v26892_v56, %v24106_v12  ;;  %v26424_v56 = vand.u32 4294901760, %v24117_v34  ;;  %v26910_v48 = vld [vmem:[#allocation90_spill] sm:$0xff] }
 0x3df   :  { %v9715_v37 = vadd.f32 %v9714_v43, %v9606_v33  ;;  %v9796_v4 = vpop.f32.mrf.mxu0  ;;  %19499 = vmatmul.mubr.f32.gmra.mxu0 %v23639_v50  ;;  %19514 = vmatprep.mubr.msk.f32.mxu1 %vm19907_vm7, %v26505_v30  ;;  %v24125_v40 = vsub.f32 %v2338_v42, %v24109_v9  ;;  %v26909_v50 = vld [vmem:[#allocation86_spill] sm:$0xff] }
 0x3e0   :  { %v9797_v20 = vadd.f32 %v9796_v4, %v9697_v59  ;;  %v19367_v3 = vpop.f32.mrf.mxu1  ;;  %19501 = vmatprep.mubr.msk.f32.mxu0 %vm19907_vm7, %v26505_v30  ;;  %v26423_v42 = vand.u32 4294901760, %v24121_v46  ;;  %v2619_v27 = vadd.f32 %v26910_v48, %v26909_v50  ;;  %v26916_v48 = vand.u32 4294901760, %v24117_v34 }
 0x3e1   :  { %v19377_v35 = vpop.f32.mrf.mxu0 }
 0x3e2   :  { %v9720_v33 = vpop.f32.mrf.mxu1  ;;  %19515 = vmatmul.mubr.f32.gmra.mxu1 %v23637_v36 }
 0x3e3   :  { %v9721_v44 = vadd.f32 %v9720_v33, %v9616_v21  ;;  %v9803_v59 = vpop.f32.mrf.mxu0  ;;  %19502 = vmatmul.mubr.f32.gmra.mxu0 %v23658_v11  ;;  %19517 = vmatprep.mubr.msk.f32.mxu1 %vm19907_vm7, %v26505_v30  ;;  %v26429_v21 = vand.u32 4294901760, %v24125_v40  ;;  %v26908_v11 = vld [vmem:[#allocation129_spill] sm:$0xff] }
 0x3e4   :  { %v9804_v8 = vadd.f32 %v9803_v59, %v9703_v19  ;;  %v19370_v2 = vpop.f32.mrf.mxu1  ;;  %19527 = vmatprep.mubr.msk.f32.mxu0 %vm19907_vm7, %v26505_v30 }
 0x3e5   :  { %v19380_v43 = vpop.f32.mrf.mxu0 }
 0x3e6   :  { %v9899_v4 = vpop.f32.mrf.mxu1  ;;  %19518 = vmatmul.mubr.f32.gmra.mxu1 %v23656_v62 }
 0x3e7   :  { %v9810_v3 = vpop.f32.mrf.mxu0  ;;  %v9900_v35 = vadd.f32 %v9899_v4, %v9797_v20  ;;  %19528 = vmatmul.mubr.msk.f32.vlgmr.msra.gmra.mxu0 %vm6092_vm2, %v23536_v28  ;;  %19520 = vmatprep.mubr.msk.f32.mxu1 %vm19907_vm7, %v26505_v30  ;;  %v12495_v20 = vsub.f32 %v24117_v34, %v26424_v56 }
 0x3e8   :  { %v9811_v19 = vadd.f32 %v9810_v3, %v9709_v18  ;;  %12365 = vmatpush1.msra.mxu0 %v24100_v31  ;;  %v19396_v33 = vpop.f32.mrf.mxu1  ;;  %19530 = vmatprep.mubr.msk.f32.mxu0 %vm19907_vm7, %v26505_v30  ;;  %v12501_v18 = vsub.f32 %v24121_v46, %v26423_v42  ;;  %v12507_v3 = vsub.f32 %v24125_v40, %v26429_v21 }
 0x3e9   :  { %12367 = vmatprep.subr.mxu0 %v24106_v12  ;;  %v19383_v59 = vpop.f32.mrf.mxu0  ;;  %v12496_v56 = vand.u32 4294901760, %v12495_v20 }
 0x3ea   :  { %12369 = vmatpush1.msra.mxu0 %v24109_v9  ;;  %v9907_v2 = vpop.f32.mrf.mxu1  ;;  %19521 = vmatmul.mubr.f32.gmra.mxu1 %v23676_v47 }
 0x3eb   :  { %12608 = vmatprep.subr.mxu0 %v24048_v5  ;;  %v9817_v43 = vpop.f32.mrf.mxu0  ;;  %v9908_v4 = vadd.f32 %v9907_v2, %v9804_v8  ;;  %19531 = vmatmul.mubr.msk.f32.gmra.mxu0 %vm6092_vm2, %v23553_v60  ;;  %v12502_v8 = vand.u32 4294901760, %v12501_v18 }
 0x3ec   :  { %v9818_v33 = vadd.f32 %v9817_v43, %v9715_v37  ;;  %v19399_v59 = vpop.f32.mrf.mxu1  ;;  %19533 = vmatprep.mubr.msk.f32.mxu0 %vm19907_vm7, %v26505_v30  ;;  %19546 = vmatprep.mubr.msk.f32.mxu1 %vm19907_vm7, %v26505_v30  ;;  %v12508_v37 = vand.u32 4294901760, %v12507_v3 }
 0x3ed   :  { %v19386_v42 = vpop.f32.mrf.mxu0 }
 0x3ee   :  { %v9915_v47 = vpop.f32.mrf.mxu1  ;;  %19547 = vmatmul.mubr.msk.f32.vlgmr.msra.gmra.mxu1 %vm6092_vm2, %v23536_v28  ;;  %v26920_v28 = vand.u32 4294901760, %v24125_v40 }
 0x3ef   :  { %v9824_v2 = vpop.f32.mrf.mxu0  ;;  %v9916_v62 = vadd.f32 %v9915_v47, %v9811_v19  ;;  %19534 = vmatmul.mubr.msk.f32.gmra.mxu0 %vm6092_vm2, %v23581_v32  ;;  %12497 = vmatpush1.msra.mxu1 %v12496_v56 }
 0x3f0   :  { %v9825_v43 = vadd.f32 %v9824_v2, %v9721_v44  ;;  %12503 = vmatprep.subr.mxu1 %v12502_v8  ;;  %v19402_v59 = vpop.f32.mrf.mxu1  ;;  %19536 = vmatprep.mubr.msk.f32.mxu0 %vm19907_vm7, %v26505_v30 }
 0x3f1   :  { %v19389_v42 = vpop.f32.mrf.mxu0  ;;  %12509 = vmatpush1.msra.mxu1 %v12508_v37  ;;  %19549 = vmatprep.mubr.msk.f32.mxu1 %vm19907_vm7, %v26505_v30 }
 0x3f2   :  { %12720 = vmatprep.subr.mxu1 %v24032_v53  ;;  %v9923_v20 = vpop.f32.mrf.mxu1  ;;  %19550 = vmatmul.mubr.msk.f32.gmra.mxu1 %vm6092_vm2, %v23553_v60  ;;  %v26917_v60 = vld [vmem:[#allocation91_spill] sm:$0xff] }
 0x3f3   :  { %v9924_v47 = vadd.f32 %v9923_v20, %v9818_v33  ;;  %v10008_v56 = vpop.f32.mrf.mxu0  ;;  %19537 = vmatmul.mubr.msk.f32.gmra.mxu0 %vm6092_vm2, %v23601_v29  ;;  %19552 = vmatprep.mubr.msk.f32.mxu1 %vm19907_vm7, %v26505_v30 }
 0x3f4   :  { %v10009_v44 = vadd.f32 %v10008_v56, %v9900_v35  ;;  %v19405_v19 = vpop.f32.mrf.mxu1  ;;  %19539 = vmatprep.mubr.msk.f32.mxu0 %vm19907_vm7, %v26505_v30 }
 0x3f5   :  { %v19415_v18 = vpop.f32.mrf.mxu0 }
 0x3f6   :  { %v9931_v3 = vpop.f32.mrf.mxu1  ;;  %19553 = vmatmul.mubr.msk.f32.gmra.mxu1 %vm6092_vm2, %v23581_v32  ;;  %v2740_v32 = vadd.f32 %v26914_v10, %v2619_v27  ;;  %v26919_v27 = vand.u32 4294901760, %v24121_v46 }
 0x3f7   :  { %v9932_v8 = vadd.f32 %v9931_v3, %v9825_v43  ;;  %v10014_v2 = vpop.f32.mrf.mxu0  ;;  %19540 = vmatmul.mubr.msk.f32.gmra.mxu0 %vm6092_vm2, %v23624_v7  ;;  %19555 = vmatprep.mubr.msk.f32.mxu1 %vm19907_vm7, %v26505_v30  ;;  %v26894_v43 = vld [vmem:[#allocation118_spill] sm:$0xff] }
 0x3f8   :  { %v10015_v33 = vadd.f32 %v10014_v2, %v9908_v4  ;;  %v19408_v37 = vpop.f32.mrf.mxu1  ;;  %12402 = vmatprep.mubr.f32.mxu0 %v26505_v30 }
 0x3f9   :  { %v19418_v35 = vpop.f32.mrf.mxu0 }
 0x3fa   :  { %v10105_v59 = vpop.f32.mrf.mxu1  ;;  %19556 = vmatmul.mubr.msk.f32.gmra.mxu1 %vm6092_vm2, %v23601_v29 }
 0x3fb   :  { %v10020_v42 = vpop.f32.mrf.mxu0  ;;  %v24188_v20 = vadd.f32 %v10105_v59, %v10009_v44  ;;  %12408 = vmatmul.mubr.f32.vlgmr.msra.gmra.mxu0 %v26894_v43  ;;  %19558 = vmatprep.mubr.msk.f32.mxu1 %vm19907_vm7, %v26505_v30  ;;  %v26895_v44 = vand.u32 4294901760, %v24048_v5  ;;  %v26900_v5 = vld [vmem:[#allocation124_spill] sm:$0xff] }
 0x3fc   :  { %v10021_v56 = vadd.f32 %v10020_v42, %v9916_v62  ;;  %12611 = vmatpush1.msra.mxu0 %v24117_v34  ;;  %v19434_v4 = vpop.f32.mrf.mxu1  ;;  %12413 = vmatprep.mubr.f32.mxu0 %v26505_v30  ;;  %v26897_v62 = vld [vmem:[#allocation120_spill] sm:$0xff] }
 0x3fd   :  { %26893 = vst [vmem:[#allocation62_spill] sm:$0xff] %v24188_v20  ;;  %12614 = vmatprep.subr.mxu0 %v24121_v46  ;;  %v19421_v19 = vpop.f32.mrf.mxu0  ;;  %v26898_v4 = vld [vmem:[#allocation69_spill] sm:$0xff] }
 0x3fe   :  { %12617 = vmatpush1.msra.mxu0 %v24125_v40  ;;  %v10111_v18 = vpop.f32.mrf.mxu1  ;;  %19559 = vmatmul.mubr.msk.f32.gmra.mxu1 %vm6092_vm2, %v23624_v7  ;;  %v26912_v7 = vld [vmem:[#allocation83_spill] sm:$0xff]  ;;  %v26926_v40 = vld [vmem:[#allocation98_spill] sm:$0xff]  ;;  %v26930_v20 = vld [vmem:[#allocation113_spill] sm:$0xff] }
 0x3ff   :  { %12836 = vmatprep.subr.mxu0 %v26895_v44  ;;  %v10026_v3 = vpop.f32.mrf.mxu0  ;;  %v24201_v2 = vadd.f32 %v10111_v18, %v10015_v33  ;;  %12419 = vmatmul.mubr.f32.gmra.mxu0 %v26897_v62  ;;  %v2612_v29 = vadd.f32 %v26913_v39, %v26912_v7  ;;  %v26918_v39 = vld [vmem:[#allocation97_spill] sm:$0xff] }
 0x400   :  { %v10027_v37 = vadd.f32 %v10026_v3, %v9924_v47  ;;  %v19437_v35 = vpop.f32.mrf.mxu1  ;;  %12424 = vmatprep.mubr.f32.mxu0 %v26505_v30  ;;  %12542 = vmatprep.mubr.f32.mxu1 %v26505_v30  ;;  %v2853_v7 = vadd.f32 %v26918_v39, %v2740_v32  ;;  %v26924_v32 = vld [vmem:[#allocation110_spill] sm:$0xff] }
 0x401   :  { %26896 = vst [vmem:[#allocation66_spill] sm:$0xff] %v24201_v2  ;;  %v19424_v59 = vpop.f32.mrf.mxu0  ;;  %v2732_v22 = vadd.f32 %v26917_v60, %v2612_v29 }
 0x402   :  { %v10117_v42 = vpop.f32.mrf.mxu1  ;;  %18639 = vmatmul.mubr.msk.f32.vlgmr.msra.gmra.mxu1 %vm6092_vm2, %v26898_v4  ;;  %v26904_v59 = vld [vmem:[#allocation84_spill] sm:$0xff] }
 0x403   :  { %v10032_v19 = vpop.f32.mrf.mxu0  ;;  %v24208_v21 = vadd.f32 %v10117_v42, %v10021_v56  ;;  %12430 = vmatmul.mubr.f32.gmra.mxu0 %v26900_v5  ;;  %12722 = vmatpush1.msra.mxu1 %v24100_v31  ;;  %v26901_v56 = vld [vmem:[#allocation72_spill] sm:$0xff]  ;;  %v24226_v42 = vand.u32 4294901760, %v26904_v59  ;;  %v2844_v26 = vadd.f32 %v26922_v61, %v2732_v22  ;;  %v26927_v22 = vld [vmem:[#allocation57_spill] sm:$0xff] }
 0x404   :  { %v10033_v33 = vadd.f32 %v10032_v19, %v9932_v8  ;;  %12724 = vmatprep.subr.mxu1 %v24106_v12  ;;  %v19440_v47 = vpop.f32.mrf.mxu1  ;;  %12435 = vmatprep.mubr.f32.mxu0 %v26505_v30  ;;  %v26903_v8 = vld [vmem:[#allocation127_spill] sm:$0xff] }
 0x405   :  { %26899 = vst [vmem:[#allocation60_spill] sm:$0xff] %v24208_v21  ;;  %v19427_v18 = vpop.f32.mrf.mxu0  ;;  %12726 = vmatpush1.msra.mxu1 %v24109_v9  ;;  %12549 = vmatprep.mubr.f32.mxu1 %v26505_v30  ;;  %26905 = vst [vmem:[#allocation70_spill] sm:$0xff] %v24226_v42  ;;  %v24241_v36 = vsub.f32 %v26904_v59, %v24226_v42  ;;  %v2975_v61 = vadd.f32 %v26926_v40, %v2844_v26 }
 0x406   :  { %12946 = vmatprep.subr.mxu1 %v24032_v53  ;;  %v10123_v44 = vpop.f32.mrf.mxu1  ;;  %18640 = vmatmul.mubr.msk.f32.gmra.mxu1 %vm6092_vm2, %v26901_v56  ;;  %v26906_v18 = vld [vmem:[#allocation106_spill] sm:$0xff] }
 0x407   :  { %v24219_v3 = vadd.f32 %v10123_v44, %v10027_v37  ;;  %v24221_v35 = vpop.f32.mrf.mxu0  ;;  %12441 = vmatmul.mubr.f32.gmra.mxu0 %v26903_v8  ;;  %12556 = vmatprep.mubr.f32.mxu1 %v26505_v30 }
 0x408   :  { %v19443_v19 = vpop.f32.mrf.mxu1  ;;  %12446 = vmatprep.mubr.f32.mxu0 %v26505_v30 }
 0x409   :  { %26902 = vst [vmem:[#allocation63_spill] sm:$0xff] %v24219_v3  ;;  %v24229_v47 = vpop.f32.mrf.mxu0  ;;  %v26929_v3 = vld [vmem:[#allocation102_spill] sm:$0xff] }
 0x40a   :  { %v10129_v53 = vpop.f32.mrf.mxu1  ;;  %18641 = vmatmul.mubr.msk.f32.gmra.mxu1 %vm6092_vm2, %v26906_v18  ;;  %v3080_v21 = vadd.f32 %v26929_v3, %v2975_v61  ;;  %v26931_v3 = vld [vmem:[#allocation89_spill] sm:$0xff] }
 0x40b   :  { %v24233_v37 = vadd.f32 %v10129_v53, %v10033_v33  ;;  %v24235_v44 = vpop.f32.mrf.mxu0  ;;  %12452 = vmatmul.mubr.f32.gmra.mxu0 %v26908_v11  ;;  %12563 = vmatprep.mubr.f32.mxu1 %v26505_v30  ;;  %v26911_v53 = vld [vmem:[#allocation111_spill] sm:$0xff]  ;;  %v24313_v61 = vand.u32 4294901760, %v26931_v3 }
 0x40c   :  { %v19446_v19 = vpop.f32.mrf.mxu1  ;;  %12650 = vmatprep.mubr.f32.mxu0 %v26505_v30 }
 0x40d   :  { %26907 = vst [vmem:[#allocation154_spill] sm:$0xff] %v24233_v37  ;;  %v24246_v24 = vpop.f32.mrf.mxu0  ;;  %v26915_v19 = vld [vmem:[#allocation105_spill] sm:$0xff]  ;;  %v2982_v37 = vadd.f32 %v26923_v54, %v2853_v7  ;;  %26932 = vst [vmem:[#allocation67_spill] sm:$0xff] %v24313_v61  ;;  %v24334_v57 = vsub.f32 %v26931_v3, %v24313_v61 }
 0x40e   :  { %v24248_v33 = vpop.f32.mrf.mxu1  ;;  %18642 = vmatmul.mubr.msk.f32.gmra.mxu1 %vm6092_vm2, %v26911_v53 }
 0x40f   :  { %v24255_v59 = vpop.f32.mrf.mxu0  ;;  %12653 = vmatmul.mubr.f32.vlgmr.msra.gmra.mxu0 %v26915_v19  ;;  %12570 = vmatprep.mubr.f32.mxu1 %v26505_v30  ;;  %v3087_v54 = vadd.f32 %v26927_v22, %v2982_v37  ;;  %v24318_v22 = vand.u32 4294901760, %v3080_v21 }
 0x410   :  { %12840 = vmatpush1.msra.mxu0 %v26916_v48  ;;  %v24261_v50 = vpop.f32.mrf.mxu1  ;;  %12658 = vmatprep.mubr.f32.mxu0 %v26505_v30  ;;  %v26921_v48 = vld [vmem:[#allocation115_spill] sm:$0xff] }
 0x411   :  { %12844 = vmatprep.subr.mxu0 %v26919_v27  ;;  %v24269_v10 = vpop.f32.mrf.mxu0  ;;  %v26928_v27 = vld [vmem:[#allocation109_spill] sm:$0xff]  ;;  %v24306_v37 = vand.u32 4294901760, %v3087_v54  ;;  %26934 = vst [vmem:[#allocation73_spill] sm:$0xff] %v24318_v22  ;;  %v24340_v17 = vsub.f32 %v3080_v21, %v24318_v22 }
 0x412   :  { %12848 = vmatpush1.msra.mxu0 %v26920_v28  ;;  %v24273_v34 = vpop.f32.mrf.mxu1  ;;  %18643 = vmatmul.mubr.msk.f32.gmra.mxu1 %vm6092_vm2, %v26921_v48  ;;  %v26925_v28 = vand.u32 4294901760, %v24241_v36 }
 0x413   :  { %13050 = vmatprep.subr.mxu0 %v24226_v42  ;;  %v24280_v60 = vpop.f32.mrf.mxu0  ;;  %12661 = vmatmul.mubr.f32.gmra.mxu0 %v26924_v32  ;;  %v26942_v19 = vand.u32 4294901760, %v24340_v17 }
 0x414   :  { %v24283_v29 = vpop.f32.mrf.mxu1  ;;  %12666 = vmatprep.mubr.f32.mxu0 %v26505_v30  ;;  %12759 = vmatprep.mubr.f32.mxu1 %v26505_v30  ;;  %v13176_v46 = vsub.f32 %v24241_v36, %v26925_v28 }
 0x415   :  { %v24292_v39 = vpop.f32.mrf.mxu0 }
 0x416   :  { %v24294_v7 = vpop.f32.mrf.mxu1  ;;  %12763 = vmatmul.mubr.f32.vlgmr.msra.gmra.mxu1 %v26928_v27  ;;  %v13177_v26 = vand.u32 4294901760, %v13176_v46  ;;  %v26935_v46 = vld [vmem:[#allocation119_spill] sm:$0xff]  ;;  %v26941_v27 = vand.u32 4294901760, %v24334_v57 }
 0x417   :  { %v24298_v2 = vpop.f32.mrf.mxu0  ;;  %12669 = vmatmul.mubr.f32.gmra.mxu0 %v26930_v20  ;;  %12948 = vmatpush1.msra.mxu1 %v24100_v31  ;;  %v26940_v20 = vld [vmem:[#allocation125_spill] sm:$0xff] }
 0x418   :  { %12950 = vmatprep.subr.mxu1 %v24106_v12  ;;  %v24303_v28 = vpop.f32.mrf.mxu1  ;;  %12674 = vmatprep.mubr.f32.mxu0 %v26505_v30  ;;  %v26933_v12 = vld [vmem:[#allocation114_spill] sm:$0xff]  ;;  %v13188_v32 = vsub.f32 %v24334_v57, %v26941_v27 }
 0x419   :  { %v24308_v40 = vpop.f32.mrf.mxu0  ;;  %12952 = vmatpush1.msra.mxu1 %v24109_v9  ;;  %12768 = vmatprep.mubr.f32.mxu1 %v26505_v30  ;;  %v24328_v9 = vsub.f32 %v3087_v54, %v24306_v37 }
 0x41a   :  { %13178 = vmatprep.subr.mxu1 %v13177_v26  ;;  %v24315_v31 = vpop.f32.mrf.mxu1  ;;  %12772 = vmatmul.mubr.f32.gmra.mxu1 %v26933_v12  ;;  %v13189_v51 = vand.u32 4294901760, %v13188_v32  ;;  %v10370_v32 = vadd.f32 %v24248_v33, %v24221_v35  ;;  %v24424_v33 = vld [vmem:[%s26256_s2] sm:$0x1f] }
 0x41b   :  { %v24320_v63 = vpop.f32.mrf.mxu0  ;;  %12677 = vmatmul.mubr.f32.gmra.mxu0 %v26935_v46  ;;  %12777 = vmatprep.mubr.f32.mxu1 %v26505_v30  ;;  %v26938_v46 = vld [vmem:[#allocation121_spill] sm:$0xff]  ;;  %v26939_v21 = vand.u32 4294901760, %v24328_v9  ;;  %26945 = vst [vmem:[#allocation77_spill] sm:$0xff] %v24424_v33 }
 0x41c   :  { %v24324_v16 = vpop.f32.mrf.mxu1  ;;  %12682 = vmatprep.mubr.f32.mxu0 %v26505_v30 }
 0x41d   :  { %v24330_v26 = vpop.f32.mrf.mxu0 }
 0x41e   :  { %v24336_v49 = vpop.f32.mrf.mxu1  ;;  %12781 = vmatmul.mubr.f32.gmra.mxu1 %v26936_v58  ;;  %v13182_v58 = vsub.f32 %v24328_v9, %v26939_v21  ;;  %v13194_v21 = vsub.f32 %v24340_v17, %v26942_v19 }
 0x41f   :  { %v24342_v0 = vpop.f32.mrf.mxu0  ;;  %12685 = vmatmul.mubr.f32.gmra.mxu0 %v26937_v14  ;;  %12786 = vmatprep.mubr.f32.mxu1 %v26505_v30 }
 0x420   :  { %v24346_v54 = vpop.f32.mrf.mxu1  ;;  %12881 = vmatprep.mubr.f32.mxu0 %v26505_v30  ;;  %v13183_v27 = vand.u32 4294901760, %v13182_v58  ;;  %v13195_v19 = vand.u32 4294901760, %v13194_v21 }
 0x421   :  { %v24350_v38 = vpop.f32.mrf.mxu0 }
 0x422   :  { %v10588_v13 = vpop.f32.mrf.mxu1  ;;  %12790 = vmatmul.mubr.f32.gmra.mxu1 %v26938_v46 }
 0x423   :  { %v24355_v12 = vpop.f32.mrf.mxu0  ;;  %18644 = vmatmul.mubr.msk.f32.vlgmr.msra.gmra.mxu0 %vm6092_vm2, %v26898_v4  ;;  %12795 = vmatprep.mubr.f32.mxu1 %v26505_v30 }
 0x424   :  { %13052 = vmatpush1.msra.mxu0 %v24306_v37  ;;  %v10590_v14 = vpop.f32.mrf.mxu1  ;;  %12888 = vmatprep.mubr.f32.mxu0 %v26505_v30 }
 0x425   :  { %13054 = vmatprep.subr.mxu0 %v24313_v61  ;;  %v24363_v3 = vpop.f32.mrf.mxu0 }
 0x426   :  { %13056 = vmatpush1.msra.mxu0 %v24318_v22  ;;  %v24369_v46 = vpop.f32.mrf.mxu1  ;;  %12799 = vmatmul.mubr.f32.gmra.mxu1 %v26940_v20  ;;  %v10377_v22 = vadd.f32 %v24273_v34, %v24235_v44 }
 0x427   :  { %13295 = vmatprep.subr.mxu0 %v24241_v36  ;;  %v24376_v25 = vpop.f32.mrf.mxu0  ;;  %18645 = vmatmul.mubr.msk.f32.gmra.mxu0 %vm6092_vm2, %v26901_v56 }
 0x428   :  { %v24383_v41 = vpop.f32.mrf.mxu1  ;;  %12895 = vmatprep.mubr.f32.mxu0 %v26505_v30  ;;  %12985 = vmatprep.mubr.f32.mxu1 %v26505_v30 }
 0x429   :  { %v24387_v20 = vpop.f32.mrf.mxu0 }
 0x42a   :  { %v24389_v11 = vpop.f32.mrf.mxu1  ;;  %18649 = vmatmul.mubr.msk.f32.vlgmr.msra.gmra.mxu1 %vm6092_vm2, %v26898_v4 }
 0x42b   :  { %v24393_v6 = vpop.f32.mrf.mxu0  ;;  %18646 = vmatmul.mubr.msk.f32.gmra.mxu0 %vm6092_vm2, %v26906_v18  ;;  %13184 = vmatpush1.msra.mxu1 %v13183_v27  ;;  %v26944_v27 = vld [vmem:[#allocation103_spill] sm:$0xff] }
 0x42c   :  { %13190 = vmatprep.subr.mxu1 %v13189_v51  ;;  %v24397_v8 = vpop.f32.mrf.mxu1  ;;  %12902 = vmatprep.mubr.f32.mxu0 %v26505_v30 }
 0x42d   :  { %v24400_v45 = vpop.f32.mrf.mxu0  ;;  %13196 = vmatpush1.msra.mxu1 %v13195_v19  ;;  %12992 = vmatprep.mubr.f32.mxu1 %v26505_v30  ;;  %v12191_v19 = vsub.s32 0, %v26944_v27 }
 0x42e   :  { %26943 = vst [vmem:[#allocation71_spill] sm:$0xff] %v24400_v45  ;;  %13407 = vmatprep.subr.mxu1 %v24226_v42  ;;  %v24404_v58 = vpop.f32.mrf.mxu1  ;;  %18650 = vmatmul.mubr.msk.f32.gmra.mxu1 %vm6092_vm2, %v26901_v56  ;;  %v12195_v45 = vsub.s32 1, %v26944_v27  ;;  %v10372_v56 = vadd.f32 %v24261_v50, %v24229_v47  ;;  %v10479_v42 = vadd.f32 %v24320_v63, %v10370_v32 }
 0x42f   :  { %v10708_v51 = vpop.f32.mrf.mxu0  ;;  %18647 = vmatmul.mubr.msk.f32.gmra.mxu0 %vm6092_vm2, %v26911_v53  ;;  %12999 = vmatprep.mubr.f32.mxu1 %v26505_v30  ;;  %v10379_v63 = vadd.f32 %v24283_v29, %v24246_v24  ;;  %v24442_v32 = vrot.slane %v24424_v33, %v12191_v19  ;;  %v10386_v24 = vadd.f32 %v24303_v28, %v24269_v10 }
 0x430   :  { %v24413_v21 = vpop.f32.mrf.mxu1  ;;  %12909 = vmatprep.mubr.f32.mxu0 %v26505_v30  ;;  %v10481_v27 = vadd.f32 %v24330_v26, %v10372_v56  ;;  %v10589_v61 = vadd.f32 %v10588_v13, %v10479_v42  ;;  %v24445_v44 = vrot.slane %v24424_v33, %v12195_v45  ;;  %v10384_v13 = vadd.f32 %v24294_v7, %v24255_v59 }
 0x431   :  { %v10710_v35 = vpop.f32.mrf.mxu0  ;;  %26946 = vst [vmem:[#allocation156_spill] sm:$0xff] %v24442_v32  ;;  %v10487_v56 = vadd.f32 %v24342_v0, %v10377_v22  ;;  %v10391_v29 = vadd.f32 %v24315_v31, %v24280_v60  ;;  %v10393_v19 = vadd.f32 %v24324_v16, %v24292_v39  ;;  %v10489_v45 = vadd.f32 %v24350_v38, %v10379_v63 }
 0x432   :  { %v24426_v55 = vpop.f32.mrf.mxu1  ;;  %18651 = vmatmul.mubr.msk.f32.gmra.mxu1 %vm6092_vm2, %v26906_v18  ;;  %26947 = vst [vmem:[#allocation75_spill] sm:$0xff] %v24445_v44  ;;  %v10591_v42 = vadd.f32 %v10590_v14, %v10481_v27  ;;  %v10709_v34 = vadd.f32 %v10708_v51, %v10589_v61  ;;  %v10398_v10 = vadd.f32 %v24336_v49, %v24298_v2 }
 0x433   :  { %v10715_v47 = vpop.f32.mrf.mxu0  ;;  %18648 = vmatmul.mubr.msk.f32.gmra.mxu0 %vm6092_vm2, %v26921_v48  ;;  %13006 = vmatprep.mubr.f32.mxu1 %v26505_v30  ;;  %v10598_v0 = vadd.f32 %v24369_v46, %v10487_v56  ;;  %v24466_v16 = vadd.f32 %v24346_v54, %v24308_v40  ;;  %v10600_v38 = vadd.f32 %v24383_v41, %v10489_v45 }
 0x434   :  { %v24438_v50 = vpop.f32.mrf.mxu1  ;;  %13089 = vmatprep.mubr.f32.mxu0 %v26505_v30  ;;  %v10711_v14 = vadd.f32 %v10710_v35, %v10591_v42  ;;  %v10495_v39 = vadd.f32 %v24355_v12, %v10384_v13  ;;  %v10497_v2 = vadd.f32 %v24363_v3, %v10386_v24  ;;  %v10503_v40 = vadd.f32 %v24376_v25, %v10391_v29 }
 0x435   :  { %v10717_v26 = vpop.f32.mrf.mxu0  ;;  %v10716_v28 = vadd.f32 %v10715_v47, %v10598_v0  ;;  %v10505_v25 = vadd.f32 %v24387_v20, %v10393_v19  ;;  %v10511_v13 = vadd.f32 %v24393_v6, %v10398_v10  ;;  %v26949_v19 = vld [vmem:[#allocation67_spill] sm:$0xff]  ;;  %v26950_v10 = vld [vmem:[#allocation73_spill] sm:$0xff] }
 0x436   :  { %v10812_v33 = vpop.f32.mrf.mxu1  ;;  %18652 = vmatmul.mubr.msk.f32.gmra.mxu1 %vm6092_vm2, %v26911_v53  ;;  %v10718_v22 = vadd.f32 %v10717_v26, %v10600_v38  ;;  %v10607_v3 = vadd.f32 %v24389_v11, %v10495_v39  ;;  %v10609_v27 = vadd.f32 %v24397_v8, %v10497_v2  ;;  %v10616_v20 = vadd.f32 %v24404_v58, %v10503_v40  ;;  %v26954_v40 = vld [vmem:[#allocation34_spill] sm:$0xff] }
 0x437   :  { %v10722_v59 = vpop.f32.mrf.mxu0  ;;  %v10813_v7 = vadd.f32 %v10812_v33, %v10709_v34  ;;  %13095 = vmatmul.mubr.f32.vlgmr.msra.gmra.mxu0 %v26894_v43  ;;  %13013 = vmatprep.mubr.f32.mxu1 %v26505_v30 }
 0x438   :  { %13298 = vmatpush1.msra.mxu0 %v24328_v9  ;;  %v10814_v60 = vpop.f32.mrf.mxu1  ;;  %13100 = vmatprep.mubr.f32.mxu0 %v26505_v30  ;;  %v10723_v56 = vadd.f32 %v10722_v59, %v10607_v3 }
 0x439   :  { %v12163_v61 = vadd.f32 %v10813_v7, %v23832_v52  ;;  %13301 = vmatprep.subr.mxu0 %v24334_v57  ;;  %v10724_v31 = vpop.f32.mrf.mxu0  ;;  %v10815_v49 = vadd.f32 %v10814_v60, %v10711_v14  ;;  %v26948_v52 = vand.u32 4294901760, %v24241_v36  ;;  %v26951_v60 = vld [vmem:[#allocation29_spill] sm:$0xff] }
 0x43a   :  { %13304 = vmatpush1.msra.mxu0 %v24340_v17  ;;  %v10819_v41 = vpop.f32.mrf.mxu1  ;;  %18653 = vmatmul.mubr.msk.f32.gmra.mxu1 %vm6092_vm2, %v26921_v48  ;;  %v10725_v11 = vadd.f32 %v10724_v31, %v10609_v27  ;;  %v26953_v31 = vld [vmem:[#allocation72_spill] sm:$0xff] }
 0x43b   :  { %v12214_v12 = vadd.f32 %v24442_v32, %v12163_v61  ;;  %v12164_v46 = vadd.f32 %v10815_v49, %v23839_v23  ;;  %13523 = vmatprep.subr.mxu0 %v26948_v52  ;;  %v10729_v54 = vpop.f32.mrf.mxu0  ;;  %v10820_v51 = vadd.f32 %v10819_v41, %v10716_v28  ;;  %13106 = vmatmul.mubr.f32.gmra.mxu0 %v26897_v62  ;;  %v26952_v28 = vld [vmem:[#allocation70_spill] sm:$0xff] }
 0x43c   :  { %v10821_v35 = vpop.f32.mrf.mxu1  ;;  %13111 = vmatprep.mubr.f32.mxu0 %v26505_v30  ;;  %13229 = vmatprep.mubr.f32.mxu1 %v26505_v30  ;;  %v10730_v6 = vadd.f32 %v10729_v54, %v10616_v20 }
 0x43d   :  { %v12239_v33 = vmax.f32 %v12214_v12, 0.05  ;;  %v12215_v23 = vadd.f32 %v24445_v44, %v12164_v46  ;;  %v12168_v36 = vadd.f32 %v10820_v51, %v23846_v15  ;;  %v10731_v47 = vpop.f32.mrf.mxu0  ;;  %v10822_v63 = vadd.f32 %v10821_v35, %v10718_v22  ;;  %v26956_v46 = vld [vmem:[#allocation71_spill] sm:$0xff]  ;;  %v26957_v35 = vld [vmem:[#allocation38_spill] sm:$0xff] }
 0x43e   :  { %v10826_v42 = vpop.f32.mrf.mxu1  ;;  %18654 = vmatmul.mubr.msk.f32.vlgmr.msra.gmra.mxu1 %vm6092_vm2, %v26898_v4  ;;  %v10618_v15 = vadd.f32 %v24413_v21, %v10505_v25  ;;  %v10625_v21 = vadd.f32 %v24426_v55, %v10511_v13  ;;  %v26955_v55 = vld [vmem:[#allocation127_spill] sm:$0xff]  ;;  %v10513_v52 = vadd.f32 %v26956_v46, %v24466_v16  ;;  %v26959_v16 = vld [vmem:[#allocation117_spill] sm:$0xff]  ;;  %v26967_v46 = vld [vmem:[#allocation42_spill] sm:$0xff] }
 0x43f   :  { %v12264_v8 = vmin.f32 %v12239_v33, 0.08  ;;  %v12240_v34 = vmax.f32 %v12215_v23, 0.05  ;;  %v12219_v26 = vadd.f32 %v24442_v32, %v12168_v36  ;;  %v12169_v24 = vadd.f32 %v10822_v63, %v23851_v1  ;;  %v10736_v29 = vpop.f32.mrf.mxu0  ;;  %13117 = vmatmul.mubr.f32.gmra.mxu0 %v26900_v5  ;;  %13409 = vmatpush1.msra.mxu1 %v24306_v37 }
 0x440   :  { %v10827_v58 = vadd.f32 %v10826_v42, %v10723_v56  ;;  %13411 = vmatprep.subr.mxu1 %v26949_v19  ;;  %v10828_v45 = vpop.f32.mrf.mxu1  ;;  %13122 = vmatprep.mubr.f32.mxu0 %v26505_v30  ;;  %v10732_v38 = vadd.f32 %v10731_v47, %v10618_v15  ;;  %v10737_v54 = vadd.f32 %v10736_v29, %v10625_v21  ;;  %v26958_v47 = vld [vmem:[#allocation107_spill] sm:$0xff]  ;;  %v26961_v29 = vld [vmem:[#allocation129_spill] sm:$0xff]  ;;  %v26963_v15 = vld [vmem:[#allocation112_spill] sm:$0xff] }
 0x441   :  { %12289 = vst [vmem:[%s26257_s3] sm:$0xff] %v12264_v8  ;;  %v12265_v0 = vmin.f32 %v12240_v34, 0.08  ;;  %v12244_v1 = vmax.f32 %v12219_v26, 0.05  ;;  %v12220_v14 = vadd.f32 %v24445_v44, %v12169_v24  ;;  %v10738_v59 = vpop.f32.mrf.mxu0  ;;  %v10829_v7 = vadd.f32 %v10828_v45, %v10725_v11  ;;  %13413 = vmatpush1.msra.mxu1 %v26950_v10  ;;  %13236 = vmatprep.mubr.f32.mxu1 %v26505_v30  ;;  %v26960_v8 = vld [vmem:[#allocation12_spill] sm:$0xff]  ;;  %v26964_v21 = vld [vmem:[#allocation7_spill] sm:$0xff] }
 0x442   :  { %v12173_v39 = vadd.f32 %v10827_v58, %v26951_v60  ;;  %13633 = vmatprep.subr.mxu1 %v26952_v28  ;;  %v10833_v61 = vpop.f32.mrf.mxu1  ;;  %18655 = vmatmul.mubr.msk.f32.gmra.mxu1 %vm6092_vm2, %v26953_v31  ;;  %v3361_v63 = vadd.f32 %v26959_v16, %v26958_v47  ;;  %v10627_v13 = vadd.f32 %v24438_v50, %v10513_v52  ;;  %v26962_v50 = vld [vmem:[#allocation68_spill] sm:$0xff]  ;;  %v26971_v47 = vand.u32 4294901760, %v24334_v57 }
 0x443   :  { %12290 = vst [vmem:[%s26257_s3 + $0x8] sm:$0xff] %v12265_v0  ;;  %v12269_v49 = vmin.f32 %v12244_v1, 0.08  ;;  %v12245_v2 = vmax.f32 %v12220_v14, 0.05  ;;  %v12174_v22 = vadd.f32 %v10829_v7, %v26954_v40  ;;  %v10834_v41 = vadd.f32 %v10833_v61, %v10730_v6  ;;  %v24517_v12 = vpop.f32.mrf.mxu0  ;;  %13128 = vmatmul.mubr.f32.gmra.mxu0 %v26955_v55  ;;  %13243 = vmatprep.mubr.f32.mxu1 %v26505_v30 }
 0x444   :  { %v12224_v51 = vadd.f32 %v24442_v32, %v12173_v39  ;;  %v10835_v25 = vpop.f32.mrf.mxu1  ;;  %13133 = vmatprep.mubr.f32.mxu0 %v26505_v30  ;;  %v3354_v6 = vadd.f32 %v26963_v15, %v26962_v50  ;;  %v10739_v45 = vadd.f32 %v10738_v59, %v10627_v13  ;;  %v26965_v59 = vld [vmem:[#allocation126_spill] sm:$0xff]  ;;  %v26976_v50 = vld [vmem:[#allocation131_spill] sm:$0xff] }
 0x445   :  { %12294 = vst [vmem:[%s26257_s3 + $0x28] sm:$0xff] %v12269_v49  ;;  %v12270_v3 = vmin.f32 %v12245_v2, 0.08  ;;  %v12225_v27 = vadd.f32 %v24445_v44, %v12174_v22  ;;  %v12178_v33 = vadd.f32 %v10834_v41, %v26957_v35  ;;  %v10836_v23 = vadd.f32 %v10835_v25, %v10732_v38  ;;  %v24530_v36 = vpop.f32.mrf.mxu0  ;;  %v26966_v41 = vld [vmem:[#allocation105_spill] sm:$0xff]  ;;  %v26969_v25 = vld [vmem:[#allocation123_spill] sm:$0xff] }
 0x446   :  { %v12249_v20 = vmax.f32 %v12224_v51, 0.05  ;;  %v10840_v56 = vpop.f32.mrf.mxu1  ;;  %18656 = vmatmul.mubr.msk.f32.gmra.mxu1 %vm6092_vm2, %v26906_v18  ;;  %v3482_v61 = vadd.f32 %v26965_v59, %v3361_v63  ;;  %v26972_v63 = vand.u32 4294901760, %v24340_v17 }
 0x447   :  { %12295 = vst [vmem:[%s26257_s3 + $0x30] sm:$0xff] %v12270_v3  ;;  %v12250_v11 = vmax.f32 %v12225_v27, 0.05  ;;  %v12229_v42 = vadd.f32 %v24442_v32, %v12178_v33  ;;  %v12179_v34 = vadd.f32 %v10836_v23, %v26960_v8  ;;  %v10841_v26 = vadd.f32 %v10840_v56, %v10737_v54  ;;  %v24542_v24 = vpop.f32.mrf.mxu0  ;;  %13139 = vmatmul.mubr.f32.gmra.mxu0 %v26961_v29  ;;  %v26970_v27 = vld [vmem:[#allocation130_spill] sm:$0xff] }
 0x448   :  { %13250 = vmatprep.mubr.f32.mxu1 %v26505_v30  ;;  %v12274_v58 = vmin.f32 %v12249_v20, 0.08  ;;  %v10842_v0 = vpop.f32.mrf.mxu1  ;;  %13337 = vmatprep.mubr.f32.mxu0 %v26505_v30  ;;  %v26968_v54 = vand.u32 4294901760, %v24328_v9  ;;  %v3474_v3 = vadd.f32 %v26969_v25, %v3354_v6  ;;  %v3595_v35 = vadd.f32 %v26970_v27, %v3482_v61  ;;  %v26973_v20 = vld [vmem:[#allocation128_spill] sm:$0xff]  ;;  %v26977_v6 = vld [vmem:[#allocation93_spill] sm:$0xff] }
 0x449   :  { %v12275_v1 = vmin.f32 %v12250_v11, 0.08  ;;  %v12254_v14 = vmax.f32 %v12229_v42, 0.05  ;;  %v12230_v7 = vadd.f32 %v24445_v44, %v12179_v34  ;;  %v12183_v38 = vadd.f32 %v10841_v26, %v26964_v21  ;;  %v24551_v60 = vpop.f32.mrf.mxu0  ;;  %v26974_v11 = vld [vmem:[#allocation85_spill] sm:$0xff]  ;;  %v26975_v34 = vld [vmem:[#allocation110_spill] sm:$0xff] }
 0x44a   :  { %12299 = vst [vmem:[%s26257_s3 + $0x50] sm:$0xff] %v12274_v58  ;;  %v10843_v39 = vadd.f32 %v10842_v0, %v10739_v45  ;;  %v24556_v28 = vpop.f32.mrf.mxu1  ;;  %18657 = vmatmul.mubr.msk.f32.gmra.mxu1 %vm6092_vm2, %v26911_v53  ;;  %v3586_v56 = vadd.f32 %v26973_v20, %v3474_v3  ;;  %v3724_v42 = vadd.f32 %v26974_v11, %v3595_v35  ;;  %v26983_v3 = vld [vmem:[#allocation116_spill] sm:$0xff]  ;;  %v26985_v20 = vld [vmem:[#allocation121_spill] sm:$0xff] }
 0x44b   :  { %12300 = vst [vmem:[%s26257_s3 + $0x58] sm:$0xff] %v12275_v1  ;;  %v12279_v49 = vmin.f32 %v12254_v14, 0.08  ;;  %v12255_v2 = vmax.f32 %v12230_v7, 0.05  ;;  %v12234_v40 = vadd.f32 %v24442_v32, %v12183_v38  ;;  %v24565_v22 = vpop.f32.mrf.mxu0  ;;  %13340 = vmatmul.mubr.f32.vlgmr.msra.gmra.mxu0 %v26966_v41  ;;  %13257 = vmatprep.mubr.f32.mxu1 %v26505_v30  ;;  %v26978_v14 = vld [vmem:[#allocation109_spill] sm:$0xff] }
 0x44c   :  { %v12184_v52 = vadd.f32 %v10843_v39, %v26967_v46  ;;  %13527 = vmatpush1.msra.mxu0 %v26968_v54  ;;  %v24572_v51 = vpop.f32.mrf.mxu1  ;;  %13345 = vmatprep.mubr.f32.mxu0 %v26505_v30  ;;  %v3717_v15 = vadd.f32 %v26976_v50, %v3586_v56  ;;  %v3829_v58 = vadd.f32 %v26977_v6, %v3724_v42  ;;  %v26979_v7 = vld [vmem:[#allocation80_spill] sm:$0xff]  ;;  %v26980_v39 = vld [vmem:[#allocation113_spill] sm:$0xff]  ;;  %v26982_v46 = vld [vmem:[#allocation119_spill] sm:$0xff] }
 0x44d   :  { %12304 = vst [vmem:[%s26257_s3 + $0x78] sm:$0xff] %v12279_v49  ;;  %v12280_v33 = vmin.f32 %v12255_v2, 0.08  ;;  %v12259_v23 = vmax.f32 %v12234_v40, 0.05  ;;  %13531 = vmatprep.subr.mxu0 %v26971_v47  ;;  %v24582_v16 = vpop.f32.mrf.mxu0  ;;  %v26987_v32 = vld [vmem:[#allocation8_spill] sm:$0xff] }
 0x44e   :  { %v12235_v9 = vadd.f32 %v24445_v44, %v12184_v52  ;;  %13535 = vmatpush1.msra.mxu0 %v26972_v63  ;;  %v24587_v13 = vpop.f32.mrf.mxu1  ;;  %18658 = vmatmul.mubr.msk.f32.gmra.mxu1 %vm6092_vm2, %v26921_v48  ;;  %v3822_v21 = vadd.f32 %v26979_v7, %v3717_v15  ;;  %v24626_v61 = vand.u32 4294901760, %v3829_v58  ;;  %v26986_v15 = vld [vmem:[#allocation125_spill] sm:$0xff] }
 0x44f   :  { %12305 = vst [vmem:[%s26257_s3 + $0x80] sm:$0xff] %v12280_v33  ;;  %v12284_v57 = vmin.f32 %v12259_v23, 0.08  ;;  %v24596_v8 = vpop.f32.mrf.mxu0  ;;  %13348 = vmatmul.mubr.f32.gmra.mxu0 %v26975_v34  ;;  %13446 = vmatprep.mubr.f32.mxu1 %v26505_v30  ;;  %v26984_v33 = vld [vmem:[#allocation122_spill] sm:$0xff] }
 0x450   :  { %v12260_v17 = vmax.f32 %v12235_v9, 0.05  ;;  %v24600_v26 = vpop.f32.mrf.mxu1  ;;  %13353 = vmatprep.mubr.f32.mxu0 %v26505_v30  ;;  %19561 = vmatprep.subr.mxu0 %v26505_v30  ;;  %v24636_v40 = vand.u32 4294901760, %v3822_v21  ;;  %v26993_v34 = vld [vmem:[#allocation26_spill] sm:$0xff] }
 0x451   :  { %12309 = vst [vmem:[%s26257_s3 + $0xa0] sm:$0x1] %v12284_v57  ;;  %v24609_v45 = vpop.f32.mrf.mxu0 }
 0x452   :  { %v12285_v0 = vmin.f32 %v12260_v17, 0.08  ;;  %v24611_v1 = vpop.f32.mrf.mxu1  ;;  %13450 = vmatmul.mubr.f32.vlgmr.msra.gmra.mxu1 %v26978_v14  ;;  %v24654_v27 = vsub.f32 %v3822_v21, %v24636_v40  ;;  %v11059_v14 = vadd.f32 %v24572_v51, %v24530_v36  ;;  %v26994_v36 = vld [vmem:[#allocation32_spill] sm:$0xff] }
 0x453   :  { %v24615_v38 = vpop.f32.mrf.mxu0  ;;  %13356 = vmatmul.mubr.f32.gmra.mxu0 %v26980_v39  ;;  %13635 = vmatpush1.msra.mxu1 %v24306_v37  ;;  %v26981_v37 = vld [vmem:[#allocation114_spill] sm:$0xff] }
 0x454   :  { %12310 = vst [vmem:[%s26257_s3 + $0xa8] sm:$0x1] %v12285_v0  ;;  %13637 = vmatprep.subr.mxu1 %v26949_v19  ;;  %v24623_v59 = vpop.f32.mrf.mxu1  ;;  %13361 = vmatprep.mubr.f32.mxu0 %v26505_v30  ;;  %v26476_v56 = vand.u32 4294901760, %v24654_v27 }
 0x455   :  { %v24628_v49 = vpop.f32.mrf.mxu0  ;;  %13639 = vmatpush1.msra.mxu1 %v26950_v10  ;;  %13455 = vmatprep.mubr.f32.mxu1 %v26505_v30  ;;  %v24646_v10 = vsub.f32 %v3829_v58, %v24626_v61 }
 0x456   :  { %v24632_v2 = vpop.f32.mrf.mxu1  ;;  %13459 = vmatmul.mubr.f32.gmra.mxu1 %v26981_v37  ;;  %19580 = vmatprep.subr.mxu1 %v26505_v30  ;;  %v13864_v58 = vsub.f32 %v24654_v27, %v26476_v56 }
 0x457   :  { %v24638_v19 = vpop.f32.mrf.mxu0  ;;  %13364 = vmatmul.mubr.f32.gmra.mxu0 %v26982_v46  ;;  %13464 = vmatprep.mubr.f32.mxu1 %v26505_v30  ;;  %v26473_v47 = vand.u32 4294901760, %v24646_v10 }
 0x458   :  { %v24642_v52 = vpop.f32.mrf.mxu1  ;;  %13369 = vmatprep.mubr.f32.mxu0 %v26505_v30  ;;  %v13865_v56 = vand.u32 4294901760, %v13864_v58 }
 0x459   :  { %v24648_v54 = vpop.f32.mrf.mxu0  ;;  %v13857_v17 = vsub.f32 %v24646_v10, %v26473_v47 }
 0x45a   :  { %v24650_v25 = vpop.f32.mrf.mxu1  ;;  %13468 = vmatmul.mubr.f32.gmra.mxu1 %v26983_v3  ;;  %v26990_v3 = vld [vmem:[#allocation16_spill] sm:$0xff] }
 0x45b   :  { %v24656_v35 = vpop.f32.mrf.mxu0  ;;  %13372 = vmatmul.mubr.f32.gmra.mxu0 %v26984_v33  ;;  %13473 = vmatprep.mubr.f32.mxu1 %v26505_v30  ;;  %v13858_v21 = vand.u32 4294901760, %v13857_v17 }
 0x45c   :  { %v24660_v23 = vpop.f32.mrf.mxu1  ;;  %13568 = vmatprep.mubr.f32.mxu0 %v26505_v30 }
 0x45d   :  { %v24664_v9 = vpop.f32.mrf.mxu0 }
 0x45e   :  { %v11275_v63 = vpop.f32.mrf.mxu1  ;;  %13477 = vmatmul.mubr.f32.gmra.mxu1 %v26985_v20 }
 0x45f   :  { %v24668_v11 = vpop.f32.mrf.mxu0  ;;  %18659 = vmatmul.mubr.msk.f32.vlgmr.msra.gmra.mxu0 %vm6092_vm2, %v26898_v4  ;;  %13482 = vmatprep.mubr.f32.mxu1 %v26505_v30 }
 0x460   :  { %19562 = vmatpush3.msra.mxu0 %v24626_v61  ;;  %v24674_v42 = vpop.f32.mrf.mxu1  ;;  %13575 = vmatprep.mubr.f32.mxu0 %v26505_v30 }
 0x461   :  { %19563 = vmatprep.subr.mxu0 %v26505_v30  ;;  %v24678_v57 = vpop.f32.mrf.mxu0 }
 0x462   :  { %19564 = vmatpush3.msra.mxu0 %v24636_v40  ;;  %v24684_v50 = vpop.f32.mrf.mxu1  ;;  %13486 = vmatmul.mubr.f32.gmra.mxu1 %v26986_v15  ;;  %v26988_v15 = vld [vmem:[#allocation11_spill] sm:$0xff] }
 0x463   :  { %v24687_v6 = vpop.f32.mrf.mxu0  ;;  %18660 = vmatmul.mubr.msk.f32.gmra.mxu0 %vm6092_vm2, %v26953_v31  ;;  %13672 = vmatprep.mubr.f32.mxu1 %v26505_v30  ;;  %v393_v20 = vadd.f32 %v26988_v15, %v26987_v32  ;;  %v11057_v32 = vadd.f32 %v24556_v28, %v24517_v12 }
 0x464   :  { %v24695_v0 = vpop.f32.mrf.mxu1  ;;  %13582 = vmatprep.mubr.f32.mxu0 %v26505_v30  ;;  %19599 = vmatprep.subr.mxu0 %v26505_v30 }
 0x465   :  { %v24699_v7 = vpop.f32.mrf.mxu0  ;;  %v514_v46 = vadd.f32 %v26990_v3, %v393_v20  ;;  %v26992_v3 = vld [vmem:[#allocation103_spill] sm:$0xff]  ;;  %v11166_v12 = vadd.f32 %v24638_v19, %v11057_v32 }
 0x466   :  { %v24701_v47 = vpop.f32.mrf.mxu1  ;;  %18664 = vmatmul.mubr.msk.f32.vlgmr.msra.gmra.mxu1 %vm6092_vm2, %v26898_v4  ;;  %v12199_v20 = vsub.s32 2, %v26992_v3  ;;  %v12203_v39 = vsub.s32 3, %v26992_v3 }
 0x467   :  { %v24705_v44 = vpop.f32.mrf.mxu0  ;;  %18661 = vmatmul.mubr.msk.f32.gmra.mxu0 %vm6092_vm2, %v26906_v18  ;;  %19581 = vmatpush3.msra.mxu1 %v13858_v21 }
 0x468   :  { %19582 = vmatprep.subr.mxu1 %v26505_v30  ;;  %v24712_v33 = vpop.f32.mrf.mxu1  ;;  %13589 = vmatprep.mubr.f32.mxu0 %v26505_v30 }
 0x469   :  { %v24715_v17 = vpop.f32.mrf.mxu0  ;;  %19583 = vmatpush3.msra.mxu1 %v13865_v56  ;;  %13679 = vmatprep.mubr.f32.mxu1 %v26505_v30  ;;  %v26991_v56 = vld [vmem:[#allocation20_spill] sm:$0xff] }
 0x46a   :  { %26989 = vst [vmem:[#allocation82_spill] sm:$0xff] %v24715_v17  ;;  %v24719_v37 = vpop.f32.mrf.mxu1  ;;  %18665 = vmatmul.mubr.msk.f32.gmra.mxu1 %vm6092_vm2, %v26953_v31  ;;  %19618 = vmatprep.subr.mxu1 %v26505_v30  ;;  %v627_v58 = vadd.f32 %v26991_v56, %v514_v46  ;;  %v11064_v46 = vadd.f32 %v24587_v13, %v24542_v24  ;;  %v26995_v24 = vld [vmem:[#allocation77_spill] sm:$0xff] }
 0x46b   :  { %v11395_v15 = vpop.f32.mrf.mxu0  ;;  %18662 = vmatmul.mubr.msk.f32.gmra.mxu0 %vm6092_vm2, %v26911_v53  ;;  %13686 = vmatprep.mubr.f32.mxu1 %v26505_v30  ;;  %v11168_v56 = vadd.f32 %v24648_v54, %v11059_v14  ;;  %v11276_v17 = vadd.f32 %v11275_v63, %v11166_v12  ;;  %v24759_v13 = vrot.slane %v26995_v24, %v12199_v20 }
 0x46c   :  { %v24730_v21 = vpop.f32.mrf.mxu1  ;;  %13596 = vmatprep.mubr.f32.mxu0 %v26505_v30  ;;  %v756_v41 = vadd.f32 %v26993_v34, %v627_v58  ;;  %v11066_v34 = vadd.f32 %v24600_v26, %v24551_v60  ;;  %v24762_v14 = vrot.slane %v26995_v24, %v12203_v39  ;;  %v11071_v54 = vadd.f32 %v24611_v1, %v24565_v22  ;;  %v27000_v24 = vld [vmem:[#allocation47_spill] sm:$0xff] }
 0x46d   :  { %v11397_v28 = vpop.f32.mrf.mxu0  ;;  %26996 = vst [vmem:[#allocation79_spill] sm:$0xff] %v24759_v13  ;;  %v11278_v63 = vadd.f32 %v24674_v42, %v11168_v56  ;;  %v11396_v32 = vadd.f32 %v11395_v15, %v11276_v17  ;;  %v11073_v26 = vadd.f32 %v24623_v59, %v24582_v16  ;;  %v11078_v58 = vadd.f32 %v24632_v2, %v24596_v8  ;;  %v26999_v17 = vld [vmem:[#allocation39_spill] sm:$0xff] }
 0x46e   :  { %v24739_v29 = vpop.f32.mrf.mxu1  ;;  %18666 = vmatmul.mubr.msk.f32.gmra.mxu1 %vm6092_vm2, %v26906_v18  ;;  %v24750_v51 = vadd.f32 %v26994_v36, %v756_v41  ;;  %26997 = vst [vmem:[#allocation15_spill] sm:$0xff] %v24762_v14  ;;  %v11174_v41 = vadd.f32 %v24656_v35, %v11064_v46  ;;  %v11080_v20 = vadd.f32 %v24642_v52, %v24609_v45  ;;  %v26998_v52 = vld [vmem:[#allocation4_spill] sm:$0xff] }
 0x46f   :  { %v11402_v3 = vpop.f32.mrf.mxu0  ;;  %18663 = vmatmul.mubr.msk.f32.gmra.mxu0 %vm6092_vm2, %v26921_v48  ;;  %13693 = vmatprep.mubr.f32.mxu1 %v26505_v30  ;;  %v11176_v39 = vadd.f32 %v24664_v9, %v11066_v34  ;;  %v11398_v1 = vadd.f32 %v11397_v28, %v11278_v63  ;;  %v11085_v16 = vadd.f32 %v24650_v25, %v24615_v38 }
 0x470   :  { %v24754_v19 = vpop.f32.mrf.mxu1  ;;  %19565 = vmatprep.mubr.msk.f32.mxu0 %vm19907_vm7, %v26505_v30  ;;  %v11285_v22 = vadd.f32 %v24684_v50, %v11174_v41  ;;  %v24784_v8 = vadd.f32 %v24660_v23, %v24628_v49  ;;  %v11182_v2 = vadd.f32 %v24668_v11, %v11071_v54  ;;  %v11184_v49 = vadd.f32 %v24678_v57, %v11073_v26 }
 0x471   :  { %v11404_v60 = vpop.f32.mrf.mxu0  ;;  %v11287_v45 = vadd.f32 %v24695_v0, %v11176_v39  ;;  %v11190_v23 = vadd.f32 %v24687_v6, %v11078_v58  ;;  %v11192_v57 = vadd.f32 %v24699_v7, %v11080_v20  ;;  %v11198_v63 = vadd.f32 %v24705_v44, %v11085_v16  ;;  %v27001_v20 = vld [vmem:[#allocation158_spill] sm:$0xff] }
 0x472   :  { %v11499_v12 = vpop.f32.mrf.mxu1  ;;  %18667 = vmatmul.mubr.msk.f32.gmra.mxu1 %vm6092_vm2, %v26911_v53  ;;  %v11294_v6 = vadd.f32 %v24701_v47, %v11182_v2  ;;  %v11296_v46 = vadd.f32 %v24712_v33, %v11184_v49  ;;  %v27002_v2 = vld [vmem:[#allocation159_spill] sm:$0xff] }
 0x473   :  { %v11409_v35 = vpop.f32.mrf.mxu0  ;;  %v11500_v42 = vadd.f32 %v11499_v12, %v11396_v32  ;;  %19566 = vmatmul.mubr.f32.vlgmr.msra.gmra.mxu0 %v26894_v43  ;;  %13700 = vmatprep.mubr.f32.mxu1 %v26505_v30  ;;  %v11403_v43 = vadd.f32 %v11402_v3, %v11285_v22  ;;  %v11405_v50 = vadd.f32 %v11404_v60, %v11287_v45 }
 0x474   :  { %19600 = vmatpush3.msra.mxu0 %v24646_v10  ;;  %v11501_v59 = vpop.f32.mrf.mxu1  ;;  %19568 = vmatprep.mubr.msk.f32.mxu0 %vm19907_vm7, %v26505_v30  ;;  %v11303_v7 = vadd.f32 %v24719_v37, %v11190_v23  ;;  %v11410_v47 = vadd.f32 %v11409_v35, %v11294_v6  ;;  %v11305_v44 = vadd.f32 %v24730_v21, %v11192_v57  ;;  %v27005_v57 = vld [vmem:[#allocation161_spill] sm:$0xff] }
 0x475   :  { %v12165_v9 = vadd.f32 %v11500_v42, %v26998_v52  ;;  %19601 = vmatprep.subr.mxu0 %v26505_v30  ;;  %v11411_v38 = vpop.f32.mrf.mxu0  ;;  %v11502_v25 = vadd.f32 %v11501_v59, %v11398_v1  ;;  %v11312_v21 = vadd.f32 %v24739_v29, %v11198_v63  ;;  %v24845_v29 = vand.u32 4294901760, %v24750_v51 }
 0x476   :  { %19602 = vmatpush3.msra.mxu0 %v24654_v27  ;;  %v11506_v0 = vpop.f32.mrf.mxu1  ;;  %18668 = vmatmul.mubr.msk.f32.gmra.mxu1 %vm6092_vm2, %v26921_v48  ;;  %v11412_v32 = vadd.f32 %v11411_v38, %v11296_v46 }
 0x477   :  { %v12216_v11 = vadd.f32 %v24759_v13, %v12165_v9  ;;  %v12166_v15 = vadd.f32 %v11502_v25, %v26999_v17  ;;  %v11416_v3 = vpop.f32.mrf.mxu0  ;;  %v11507_v28 = vadd.f32 %v11506_v0, %v11403_v43  ;;  %19569 = vmatmul.mubr.f32.gmra.mxu0 %v26897_v62  ;;  %19584 = vmatprep.mubr.msk.f32.mxu1 %vm19907_vm7, %v26505_v30  ;;  %v27003_v25 = vld [vmem:[#allocation160_spill] sm:$0xff]  ;;  %v27004_v0 = vld [vmem:[#allocation82_spill] sm:$0xff] }
 0x478   :  { %v11508_v56 = vpop.f32.mrf.mxu1  ;;  %19571 = vmatprep.mubr.msk.f32.mxu0 %vm19907_vm7, %v26505_v30  ;;  %19637 = vmatprep.subr.mxu0 %v26505_v30  ;;  %v11417_v37 = vadd.f32 %v11416_v3, %v11303_v7 }
 0x479   :  { %v12241_v36 = vmax.f32 %v12216_v11, 0.05  ;;  %v12217_v34 = vadd.f32 %v24762_v14, %v12166_v15  ;;  %v12170_v62 = vadd.f32 %v11507_v28, %v27000_v24  ;;  %v11418_v54 = vpop.f32.mrf.mxu0  ;;  %v11509_v41 = vadd.f32 %v11508_v56, %v11405_v50 }
 0x47a   :  { %v11513_v33 = vpop.f32.mrf.mxu1  ;;  %19585 = vmatmul.mubr.msk.f32.vlgmr.msra.gmra.mxu1 %vm6092_vm2, %v26898_v4  ;;  %v11419_v59 = vadd.f32 %v11418_v54, %v11305_v44  ;;  %v11200_v11 = vadd.f32 %v27004_v0, %v24784_v8  ;;  %v27006_v54 = vld [vmem:[#allocation65_spill] sm:$0xff] }
 0x47b   :  { %v12266_v60 = vmin.f32 %v12241_v36, 0.08  ;;  %v12242_v26 = vmax.f32 %v12217_v34, 0.05  ;;  %v12221_v58 = vadd.f32 %v24759_v13, %v12170_v62  ;;  %v12171_v39 = vadd.f32 %v11509_v41, %v27001_v20  ;;  %v11423_v12 = vpop.f32.mrf.mxu0  ;;  %19572 = vmatmul.mubr.f32.gmra.mxu0 %v26900_v5  ;;  %19619 = vmatpush3.msra.mxu1 %v24626_v61 }
 0x47c   :  { %v11514_v22 = vadd.f32 %v11513_v33, %v11410_v47  ;;  %19620 = vmatprep.subr.mxu1 %v26505_v30  ;;  %v11515_v1 = vpop.f32.mrf.mxu1  ;;  %19574 = vmatprep.mubr.msk.f32.mxu0 %vm19907_vm7, %v26505_v30  ;;  %v11424_v17 = vadd.f32 %v11423_v12, %v11312_v21  ;;  %v11314_v8 = vadd.f32 %v24754_v19, %v11200_v11  ;;  %v27007_v47 = vld [vmem:[#allocation129_spill] sm:$0xff] }
 0x47d   :  { %12291 = vst [vmem:[%s26257_s3 + $0x10] sm:$0xff] %v12266_v60  ;;  %v12267_v35 = vmin.f32 %v12242_v26, 0.08  ;;  %v12246_v42 = vmax.f32 %v12221_v58, 0.05  ;;  %v12222_v5 = vadd.f32 %v24762_v14, %v12171_v39  ;;  %v11425_v16 = vpop.f32.mrf.mxu0  ;;  %v11516_v45 = vadd.f32 %v11515_v1, %v11412_v32  ;;  %19621 = vmatpush3.msra.mxu1 %v24636_v40  ;;  %19587 = vmatprep.mubr.msk.f32.mxu1 %vm19907_vm7, %v26505_v30  ;;  %v27008_v39 = vld [vmem:[#allocation148_spill] sm:$0xff] }
 0x47e   :  { %v12175_v43 = vadd.f32 %v11514_v22, %v27002_v2  ;;  %v11520_v52 = vpop.f32.mrf.mxu1  ;;  %19588 = vmatmul.mubr.msk.f32.gmra.mxu1 %vm6092_vm2, %v26953_v31  ;;  %19656 = vmatprep.subr.mxu1 %v26505_v30  ;;  %v24872_v19 = vsub.f32 %v24750_v51, %v24845_v29  ;;  %v11426_v33 = vadd.f32 %v11425_v16, %v11314_v8  ;;  %v27010_v22 = vld [vmem:[#allocation9_spill] sm:$0xff] }
 0x47f   :  { %12292 = vst [vmem:[%s26257_s3 + $0x18] sm:$0xff] %v12267_v35  ;;  %v12271_v9 = vmin.f32 %v12246_v42, 0.08  ;;  %v12247_v38 = vmax.f32 %v12222_v5, 0.05  ;;  %v12176_v49 = vadd.f32 %v11516_v45, %v27003_v25  ;;  %v11521_v23 = vadd.f32 %v11520_v52, %v11417_v37  ;;  %v24839_v50 = vpop.f32.mrf.mxu0  ;;  %19575 = vmatmul.mubr.f32.gmra.mxu0 %v26955_v55  ;;  %19590 = vmatprep.mubr.msk.f32.mxu1 %vm19907_vm7, %v26505_v30  ;;  %v27009_v37 = vld [vmem:[#allocation6_spill] sm:$0xff] }
 0x480   :  { %v12226_v15 = vadd.f32 %v24759_v13, %v12175_v43  ;;  %v11522_v3 = vpop.f32.mrf.mxu1  ;;  %19577 = vmatprep.mubr.msk.f32.mxu0 %vm19907_vm7, %v26505_v30  ;;  %v386_v1 = vadd.f32 %v27010_v22, %v27009_v37  ;;  %v27011_v21 = vld [vmem:[#allocation105_spill] sm:$0xff]  ;;  %v27013_v43 = vld [vmem:[#allocation151_spill] sm:$0xff]  ;;  %v14493_v25 = vand.u32 4294901760, %v24872_v19 }
 0x481   :  { %12296 = vst [vmem:[%s26257_s3 + $0x38] sm:$0xff] %v12271_v9  ;;  %v12272_v55 = vmin.f32 %v12247_v38, 0.08  ;;  %v12227_v28 = vadd.f32 %v24762_v14, %v12176_v49  ;;  %v12180_v6 = vadd.f32 %v11521_v23, %v27005_v57  ;;  %v11523_v46 = vadd.f32 %v11522_v3, %v11419_v59  ;;  %v19453_v56 = vpop.f32.mrf.mxu0  ;;  %v27012_v59 = vld [vmem:[#allocation13_spill] sm:$0xff]  ;;  %v27017_v57 = vld [vmem:[#allocation110_spill] sm:$0xff]  ;;  %v27025_v22 = vld [vmem:[#allocation119_spill] sm:$0xff] }
 0x482   :  { %v12251_v36 = vmax.f32 %v12226_v15, 0.05  ;;  %v11527_v34 = vpop.f32.mrf.mxu1  ;;  %19591 = vmatmul.mubr.msk.f32.gmra.mxu1 %vm6092_vm2, %v26906_v18  ;;  %v506_v2 = vadd.f32 %v27012_v59, %v386_v1  ;;  %v27014_v9 = vand.u32 4294901760, %v24646_v10  ;;  %v27015_v11 = vld [vmem:[#allocation17_spill] sm:$0xff]  ;;  %v27016_v15 = vand.u32 4294901760, %v24654_v27 }
 0x483   :  { %12297 = vst [vmem:[%s26257_s3 + $0x40] sm:$0xff] %v12272_v55  ;;  %v12252_v24 = vmax.f32 %v12227_v28, 0.05  ;;  %v12231_v62 = vadd.f32 %v24759_v13, %v12180_v6  ;;  %v12181_v41 = vadd.f32 %v11523_v46, %v27006_v54  ;;  %v11528_v63 = vadd.f32 %v11527_v34, %v11424_v17  ;;  %v24865_v7 = vpop.f32.mrf.mxu0  ;;  %19578 = vmatmul.mubr.f32.gmra.mxu0 %v27007_v47  ;;  %v27018_v6 = vld [vmem:[#allocation22_spill] sm:$0xff]  ;;  %v27019_v34 = vld [vmem:[#allocation28_spill] sm:$0xff]  ;;  %v27021_v47 = vld [vmem:[#allocation113_spill] sm:$0xff] }
 0x484   :  { %19593 = vmatprep.mubr.msk.f32.mxu1 %vm19907_vm7, %v26505_v30  ;;  %v12276_v32 = vmin.f32 %v12251_v36, 0.08  ;;  %v11529_v60 = vpop.f32.mrf.mxu1  ;;  %19603 = vmatprep.mubr.msk.f32.mxu0 %vm19907_vm7, %v26505_v30  ;;  %v618_v17 = vadd.f32 %v27015_v11, %v506_v2  ;;  %v14494_v8 = vsub.f32 %v24872_v19, %v14493_v25  ;;  %v27027_v2 = vld [vmem:[#allocation122_spill] sm:$0xff] }
 0x485   :  { %v12277_v26 = vmin.f32 %v12252_v24, 0.08  ;;  %v12256_v58 = vmax.f32 %v12231_v62, 0.05  ;;  %v12232_v20 = vadd.f32 %v24762_v14, %v12181_v41  ;;  %v12185_v12 = vadd.f32 %v11528_v63, %v27008_v39  ;;  %v19456_v44 = vpop.f32.mrf.mxu0  ;;  %v27020_v41 = vld [vmem:[#allocation109_spill] sm:$0xff]  ;;  %v27023_v39 = vld [vmem:[#allocation114_spill] sm:$0xff] }
 0x486   :  { %12301 = vst [vmem:[%s26257_s3 + $0x60] sm:$0xff] %v12276_v32  ;;  %v11530_v51 = vadd.f32 %v11529_v60, %v11426_v33  ;;  %v24883_v35 = vpop.f32.mrf.mxu1  ;;  %19594 = vmatmul.mubr.msk.f32.gmra.mxu1 %vm6092_vm2, %v26911_v53  ;;  %v749_v46 = vadd.f32 %v27018_v6, %v618_v17  ;;  %v14495_v33 = vand.u32 4294901760, %v14494_v8  ;;  %v27022_v60 = vld [vmem:[#allocation30_spill] sm:$0xff] }
 0x487   :  { %12302 = vst [vmem:[%s26257_s3 + $0x68] sm:$0xff] %v12277_v26  ;;  %v12281_v42 = vmin.f32 %v12256_v58, 0.08  ;;  %v12257_v5 = vmax.f32 %v12232_v20, 0.05  ;;  %v12236_v16 = vadd.f32 %v24759_v13, %v12185_v12  ;;  %v24891_v45 = vpop.f32.mrf.mxu0  ;;  %19604 = vmatmul.mubr.f32.vlgmr.msra.gmra.mxu0 %v27011_v21  ;;  %19596 = vmatprep.mubr.msk.f32.mxu1 %vm19907_vm7, %v26505_v30  ;;  %v24948_v26 = vand.u32 4294901760, %v27022_v60 }
 0x488   :  { %v12186_v52 = vadd.f32 %v11530_v51, %v27013_v43  ;;  %19638 = vmatpush3.msra.mxu0 %v27014_v9  ;;  %v19472_v38 = vpop.f32.mrf.mxu1  ;;  %19606 = vmatprep.mubr.msk.f32.mxu0 %vm19907_vm7, %v26505_v30  ;;  %v854_v24 = vadd.f32 %v27019_v34, %v749_v46  ;;  %v27024_v12 = vld [vmem:[#allocation27_spill] sm:$0xff]  ;;  %v27104_v13 = vld [vmem:[#allocation149_spill] sm:$0xff] }
 0x489   :  { %12306 = vst [vmem:[%s26257_s3 + $0x88] sm:$0xff] %v12281_v42  ;;  %v12282_v49 = vmin.f32 %v12257_v5, 0.08  ;;  %v12261_v23 = vmax.f32 %v12236_v16, 0.05  ;;  %19639 = vmatprep.subr.mxu0 %v26505_v30  ;;  %v19459_v0 = vpop.f32.mrf.mxu0  ;;  %v24959_v44 = vand.u32 4294901760, %v27024_v12  ;;  %v24970_v1 = vsub.f32 %v27022_v60, %v24948_v26 }
 0x48a   :  { %v12237_v10 = vadd.f32 %v24762_v14, %v12186_v52  ;;  %19640 = vmatpush3.msra.mxu0 %v27016_v15  ;;  %v24911_v3 = vpop.f32.mrf.mxu1  ;;  %19597 = vmatmul.mubr.msk.f32.gmra.mxu1 %vm6092_vm2, %v26921_v48  ;;  %v27026_v16 = vld [vmem:[#allocation116_spill] sm:$0xff] }
 0x48b   :  { %12307 = vst [vmem:[%s26257_s3 + $0x90] sm:$0xff] %v12282_v49  ;;  %v12286_v55 = vmin.f32 %v12261_v23, 0.08  ;;  %14368 = vmatprep.subr.mxu0 %v24845_v29  ;;  %v24919_v28 = vpop.f32.mrf.mxu0  ;;  %19607 = vmatmul.mubr.f32.gmra.mxu0 %v27017_v57  ;;  %v24980_v21 = vsub.f32 %v27024_v12, %v24959_v44  ;;  %v14499_v52 = vand.u32 4294901760, %v24970_v1  ;;  %v27028_v49 = vld [vmem:[#allocation121_spill] sm:$0xff] }
 0x48c   :  { %v12262_v27 = vmax.f32 %v12237_v10, 0.05  ;;  %v19475_v56 = vpop.f32.mrf.mxu1  ;;  %19609 = vmatprep.mubr.msk.f32.mxu0 %vm19907_vm7, %v26505_v30  ;;  %19622 = vmatprep.mubr.msk.f32.mxu1 %vm19907_vm7, %v26505_v30  ;;  %v27029_v57 = vld [vmem:[#allocation125_spill] sm:$0xff] }
 0x48d   :  { %12311 = vst [vmem:[%s26257_s3 + $0xb0] sm:$0x1] %v12286_v55  ;;  %v19462_v36 = vpop.f32.mrf.mxu0  ;;  %v14511_v0 = vand.u32 4294901760, %v24980_v21  ;;  %v14500_v10 = vsub.f32 %v24970_v1, %v14499_v52 }
 0x48e   :  { %v12287_v62 = vmin.f32 %v12262_v27, 0.08  ;;  %v24934_v54 = vpop.f32.mrf.mxu1  ;;  %19623 = vmatmul.mubr.f32.vlgmr.msra.gmra.mxu1 %v27020_v41 }
 0x48f   :  { %v24937_v63 = vpop.f32.mrf.mxu0  ;;  %19610 = vmatmul.mubr.f32.gmra.mxu0 %v27021_v47  ;;  %19657 = vmatpush3.msra.mxu1 %v24626_v61  ;;  %v24953_v61 = vand.u32 4294901760, %v854_v24  ;;  %v14512_v46 = vsub.f32 %v24980_v21, %v14511_v0  ;;  %v14501_v36 = vand.u32 4294901760, %v14500_v10  ;;  %v27032_v10 = vld [vmem:[#allocation108_spill] sm:$0xff] }
 0x490   :  { %12312 = vst [vmem:[%s26257_s3 + $0xb8] sm:$0x1] %v12287_v62  ;;  %19658 = vmatprep.subr.mxu1 %v26505_v30  ;;  %v19478_v32 = vpop.f32.mrf.mxu1  ;;  %19612 = vmatprep.mubr.msk.f32.mxu0 %vm19907_vm7, %v26505_v30 }
 0x491   :  { %v19465_v58 = vpop.f32.mrf.mxu0  ;;  %19659 = vmatpush3.msra.mxu1 %v24636_v40  ;;  %19625 = vmatprep.mubr.msk.f32.mxu1 %vm19907_vm7, %v26505_v30  ;;  %v24973_v42 = vsub.f32 %v854_v24, %v24953_v61  ;;  %v14513_v41 = vand.u32 4294901760, %v14512_v46 }
 0x492   :  { %14496 = vmatprep.subr.mxu1 %v14495_v33  ;;  %v24955_v20 = vpop.f32.mrf.mxu1  ;;  %19626 = vmatmul.mubr.f32.gmra.mxu1 %v27023_v39  ;;  %v11727_v33 = vadd.f32 %v24883_v35, %v24839_v50  ;;  %v11733_v35 = vadd.f32 %v24911_v3, %v24865_v7  ;;  %v19905_v7 = vld [vmem:[%s26256_s2] sm:$0x1f] }
 0x493   :  { %v24961_v37 = vpop.f32.mrf.mxu0  ;;  %19613 = vmatmul.mubr.f32.gmra.mxu0 %v27025_v22  ;;  %19628 = vmatprep.mubr.msk.f32.mxu1 %vm19907_vm7, %v26505_v30  ;;  %v14505_v23 = vand.u32 4294901760, %v24973_v42 }
 0x494   :  { %v19481_v40 = vpop.f32.mrf.mxu1  ;;  %19615 = vmatprep.mubr.msk.f32.mxu0 %vm19907_vm7, %v26505_v30  ;;  %v11827_v39 = vadd.f32 %v24961_v37, %v11727_v33  ;;  %v27037_v33 = vld [vmem:[#allocation135_spill] sm:$0xff] }
 0x495   :  { %v19491_v51 = vpop.f32.mrf.mxu0  ;;  %v14506_v6 = vsub.f32 %v24973_v42, %v14505_v23 }
 0x496   :  { %v24975_v5 = vpop.f32.mrf.mxu1  ;;  %19629 = vmatmul.mubr.f32.gmra.mxu1 %v27026_v16 }
 0x497   :  { %v24982_v59 = vpop.f32.mrf.mxu0  ;;  %19616 = vmatmul.mubr.f32.gmra.mxu0 %v27027_v2  ;;  %19631 = vmatprep.mubr.msk.f32.mxu1 %vm19907_vm7, %v26505_v30  ;;  %v14507_v24 = vand.u32 4294901760, %v14506_v6 }
 0x498   :  { %v19484_v43 = vpop.f32.mrf.mxu1  ;;  %19641 = vmatprep.mubr.msk.f32.mxu0 %vm19907_vm7, %v26505_v30  ;;  %v11834_v16 = vadd.f32 %v24982_v59, %v11733_v35  ;;  %v27033_v59 = vld [vmem:[#allocation36_spill] sm:$0xff] }
 0x499   :  { %v19494_v9 = vpop.f32.mrf.mxu0 }
 0x49a   :  { %v11929_v38 = vpop.f32.mrf.mxu1  ;;  %19632 = vmatmul.mubr.f32.gmra.mxu1 %v27028_v49  ;;  %v11739_v9 = vadd.f32 %v24934_v54, %v24891_v45  ;;  %v27035_v45 = vld [vmem:[#allocation62_spill] sm:$0xff] }
 0x49b   :  { %v24993_v11 = vpop.f32.mrf.mxu0  ;;  %19642 = vmatmul.mubr.msk.f32.vlgmr.msra.gmra.mxu0 %vm6092_vm2, %v26898_v4  ;;  %19634 = vmatprep.mubr.msk.f32.mxu1 %vm19907_vm7, %v26505_v30  ;;  %v11930_v40 = vadd.f32 %v11929_v38, %v11827_v39 }
 0x49c   :  { %14370 = vmatpush1.msra.mxu0 %v24948_v26  ;;  %v19510_v17 = vpop.f32.mrf.mxu1  ;;  %19644 = vmatprep.mubr.msk.f32.mxu0 %vm19907_vm7, %v26505_v30 }
 0x49d   :  { %14372 = vmatprep.subr.mxu0 %v24953_v61  ;;  %v19497_v15 = vpop.f32.mrf.mxu0 }
 0x49e   :  { %14374 = vmatpush1.msra.mxu0 %v24959_v44  ;;  %v11937_v55 = vpop.f32.mrf.mxu1  ;;  %19635 = vmatmul.mubr.f32.gmra.mxu1 %v27029_v57  ;;  %v27034_v15 = vld [vmem:[#allocation40_spill] sm:$0xff] }
 0x49f   :  { %14613 = vmatprep.subr.mxu0 %v24872_v19  ;;  %v25015_v27 = vpop.f32.mrf.mxu0  ;;  %19645 = vmatmul.mubr.msk.f32.gmra.mxu0 %vm6092_vm2, %v26953_v31  ;;  %v11938_v38 = vadd.f32 %v11937_v55, %v11834_v16  ;;  %v1135_v57 = vadd.f32 %v27034_v15, %v27033_v59  ;;  %v27040_v19 = vld [vmem:[#allocation54_spill] sm:$0xff] }
 0x4a0   :  { %v19513_v56 = vpop.f32.mrf.mxu1  ;;  %19647 = vmatprep.mubr.msk.f32.mxu0 %vm19907_vm7, %v26505_v30  ;;  %19660 = vmatprep.mubr.msk.f32.mxu1 %vm19907_vm7, %v26505_v30  ;;  %v27045_v15 = vld [vmem:[#allocation14_spill] sm:$0xff] }
 0x4a1   :  { %v19500_v8 = vpop.f32.mrf.mxu0  ;;  %v27036_v56 = vld [vmem:[#allocation44_spill] sm:$0xff] }
 0x4a2   :  { %v11945_v34 = vpop.f32.mrf.mxu1  ;;  %19661 = vmatmul.mubr.msk.f32.vlgmr.msra.gmra.mxu1 %vm6092_vm2, %v26898_v4  ;;  %v1256_v8 = vadd.f32 %v27036_v56, %v1135_v57  ;;  %v27047_v56 = vld [vmem:[#allocation63_spill] sm:$0xff] }
 0x4a3   :  { %v25025_v62 = vpop.f32.mrf.mxu0  ;;  %19648 = vmatmul.mubr.msk.f32.gmra.mxu0 %vm6092_vm2, %v26906_v18  ;;  %14502 = vmatpush1.msra.mxu1 %v14501_v36  ;;  %v11745_v36 = vadd.f32 %v24955_v20, %v24919_v28 }
 0x4a4   :  { %14508 = vmatprep.subr.mxu1 %v14507_v24  ;;  %v19516_v47 = vpop.f32.mrf.mxu1  ;;  %19650 = vmatprep.mubr.msk.f32.mxu0 %vm19907_vm7, %v26505_v30 }
 0x4a5   :  { %v19503_v32 = vpop.f32.mrf.mxu0  ;;  %14514 = vmatpush1.msra.mxu1 %v14513_v41  ;;  %19663 = vmatprep.mubr.msk.f32.mxu1 %vm19907_vm7, %v26505_v30  ;;  %v11848_v28 = vadd.f32 %v25015_v27, %v11745_v36 }
 0x4a6   :  { %14725 = vmatprep.subr.mxu1 %v24845_v29  ;;  %v25034_v4 = vpop.f32.mrf.mxu1  ;;  %19664 = vmatmul.mubr.msk.f32.gmra.mxu1 %vm6092_vm2, %v26953_v31  ;;  %v27030_v31 = vld [vmem:[#allocation103_spill] sm:$0xff] }
 0x4a7   :  { %v12038_v60 = vpop.f32.mrf.mxu0  ;;  %19651 = vmatmul.mubr.msk.f32.gmra.mxu0 %vm6092_vm2, %v26911_v53  ;;  %19666 = vmatprep.mubr.msk.f32.mxu1 %vm19907_vm7, %v26505_v30  ;;  %v12207_v50 = vsub.s32 4, %v27030_v31 }
 0x4a8   :  { %v19519_v58 = vpop.f32.mrf.mxu1  ;;  %19653 = vmatprep.mubr.msk.f32.mxu0 %vm19907_vm7, %v26505_v30  ;;  %v12039_v2 = vadd.f32 %v12038_v60, %v11930_v40  ;;  %v27038_v60 = vld [vmem:[#allocation48_spill] sm:$0xff]  ;;  %v27041_v40 = vld [vmem:[#allocation10_spill] sm:$0xff] }
 0x4a9   :  { %v19529_v12 = vpop.f32.mrf.mxu0  ;;  %v25063_v3 = vrot.slane %v19905_v7, %v12207_v50  ;;  %v1369_v58 = vadd.f32 %v27038_v60, %v1256_v8  ;;  %v11751_v50 = vadd.f32 %v24975_v5, %v24937_v63 }
 0x4aa   :  { %v25047_v22 = vpop.f32.mrf.mxu1  ;;  %19667 = vmatmul.mubr.msk.f32.gmra.mxu1 %vm6092_vm2, %v26906_v18 }
 0x4ab   :  { %v12044_v51 = vpop.f32.mrf.mxu0  ;;  %19654 = vmatmul.mubr.msk.f32.gmra.mxu0 %vm6092_vm2, %v26921_v48  ;;  %19669 = vmatprep.mubr.msk.f32.mxu1 %vm19907_vm7, %v26505_v30  ;;  %27031 = vst [vmem:[#allocation101_spill] sm:$0xff] %v25063_v3  ;;  %v11855_v5 = vadd.f32 %v25025_v62, %v11751_v50 }
 0x4ac   :  { %v19522_v37 = vpop.f32.mrf.mxu1  ;;  %14407 = vmatprep.mubr.f32.mxu0 %v26505_v30  ;;  %v12045_v46 = vadd.f32 %v12044_v51, %v11938_v38  ;;  %v11954_v51 = vadd.f32 %v25034_v4, %v11848_v28  ;;  %v27044_v38 = vld [vmem:[#allocation60_spill] sm:$0xff] }
 0x4ad   :  { %v19532_v18 = vpop.f32.mrf.mxu0  ;;  %v11962_v62 = vadd.f32 %v25047_v22, %v11855_v5 }
 0x4ae   :  { %v12135_v43 = vpop.f32.mrf.mxu1  ;;  %19670 = vmatmul.mubr.msk.f32.gmra.mxu1 %vm6092_vm2, %v26911_v53  ;;  %v11841_v53 = vadd.f32 %v24993_v11, %v11739_v9  ;;  %v27042_v18 = vld [vmem:[#allocation31_spill] sm:$0xff] }
 0x4af   :  { %v12050_v49 = vpop.f32.mrf.mxu0  ;;  %v12136_v17 = vadd.f32 %v12135_v43, %v12039_v2  ;;  %14413 = vmatmul.mubr.f32.vlgmr.msra.gmra.mxu0 %v27032_v10  ;;  %19672 = vmatprep.mubr.msk.f32.mxu1 %vm19907_vm7, %v26505_v30  ;;  %v27043_v43 = vld [vmem:[#allocation59_spill] sm:$0xff] }
 0x4b0   :  { %14616 = vmatpush1.msra.mxu0 %v24970_v1  ;;  %v19548_v6 = vpop.f32.mrf.mxu1  ;;  %14418 = vmatprep.mubr.f32.mxu0 %v26505_v30  ;;  %v11946_v41 = vadd.f32 %v11945_v34, %v11841_v53  ;;  %v27039_v34 = vld [vmem:[#allocation66_spill] sm:$0xff] }
 0x4b1   :  { %v12167_v54 = vadd.f32 %v12136_v17, %v27035_v45  ;;  %14619 = vmatprep.subr.mxu0 %v24973_v42  ;;  %v19535_v55 = vpop.f32.mrf.mxu0  ;;  %v27046_v45 = vld [vmem:[#allocation43_spill] sm:$0xff]  ;;  %v27059_v42 = vld [vmem:[#allocation50_spill] sm:$0xff] }
 0x4b2   :  { %14622 = vmatpush1.msra.mxu0 %v24980_v21  ;;  %v12141_v24 = vpop.f32.mrf.mxu1  ;;  %19673 = vmatmul.mubr.msk.f32.gmra.mxu1 %vm6092_vm2, %v26921_v48  ;;  %v12051_v48 = vadd.f32 %v12050_v49, %v11946_v41  ;;  %v27048_v41 = vld [vmem:[#allocation23_spill] sm:$0xff] }
 0x4b3   :  { %v12218_v11 = vadd.f32 %v25063_v3, %v12167_v54  ;;  %14841 = vmatprep.subr.mxu0 %v14493_v25  ;;  %v12056_v47 = vpop.f32.mrf.mxu0  ;;  %v12142_v32 = vadd.f32 %v12141_v24, %v12045_v46  ;;  %14424 = vmatmul.mubr.f32.gmra.mxu0 %v27037_v33  ;;  %v1498_v25 = vadd.f32 %v27040_v19, %v1369_v58  ;;  %v27049_v58 = vld [vmem:[#allocation138_spill] sm:$0xff]  ;;  %v27052_v19 = vld [vmem:[#allocation37_spill] sm:$0xff] }
 0x4b4   :  { %v19551_v39 = vpop.f32.mrf.mxu1  ;;  %14429 = vmatprep.mubr.f32.mxu0 %v26505_v30  ;;  %14547 = vmatprep.mubr.f32.mxu1 %v26505_v30  ;;  %v12057_v4 = vadd.f32 %v12056_v47, %v11954_v51 }
 0x4b5   :  { %v12243_v20 = vmax.f32 %v12218_v11, 0.05  ;;  %v12172_v12 = vadd.f32 %v12142_v32, %v27039_v34  ;;  %v19538_v31 = vpop.f32.mrf.mxu0  ;;  %v1603_v7 = vadd.f32 %v27043_v43, %v1498_v25  ;;  %v27055_v43 = vld [vmem:[#allocation41_spill] sm:$0xff] }
 0x4b6   :  { %v12147_v35 = vpop.f32.mrf.mxu1  ;;  %18684 = vmatmul.mubr.msk.f32.vlgmr.msra.gmra.mxu1 %vm6092_vm2, %v27041_v40  ;;  %v27051_v31 = vld [vmem:[#allocation33_spill] sm:$0xff] }
 0x4b7   :  { %v12268_v37 = vmin.f32 %v12243_v20, 0.08  ;;  %v12223_v16 = vadd.f32 %v25063_v3, %v12172_v12  ;;  %v12062_v27 = vpop.f32.mrf.mxu0  ;;  %v12148_v2 = vadd.f32 %v12147_v35, %v12051_v48  ;;  %14435 = vmatmul.mubr.f32.gmra.mxu0 %v27042_v18  ;;  %14727 = vmatpush1.msra.mxu1 %v24948_v26  ;;  %v25120_v54 = vand.u32 4294901760, %v1603_v7  ;;  %v27050_v20 = vld [vmem:[#allocation154_spill] sm:$0xff]  ;;  %v27053_v35 = vld [vmem:[#allocation100_spill] sm:$0xff] }
 0x4b8   :  { %14729 = vmatprep.subr.mxu1 %v24953_v61  ;;  %v19554_v63 = vpop.f32.mrf.mxu1  ;;  %14440 = vmatprep.mubr.f32.mxu0 %v26505_v30  ;;  %v1128_v25 = vadd.f32 %v27052_v19, %v27051_v31 }
 0x4b9   :  { %12293 = vst [vmem:[%s26257_s3 + $0x20] sm:$0xff] %v12268_v37  ;;  %v12248_v9 = vmax.f32 %v12223_v16, 0.05  ;;  %v12177_v49 = vadd.f32 %v12148_v2, %v27044_v38  ;;  %v19541_v17 = vpop.f32.mrf.mxu0  ;;  %14731 = vmatpush1.msra.mxu1 %v24959_v44  ;;  %14554 = vmatprep.mubr.f32.mxu1 %v26505_v30  ;;  %v25133_v39 = vsub.f32 %v1603_v7, %v25120_v54  ;;  %v27054_v2 = vld [vmem:[#allocation18_spill] sm:$0xff] }
 0x4ba   :  { %14951 = vmatprep.subr.mxu1 %v24845_v29  ;;  %v12153_v59 = vpop.f32.mrf.mxu1  ;;  %18685 = vmatmul.mubr.msk.f32.gmra.mxu1 %vm6092_vm2, %v27045_v15  ;;  %v12063_v29 = vadd.f32 %v12062_v27, %v11962_v62  ;;  %v1248_v7 = vadd.f32 %v27055_v43, %v1128_v25  ;;  %v27066_v25 = vld [vmem:[#allocation134_spill] sm:$0xff] }
 0x4bb   :  { %v12273_v57 = vmin.f32 %v12248_v9, 0.08  ;;  %v12228_v6 = vadd.f32 %v25063_v3, %v12177_v49  ;;  %v12154_v53 = vadd.f32 %v12153_v59, %v12057_v4  ;;  %v12409_v46 = vpop.f32.mrf.mxu0  ;;  %14446 = vmatmul.mubr.f32.gmra.mxu0 %v27046_v45  ;;  %14561 = vmatprep.mubr.f32.mxu1 %v26505_v30  ;;  %v15180_v5 = vand.u32 4294901760, %v25133_v39  ;;  %v27056_v49 = vld [vmem:[#allocation45_spill] sm:$0xff] }
 0x4bc   :  { %v19557_v55 = vpop.f32.mrf.mxu1  ;;  %14451 = vmatprep.mubr.f32.mxu0 %v26505_v30  ;;  %v1360_v17 = vadd.f32 %v27056_v49, %v1248_v7 }
 0x4bd   :  { %12298 = vst [vmem:[%s26257_s3 + $0x48] sm:$0xff] %v12273_v57  ;;  %v12253_v22 = vmax.f32 %v12228_v6, 0.05  ;;  %v12182_v8 = vadd.f32 %v12154_v53, %v27047_v56  ;;  %v12411_v36 = vpop.f32.mrf.mxu0  ;;  %v27058_v6 = vld [vmem:[#allocation21_spill] sm:$0xff]  ;;  %v15181_v21 = vsub.f32 %v25133_v39, %v15180_v5  ;;  %v27060_v55 = vld [vmem:[#allocation56_spill] sm:$0xff] }
 0x4be   :  { %v12159_v24 = vpop.f32.mrf.mxu1  ;;  %18686 = vmatmul.mubr.msk.f32.gmra.mxu1 %vm6092_vm2, %v27048_v41  ;;  %v27061_v56 = vld [vmem:[#allocation24_spill] sm:$0xff] }
 0x4bf   :  { %v12278_v11 = vmin.f32 %v12253_v22, 0.08  ;;  %v12233_v47 = vadd.f32 %v25063_v3, %v12182_v8  ;;  %v12160_v32 = vadd.f32 %v12159_v24, %v12063_v29  ;;  %v12420_v60 = vpop.f32.mrf.mxu0  ;;  %14457 = vmatmul.mubr.f32.gmra.mxu0 %v27049_v58  ;;  %14568 = vmatprep.mubr.f32.mxu1 %v26505_v30  ;;  %v27062_v24 = vld [vmem:[#allocation64_spill] sm:$0xff] }
 0x4c0   :  { %v19560_v28 = vpop.f32.mrf.mxu1  ;;  %14655 = vmatprep.mubr.f32.mxu0 %v26505_v30 }
 0x4c1   :  { %12303 = vst [vmem:[%s26257_s3 + $0x70] sm:$0xff] %v12278_v11  ;;  %v12258_v48 = vmax.f32 %v12233_v47, 0.05  ;;  %v12187_v34 = vadd.f32 %v12160_v32, %v27050_v20  ;;  %v12422_v12 = vpop.f32.mrf.mxu0  ;;  %v15182_v47 = vand.u32 4294901760, %v15181_v21  ;;  %v27063_v32 = vld [vmem:[#allocation58_spill] sm:$0xff]  ;;  %v27069_v21 = vld [vmem:[#allocation136_spill] sm:$0xff] }
 0x4c2   :  { %v12545_v50 = vpop.f32.mrf.mxu1  ;;  %18687 = vmatmul.mubr.msk.f32.gmra.mxu1 %vm6092_vm2, %v27053_v35 }
 0x4c3   :  { %v12283_v51 = vmin.f32 %v12258_v48, 0.08  ;;  %v12238_v37 = vadd.f32 %v25063_v3, %v12187_v34  ;;  %v12431_v16 = vpop.f32.mrf.mxu0  ;;  %v12546_v27 = vadd.f32 %v12545_v50, %v12409_v46  ;;  %14658 = vmatmul.mubr.f32.vlgmr.msra.gmra.mxu0 %v27054_v2  ;;  %14575 = vmatprep.mubr.f32.mxu1 %v26505_v30  ;;  %v27103_v3 = vld [vmem:[#allocation150_spill] sm:$0xff] }
 0x4c4   :  { %14845 = vmatpush1.msra.mxu0 %v14499_v52  ;;  %v12547_v63 = vpop.f32.mrf.mxu1  ;;  %14663 = vmatprep.mubr.f32.mxu0 %v26505_v30  ;;  %v27057_v52 = vld [vmem:[#allocation104_spill] sm:$0xff] }
 0x4c5   :  { %12308 = vst [vmem:[%s26257_s3 + $0x98] sm:$0xff] %v12283_v51  ;;  %v12263_v4 = vmax.f32 %v12238_v37, 0.05  ;;  %14849 = vmatprep.subr.mxu0 %v14505_v23  ;;  %v12433_v9 = vpop.f32.mrf.mxu0  ;;  %v12548_v38 = vadd.f32 %v12547_v63, %v12411_v36  ;;  %v1491_v23 = vadd.f32 %v27059_v42, %v1360_v17  ;;  %v27068_v17 = vld [vmem:[#allocation137_spill] sm:$0xff] }
 0x4c6   :  { %14853 = vmatpush1.msra.mxu0 %v14511_v0  ;;  %v12552_v1 = vpop.f32.mrf.mxu1  ;;  %18688 = vmatmul.mubr.msk.f32.gmra.mxu1 %vm6092_vm2, %v27057_v52 }
 0x4c7   :  { %v12288_v59 = vmin.f32 %v12263_v4, 0.08  ;;  %15055 = vmatprep.subr.mxu0 %v25120_v54  ;;  %v12442_v62 = vpop.f32.mrf.mxu0  ;;  %v12553_v57 = vadd.f32 %v12552_v1, %v12420_v60  ;;  %14666 = vmatmul.mubr.f32.gmra.mxu0 %v27058_v6  ;;  %v1596_v29 = vadd.f32 %v27060_v55, %v1491_v23  ;;  %v25180_v60 = vand.u32 4294901760, %v27063_v32  ;;  %v27067_v4 = vld [vmem:[#allocation133_spill] sm:$0xff] }
 0x4c8   :  { %v12554_v53 = vpop.f32.mrf.mxu1  ;;  %14671 = vmatprep.mubr.f32.mxu0 %v26505_v30  ;;  %14764 = vmatprep.mubr.f32.mxu1 %v26505_v30 }
 0x4c9   :  { %12313 = vst [vmem:[%s26257_s3 + $0xc0] sm:$0x1] %v12288_v59  ;;  %v12444_v0 = vpop.f32.mrf.mxu0  ;;  %v12555_v46 = vadd.f32 %v12554_v53, %v12422_v12  ;;  %v25184_v20 = vand.u32 4294901760, %v1596_v29 }
 0x4ca   :  { %v12559_v22 = vpop.f32.mrf.mxu1  ;;  %14768 = vmatmul.mubr.f32.vlgmr.msra.gmra.mxu1 %v27061_v56 }
 0x4cb   :  { %v12453_v8 = vpop.f32.mrf.mxu0  ;;  %v12560_v36 = vadd.f32 %v12559_v22, %v12431_v16  ;;  %14674 = vmatmul.mubr.f32.gmra.mxu0 %v27062_v24  ;;  %14953 = vmatpush1.msra.mxu1 %v24948_v26  ;;  %v27064_v26 = vld [vmem:[#allocation61_spill] sm:$0xff]  ;;  %v25198_v43 = vsub.f32 %v1596_v29, %v25184_v20 }
 0x4cc   :  { %14955 = vmatprep.subr.mxu1 %v24953_v61  ;;  %v12561_v11 = vpop.f32.mrf.mxu1  ;;  %14679 = vmatprep.mubr.f32.mxu0 %v26505_v30  ;;  %v27065_v61 = vld [vmem:[#allocation55_spill] sm:$0xff] }
 0x4cd   :  { %v12455_v28 = vpop.f32.mrf.mxu0  ;;  %v12562_v48 = vadd.f32 %v12561_v11, %v12433_v9  ;;  %14957 = vmatpush1.msra.mxu1 %v24959_v44  ;;  %14773 = vmatprep.mubr.f32.mxu1 %v26505_v30  ;;  %v25188_v12 = vand.u32 4294901760, %v27065_v61  ;;  %v25195_v44 = vsub.f32 %v27063_v32, %v25180_v60 }
 0x4ce   :  { %15183 = vmatprep.subr.mxu1 %v15182_v47  ;;  %v12566_v34 = vpop.f32.mrf.mxu1  ;;  %14777 = vmatmul.mubr.f32.gmra.mxu1 %v27064_v26 }
 0x4cf   :  { %v12567_v31 = vadd.f32 %v12566_v34, %v12442_v62  ;;  %v12654_v19 = vpop.f32.mrf.mxu0  ;;  %14682 = vmatmul.mubr.f32.gmra.mxu0 %v27066_v25  ;;  %14782 = vmatprep.mubr.f32.mxu1 %v26505_v30  ;;  %v25203_v9 = vsub.f32 %v27065_v61, %v25188_v12  ;;  %v15186_v62 = vand.u32 4294901760, %v25195_v44  ;;  %v27070_v34 = vld [vmem:[#allocation35_spill] sm:$0xff] }
 0x4d0   :  { %v12655_v50 = vadd.f32 %v12654_v19, %v12546_v27  ;;  %v12568_v51 = vpop.f32.mrf.mxu1  ;;  %14687 = vmatprep.mubr.f32.mxu0 %v26505_v30 }
 0x4d1   :  { %v12569_v37 = vadd.f32 %v12568_v51, %v12444_v0  ;;  %v12656_v16 = vpop.f32.mrf.mxu0  ;;  %v15192_v0 = vand.u32 4294901760, %v25198_v43  ;;  %v15198_v55 = vand.u32 4294901760, %v25203_v9 }
 0x4d2   :  { %v12657_v7 = vadd.f32 %v12656_v16, %v12548_v38  ;;  %v12573_v63 = vpop.f32.mrf.mxu1  ;;  %14786 = vmatmul.mubr.f32.gmra.mxu1 %v27067_v4 }
 0x4d3   :  { %v12574_v27 = vadd.f32 %v12573_v63, %v12453_v8  ;;  %v12662_v49 = vpop.f32.mrf.mxu0  ;;  %14690 = vmatmul.mubr.f32.gmra.mxu0 %v27068_v17  ;;  %14791 = vmatprep.mubr.f32.mxu1 %v26505_v30  ;;  %v15199_v61 = vsub.f32 %v25203_v9, %v15198_v55 }
 0x4d4   :  { %v12663_v1 = vadd.f32 %v12662_v49, %v12553_v57  ;;  %v12575_v59 = vpop.f32.mrf.mxu1  ;;  %14886 = vmatprep.mubr.f32.mxu0 %v26505_v30 }
 0x4d5   :  { %v12576_v38 = vadd.f32 %v12575_v59, %v12455_v28  ;;  %v12664_v42 = vpop.f32.mrf.mxu0 }
 0x4d6   :  { %v12665_v23 = vadd.f32 %v12664_v42, %v12555_v46  ;;  %v12764_v53 = vpop.f32.mrf.mxu1  ;;  %14795 = vmatmul.mubr.f32.gmra.mxu1 %v27069_v21  ;;  %v15187_v46 = vsub.f32 %v25195_v44, %v15186_v62 }
 0x4d7   :  { %v12670_v29 = vpop.f32.mrf.mxu0  ;;  %v12765_v22 = vadd.f32 %v12764_v53, %v12655_v50  ;;  %18689 = vmatmul.mubr.msk.f32.vlgmr.msra.gmra.mxu0 %vm6092_vm2, %v27041_v40  ;;  %14800 = vmatprep.mubr.f32.mxu1 %v26505_v30 }
 0x4d8   :  { %v12671_v57 = vadd.f32 %v12670_v29, %v12560_v36  ;;  %15057 = vmatpush1.msra.mxu0 %v25180_v60  ;;  %v12766_v8 = vpop.f32.mrf.mxu1  ;;  %14893 = vmatprep.mubr.f32.mxu0 %v26505_v30  ;;  %v15193_v36 = vsub.f32 %v25198_v43, %v15192_v0  ;;  %v15188_v63 = vand.u32 4294901760, %v15187_v46 }
 0x4d9   :  { %15059 = vmatprep.subr.mxu0 %v25184_v20  ;;  %v12672_v11 = vpop.f32.mrf.mxu0  ;;  %v12767_v47 = vadd.f32 %v12766_v8, %v12657_v7 }
 0x4da   :  { %v12673_v32 = vadd.f32 %v12672_v11, %v12562_v48  ;;  %15061 = vmatpush1.msra.mxu0 %v25188_v12  ;;  %v12773_v28 = vpop.f32.mrf.mxu1  ;;  %14804 = vmatmul.mubr.f32.gmra.mxu1 %v27070_v34  ;;  %v15194_v42 = vand.u32 4294901760, %v15193_v36 }
 0x4db   :  { %15300 = vmatprep.subr.mxu0 %v25133_v39  ;;  %v12678_v19 = vpop.f32.mrf.mxu0  ;;  %v12774_v50 = vadd.f32 %v12773_v28, %v12663_v1  ;;  %18690 = vmatmul.mubr.msk.f32.gmra.mxu0 %vm6092_vm2, %v27045_v15 }
 0x4dc   :  { %v12679_v48 = vadd.f32 %v12678_v19, %v12567_v31  ;;  %v12775_v51 = vpop.f32.mrf.mxu1  ;;  %14900 = vmatprep.mubr.f32.mxu0 %v26505_v30  ;;  %14990 = vmatprep.mubr.f32.mxu1 %v26505_v30  ;;  %v15200_v31 = vand.u32 4294901760, %v15199_v61 }
 0x4dd   :  { %v12680_v16 = vpop.f32.mrf.mxu0  ;;  %v12776_v7 = vadd.f32 %v12775_v51, %v12665_v23 }
 0x4de   :  { %v12681_v49 = vadd.f32 %v12680_v16, %v12569_v37  ;;  %v12782_v59 = vpop.f32.mrf.mxu1  ;;  %18694 = vmatmul.mubr.msk.f32.vlgmr.msra.gmra.mxu1 %vm6092_vm2, %v27041_v40 }
 0x4df   :  { %v12686_v53 = vpop.f32.mrf.mxu0  ;;  %v12783_v1 = vadd.f32 %v12782_v59, %v12671_v57  ;;  %18691 = vmatmul.mubr.msk.f32.gmra.mxu0 %vm6092_vm2, %v27048_v41  ;;  %15189 = vmatpush1.msra.mxu1 %v15188_v63 }
 0x4e0   :  { %v12687_v29 = vadd.f32 %v12686_v53, %v12574_v27  ;;  %15195 = vmatprep.subr.mxu1 %v15194_v42  ;;  %v12784_v8 = vpop.f32.mrf.mxu1  ;;  %14907 = vmatprep.mubr.f32.mxu0 %v26505_v30 }
 0x4e1   :  { %v12688_v23 = vpop.f32.mrf.mxu0  ;;  %v12785_v46 = vadd.f32 %v12784_v8, %v12673_v32  ;;  %15201 = vmatpush1.msra.mxu1 %v15200_v31  ;;  %14997 = vmatprep.mubr.f32.mxu1 %v26505_v30 }
 0x4e2   :  { %v12689_v37 = vadd.f32 %v12688_v23, %v12576_v38  ;;  %15412 = vmatprep.subr.mxu1 %v25120_v54  ;;  %v12791_v11 = vpop.f32.mrf.mxu1  ;;  %18695 = vmatmul.mubr.msk.f32.gmra.mxu1 %vm6092_vm2, %v27045_v15 }
 0x4e3   :  { %v12792_v57 = vadd.f32 %v12791_v11, %v12679_v48  ;;  %v12884_v28 = vpop.f32.mrf.mxu0  ;;  %18692 = vmatmul.mubr.msk.f32.gmra.mxu0 %vm6092_vm2, %v27053_v35  ;;  %15004 = vmatprep.mubr.f32.mxu1 %v26505_v30 }
 0x4e4   :  { %v12885_v27 = vadd.f32 %v12884_v28, %v12765_v22  ;;  %v12793_v36 = vpop.f32.mrf.mxu1  ;;  %14914 = vmatprep.mubr.f32.mxu0 %v26505_v30 }
 0x4e5   :  { %v12794_v32 = vadd.f32 %v12793_v36, %v12681_v49  ;;  %v12886_v61 = vpop.f32.mrf.mxu0 }
 0x4e6   :  { %v12887_v38 = vadd.f32 %v12886_v61, %v12767_v47  ;;  %v12800_v19 = vpop.f32.mrf.mxu1  ;;  %18696 = vmatmul.mubr.msk.f32.gmra.mxu1 %vm6092_vm2, %v27048_v41 }
 0x4e7   :  { %v12801_v51 = vadd.f32 %v12800_v19, %v12687_v29  ;;  %v12891_v16 = vpop.f32.mrf.mxu0  ;;  %18693 = vmatmul.mubr.msk.f32.gmra.mxu0 %vm6092_vm2, %v27057_v52  ;;  %15011 = vmatprep.mubr.f32.mxu1 %v26505_v30 }
 0x4e8   :  { %v12892_v48 = vadd.f32 %v12891_v16, %v12774_v50  ;;  %v12802_v63 = vpop.f32.mrf.mxu1  ;;  %15094 = vmatprep.mubr.f32.mxu0 %v26505_v30 }
 0x4e9   :  { %v12803_v22 = vadd.f32 %v12802_v63, %v12689_v37  ;;  %v12893_v59 = vpop.f32.mrf.mxu0 }
 0x4ea   :  { %v12894_v49 = vadd.f32 %v12893_v59, %v12776_v7  ;;  %v12988_v42 = vpop.f32.mrf.mxu1  ;;  %18697 = vmatmul.mubr.msk.f32.gmra.mxu1 %vm6092_vm2, %v27053_v35 }
 0x4eb   :  { %v12898_v47 = vpop.f32.mrf.mxu0  ;;  %v25255_v53 = vadd.f32 %v12988_v42, %v12885_v27  ;;  %15100 = vmatmul.mubr.f32.vlgmr.msra.gmra.mxu0 %v27032_v10  ;;  %15018 = vmatprep.mubr.f32.mxu1 %v26505_v30 }
 0x4ec   :  { %v12899_v31 = vadd.f32 %v12898_v47, %v12783_v1  ;;  %15303 = vmatpush1.msra.mxu0 %v25195_v44  ;;  %v12990_v50 = vpop.f32.mrf.mxu1  ;;  %15105 = vmatprep.mubr.f32.mxu0 %v26505_v30 }
 0x4ed   :  { %15306 = vmatprep.subr.mxu0 %v25198_v43  ;;  %v12900_v7 = vpop.f32.mrf.mxu0  ;;  %v25262_v29 = vadd.f32 %v12990_v50, %v12887_v38 }
 0x4ee   :  { %v12901_v8 = vadd.f32 %v12900_v7, %v12785_v46  ;;  %15309 = vmatpush1.msra.mxu0 %v25203_v9  ;;  %v12995_v23 = vpop.f32.mrf.mxu1  ;;  %18698 = vmatmul.mubr.msk.f32.gmra.mxu1 %vm6092_vm2, %v27057_v52 }
 0x4ef   :  { %15528 = vmatprep.subr.mxu0 %v15180_v5  ;;  %v12905_v1 = vpop.f32.mrf.mxu0  ;;  %v25269_v37 = vadd.f32 %v12995_v23, %v12892_v48  ;;  %15111 = vmatmul.mubr.f32.gmra.mxu0 %v27037_v33 }
 0x4f0   :  { %v12906_v11 = vadd.f32 %v12905_v1, %v12792_v57  ;;  %v12997_v28 = vpop.f32.mrf.mxu1  ;;  %15116 = vmatprep.mubr.f32.mxu0 %v26505_v30  ;;  %15234 = vmatprep.mubr.f32.mxu1 %v26505_v30 }
 0x4f1   :  { %v12907_v46 = vpop.f32.mrf.mxu0  ;;  %v25274_v27 = vadd.f32 %v12997_v28, %v12894_v49 }
 0x4f2   :  { %v12908_v36 = vadd.f32 %v12907_v46, %v12794_v32  ;;  %v13002_v61 = vpop.f32.mrf.mxu1  ;;  %18699 = vmatmul.mubr.msk.f32.vlgmr.msra.gmra.mxu1 %vm6092_vm2, %v27041_v40 }
 0x4f3   :  { %v12912_v39 = vpop.f32.mrf.mxu0  ;;  %v25278_v5 = vadd.f32 %v13002_v61, %v12899_v31  ;;  %15122 = vmatmul.mubr.f32.gmra.mxu0 %v27042_v18  ;;  %15414 = vmatpush1.msra.mxu1 %v25180_v60 }
 0x4f4   :  { %v12913_v57 = vadd.f32 %v12912_v39, %v12801_v51  ;;  %15416 = vmatprep.subr.mxu1 %v25184_v20  ;;  %v13004_v38 = vpop.f32.mrf.mxu1  ;;  %15127 = vmatprep.mubr.f32.mxu0 %v26505_v30 }
 0x4f5   :  { %v12914_v19 = vpop.f32.mrf.mxu0  ;;  %v25284_v16 = vadd.f32 %v13004_v38, %v12901_v8  ;;  %15418 = vmatpush1.msra.mxu1 %v25188_v12  ;;  %15241 = vmatprep.mubr.f32.mxu1 %v26505_v30  ;;  %v27071_v38 = vld [vmem:[#allocation81_spill] sm:$0xff] }
 0x4f6   :  { %v12915_v32 = vadd.f32 %v12914_v19, %v12803_v22  ;;  %15638 = vmatprep.subr.mxu1 %v25120_v54  ;;  %v13009_v48 = vpop.f32.mrf.mxu1  ;;  %18700 = vmatmul.mubr.msk.f32.gmra.mxu1 %vm6092_vm2, %v27045_v15  ;;  %v25330_v19 = vand.u32 4294901760, %v27071_v38 }
 0x4f7   :  { %v25291_v51 = vadd.f32 %v13009_v48, %v12906_v11  ;;  %v13096_v63 = vpop.f32.mrf.mxu0  ;;  %15133 = vmatmul.mubr.f32.gmra.mxu0 %v27046_v45  ;;  %15248 = vmatprep.mubr.f32.mxu1 %v26505_v30 }
 0x4f8   :  { %v13011_v59 = vpop.f32.mrf.mxu1  ;;  %15138 = vmatprep.mubr.f32.mxu0 %v26505_v30 }
 0x4f9   :  { %v25296_v49 = vadd.f32 %v13011_v59, %v12908_v36  ;;  %v13098_v42 = vpop.f32.mrf.mxu0 }
 0x4fa   :  { %v13016_v22 = vpop.f32.mrf.mxu1  ;;  %18701 = vmatmul.mubr.msk.f32.gmra.mxu1 %vm6092_vm2, %v27048_v41 }
 0x4fb   :  { %v25300_v54 = vadd.f32 %v13016_v22, %v12913_v57  ;;  %v13107_v47 = vpop.f32.mrf.mxu0  ;;  %15144 = vmatmul.mubr.f32.gmra.mxu0 %v27049_v58  ;;  %15255 = vmatprep.mubr.f32.mxu1 %v26505_v30 }
 0x4fc   :  { %v13018_v31 = vpop.f32.mrf.mxu1  ;;  %15342 = vmatprep.mubr.f32.mxu0 %v26505_v30 }
 0x4fd   :  { %v25305_v50 = vadd.f32 %v13018_v31, %v12915_v32  ;;  %v13109_v7 = vpop.f32.mrf.mxu0 }
 0x4fe   :  { %v13232_v8 = vpop.f32.mrf.mxu1  ;;  %18702 = vmatmul.mubr.msk.f32.gmra.mxu1 %vm6092_vm2, %v27053_v35 }
 0x4ff   :  { %v13118_v23 = vpop.f32.mrf.mxu0  ;;  %v13233_v1 = vadd.f32 %v13232_v8, %v13096_v63  ;;  %15345 = vmatmul.mubr.f32.vlgmr.msra.gmra.mxu0 %v27054_v2  ;;  %15262 = vmatprep.mubr.f32.mxu1 %v26505_v30 }
 0x500   :  { %15532 = vmatpush1.msra.mxu0 %v15186_v62  ;;  %v13234_v11 = vpop.f32.mrf.mxu1  ;;  %15350 = vmatprep.mubr.f32.mxu0 %v26505_v30 }
 0x501   :  { %15536 = vmatprep.subr.mxu0 %v15192_v0  ;;  %v13120_v28 = vpop.f32.mrf.mxu0  ;;  %v13235_v46 = vadd.f32 %v13234_v11, %v13098_v42 }
 0x502   :  { %15540 = vmatpush1.msra.mxu0 %v15198_v55  ;;  %v13239_v36 = vpop.f32.mrf.mxu1  ;;  %18703 = vmatmul.mubr.msk.f32.gmra.mxu1 %vm6092_vm2, %v27057_v52 }
 0x503   :  { %v13129_v61 = vpop.f32.mrf.mxu0  ;;  %v13240_v39 = vadd.f32 %v13239_v36, %v13107_v47  ;;  %15353 = vmatmul.mubr.f32.gmra.mxu0 %v27058_v6  ;;  %15451 = vmatprep.mubr.f32.mxu1 %v26505_v30 }
 0x504   :  { %v13241_v44 = vpop.f32.mrf.mxu1  ;;  %15358 = vmatprep.mubr.f32.mxu0 %v26505_v30  ;;  %19675 = vmatprep.subr.mxu0 %v26505_v30 }
 0x505   :  { %v13131_v43 = vpop.f32.mrf.mxu0  ;;  %v13242_v62 = vadd.f32 %v13241_v44, %v13109_v7 }
 0x506   :  { %v13246_v0 = vpop.f32.mrf.mxu1  ;;  %15455 = vmatmul.mubr.f32.vlgmr.msra.gmra.mxu1 %v27061_v56 }
 0x507   :  { %v13140_v9 = vpop.f32.mrf.mxu0  ;;  %v13247_v55 = vadd.f32 %v13246_v0, %v13118_v23  ;;  %15361 = vmatmul.mubr.f32.gmra.mxu0 %v27062_v24  ;;  %15640 = vmatpush1.msra.mxu1 %v25180_v60  ;;  %v27072_v60 = vld [vmem:[#allocation78_spill] sm:$0xff] }
 0x508   :  { %15642 = vmatprep.subr.mxu1 %v25184_v20  ;;  %v13248_v57 = vpop.f32.mrf.mxu1  ;;  %15366 = vmatprep.mubr.f32.mxu0 %v26505_v30  ;;  %v25337_v59 = vand.u32 4294901760, %v27072_v60 }
 0x509   :  { %v13142_v32 = vpop.f32.mrf.mxu0  ;;  %v13249_v48 = vadd.f32 %v13248_v57, %v13120_v28  ;;  %15644 = vmatpush1.msra.mxu1 %v25188_v12  ;;  %15460 = vmatprep.mubr.f32.mxu1 %v26505_v30  ;;  %v25344_v12 = vsub.f32 %v27071_v38, %v25330_v19 }
 0x50a   :  { %v13253_v63 = vpop.f32.mrf.mxu1  ;;  %15464 = vmatmul.mubr.f32.gmra.mxu1 %v27064_v26  ;;  %19694 = vmatprep.subr.mxu1 %v26505_v30  ;;  %v25349_v11 = vsub.f32 %v27072_v60, %v25337_v59 }
 0x50b   :  { %v13254_v20 = vadd.f32 %v13253_v63, %v13129_v61  ;;  %v13341_v42 = vpop.f32.mrf.mxu0  ;;  %15369 = vmatmul.mubr.f32.gmra.mxu0 %v27066_v25  ;;  %15469 = vmatprep.mubr.f32.mxu1 %v26505_v30  ;;  %v15861_v44 = vand.u32 4294901760, %v25344_v12 }
 0x50c   :  { %v13342_v22 = vadd.f32 %v13341_v42, %v13233_v1  ;;  %v13255_v47 = vpop.f32.mrf.mxu1  ;;  %15374 = vmatprep.mubr.f32.mxu0 %v26505_v30  ;;  %v15868_v38 = vand.u32 4294901760, %v25349_v11 }
 0x50d   :  { %v13256_v31 = vadd.f32 %v13255_v47, %v13131_v43  ;;  %v13343_v7 = vpop.f32.mrf.mxu0 }
 0x50e   :  { %v13344_v8 = vadd.f32 %v13343_v7, %v13235_v46  ;;  %v13260_v23 = vpop.f32.mrf.mxu1  ;;  %15473 = vmatmul.mubr.f32.gmra.mxu1 %v27067_v4 }
 0x50f   :  { %v13261_v28 = vadd.f32 %v13260_v23, %v13140_v9  ;;  %v13349_v36 = vpop.f32.mrf.mxu0  ;;  %15377 = vmatmul.mubr.f32.gmra.mxu0 %v27068_v17  ;;  %15478 = vmatprep.mubr.f32.mxu1 %v26505_v30 }
 0x510   :  { %v13350_v1 = vadd.f32 %v13349_v36, %v13240_v39  ;;  %v13262_v61 = vpop.f32.mrf.mxu1  ;;  %15573 = vmatprep.mubr.f32.mxu0 %v26505_v30 }
 0x511   :  { %v13263_v46 = vadd.f32 %v13262_v61, %v13142_v32  ;;  %v13351_v43 = vpop.f32.mrf.mxu0 }
 0x512   :  { %v13352_v0 = vadd.f32 %v13351_v43, %v13242_v62  ;;  %v13451_v57 = vpop.f32.mrf.mxu1  ;;  %15482 = vmatmul.mubr.f32.gmra.mxu1 %v27069_v21  ;;  %v15862_v62 = vsub.f32 %v25344_v12, %v15861_v44 }
 0x513   :  { %v13357_v9 = vpop.f32.mrf.mxu0  ;;  %v13452_v63 = vadd.f32 %v13451_v57, %v13342_v22  ;;  %18704 = vmatmul.mubr.msk.f32.vlgmr.msra.gmra.mxu0 %vm6092_vm2, %v27041_v40  ;;  %15487 = vmatprep.mubr.f32.mxu1 %v26505_v30 }
 0x514   :  { %v13358_v39 = vadd.f32 %v13357_v9, %v13247_v55  ;;  %19676 = vmatpush3.msra.mxu0 %v25330_v19  ;;  %v13453_v60 = vpop.f32.mrf.mxu1  ;;  %15580 = vmatprep.mubr.f32.mxu0 %v26505_v30  ;;  %v15869_v55 = vsub.f32 %v25349_v11, %v15868_v38  ;;  %v15863_v43 = vand.u32 4294901760, %v15862_v62 }
 0x515   :  { %19677 = vmatprep.subr.mxu0 %v26505_v30  ;;  %v13359_v32 = vpop.f32.mrf.mxu0  ;;  %v13454_v42 = vadd.f32 %v13453_v60, %v13344_v8 }
 0x516   :  { %v13360_v22 = vadd.f32 %v13359_v32, %v13249_v48  ;;  %19678 = vmatpush3.msra.mxu0 %v25337_v59  ;;  %v13460_v47 = vpop.f32.mrf.mxu1  ;;  %15491 = vmatmul.mubr.f32.gmra.mxu1 %v27070_v34 }
 0x517   :  { %v13365_v7 = vpop.f32.mrf.mxu0  ;;  %v13461_v23 = vadd.f32 %v13460_v47, %v13350_v1  ;;  %18705 = vmatmul.mubr.msk.f32.gmra.mxu0 %vm6092_vm2, %v27045_v15  ;;  %15677 = vmatprep.mubr.f32.mxu1 %v26505_v30 }
 0x518   :  { %v13366_v36 = vadd.f32 %v13365_v7, %v13254_v20  ;;  %v13462_v61 = vpop.f32.mrf.mxu1  ;;  %15587 = vmatprep.mubr.f32.mxu0 %v26505_v30  ;;  %19713 = vmatprep.subr.mxu0 %v26505_v30  ;;  %v15870_v20 = vand.u32 4294901760, %v15869_v55 }
 0x519   :  { %v13367_v48 = vpop.f32.mrf.mxu0  ;;  %v13463_v8 = vadd.f32 %v13462_v61, %v13352_v0 }
 0x51a   :  { %v13368_v57 = vadd.f32 %v13367_v48, %v13256_v31  ;;  %v13469_v9 = vpop.f32.mrf.mxu1  ;;  %18709 = vmatmul.mubr.msk.f32.vlgmr.msra.gmra.mxu1 %vm6092_vm2, %v27041_v40 }
 0x51b   :  { %v13373_v1 = vpop.f32.mrf.mxu0  ;;  %v13470_v60 = vadd.f32 %v13469_v9, %v13358_v39  ;;  %18706 = vmatmul.mubr.msk.f32.gmra.mxu0 %vm6092_vm2, %v27048_v41  ;;  %19695 = vmatpush3.msra.mxu1 %v15863_v43 }
 0x51c   :  { %v13374_v32 = vadd.f32 %v13373_v1, %v13261_v28  ;;  %19696 = vmatprep.subr.mxu1 %v26505_v30  ;;  %v13471_v47 = vpop.f32.mrf.mxu1  ;;  %15594 = vmatprep.mubr.f32.mxu0 %v26505_v30 }
 0x51d   :  { %v13375_v0 = vpop.f32.mrf.mxu0  ;;  %v13472_v62 = vadd.f32 %v13471_v47, %v13360_v22  ;;  %19697 = vmatpush3.msra.mxu1 %v15870_v20  ;;  %15684 = vmatprep.mubr.f32.mxu1 %v26505_v30 }
 0x51e   :  { %v13376_v31 = vadd.f32 %v13375_v0, %v13263_v46  ;;  %v13478_v7 = vpop.f32.mrf.mxu1  ;;  %18710 = vmatmul.mubr.msk.f32.gmra.mxu1 %vm6092_vm2, %v27045_v15  ;;  %19732 = vmatprep.subr.mxu1 %v26505_v30 }
 0x51f   :  { %v13479_v39 = vadd.f32 %v13478_v7, %v13366_v36  ;;  %v13571_v55 = vpop.f32.mrf.mxu0  ;;  %18707 = vmatmul.mubr.msk.f32.gmra.mxu0 %vm6092_vm2, %v27053_v35  ;;  %15691 = vmatprep.mubr.f32.mxu1 %v26505_v30 }
 0x520   :  { %v13572_v28 = vadd.f32 %v13571_v55, %v13452_v63  ;;  %v13480_v61 = vpop.f32.mrf.mxu1  ;;  %15601 = vmatprep.mubr.f32.mxu0 %v26505_v30 }
 0x521   :  { %v13481_v22 = vadd.f32 %v13480_v61, %v13368_v57  ;;  %v13573_v48 = vpop.f32.mrf.mxu0 }
 0x522   :  { %v13574_v46 = vadd.f32 %v13573_v48, %v13454_v42  ;;  %v13487_v43 = vpop.f32.mrf.mxu1  ;;  %18711 = vmatmul.mubr.msk.f32.gmra.mxu1 %vm6092_vm2, %v27048_v41 }
 0x523   :  { %v13488_v9 = vadd.f32 %v13487_v43, %v13374_v32  ;;  %v13578_v1 = vpop.f32.mrf.mxu0  ;;  %18708 = vmatmul.mubr.msk.f32.gmra.mxu0 %vm6092_vm2, %v27057_v52  ;;  %15698 = vmatprep.mubr.f32.mxu1 %v26505_v30 }
 0x524   :  { %v13579_v36 = vadd.f32 %v13578_v1, %v13461_v23  ;;  %v13489_v20 = vpop.f32.mrf.mxu1  ;;  %19679 = vmatprep.mubr.msk.f32.mxu0 %vm19907_vm7, %v26505_v30 }
 0x525   :  { %v13490_v63 = vadd.f32 %v13489_v20, %v13376_v31  ;;  %v13580_v57 = vpop.f32.mrf.mxu0 }
 0x526   :  { %v13581_v47 = vadd.f32 %v13580_v57, %v13463_v8  ;;  %v13675_v42 = vpop.f32.mrf.mxu1  ;;  %18712 = vmatmul.mubr.msk.f32.gmra.mxu1 %vm6092_vm2, %v27053_v35 }
 0x527   :  { %v13585_v0 = vpop.f32.mrf.mxu0  ;;  %v25399_v32 = vadd.f32 %v13675_v42, %v13572_v28  ;;  %19680 = vmatmul.mubr.f32.vlgmr.msra.gmra.mxu0 %v27032_v10  ;;  %15705 = vmatprep.mubr.f32.mxu1 %v26505_v30 }
 0x528   :  { %v13586_v7 = vadd.f32 %v13585_v0, %v13470_v60  ;;  %19714 = vmatpush3.msra.mxu0 %v25344_v12  ;;  %v13677_v23 = vpop.f32.mrf.mxu1  ;;  %19682 = vmatprep.mubr.msk.f32.mxu0 %vm19907_vm7, %v26505_v30  ;;  %v27073_v0 = vld [vmem:[#allocation132_spill] sm:$0xff] }
 0x529   :  { %19715 = vmatprep.subr.mxu0 %v26505_v30  ;;  %v13587_v8 = vpop.f32.mrf.mxu0  ;;  %v25407_v31 = vadd.f32 %v13677_v23, %v13574_v46 }
 0x52a   :  { %v13588_v55 = vadd.f32 %v13587_v8, %v13472_v62  ;;  %19716 = vmatpush3.msra.mxu0 %v25349_v11  ;;  %v13682_v28 = vpop.f32.mrf.mxu1  ;;  %18713 = vmatmul.mubr.msk.f32.gmra.mxu1 %vm6092_vm2, %v27057_v52 }
 0x52b   :  { %v13592_v10 = vpop.f32.mrf.mxu0  ;;  %v25412_v60 = vadd.f32 %v13682_v28, %v13579_v36  ;;  %19683 = vmatmul.mubr.f32.gmra.mxu0 %v27037_v33  ;;  %19698 = vmatprep.mubr.msk.f32.mxu1 %vm19907_vm7, %v26505_v30 }
 0x52c   :  { %v13593_v61 = vadd.f32 %v13592_v10, %v13479_v39  ;;  %v13684_v48 = vpop.f32.mrf.mxu1  ;;  %19685 = vmatprep.mubr.msk.f32.mxu0 %vm19907_vm7, %v26505_v30  ;;  %19751 = vmatprep.subr.mxu0 %v26505_v30 }
 0x52d   :  { %v13594_v62 = vpop.f32.mrf.mxu0  ;;  %v25420_v46 = vadd.f32 %v13684_v48, %v13581_v47 }
 0x52e   :  { %v13595_v43 = vadd.f32 %v13594_v62, %v13481_v22  ;;  %v13689_v1 = vpop.f32.mrf.mxu1  ;;  %19699 = vmatmul.mubr.msk.f32.vlgmr.msra.gmra.mxu1 %vm6092_vm2, %v27041_v40 }
 0x52f   :  { %v13599_v36 = vpop.f32.mrf.mxu0  ;;  %v25424_v33 = vadd.f32 %v13689_v1, %v13586_v7  ;;  %19686 = vmatmul.mubr.f32.gmra.mxu0 %v27042_v18  ;;  %19733 = vmatpush3.msra.mxu1 %v25330_v19  ;;  %v25445_v7 = vand.u32 4294901760, %v27073_v0 }
 0x530   :  { %v13600_v39 = vadd.f32 %v13599_v36, %v13488_v9  ;;  %19734 = vmatprep.subr.mxu1 %v26505_v30  ;;  %v13691_v20 = vpop.f32.mrf.mxu1  ;;  %19688 = vmatprep.mubr.msk.f32.mxu0 %vm19907_vm7, %v26505_v30 }
 0x531   :  { %v13601_v57 = vpop.f32.mrf.mxu0  ;;  %v25431_v22 = vadd.f32 %v13691_v20, %v13588_v55  ;;  %19735 = vmatpush3.msra.mxu1 %v25337_v59  ;;  %19701 = vmatprep.mubr.msk.f32.mxu1 %vm19907_vm7, %v26505_v30  ;;  %v25460_v10 = vsub.f32 %v27073_v0, %v25445_v7 }
 0x532   :  { %v13602_v47 = vadd.f32 %v13601_v57, %v13490_v63  ;;  %v13696_v42 = vpop.f32.mrf.mxu1  ;;  %19702 = vmatmul.mubr.msk.f32.gmra.mxu1 %vm6092_vm2, %v27045_v15  ;;  %19770 = vmatprep.subr.mxu1 %v26505_v30 }
 0x533   :  { %v25439_v18 = vadd.f32 %v13696_v42, %v13593_v61  ;;  %v13781_v9 = vpop.f32.mrf.mxu0  ;;  %19689 = vmatmul.mubr.f32.gmra.mxu0 %v27046_v45  ;;  %19704 = vmatprep.mubr.msk.f32.mxu1 %vm19907_vm7, %v26505_v30 }
 0x534   :  { %v13698_v23 = vpop.f32.mrf.mxu1  ;;  %19691 = vmatprep.mubr.msk.f32.mxu0 %vm19907_vm7, %v26505_v30 }
 0x535   :  { %v25449_v63 = vadd.f32 %v13698_v23, %v13595_v43  ;;  %v19567_v8 = vpop.f32.mrf.mxu0  ;;  %v27074_v23 = vld [vmem:[#allocation96_spill] sm:$0xff] }
 0x536   :  { %v13703_v55 = vpop.f32.mrf.mxu1  ;;  %19705 = vmatmul.mubr.msk.f32.gmra.mxu1 %vm6092_vm2, %v27048_v41  ;;  %v25497_v8 = vand.u32 4294901760, %v27074_v23 }
 0x537   :  { %v25453_v28 = vadd.f32 %v13703_v55, %v13600_v39  ;;  %v13791_v45 = vpop.f32.mrf.mxu0  ;;  %19692 = vmatmul.mubr.f32.gmra.mxu0 %v27049_v58  ;;  %19707 = vmatprep.mubr.msk.f32.mxu1 %vm19907_vm7, %v26505_v30  ;;  %v16508_v39 = vand.u32 4294901760, %v25460_v10 }
 0x538   :  { %v13705_v61 = vpop.f32.mrf.mxu1  ;;  %19717 = vmatprep.mubr.msk.f32.mxu0 %vm19907_vm7, %v26505_v30 }
 0x539   :  { %v25464_v48 = vadd.f32 %v13705_v61, %v13602_v47  ;;  %v19570_v62 = vpop.f32.mrf.mxu0  ;;  %v16509_v11 = vsub.f32 %v25460_v10, %v16508_v39 }
 0x53a   :  { %v13902_v43 = vpop.f32.mrf.mxu1  ;;  %19708 = vmatmul.mubr.msk.f32.gmra.mxu1 %vm6092_vm2, %v27053_v35 }
 0x53b   :  { %v13801_v1 = vpop.f32.mrf.mxu0  ;;  %v13903_v58 = vadd.f32 %v13902_v43, %v13781_v9  ;;  %19718 = vmatmul.mubr.f32.vlgmr.msra.gmra.mxu0 %v27054_v2  ;;  %19710 = vmatprep.mubr.msk.f32.mxu1 %vm19907_vm7, %v26505_v30  ;;  %v16510_v0 = vand.u32 4294901760, %v16509_v11 }
 0x53c   :  { %19752 = vmatpush3.msra.mxu0 %v15861_v44  ;;  %v19586_v36 = vpop.f32.mrf.mxu1  ;;  %19720 = vmatprep.mubr.msk.f32.mxu0 %vm19907_vm7, %v26505_v30 }
 0x53d   :  { %19753 = vmatprep.subr.mxu0 %v26505_v30  ;;  %v19573_v20 = vpop.f32.mrf.mxu0  ;;  %v25516_v36 = vsub.f32 %v27074_v23, %v25497_v8 }
 0x53e   :  { %19754 = vmatpush3.msra.mxu0 %v15868_v38  ;;  %v13908_v57 = vpop.f32.mrf.mxu1  ;;  %19711 = vmatmul.mubr.msk.f32.gmra.mxu1 %vm6092_vm2, %v27057_v52 }
 0x53f   :  { %16383 = vmatprep.subr.mxu0 %v25445_v7  ;;  %v13811_v2 = vpop.f32.mrf.mxu0  ;;  %v13909_v12 = vadd.f32 %v13908_v57, %v13791_v45  ;;  %19721 = vmatmul.mubr.f32.gmra.mxu0 %v27058_v6  ;;  %v27076_v45 = vld [vmem:[#allocation88_spill] sm:$0xff] }
 0x540   :  { %v19589_v44 = vpop.f32.mrf.mxu1  ;;  %19723 = vmatprep.mubr.msk.f32.mxu0 %vm19907_vm7, %v26505_v30  ;;  %19736 = vmatprep.mubr.msk.f32.mxu1 %vm19907_vm7, %v26505_v30  ;;  %v25507_v61 = vand.u32 4294901760, %v27076_v45 }
 0x541   :  { %v19576_v38 = vpop.f32.mrf.mxu0 }
 0x542   :  { %v13914_v47 = vpop.f32.mrf.mxu1  ;;  %19737 = vmatmul.mubr.f32.vlgmr.msra.gmra.mxu1 %v27061_v56  ;;  %v27075_v56 = vld [vmem:[#allocation92_spill] sm:$0xff]  ;;  %v16514_v38 = vand.u32 4294901760, %v25516_v36 }
 0x543   :  { %v13821_v42 = vpop.f32.mrf.mxu0  ;;  %v13915_v9 = vadd.f32 %v13914_v47, %v13801_v1  ;;  %19724 = vmatmul.mubr.f32.gmra.mxu0 %v27062_v24  ;;  %19771 = vmatpush3.msra.mxu1 %v25330_v19  ;;  %v25503_v24 = vand.u32 4294901760, %v27075_v56 }
 0x544   :  { %19772 = vmatprep.subr.mxu1 %v26505_v30  ;;  %v19592_v6 = vpop.f32.mrf.mxu1  ;;  %19726 = vmatprep.mubr.msk.f32.mxu0 %vm19907_vm7, %v26505_v30 }
 0x545   :  { %v19579_v55 = vpop.f32.mrf.mxu0  ;;  %19773 = vmatpush3.msra.mxu1 %v25337_v59  ;;  %19739 = vmatprep.mubr.msk.f32.mxu1 %vm19907_vm7, %v26505_v30  ;;  %v25520_v20 = vsub.f32 %v27075_v56, %v25503_v24 }
 0x546   :  { %16511 = vmatprep.subr.mxu1 %v16510_v0  ;;  %v13920_v19 = vpop.f32.mrf.mxu1  ;;  %19740 = vmatmul.mubr.f32.gmra.mxu1 %v27064_v26 }
 0x547   :  { %v13921_v62 = vadd.f32 %v13920_v19, %v13811_v2  ;;  %v14002_v43 = vpop.f32.mrf.mxu0  ;;  %19727 = vmatmul.mubr.f32.gmra.mxu0 %v27066_v25  ;;  %19742 = vmatprep.mubr.msk.f32.mxu1 %vm19907_vm7, %v26505_v30  ;;  %v25525_v25 = vsub.f32 %v27076_v45, %v25507_v61  ;;  %v16520_v6 = vand.u32 4294901760, %v25520_v20 }
 0x548   :  { %v14003_v59 = vadd.f32 %v14002_v43, %v13903_v58  ;;  %v19595_v1 = vpop.f32.mrf.mxu1  ;;  %19729 = vmatprep.mubr.msk.f32.mxu0 %vm19907_vm7, %v26505_v30 }
 0x549   :  { %v19605_v26 = vpop.f32.mrf.mxu0 }
 0x54a   :  { %v13926_v57 = vpop.f32.mrf.mxu1  ;;  %19743 = vmatmul.mubr.f32.gmra.mxu1 %v27067_v4 }
 0x54b   :  { %v13927_v58 = vadd.f32 %v13926_v57, %v13821_v42  ;;  %v14009_v2 = vpop.f32.mrf.mxu0  ;;  %19730 = vmatmul.mubr.f32.gmra.mxu0 %v27068_v17  ;;  %19745 = vmatprep.mubr.msk.f32.mxu1 %vm19907_vm7, %v26505_v30  ;;  %v16526_v42 = vand.u32 4294901760, %v25525_v25 }
 0x54c   :  { %v14010_v44 = vadd.f32 %v14009_v2, %v13909_v12  ;;  %v19598_v11 = vpop.f32.mrf.mxu1  ;;  %19755 = vmatprep.mubr.msk.f32.mxu0 %vm19907_vm7, %v26505_v30 }
 0x54d   :  { %v19608_v47 = vpop.f32.mrf.mxu0  ;;  %v16527_v19 = vsub.f32 %v25525_v25, %v16526_v42 }
 0x54e   :  { %v14105_v4 = vpop.f32.mrf.mxu1  ;;  %19746 = vmatmul.mubr.f32.gmra.mxu1 %v27069_v21  ;;  %v16515_v21 = vsub.f32 %v25516_v36, %v16514_v38 }
 0x54f   :  { %v14016_v0 = vpop.f32.mrf.mxu0  ;;  %v14106_v17 = vadd.f32 %v14105_v4, %v14003_v59  ;;  %19756 = vmatmul.mubr.msk.f32.vlgmr.msra.gmra.mxu0 %vm6092_vm2, %v27041_v40  ;;  %19748 = vmatprep.mubr.msk.f32.mxu1 %vm19907_vm7, %v26505_v30 }
 0x550   :  { %v14017_v12 = vadd.f32 %v14016_v0, %v13915_v9  ;;  %16385 = vmatpush1.msra.mxu0 %v25497_v8  ;;  %v19624_v23 = vpop.f32.mrf.mxu1  ;;  %19758 = vmatprep.mubr.msk.f32.mxu0 %vm19907_vm7, %v26505_v30  ;;  %v16521_v9 = vsub.f32 %v25520_v20, %v16520_v6  ;;  %v16516_v26 = vand.u32 4294901760, %v16515_v21 }
 0x551   :  { %16387 = vmatprep.subr.mxu0 %v25503_v24  ;;  %v19611_v55 = vpop.f32.mrf.mxu0 }
 0x552   :  { %16389 = vmatpush1.msra.mxu0 %v25507_v61  ;;  %v14113_v56 = vpop.f32.mrf.mxu1  ;;  %19749 = vmatmul.mubr.f32.gmra.mxu1 %v27070_v34  ;;  %v16522_v2 = vand.u32 4294901760, %v16521_v9 }
 0x553   :  { %16628 = vmatprep.subr.mxu0 %v25460_v10  ;;  %v14023_v45 = vpop.f32.mrf.mxu0  ;;  %v14114_v43 = vadd.f32 %v14113_v56, %v14010_v44  ;;  %19759 = vmatmul.mubr.msk.f32.gmra.mxu0 %vm6092_vm2, %v27045_v15  ;;  %v27083_v10 = vld [vmem:[#allocation152_spill] sm:$0xff] }
 0x554   :  { %v14024_v59 = vadd.f32 %v14023_v45, %v13921_v62  ;;  %v19627_v1 = vpop.f32.mrf.mxu1  ;;  %19761 = vmatprep.mubr.msk.f32.mxu0 %vm19907_vm7, %v26505_v30  ;;  %19774 = vmatprep.mubr.msk.f32.mxu1 %vm19907_vm7, %v26505_v30  ;;  %v16528_v62 = vand.u32 4294901760, %v16527_v19 }
 0x555   :  { %v19614_v34 = vpop.f32.mrf.mxu0 }
 0x556   :  { %v14121_v57 = vpop.f32.mrf.mxu1  ;;  %19775 = vmatmul.mubr.msk.f32.vlgmr.msra.gmra.mxu1 %vm6092_vm2, %v27041_v40 }
 0x557   :  { %v14030_v11 = vpop.f32.mrf.mxu0  ;;  %v14122_v44 = vadd.f32 %v14121_v57, %v14017_v12  ;;  %19762 = vmatmul.mubr.msk.f32.gmra.mxu0 %vm6092_vm2, %v27048_v41  ;;  %16517 = vmatpush1.msra.mxu1 %v16516_v26 }
 0x558   :  { %v14031_v47 = vadd.f32 %v14030_v11, %v13927_v58  ;;  %16523 = vmatprep.subr.mxu1 %v16522_v2  ;;  %v19630_v4 = vpop.f32.mrf.mxu1  ;;  %19764 = vmatprep.mubr.msk.f32.mxu0 %vm19907_vm7, %v26505_v30 }
 0x559   :  { %v19617_v0 = vpop.f32.mrf.mxu0  ;;  %16529 = vmatpush1.msra.mxu1 %v16528_v62  ;;  %19777 = vmatprep.mubr.msk.f32.mxu1 %vm19907_vm7, %v26505_v30 }
 0x55a   :  { %16740 = vmatprep.subr.mxu1 %v25445_v7  ;;  %v14129_v40 = vpop.f32.mrf.mxu1  ;;  %19778 = vmatmul.mubr.msk.f32.gmra.mxu1 %vm6092_vm2, %v27045_v15 }
 0x55b   :  { %v14130_v12 = vadd.f32 %v14129_v40, %v14024_v59  ;;  %v14214_v23 = vpop.f32.mrf.mxu0  ;;  %19765 = vmatmul.mubr.msk.f32.gmra.mxu0 %vm6092_vm2, %v27053_v35  ;;  %19780 = vmatprep.mubr.msk.f32.mxu1 %vm19907_vm7, %v26505_v30  ;;  %v27081_v40 = vld [vmem:[#allocation46_spill] sm:$0xff] }
 0x55c   :  { %v14215_v58 = vadd.f32 %v14214_v23, %v14106_v17  ;;  %v19633_v21 = vpop.f32.mrf.mxu1  ;;  %19767 = vmatprep.mubr.msk.f32.mxu0 %vm19907_vm7, %v26505_v30 }
 0x55d   :  { %v19643_v55 = vpop.f32.mrf.mxu0 }
 0x55e   :  { %v14137_v56 = vpop.f32.mrf.mxu1  ;;  %19781 = vmatmul.mubr.msk.f32.gmra.mxu1 %vm6092_vm2, %v27048_v41  ;;  %v27078_v41 = vld [vmem:[#allocation144_spill] sm:$0xff]  ;;  %v27084_v55 = vld [vmem:[#allocation51_spill] sm:$0xff] }
 0x55f   :  { %v14138_v9 = vadd.f32 %v14137_v56, %v14031_v47  ;;  %v14220_v15 = vpop.f32.mrf.mxu0  ;;  %19768 = vmatmul.mubr.msk.f32.gmra.mxu0 %vm6092_vm2, %v27057_v52  ;;  %19783 = vmatprep.mubr.msk.f32.mxu1 %vm19907_vm7, %v26505_v30 }
 0x560   :  { %v14221_v19 = vadd.f32 %v14220_v15, %v14114_v43  ;;  %v19636_v45 = vpop.f32.mrf.mxu1  ;;  %16422 = vmatprep.mubr.f32.mxu0 %v26505_v30 }
 0x561   :  { %v19646_v17 = vpop.f32.mrf.mxu0 }
 0x562   :  { %v14311_v59 = vpop.f32.mrf.mxu1  ;;  %19784 = vmatmul.mubr.msk.f32.gmra.mxu1 %vm6092_vm2, %v27053_v35 }
 0x563   :  { %v14226_v1 = vpop.f32.mrf.mxu0  ;;  %v25588_v34 = vadd.f32 %v14311_v59, %v14215_v58  ;;  %16428 = vmatmul.mubr.f32.vlgmr.msra.gmra.mxu0 %v27078_v41  ;;  %19786 = vmatprep.mubr.msk.f32.mxu1 %vm19907_vm7, %v26505_v30 }
 0x564   :  { %v14227_v26 = vadd.f32 %v14226_v1, %v14122_v44  ;;  %16631 = vmatpush1.msra.mxu0 %v25516_v36  ;;  %v19662_v43 = vpop.f32.mrf.mxu1  ;;  %16433 = vmatprep.mubr.f32.mxu0 %v26505_v30  ;;  %v27080_v44 = vld [vmem:[#allocation147_spill] sm:$0xff] }
 0x565   :  { %27077 = vst [vmem:[#allocation118_spill] sm:$0xff] %v25588_v34  ;;  %16634 = vmatprep.subr.mxu0 %v25520_v20  ;;  %v19649_v57 = vpop.f32.mrf.mxu0  ;;  %v27088_v43 = vld [vmem:[#allocation49_spill] sm:$0xff] }
 0x566   :  { %16637 = vmatpush1.msra.mxu0 %v25525_v25  ;;  %v14317_v35 = vpop.f32.mrf.mxu1  ;;  %19787 = vmatmul.mubr.msk.f32.gmra.mxu1 %vm6092_vm2, %v27057_v52 }
 0x567   :  { %16856 = vmatprep.subr.mxu0 %v16508_v39  ;;  %v14232_v2 = vpop.f32.mrf.mxu0  ;;  %v25601_v11 = vadd.f32 %v14317_v35, %v14221_v19  ;;  %16439 = vmatmul.mubr.f32.gmra.mxu0 %v27080_v44  ;;  %v27087_v19 = vld [vmem:[#allocation5_spill] sm:$0xff] }
 0x568   :  { %v14233_v62 = vadd.f32 %v14232_v2, %v14130_v12  ;;  %v19665_v47 = vpop.f32.mrf.mxu1  ;;  %16444 = vmatprep.mubr.f32.mxu0 %v26505_v30  ;;  %16562 = vmatprep.mubr.f32.mxu1 %v26505_v30  ;;  %v25624_v45 = vand.u32 4294901760, %v27087_v19  ;;  %v27090_v2 = vld [vmem:[#allocation157_spill] sm:$0xff] }
 0x569   :  { %27079 = vst [vmem:[#allocation120_spill] sm:$0xff] %v25601_v11  ;;  %v19652_v4 = vpop.f32.mrf.mxu0 }
 0x56a   :  { %v14323_v0 = vpop.f32.mrf.mxu1  ;;  %18729 = vmatmul.mubr.msk.f32.vlgmr.msra.gmra.mxu1 %vm6092_vm2, %v27081_v40 }
 0x56b   :  { %v14238_v52 = vpop.f32.mrf.mxu0  ;;  %v25608_v23 = vadd.f32 %v14323_v0, %v14227_v26  ;;  %16450 = vmatmul.mubr.f32.gmra.mxu0 %v27083_v10  ;;  %16742 = vmatpush1.msra.mxu1 %v25497_v8 }
 0x56c   :  { %v14239_v39 = vadd.f32 %v14238_v52, %v14138_v9  ;;  %16744 = vmatprep.subr.mxu1 %v25503_v24  ;;  %v19668_v12 = vpop.f32.mrf.mxu1  ;;  %16455 = vmatprep.mubr.f32.mxu0 %v26505_v30  ;;  %v27086_v9 = vld [vmem:[#allocation155_spill] sm:$0xff]  ;;  %v27091_v52 = vld [vmem:[#allocation140_spill] sm:$0xff] }
 0x56d   :  { %27082 = vst [vmem:[#allocation69_spill] sm:$0xff] %v25608_v23  ;;  %v19655_v58 = vpop.f32.mrf.mxu0  ;;  %16746 = vmatpush1.msra.mxu1 %v25507_v61  ;;  %16569 = vmatprep.mubr.f32.mxu1 %v26505_v30 }
 0x56e   :  { %16966 = vmatprep.subr.mxu1 %v25445_v7  ;;  %v14329_v21 = vpop.f32.mrf.mxu1  ;;  %18730 = vmatmul.mubr.msk.f32.gmra.mxu1 %vm6092_vm2, %v27084_v55  ;;  %v27092_v58 = vld [vmem:[#allocation52_spill] sm:$0xff] }
 0x56f   :  { %v25619_v56 = vadd.f32 %v14329_v21, %v14233_v62  ;;  %v14414_v15 = vpop.f32.mrf.mxu0  ;;  %16461 = vmatmul.mubr.f32.gmra.mxu0 %v27086_v9  ;;  %16576 = vmatprep.mubr.f32.mxu1 %v26505_v30 }
 0x570   :  { %v14415_v17 = vadd.f32 %v14414_v15, %v25255_v53  ;;  %v19671_v59 = vpop.f32.mrf.mxu1  ;;  %16466 = vmatprep.mubr.f32.mxu0 %v26505_v30  ;;  %v25637_v53 = vsub.f32 %v27087_v19, %v25624_v45 }
 0x571   :  { %27085 = vst [vmem:[#allocation124_spill] sm:$0xff] %v25619_v56  ;;  %v14416_v7 = vpop.f32.mrf.mxu0 }
 0x572   :  { %v14417_v1 = vadd.f32 %v14416_v7, %v25262_v29  ;;  %v14335_v26 = vpop.f32.mrf.mxu1  ;;  %18731 = vmatmul.mubr.msk.f32.gmra.mxu1 %vm6092_vm2, %v27088_v43  ;;  %v27094_v7 = vld [vmem:[#allocation76_spill] sm:$0xff] }
 0x573   :  { %v25631_v57 = vadd.f32 %v14335_v26, %v14239_v39  ;;  %v14425_v35 = vpop.f32.mrf.mxu0  ;;  %16472 = vmatmul.mubr.f32.gmra.mxu0 %v27090_v2  ;;  %16583 = vmatprep.mubr.f32.mxu1 %v26505_v30 }
 0x574   :  { %v14426_v62 = vadd.f32 %v14425_v35, %v25269_v37  ;;  %v19674_v47 = vpop.f32.mrf.mxu1  ;;  %16670 = vmatprep.mubr.f32.mxu0 %v26505_v30  ;;  %v27095_v35 = vld [vmem:[#allocation74_spill] sm:$0xff] }
 0x575   :  { %27089 = vst [vmem:[#allocation84_spill] sm:$0xff] %v25631_v57  ;;  %v14427_v29 = vpop.f32.mrf.mxu0 }
 0x576   :  { %v14428_v4 = vadd.f32 %v14427_v29, %v25274_v27  ;;  %v14550_v0 = vpop.f32.mrf.mxu1  ;;  %18732 = vmatmul.mubr.msk.f32.gmra.mxu1 %vm6092_vm2, %v27091_v52  ;;  %v26480_v27 = vand.u32 4294901760, %v25637_v53  ;;  %v27096_v29 = vld [vmem:[#allocation142_spill] sm:$0xff] }
 0x577   :  { %v14436_v39 = vpop.f32.mrf.mxu0  ;;  %v14551_v12 = vadd.f32 %v14550_v0, %v14415_v17  ;;  %16673 = vmatmul.mubr.f32.vlgmr.msra.gmra.mxu0 %v27092_v58  ;;  %16590 = vmatprep.mubr.f32.mxu1 %v26505_v30 }
 0x578   :  { %v14437_v21 = vadd.f32 %v14436_v39, %v25278_v5  ;;  %16860 = vmatpush1.msra.mxu0 %v16514_v38  ;;  %v14552_v37 = vpop.f32.mrf.mxu1  ;;  %16678 = vmatprep.mubr.f32.mxu0 %v26505_v30  ;;  %v27093_v5 = vld [vmem:[#allocation143_spill] sm:$0xff] }
 0x579   :  { %16864 = vmatprep.subr.mxu0 %v16520_v6  ;;  %v14438_v15 = vpop.f32.mrf.mxu0  ;;  %v14553_v19 = vadd.f32 %v14552_v37, %v14417_v1 }
 0x57a   :  { %v14439_v17 = vadd.f32 %v14438_v15, %v25284_v16  ;;  %16868 = vmatpush1.msra.mxu0 %v16526_v42  ;;  %v14557_v59 = vpop.f32.mrf.mxu1  ;;  %18733 = vmatmul.mubr.msk.f32.gmra.mxu1 %vm6092_vm2, %v27093_v5  ;;  %v17196_v16 = vsub.f32 %v25637_v53, %v26480_v27 }
 0x57b   :  { %17070 = vmatprep.subr.mxu0 %v25624_v45  ;;  %v14447_v36 = vpop.f32.mrf.mxu0  ;;  %v14558_v38 = vadd.f32 %v14557_v59, %v14426_v62  ;;  %16681 = vmatmul.mubr.f32.gmra.mxu0 %v27094_v7 }
 0x57c   :  { %v14448_v20 = vadd.f32 %v14447_v36, %v25291_v51  ;;  %v14559_v6 = vpop.f32.mrf.mxu1  ;;  %16686 = vmatprep.mubr.f32.mxu0 %v26505_v30  ;;  %16779 = vmatprep.mubr.f32.mxu1 %v26505_v30  ;;  %v17197_v39 = vand.u32 4294901760, %v17196_v16  ;;  %v27100_v36 = vld [vmem:[#allocation19_spill] sm:$0xff] }
 0x57d   :  { %v14449_v25 = vpop.f32.mrf.mxu0  ;;  %v14560_v42 = vadd.f32 %v14559_v6, %v14428_v4  ;;  %v27097_v4 = vld [vmem:[#allocation3_spill] sm:$0xff]  ;;  %v25684_v6 = vand.u32 4294901760, %v27100_v36 }
 0x57e   :  { %v14450_v1 = vadd.f32 %v14449_v25, %v25296_v49  ;;  %v14564_v26 = vpop.f32.mrf.mxu1  ;;  %16783 = vmatmul.mubr.f32.vlgmr.msra.gmra.mxu1 %v27095_v35  ;;  %v25674_v37 = vand.u32 4294901760, %v27097_v4 }
 0x57f   :  { %v14458_v62 = vpop.f32.mrf.mxu0  ;;  %v14565_v47 = vadd.f32 %v14564_v26, %v14437_v21  ;;  %16689 = vmatmul.mubr.f32.gmra.mxu0 %v27096_v29  ;;  %16968 = vmatpush1.msra.mxu1 %v25497_v8  ;;  %v27098_v21 = vld [vmem:[#allocation25_spill] sm:$0xff]  ;;  %v27101_v26 = vld [vmem:[#allocation146_spill] sm:$0xff] }
 0x580   :  { %v14459_v51 = vadd.f32 %v14458_v62, %v25300_v54  ;;  %16970 = vmatprep.subr.mxu1 %v25503_v24  ;;  %v14566_v0 = vpop.f32.mrf.mxu1  ;;  %16694 = vmatprep.mubr.f32.mxu0 %v26505_v30  ;;  %v25679_v59 = vand.u32 4294901760, %v27098_v21  ;;  %v27099_v24 = vld [vmem:[#allocation141_spill] sm:$0xff] }
 0x581   :  { %v14460_v49 = vpop.f32.mrf.mxu0  ;;  %v14567_v15 = vadd.f32 %v14566_v0, %v14439_v17  ;;  %16972 = vmatpush1.msra.mxu1 %v25507_v61  ;;  %16788 = vmatprep.mubr.f32.mxu1 %v26505_v30 }
 0x582   :  { %v14461_v54 = vadd.f32 %v14460_v49, %v25305_v50  ;;  %17198 = vmatprep.subr.mxu1 %v17197_v39  ;;  %v14571_v8 = vpop.f32.mrf.mxu1  ;;  %16792 = vmatmul.mubr.f32.gmra.mxu1 %v27099_v24  ;;  %v25691_v50 = vsub.f32 %v27097_v4, %v25674_v37  ;;  %v25695_v39 = vsub.f32 %v27098_v21, %v25679_v59 }
 0x583   :  { %v14572_v16 = vadd.f32 %v14571_v8, %v14448_v20  ;;  %v14659_v25 = vpop.f32.mrf.mxu0  ;;  %16697 = vmatmul.mubr.f32.gmra.mxu0 %v27101_v26  ;;  %16797 = vmatprep.mubr.f32.mxu1 %v26505_v30  ;;  %v27102_v8 = vld [vmem:[#allocation145_spill] sm:$0xff] }
 0x584   :  { %v14660_v61 = vadd.f32 %v14659_v25, %v14551_v12  ;;  %v14573_v17 = vpop.f32.mrf.mxu1  ;;  %16702 = vmatprep.mubr.f32.mxu0 %v26505_v30  ;;  %v25700_v12 = vsub.f32 %v27100_v36, %v25684_v6  ;;  %v26487_v21 = vand.u32 4294901760, %v25691_v50  ;;  %v26488_v36 = vand.u32 4294901760, %v25695_v39 }
 0x585   :  { %v14574_v62 = vadd.f32 %v14573_v17, %v14450_v1  ;;  %v14661_v0 = vpop.f32.mrf.mxu0 }
 0x586   :  { %v14662_v20 = vadd.f32 %v14661_v0, %v14553_v19  ;;  %v14578_v49 = vpop.f32.mrf.mxu1  ;;  %16801 = vmatmul.mubr.f32.gmra.mxu1 %v27102_v8 }
 0x587   :  { %v14579_v25 = vadd.f32 %v14578_v49, %v14459_v51  ;;  %v14667_v27 = vpop.f32.mrf.mxu0  ;;  %16705 = vmatmul.mubr.f32.gmra.mxu0 %v27103_v3  ;;  %16806 = vmatprep.mubr.f32.mxu1 %v26505_v30  ;;  %v26489_v51 = vand.u32 4294901760, %v25700_v12 }
 0x588   :  { %v14668_v1 = vadd.f32 %v14667_v27, %v14558_v38  ;;  %v14580_v4 = vpop.f32.mrf.mxu1  ;;  %16901 = vmatprep.mubr.f32.mxu0 %v26505_v30 }
 0x589   :  { %v14581_v19 = vadd.f32 %v14580_v4, %v14461_v54  ;;  %v14669_v17 = vpop.f32.mrf.mxu0 }
 0x58a   :  { %v14670_v0 = vadd.f32 %v14669_v17, %v14560_v42  ;;  %v14769_v14 = vpop.f32.mrf.mxu1  ;;  %16810 = vmatmul.mubr.f32.gmra.mxu1 %v27104_v13  ;;  %v17202_v42 = vsub.f32 %v25691_v50, %v26487_v21  ;;  %v27105_v17 = vld [vmem:[#allocation153_spill] sm:$0xff] }
 0x58b   :  { %v14675_v49 = vpop.f32.mrf.mxu0  ;;  %v14770_v57 = vadd.f32 %v14769_v14, %v14660_v61  ;;  %18734 = vmatmul.mubr.msk.f32.vlgmr.msra.gmra.mxu0 %vm6092_vm2, %v27081_v40  ;;  %16815 = vmatprep.mubr.f32.mxu1 %v26505_v30 }
 0x58c   :  { %v14676_v27 = vadd.f32 %v14675_v49, %v14565_v47  ;;  %17072 = vmatpush1.msra.mxu0 %v25674_v37  ;;  %v14771_v38 = vpop.f32.mrf.mxu1  ;;  %16908 = vmatprep.mubr.f32.mxu0 %v26505_v30  ;;  %v17208_v47 = vsub.f32 %v25695_v39, %v26488_v36  ;;  %v17214_v49 = vsub.f32 %v25700_v12, %v26489_v51  ;;  %v17203_v36 = vand.u32 4294901760, %v17202_v42 }
 0x58d   :  { %17074 = vmatprep.subr.mxu0 %v25679_v59  ;;  %v14677_v54 = vpop.f32.mrf.mxu0  ;;  %v14772_v4 = vadd.f32 %v14771_v38, %v14662_v20 }
 0x58e   :  { %v14678_v14 = vadd.f32 %v14677_v54, %v14567_v15  ;;  %17076 = vmatpush1.msra.mxu0 %v25684_v6  ;;  %v14778_v61 = vpop.f32.mrf.mxu1  ;;  %16819 = vmatmul.mubr.f32.gmra.mxu1 %v27105_v17  ;;  %v17209_v51 = vand.u32 4294901760, %v17208_v47 }
 0x58f   :  { %17315 = vmatprep.subr.mxu0 %v25637_v53  ;;  %v14683_v21 = vpop.f32.mrf.mxu0  ;;  %v14779_v56 = vadd.f32 %v14778_v61, %v14668_v1  ;;  %18735 = vmatmul.mubr.msk.f32.gmra.mxu0 %vm6092_vm2, %v27084_v55 }
 0x590   :  { %v14684_v15 = vadd.f32 %v14683_v21, %v14572_v16  ;;  %v14780_v20 = vpop.f32.mrf.mxu1  ;;  %16915 = vmatprep.mubr.f32.mxu0 %v26505_v30  ;;  %17005 = vmatprep.mubr.f32.mxu1 %v26505_v30  ;;  %v17215_v16 = vand.u32 4294901760, %v17214_v49 }
 0x591   :  { %v14685_v38 = vpop.f32.mrf.mxu0  ;;  %v14781_v54 = vadd.f32 %v14780_v20, %v14670_v0 }
 0x592   :  { %v14686_v23 = vadd.f32 %v14685_v38, %v14574_v62  ;;  %v14787_v11 = vpop.f32.mrf.mxu1  ;;  %18739 = vmatmul.mubr.msk.f32.vlgmr.msra.gmra.mxu1 %vm6092_vm2, %v27081_v40 }
 0x593   :  { %v14691_v34 = vpop.f32.mrf.mxu0  ;;  %v14788_v1 = vadd.f32 %v14787_v11, %v14676_v27  ;;  %18736 = vmatmul.mubr.msk.f32.gmra.mxu0 %vm6092_vm2, %v27088_v43  ;;  %17204 = vmatpush1.msra.mxu1 %v17203_v36 }
 0x594   :  { %v14692_v21 = vadd.f32 %v14691_v34, %v14579_v25  ;;  %17210 = vmatprep.subr.mxu1 %v17209_v51  ;;  %v14789_v61 = vpop.f32.mrf.mxu1  ;;  %16922 = vmatprep.mubr.f32.mxu0 %v26505_v30 }
 0x595   :  { %v14693_v0 = vpop.f32.mrf.mxu0  ;;  %v14790_v42 = vadd.f32 %v14789_v61, %v14678_v14  ;;  %17216 = vmatpush1.msra.mxu1 %v17215_v16  ;;  %17012 = vmatprep.mubr.f32.mxu1 %v26505_v30 }
 0x596   :  { %v14694_v62 = vadd.f32 %v14693_v0, %v14581_v19  ;;  %17427 = vmatprep.subr.mxu1 %v25624_v45  ;;  %v14796_v47 = vpop.f32.mrf.mxu1  ;;  %18740 = vmatmul.mubr.msk.f32.gmra.mxu1 %vm6092_vm2, %v27084_v55 }
 0x597   :  { %v14797_v11 = vadd.f32 %v14796_v47, %v14684_v15  ;;  %v14889_v36 = vpop.f32.mrf.mxu0  ;;  %18737 = vmatmul.mubr.msk.f32.gmra.mxu0 %vm6092_vm2, %v27091_v52  ;;  %17019 = vmatprep.mubr.f32.mxu1 %v26505_v30 }
 0x598   :  { %v14890_v34 = vadd.f32 %v14889_v36, %v14770_v57  ;;  %v14798_v25 = vpop.f32.mrf.mxu1  ;;  %16929 = vmatprep.mubr.f32.mxu0 %v26505_v30 }
 0x599   :  { %v14799_v51 = vadd.f32 %v14798_v25, %v14686_v23  ;;  %v14891_v27 = vpop.f32.mrf.mxu0 }
 0x59a   :  { %v14892_v19 = vadd.f32 %v14891_v27, %v14772_v4  ;;  %v14805_v14 = vpop.f32.mrf.mxu1  ;;  %18741 = vmatmul.mubr.msk.f32.gmra.mxu1 %vm6092_vm2, %v27088_v43 }
 0x59b   :  { %v14806_v49 = vadd.f32 %v14805_v14, %v14692_v21  ;;  %v14896_v20 = vpop.f32.mrf.mxu0  ;;  %18738 = vmatmul.mubr.msk.f32.gmra.mxu0 %vm6092_vm2, %v27093_v5  ;;  %17026 = vmatprep.mubr.f32.mxu1 %v26505_v30 }
 0x59c   :  { %v14897_v15 = vadd.f32 %v14896_v20, %v14779_v56  ;;  %v14807_v38 = vpop.f32.mrf.mxu1  ;;  %17109 = vmatprep.mubr.f32.mxu0 %v26505_v30 }
 0x59d   :  { %v14808_v57 = vadd.f32 %v14807_v38, %v14694_v62  ;;  %v14898_v16 = vpop.f32.mrf.mxu0 }
 0x59e   :  { %v14899_v23 = vadd.f32 %v14898_v16, %v14781_v54  ;;  %v14993_v61 = vpop.f32.mrf.mxu1  ;;  %18742 = vmatmul.mubr.msk.f32.gmra.mxu1 %vm6092_vm2, %v27091_v52 }
 0x59f   :  { %v14903_v4 = vpop.f32.mrf.mxu0  ;;  %v25752_v0 = vadd.f32 %v14993_v61, %v14890_v34  ;;  %17115 = vmatmul.mubr.f32.vlgmr.msra.gmra.mxu0 %v27078_v41  ;;  %17033 = vmatprep.mubr.f32.mxu1 %v26505_v30  ;;  %v27106_v34 = vand.u32 4294901760, %v25637_v53 }
 0x5a0   :  { %v14904_v21 = vadd.f32 %v14903_v4, %v14788_v1  ;;  %17318 = vmatpush1.msra.mxu0 %v25691_v50  ;;  %v14995_v56 = vpop.f32.mrf.mxu1  ;;  %17120 = vmatprep.mubr.f32.mxu0 %v26505_v30 }
 0x5a1   :  { %17321 = vmatprep.subr.mxu0 %v25695_v39  ;;  %v14905_v54 = vpop.f32.mrf.mxu0  ;;  %v25759_v62 = vadd.f32 %v14995_v56, %v14892_v19 }
 0x5a2   :  { %v14906_v47 = vadd.f32 %v14905_v54, %v14790_v42  ;;  %17324 = vmatpush1.msra.mxu0 %v25700_v12  ;;  %v15000_v36 = vpop.f32.mrf.mxu1  ;;  %18743 = vmatmul.mubr.msk.f32.gmra.mxu1 %vm6092_vm2, %v27093_v5 }
 0x5a3   :  { %17543 = vmatprep.subr.mxu0 %v27106_v34  ;;  %v14910_v1 = vpop.f32.mrf.mxu0  ;;  %v25766_v25 = vadd.f32 %v15000_v36, %v14897_v15  ;;  %17126 = vmatmul.mubr.f32.gmra.mxu0 %v27080_v44 }
 0x5a4   :  { %v14911_v27 = vadd.f32 %v14910_v1, %v14797_v11  ;;  %v15002_v14 = vpop.f32.mrf.mxu1  ;;  %17131 = vmatprep.mubr.f32.mxu0 %v26505_v30  ;;  %17249 = vmatprep.mubr.f32.mxu1 %v26505_v30 }
 0x5a5   :  { %v14912_v42 = vpop.f32.mrf.mxu0  ;;  %v25771_v19 = vadd.f32 %v15002_v14, %v14899_v23 }
 0x5a6   :  { %v14913_v20 = vadd.f32 %v14912_v42, %v14799_v51  ;;  %v15007_v38 = vpop.f32.mrf.mxu1  ;;  %18744 = vmatmul.mubr.msk.f32.vlgmr.msra.gmra.mxu1 %vm6092_vm2, %v27081_v40 }
 0x5a7   :  { %v14917_v53 = vpop.f32.mrf.mxu0  ;;  %v25775_v16 = vadd.f32 %v15007_v38, %v14904_v21  ;;  %17137 = vmatmul.mubr.f32.gmra.mxu0 %v27083_v10  ;;  %17429 = vmatpush1.msra.mxu1 %v25674_v37 }
 0x5a8   :  { %v14918_v11 = vadd.f32 %v14917_v53, %v14806_v49  ;;  %17431 = vmatprep.subr.mxu1 %v25679_v59  ;;  %v15009_v15 = vpop.f32.mrf.mxu1  ;;  %17142 = vmatprep.mubr.f32.mxu0 %v26505_v30 }
 0x5a9   :  { %v14919_v23 = vpop.f32.mrf.mxu0  ;;  %v25781_v61 = vadd.f32 %v15009_v15, %v14906_v47  ;;  %17433 = vmatpush1.msra.mxu1 %v25684_v6  ;;  %17256 = vmatprep.mubr.f32.mxu1 %v26505_v30 }
 0x5aa   :  { %v14920_v51 = vadd.f32 %v14919_v23, %v14808_v57  ;;  %17653 = vmatprep.subr.mxu1 %v25624_v45  ;;  %v15014_v4 = vpop.f32.mrf.mxu1  ;;  %18745 = vmatmul.mubr.msk.f32.gmra.mxu1 %vm6092_vm2, %v27084_v55 }
 0x5ab   :  { %v25788_v49 = vadd.f32 %v15014_v4, %v14911_v27  ;;  %v15101_v21 = vpop.f32.mrf.mxu0  ;;  %17148 = vmatmul.mubr.f32.gmra.mxu0 %v27086_v9  ;;  %17263 = vmatprep.mubr.f32.mxu1 %v26505_v30 }
 0x5ac   :  { %v15102_v56 = vadd.f32 %v15101_v21, %v25399_v32  ;;  %v15016_v54 = vpop.f32.mrf.mxu1  ;;  %17153 = vmatprep.mubr.f32.mxu0 %v26505_v30  ;;  %v27112_v21 = vand.u32 4294901760, %v25700_v12 }
 0x5ad   :  { %v25794_v47 = vadd.f32 %v15016_v54, %v14913_v20  ;;  %v15103_v57 = vpop.f32.mrf.mxu0 }
 0x5ae   :  { %v15104_v45 = vadd.f32 %v15103_v57, %v25407_v31  ;;  %v15021_v36 = vpop.f32.mrf.mxu1  ;;  %18746 = vmatmul.mubr.msk.f32.gmra.mxu1 %vm6092_vm2, %v27088_v43 }
 0x5af   :  { %27107 = vst [vmem:[#allocation106_spill] sm:$0xff] %v25794_v47  ;;  %v25799_v34 = vadd.f32 %v15021_v36, %v14918_v11  ;;  %v15112_v1 = vpop.f32.mrf.mxu0  ;;  %17159 = vmatmul.mubr.f32.gmra.mxu0 %v27090_v2  ;;  %17270 = vmatprep.mubr.f32.mxu1 %v26505_v30  ;;  %v27110_v11 = vand.u32 4294901760, %v25691_v50 }
 0x5b0   :  { %v15113_v32 = vadd.f32 %v15112_v1, %v25412_v60  ;;  %v15023_v27 = vpop.f32.mrf.mxu1  ;;  %17357 = vmatprep.mubr.f32.mxu0 %v26505_v30 }
 0x5b1   :  { %27108 = vst [vmem:[#allocation86_spill] sm:$0xff] %v25799_v34  ;;  %v25805_v14 = vadd.f32 %v15023_v27, %v14920_v51  ;;  %v15114_v42 = vpop.f32.mrf.mxu0  ;;  %v27113_v27 = vld [vmem:[#allocation53_spill] sm:$0xff] }
 0x5b2   :  { %v15115_v31 = vadd.f32 %v15114_v42, %v25420_v46  ;;  %v15237_v20 = vpop.f32.mrf.mxu1  ;;  %18747 = vmatmul.mubr.msk.f32.gmra.mxu1 %vm6092_vm2, %v27091_v52  ;;  %v27111_v46 = vand.u32 4294901760, %v25695_v39  ;;  %v25836_v42 = vand.u32 4294901760, %v27113_v27 }
 0x5b3   :  { %27109 = vst [vmem:[#allocation90_spill] sm:$0xff] %v25805_v14  ;;  %v15123_v38 = vpop.f32.mrf.mxu0  ;;  %v15238_v53 = vadd.f32 %v15237_v20, %v15102_v56  ;;  %17360 = vmatmul.mubr.f32.vlgmr.msra.gmra.mxu0 %v27092_v58  ;;  %17277 = vmatprep.mubr.f32.mxu1 %v26505_v30 }
 0x5b4   :  { %v15124_v60 = vadd.f32 %v15123_v38, %v25424_v33  ;;  %17547 = vmatpush1.msra.mxu0 %v27110_v11  ;;  %v15239_v15 = vpop.f32.mrf.mxu1  ;;  %17365 = vmatprep.mubr.f32.mxu0 %v26505_v30 }
 0x5b5   :  { %17551 = vmatprep.subr.mxu0 %v27111_v46  ;;  %v15125_v23 = vpop.f32.mrf.mxu0  ;;  %v15240_v51 = vadd.f32 %v15239_v15, %v15104_v45 }
 0x5b6   :  { %v15126_v4 = vadd.f32 %v15125_v23, %v25431_v22  ;;  %17555 = vmatpush1.msra.mxu0 %v27112_v21  ;;  %v15244_v56 = vpop.f32.mrf.mxu1  ;;  %18748 = vmatmul.mubr.msk.f32.gmra.mxu1 %vm6092_vm2, %v27093_v5 }
 0x5b7   :  { %v15134_v33 = vpop.f32.mrf.mxu0  ;;  %v15245_v50 = vadd.f32 %v15244_v56, %v15113_v32  ;;  %17368 = vmatmul.mubr.f32.gmra.mxu0 %v27094_v7  ;;  %17466 = vmatprep.mubr.f32.mxu1 %v26505_v30 }
 0x5b8   :  { %v15135_v39 = vadd.f32 %v15134_v33, %v25439_v18  ;;  %v15246_v54 = vpop.f32.mrf.mxu1  ;;  %17373 = vmatprep.mubr.f32.mxu0 %v26505_v30  ;;  %19789 = vmatprep.subr.mxu0 %v26505_v30 }
 0x5b9   :  { %v15136_v22 = vpop.f32.mrf.mxu0  ;;  %v15247_v12 = vadd.f32 %v15246_v54, %v15115_v31 }
 0x5ba   :  { %v15137_v57 = vadd.f32 %v15136_v22, %v25449_v63  ;;  %v15251_v45 = vpop.f32.mrf.mxu1  ;;  %17470 = vmatmul.mubr.f32.vlgmr.msra.gmra.mxu1 %v27095_v35 }
 0x5bb   :  { %v15145_v36 = vpop.f32.mrf.mxu0  ;;  %v15252_v1 = vadd.f32 %v15251_v45, %v15124_v60  ;;  %17376 = vmatmul.mubr.f32.gmra.mxu0 %v27096_v29  ;;  %17655 = vmatpush1.msra.mxu1 %v25674_v37 }
 0x5bc   :  { %v15146_v18 = vadd.f32 %v15145_v36, %v25453_v28  ;;  %17657 = vmatprep.subr.mxu1 %v25679_v59  ;;  %v15253_v32 = vpop.f32.mrf.mxu1  ;;  %17381 = vmatprep.mubr.f32.mxu0 %v26505_v30  ;;  %v27114_v28 = vld [vmem:[#allocation139_spill] sm:$0xff] }
 0x5bd   :  { %v15147_v63 = vpop.f32.mrf.mxu0  ;;  %v15254_v31 = vadd.f32 %v15253_v32, %v15126_v4  ;;  %17659 = vmatpush1.msra.mxu1 %v25684_v6  ;;  %17475 = vmatprep.mubr.f32.mxu1 %v26505_v30  ;;  %v25844_v37 = vand.u32 4294901760, %v27114_v28 }
 0x5be   :  { %v15148_v20 = vadd.f32 %v15147_v63, %v25464_v48  ;;  %v15258_v38 = vpop.f32.mrf.mxu1  ;;  %17479 = vmatmul.mubr.f32.gmra.mxu1 %v27099_v24  ;;  %19808 = vmatprep.subr.mxu1 %v26505_v30  ;;  %v25851_v48 = vsub.f32 %v27113_v27, %v25836_v42 }
 0x5bf   :  { %v15259_v59 = vadd.f32 %v15258_v38, %v15135_v39  ;;  %v15346_v60 = vpop.f32.mrf.mxu0  ;;  %17384 = vmatmul.mubr.f32.gmra.mxu0 %v27101_v26  ;;  %17484 = vmatprep.mubr.f32.mxu1 %v26505_v30  ;;  %v25856_v21 = vsub.f32 %v27114_v28, %v25844_v37 }
 0x5c0   :  { %v15347_v11 = vadd.f32 %v15346_v60, %v15238_v53  ;;  %v15260_v6 = vpop.f32.mrf.mxu1  ;;  %17389 = vmatprep.mubr.f32.mxu0 %v26505_v30  ;;  %v17876_v54 = vand.u32 4294901760, %v25851_v48 }
 0x5c1   :  { %v15261_v15 = vadd.f32 %v15260_v6, %v15137_v57  ;;  %v15348_v46 = vpop.f32.mrf.mxu0  ;;  %v17883_v36 = vand.u32 4294901760, %v25856_v21 }
 0x5c2   :  { %v15349_v23 = vadd.f32 %v15348_v46, %v15240_v51  ;;  %v15265_v4 = vpop.f32.mrf.mxu1  ;;  %17488 = vmatmul.mubr.f32.gmra.mxu1 %v27102_v8 }
 0x5c3   :  { %v15266_v56 = vadd.f32 %v15265_v4, %v15146_v18  ;;  %v15354_v33 = vpop.f32.mrf.mxu0  ;;  %17392 = vmatmul.mubr.f32.gmra.mxu0 %v27103_v3  ;;  %17493 = vmatprep.mubr.f32.mxu1 %v26505_v30 }
 0x5c4   :  { %v15355_v53 = vadd.f32 %v15354_v33, %v15245_v50  ;;  %v15267_v39 = vpop.f32.mrf.mxu1  ;;  %17588 = vmatprep.mubr.f32.mxu0 %v26505_v30 }
 0x5c5   :  { %v15268_v51 = vadd.f32 %v15267_v39, %v15148_v20  ;;  %v15356_v22 = vpop.f32.mrf.mxu0 }
 0x5c6   :  { %v15357_v57 = vadd.f32 %v15356_v22, %v15247_v12  ;;  %v15456_v45 = vpop.f32.mrf.mxu1  ;;  %17497 = vmatmul.mubr.f32.gmra.mxu1 %v27104_v13  ;;  %v17877_v12 = vsub.f32 %v25851_v48, %v17876_v54 }
 0x5c7   :  { %v15362_v18 = vpop.f32.mrf.mxu0  ;;  %v15457_v32 = vadd.f32 %v15456_v45, %v15347_v11  ;;  %18749 = vmatmul.mubr.msk.f32.vlgmr.msra.gmra.mxu0 %vm6092_vm2, %v27081_v40  ;;  %17502 = vmatprep.mubr.f32.mxu1 %v26505_v30  ;;  %v17884_v11 = vsub.f32 %v25856_v21, %v17883_v36 }
 0x5c8   :  { %v15363_v50 = vadd.f32 %v15362_v18, %v15252_v1  ;;  %19790 = vmatpush3.msra.mxu0 %v25836_v42  ;;  %v15458_v27 = vpop.f32.mrf.mxu1  ;;  %17595 = vmatprep.mubr.f32.mxu0 %v26505_v30  ;;  %v17878_v4 = vand.u32 4294901760, %v17877_v12 }
 0x5c9   :  { %19791 = vmatprep.subr.mxu0 %v26505_v30  ;;  %v15364_v63 = vpop.f32.mrf.mxu0  ;;  %v15459_v20 = vadd.f32 %v15458_v27, %v15349_v23 }
 0x5ca   :  { %v15365_v38 = vadd.f32 %v15364_v63, %v15254_v31  ;;  %19792 = vmatpush3.msra.mxu0 %v25844_v37  ;;  %v15465_v28 = vpop.f32.mrf.mxu1  ;;  %17506 = vmatmul.mubr.f32.gmra.mxu1 %v27105_v17 }
 0x5cb   :  { %v15370_v1 = vpop.f32.mrf.mxu0  ;;  %v15466_v60 = vadd.f32 %v15465_v28, %v15355_v53  ;;  %18750 = vmatmul.mubr.msk.f32.gmra.mxu0 %vm6092_vm2, %v27084_v55  ;;  %17692 = vmatprep.mubr.f32.mxu1 %v26505_v30 }
 0x5cc   :  { %v15371_v6 = vadd.f32 %v15370_v1, %v15259_v59  ;;  %v15467_v46 = vpop.f32.mrf.mxu1  ;;  %17602 = vmatprep.mubr.f32.mxu0 %v26505_v30  ;;  %19827 = vmatprep.subr.mxu0 %v26505_v30  ;;  %v17885_v59 = vand.u32 4294901760, %v17884_v11 }
 0x5cd   :  { %v15372_v31 = vpop.f32.mrf.mxu0  ;;  %v15468_v23 = vadd.f32 %v15467_v46, %v15357_v57 }
 0x5ce   :  { %v15373_v33 = vadd.f32 %v15372_v31, %v15261_v15  ;;  %v15474_v53 = vpop.f32.mrf.mxu1  ;;  %18754 = vmatmul.mubr.msk.f32.vlgmr.msra.gmra.mxu1 %vm6092_vm2, %v27081_v40 }
 0x5cf   :  { %v15378_v39 = vpop.f32.mrf.mxu0  ;;  %v15475_v22 = vadd.f32 %v15474_v53, %v15363_v50  ;;  %18751 = vmatmul.mubr.msk.f32.gmra.mxu0 %vm6092_vm2, %v27088_v43  ;;  %19809 = vmatpush3.msra.mxu1 %v17878_v4 }
 0x5d0   :  { %v15379_v45 = vadd.f32 %v15378_v39, %v15266_v56  ;;  %19810 = vmatprep.subr.mxu1 %v26505_v30  ;;  %v15476_v18 = vpop.f32.mrf.mxu1  ;;  %17609 = vmatprep.mubr.f32.mxu0 %v26505_v30 }
 0x5d1   :  { %v15380_v57 = vpop.f32.mrf.mxu0  ;;  %v15477_v27 = vadd.f32 %v15476_v18, %v15365_v38  ;;  %19811 = vmatpush3.msra.mxu1 %v17885_v59  ;;  %17699 = vmatprep.mubr.f32.mxu1 %v26505_v30 }
 0x5d2   :  { %v15381_v15 = vadd.f32 %v15380_v57, %v15268_v51  ;;  %v15483_v12 = vpop.f32.mrf.mxu1  ;;  %18755 = vmatmul.mubr.msk.f32.gmra.mxu1 %vm6092_vm2, %v27084_v55  ;;  %19846 = vmatprep.subr.mxu1 %v26505_v30 }
 0x5d3   :  { %v15484_v50 = vadd.f32 %v15483_v12, %v15371_v6  ;;  %v15576_v63 = vpop.f32.mrf.mxu0  ;;  %18752 = vmatmul.mubr.msk.f32.gmra.mxu0 %vm6092_vm2, %v27091_v52  ;;  %17706 = vmatprep.mubr.f32.mxu1 %v26505_v30 }
 0x5d4   :  { %v15577_v56 = vadd.f32 %v15576_v63, %v15457_v32  ;;  %v15485_v28 = vpop.f32.mrf.mxu1  ;;  %17616 = vmatprep.mubr.f32.mxu0 %v26505_v30 }
 0x5d5   :  { %v15486_v38 = vadd.f32 %v15485_v28, %v15373_v33  ;;  %v15578_v1 = vpop.f32.mrf.mxu0 }
 0x5d6   :  { %v15579_v51 = vadd.f32 %v15578_v1, %v15459_v20  ;;  %v15492_v11 = vpop.f32.mrf.mxu1  ;;  %18756 = vmatmul.mubr.msk.f32.gmra.mxu1 %vm6092_vm2, %v27088_v43 }
 0x5d7   :  { %v15493_v46 = vadd.f32 %v15492_v11, %v15379_v45  ;;  %v15583_v31 = vpop.f32.mrf.mxu0  ;;  %18753 = vmatmul.mubr.msk.f32.gmra.mxu0 %vm6092_vm2, %v27093_v5  ;;  %17713 = vmatprep.mubr.f32.mxu1 %v26505_v30 }
 0x5d8   :  { %v15584_v6 = vadd.f32 %v15583_v31, %v15466_v60  ;;  %v15494_v4 = vpop.f32.mrf.mxu1  ;;  %19793 = vmatprep.mubr.msk.f32.mxu0 %vm19907_vm7, %v26505_v30 }
 0x5d9   :  { %v15495_v32 = vadd.f32 %v15494_v4, %v15381_v15  ;;  %v15585_v33 = vpop.f32.mrf.mxu0 }
 0x5da   :  { %v15586_v53 = vadd.f32 %v15585_v33, %v15468_v23  ;;  %v15680_v20 = vpop.f32.mrf.mxu1  ;;  %18757 = vmatmul.mubr.msk.f32.gmra.mxu1 %vm6092_vm2, %v27091_v52  ;;  %v27122_v33 = vld [vmem:[#allocation118_spill] sm:$0xff] }
 0x5db   :  { %v15590_v39 = vpop.f32.mrf.mxu0  ;;  %v25906_v59 = vadd.f32 %v15680_v20, %v15577_v56  ;;  %19794 = vmatmul.mubr.f32.vlgmr.msra.gmra.mxu0 %v27078_v41  ;;  %17720 = vmatprep.mubr.f32.mxu1 %v26505_v30 }
 0x5dc   :  { %v15591_v45 = vadd.f32 %v15590_v39, %v15475_v22  ;;  %19828 = vmatpush3.msra.mxu0 %v25851_v48  ;;  %v15682_v60 = vpop.f32.mrf.mxu1  ;;  %19796 = vmatprep.mubr.msk.f32.mxu0 %vm19907_vm7, %v26505_v30  ;;  %v27128_v48 = vld [vmem:[#allocation124_spill] sm:$0xff] }
 0x5dd   :  { %27115 = vst [vmem:[#allocation111_spill] sm:$0xff] %v25906_v59  ;;  %19829 = vmatprep.subr.mxu0 %v26505_v30  ;;  %v15592_v23 = vpop.f32.mrf.mxu0  ;;  %v25914_v18 = vadd.f32 %v15682_v60, %v15579_v51 }
 0x5de   :  { %v15593_v57 = vadd.f32 %v15592_v23, %v15477_v27  ;;  %19830 = vmatpush3.msra.mxu0 %v25856_v21  ;;  %v15687_v15 = vpop.f32.mrf.mxu1  ;;  %18758 = vmatmul.mubr.msk.f32.gmra.mxu1 %vm6092_vm2, %v27093_v5 }
 0x5df   :  { %27116 = vst [vmem:[#allocation83_spill] sm:$0xff] %v25914_v18  ;;  %v15597_v41 = vpop.f32.mrf.mxu0  ;;  %v25919_v22 = vadd.f32 %v15687_v15, %v15584_v6  ;;  %19797 = vmatmul.mubr.f32.gmra.mxu0 %v27080_v44  ;;  %19812 = vmatprep.mubr.msk.f32.mxu1 %vm19907_vm7, %v26505_v30 }
 0x5e0   :  { %v15598_v12 = vadd.f32 %v15597_v41, %v15484_v50  ;;  %v15689_v63 = vpop.f32.mrf.mxu1  ;;  %19799 = vmatprep.mubr.msk.f32.mxu0 %vm19907_vm7, %v26505_v30  ;;  %19865 = vmatprep.subr.mxu0 %v26505_v30 }
 0x5e1   :  { %27117 = vst [vmem:[#allocation87_spill] sm:$0xff] %v25919_v22  ;;  %v15599_v27 = vpop.f32.mrf.mxu0  ;;  %v25927_v56 = vadd.f32 %v15689_v63, %v15586_v53 }
 0x5e2   :  { %v15600_v28 = vadd.f32 %v15599_v27, %v15486_v38  ;;  %v15694_v1 = vpop.f32.mrf.mxu1  ;;  %19813 = vmatmul.mubr.msk.f32.vlgmr.msra.gmra.mxu1 %vm6092_vm2, %v27081_v40 }
 0x5e3   :  { %27118 = vst [vmem:[#allocation94_spill] sm:$0xff] %v25927_v56  ;;  %v15604_v51 = vpop.f32.mrf.mxu0  ;;  %v25931_v44 = vadd.f32 %v15694_v1, %v15591_v45  ;;  %19800 = vmatmul.mubr.f32.gmra.mxu0 %v27083_v10  ;;  %19847 = vmatpush3.msra.mxu1 %v25836_v42 }
 0x5e4   :  { %v15605_v50 = vadd.f32 %v15604_v51, %v15493_v46  ;;  %19848 = vmatprep.subr.mxu1 %v26505_v30  ;;  %v15696_v11 = vpop.f32.mrf.mxu1  ;;  %19802 = vmatprep.mubr.msk.f32.mxu0 %vm19907_vm7, %v26505_v30 }
 0x5e5   :  { %27119 = vst [vmem:[#allocation91_spill] sm:$0xff] %v25931_v44  ;;  %v15606_v31 = vpop.f32.mrf.mxu0  ;;  %v25938_v38 = vadd.f32 %v15696_v11, %v15593_v57  ;;  %19849 = vmatpush3.msra.mxu1 %v25844_v37  ;;  %19815 = vmatprep.mubr.msk.f32.mxu1 %vm19907_vm7, %v26505_v30 }
 0x5e6   :  { %v15607_v6 = vadd.f32 %v15606_v31, %v15495_v32  ;;  %v15701_v4 = vpop.f32.mrf.mxu1  ;;  %19816 = vmatmul.mubr.msk.f32.gmra.mxu1 %vm6092_vm2, %v27084_v55  ;;  %19884 = vmatprep.subr.mxu1 %v26505_v30 }
 0x5e7   :  { %27120 = vst [vmem:[#allocation97_spill] sm:$0xff] %v25938_v38  ;;  %v25946_v10 = vadd.f32 %v15701_v4, %v15598_v12  ;;  %v15786_v46 = vpop.f32.mrf.mxu0  ;;  %19803 = vmatmul.mubr.f32.gmra.mxu0 %v27086_v9  ;;  %19818 = vmatprep.mubr.msk.f32.mxu1 %vm19907_vm7, %v26505_v30  ;;  %v27125_v9 = vld [vmem:[#allocation120_spill] sm:$0xff] }
 0x5e8   :  { %v15787_v53 = vadd.f32 %v15786_v46, %v27122_v33  ;;  %v15703_v20 = vpop.f32.mrf.mxu1  ;;  %19805 = vmatprep.mubr.msk.f32.mxu0 %vm19907_vm7, %v26505_v30 }
 0x5e9   :  { %27121 = vst [vmem:[#allocation115_spill] sm:$0xff] %v25946_v10  ;;  %v25954_v32 = vadd.f32 %v15703_v20, %v15600_v28  ;;  %v19681_v39 = vpop.f32.mrf.mxu0 }
 0x5ea   :  { %v15708_v45 = vpop.f32.mrf.mxu1  ;;  %19819 = vmatmul.mubr.msk.f32.gmra.mxu1 %vm6092_vm2, %v27088_v43 }
 0x5eb   :  { %27123 = vst [vmem:[#allocation95_spill] sm:$0xff] %v25954_v32  ;;  %v25958_v60 = vadd.f32 %v15708_v45, %v15605_v50  ;;  %v15796_v23 = vpop.f32.mrf.mxu0  ;;  %19806 = vmatmul.mubr.f32.gmra.mxu0 %v27090_v2  ;;  %19821 = vmatprep.mubr.msk.f32.mxu1 %vm19907_vm7, %v26505_v30  ;;  %v27127_v2 = vld [vmem:[#allocation69_spill] sm:$0xff] }
 0x5ec   :  { %v15797_v57 = vadd.f32 %v15796_v23, %v27125_v9  ;;  %v15710_v15 = vpop.f32.mrf.mxu1  ;;  %19831 = vmatprep.mubr.msk.f32.mxu0 %vm19907_vm7, %v26505_v30 }
 0x5ed   :  { %27124 = vst [vmem:[#allocation99_spill] sm:$0xff] %v25958_v60  ;;  %v25966_v41 = vadd.f32 %v15710_v15, %v15607_v6  ;;  %v19684_v12 = vpop.f32.mrf.mxu0 }
 0x5ee   :  { %v15907_v63 = vpop.f32.mrf.mxu1  ;;  %19822 = vmatmul.mubr.msk.f32.gmra.mxu1 %vm6092_vm2, %v27091_v52 }
 0x5ef   :  { %27126 = vst [vmem:[#allocation98_spill] sm:$0xff] %v25966_v41  ;;  %v15806_v27 = vpop.f32.mrf.mxu0  ;;  %v15908_v28 = vadd.f32 %v15907_v63, %v15787_v53  ;;  %19832 = vmatmul.mubr.f32.vlgmr.msra.gmra.mxu0 %v27092_v58  ;;  %19824 = vmatprep.mubr.msk.f32.mxu1 %vm19907_vm7, %v26505_v30 }
 0x5f0   :  { %v15807_v1 = vadd.f32 %v15806_v27, %v27127_v2  ;;  %19866 = vmatpush3.msra.mxu0 %v17876_v54  ;;  %v19700_v51 = vpop.f32.mrf.mxu1  ;;  %19834 = vmatprep.mubr.msk.f32.mxu0 %vm19907_vm7, %v26505_v30 }
 0x5f1   :  { %19867 = vmatprep.subr.mxu0 %v26505_v30  ;;  %v19687_v50 = vpop.f32.mrf.mxu0 }
 0x5f2   :  { %19868 = vmatpush3.msra.mxu0 %v17883_v36  ;;  %v15913_v11 = vpop.f32.mrf.mxu1  ;;  %19825 = vmatmul.mubr.msk.f32.gmra.mxu1 %vm6092_vm2, %v27093_v5 }
 0x5f3   :  { %v15816_v58 = vpop.f32.mrf.mxu0  ;;  %v15914_v31 = vadd.f32 %v15913_v11, %v15797_v57  ;;  %19835 = vmatmul.mubr.f32.gmra.mxu0 %v27094_v7  ;;  %19850 = vmatprep.mubr.msk.f32.mxu1 %vm19907_vm7, %v26505_v30  ;;  %v27129_v7 = vld [vmem:[#allocation84_spill] sm:$0xff] }
 0x5f4   :  { %v15817_v54 = vadd.f32 %v15816_v58, %v27128_v48  ;;  %v19703_v6 = vpop.f32.mrf.mxu1  ;;  %19837 = vmatprep.mubr.msk.f32.mxu0 %vm19907_vm7, %v26505_v30 }
 0x5f5   :  { %v19690_v4 = vpop.f32.mrf.mxu0 }
 0x5f6   :  { %v15919_v21 = vpop.f32.mrf.mxu1  ;;  %19851 = vmatmul.mubr.f32.vlgmr.msra.gmra.mxu1 %v27095_v35 }
 0x5f7   :  { %v15826_v36 = vpop.f32.mrf.mxu0  ;;  %v15920_v46 = vadd.f32 %v15919_v21, %v15807_v1  ;;  %19838 = vmatmul.mubr.f32.gmra.mxu0 %v27096_v29  ;;  %19885 = vmatpush3.msra.mxu1 %v25836_v42 }
 0x5f8   :  { %v15827_v33 = vadd.f32 %v15826_v36, %v27129_v7  ;;  %19886 = vmatprep.subr.mxu1 %v26505_v30  ;;  %v19706_v53 = vpop.f32.mrf.mxu1  ;;  %19840 = vmatprep.mubr.msk.f32.mxu0 %vm19907_vm7, %v26505_v30 }
 0x5f9   :  { %v19693_v20 = vpop.f32.mrf.mxu0  ;;  %19887 = vmatpush3.msra.mxu1 %v25844_v37  ;;  %19853 = vmatprep.mubr.msk.f32.mxu1 %vm19907_vm7, %v26505_v30 }
 0x5fa   :  { %v15925_v35 = vpop.f32.mrf.mxu1  ;;  %19854 = vmatmul.mubr.f32.gmra.mxu1 %v27099_v24 }
 0x5fb   :  { %v15926_v29 = vadd.f32 %v15925_v35, %v15817_v54  ;;  %v16007_v39 = vpop.f32.mrf.mxu0  ;;  %19841 = vmatmul.mubr.f32.gmra.mxu0 %v27101_v26  ;;  %19856 = vmatprep.mubr.msk.f32.mxu1 %vm19907_vm7, %v26505_v30 }
 0x5fc   :  { %v16008_v42 = vadd.f32 %v16007_v39, %v15908_v28  ;;  %v19709_v45 = vpop.f32.mrf.mxu1  ;;  %19843 = vmatprep.mubr.msk.f32.mxu0 %vm19907_vm7, %v26505_v30 }
 0x5fd   :  { %v19719_v23 = vpop.f32.mrf.mxu0 }
 0x5fe   :  { %v15931_v37 = vpop.f32.mrf.mxu1  ;;  %19857 = vmatmul.mubr.f32.gmra.mxu1 %v27102_v8 }
 0x5ff   :  { %v15932_v9 = vadd.f32 %v15931_v37, %v15827_v33  ;;  %v16014_v57 = vpop.f32.mrf.mxu0  ;;  %19844 = vmatmul.mubr.f32.gmra.mxu0 %v27103_v3  ;;  %19859 = vmatprep.mubr.msk.f32.mxu1 %vm19907_vm7, %v26505_v30 }
 0x600   :  { %v16015_v24 = vadd.f32 %v16014_v57, %v15914_v31  ;;  %v19712_v26 = vpop.f32.mrf.mxu1  ;;  %19869 = vmatprep.mubr.msk.f32.mxu0 %vm19907_vm7, %v26505_v30 }
 0x601   :  { %v19722_v15 = vpop.f32.mrf.mxu0 }
 0x602   :  { %v16110_v12 = vpop.f32.mrf.mxu1  ;;  %19860 = vmatmul.mubr.f32.gmra.mxu1 %v27104_v13 }
 0x603   :  { %v16021_v63 = vpop.f32.mrf.mxu0  ;;  %v16111_v27 = vadd.f32 %v16110_v12, %v16008_v42  ;;  %19870 = vmatmul.mubr.msk.f32.vlgmr.msra.gmra.mxu0 %vm6092_vm2, %v27081_v40  ;;  %19862 = vmatprep.mubr.msk.f32.mxu1 %vm19907_vm7, %v26505_v30 }
 0x604   :  { %v16022_v3 = vadd.f32 %v16021_v63, %v15920_v46  ;;  %v19738_v8 = vpop.f32.mrf.mxu1  ;;  %19872 = vmatprep.mubr.msk.f32.mxu0 %vm19907_vm7, %v26505_v30 }
 0x605   :  { %v19725_v28 = vpop.f32.mrf.mxu0 }
 0x606   :  { %v16118_v2 = vpop.f32.mrf.mxu1  ;;  %19863 = vmatmul.mubr.f32.gmra.mxu1 %v27105_v17 }
 0x607   :  { %v16028_v1 = vpop.f32.mrf.mxu0  ;;  %v16119_v51 = vadd.f32 %v16118_v2, %v16015_v24  ;;  %19873 = vmatmul.mubr.msk.f32.gmra.mxu0 %vm6092_vm2, %v27084_v55  ;;  %19888 = vmatprep.mubr.msk.f32.mxu1 %vm19907_vm7, %v26505_v30 }
 0x608   :  { %v16029_v13 = vadd.f32 %v16028_v1, %v15926_v29  ;;  %v19741_v50 = vpop.f32.mrf.mxu1  ;;  %19875 = vmatprep.mubr.msk.f32.mxu0 %vm19907_vm7, %v26505_v30 }
 0x609   :  { %v19728_v11 = vpop.f32.mrf.mxu0 }
 0x60a   :  { %v16126_v58 = vpop.f32.mrf.mxu1  ;;  %19889 = vmatmul.mubr.msk.f32.vlgmr.msra.gmra.mxu1 %vm6092_vm2, %v27081_v40 }
 0x60b   :  { %v16035_v31 = vpop.f32.mrf.mxu0  ;;  %v16127_v17 = vadd.f32 %v16126_v58, %v16022_v3  ;;  %19876 = vmatmul.mubr.msk.f32.gmra.mxu0 %vm6092_vm2, %v27088_v43  ;;  %19891 = vmatprep.mubr.msk.f32.mxu1 %vm19907_vm7, %v26505_v30 }
 0x60c   :  { %v16036_v48 = vadd.f32 %v16035_v31, %v15932_v9  ;;  %v19744_v54 = vpop.f32.mrf.mxu1  ;;  %19878 = vmatprep.mubr.msk.f32.mxu0 %vm19907_vm7, %v26505_v30 }
 0x60d   :  { %v19731_v6 = vpop.f32.mrf.mxu0 }
 0x60e   :  { %v16134_v4 = vpop.f32.mrf.mxu1  ;;  %19892 = vmatmul.mubr.msk.f32.gmra.mxu1 %vm6092_vm2, %v27084_v55 }
 0x60f   :  { %v16135_v21 = vadd.f32 %v16134_v4, %v16029_v13  ;;  %v16219_v40 = vpop.f32.mrf.mxu0  ;;  %19879 = vmatmul.mubr.msk.f32.gmra.mxu0 %vm6092_vm2, %v27091_v52  ;;  %19894 = vmatprep.mubr.msk.f32.mxu1 %vm19907_vm7, %v26505_v30 }
 0x610   :  { %v16220_v36 = vadd.f32 %v16219_v40, %v16111_v27  ;;  %v19747_v46 = vpop.f32.mrf.mxu1  ;;  %19881 = vmatprep.mubr.msk.f32.mxu0 %vm19907_vm7, %v26505_v30 }
 0x611   :  { %v19757_v7 = vpop.f32.mrf.mxu0 }
 0x612   :  { %v16142_v33 = vpop.f32.mrf.mxu1  ;;  %19895 = vmatmul.mubr.msk.f32.gmra.mxu1 %vm6092_vm2, %v27088_v43 }
 0x613   :  { %v16143_v53 = vadd.f32 %v16142_v33, %v16036_v48  ;;  %v16225_v55 = vpop.f32.mrf.mxu0  ;;  %19882 = vmatmul.mubr.msk.f32.gmra.mxu0 %vm6092_vm2, %v27093_v5  ;;  %19897 = vmatprep.mubr.msk.f32.mxu1 %vm19907_vm7, %v26505_v30 }
 0x614   :  { %v16226_v20 = vadd.f32 %v16225_v55, %v16119_v51  ;;  %v19750_v35 = vpop.f32.mrf.mxu1 }
 0x615   :  { %v19760_v29 = vpop.f32.mrf.mxu0 }
 0x616   :  { %v16316_v39 = vpop.f32.mrf.mxu1  ;;  %19898 = vmatmul.mubr.msk.f32.gmra.mxu1 %vm6092_vm2, %v27091_v52 }
 0x617   :  { %v16231_v42 = vpop.f32.mrf.mxu0  ;;  %v26049_v45 = vadd.f32 %v16316_v39, %v16220_v36  ;;  %19900 = vmatprep.mubr.msk.f32.mxu1 %vm19907_vm7, %v26505_v30 }
 0x618   :  { %v16232_v43 = vadd.f32 %v16231_v42, %v16127_v17  ;;  %v19776_v23 = vpop.f32.mrf.mxu1 }
 0x619   :  { %27130 = vst [vmem:[#allocation57_spill] sm:$0xff] %v26049_v45  ;;  %v19763_v37 = vpop.f32.mrf.mxu0 }
 0x61a   :  { %v16322_v9 = vpop.f32.mrf.mxu1  ;;  %19901 = vmatmul.mubr.msk.f32.gmra.mxu1 %vm6092_vm2, %v27093_v5 }
 0x61b   :  { %v16237_v57 = vpop.f32.mrf.mxu0  ;;  %v26055_v24 = vadd.f32 %v16322_v9, %v16226_v20 }
 0x61c   :  { %v16238_v26 = vadd.f32 %v16237_v57, %v16135_v21  ;;  %v19779_v15 = vpop.f32.mrf.mxu1 }
 0x61d   :  { %27131 = vst [vmem:[#allocation102_spill] sm:$0xff] %v26055_v24  ;;  %v19766_v12 = vpop.f32.mrf.mxu0 }
 0x61e   :  { %v16328_v52 = vpop.f32.mrf.mxu1 }
 0x61f   :  { %v16243_v63 = vpop.f32.mrf.mxu0  ;;  %v26057_v27 = vadd.f32 %v16328_v52, %v16232_v43 }
 0x620   :  { %v16244_v3 = vadd.f32 %v16243_v63, %v16143_v53  ;;  %v19782_v8 = vpop.f32.mrf.mxu1 }
 0x621   :  { %27132 = vst [vmem:[#allocation89_spill] sm:$0xff] %v26057_v27  ;;  %v19769_v30 = vpop.f32.mrf.mxu0 }
 0x622   :  { %v16334_v28 = vpop.f32.mrf.mxu1 }
 0x623   :  { %v26059_v2 = vadd.f32 %v16334_v28, %v16238_v26  ;;  %v16429_v1 = vpop.f32.mrf.mxu0 }
 0x624   :  { %v19785_v51 = vpop.f32.mrf.mxu1 }
 0x625   :  { %27133 = vst [vmem:[#allocation67_spill] sm:$0xff] %v26059_v2  ;;  %v16431_v13 = vpop.f32.mrf.mxu0 }
 0x626   :  { %v16340_v5 = vpop.f32.mrf.mxu1 }
 0x627   :  { %v26061_v50 = vadd.f32 %v16340_v5, %v16244_v3  ;;  %v16440_v11 = vpop.f32.mrf.mxu0 }
 0x628   :  { %v19788_v58 = vpop.f32.mrf.mxu1 }
 0x629   :  { %27134 = vst [vmem:[#allocation73_spill] sm:$0xff] %v26061_v50  ;;  %v16442_v31 = vpop.f32.mrf.mxu0 }
 0x62a   :  { %v16565_v17 = vpop.f32.mrf.mxu1 }
 0x62b   :  { %v16451_v48 = vpop.f32.mrf.mxu0  ;;  %v16566_v5 = vadd.f32 %v16565_v17, %v16429_v1 }
 0x62c   :  { %v16567_v54 = vpop.f32.mrf.mxu1 }
 0x62d   :  { %v16453_v6 = vpop.f32.mrf.mxu0  ;;  %v16568_v2 = vadd.f32 %v16567_v54, %v16431_v13 }
 0x62e   :  { %v16572_v4 = vpop.f32.mrf.mxu1 }
 0x62f   :  { %v16462_v21 = vpop.f32.mrf.mxu0  ;;  %v16573_v41 = vadd.f32 %v16572_v4, %v16440_v11 }
 0x630   :  { %v16574_v40 = vpop.f32.mrf.mxu1 }
 0x631   :  { %v16464_v36 = vpop.f32.mrf.mxu0  ;;  %v16575_v44 = vadd.f32 %v16574_v40, %v16442_v31 }
 0x632   :  { %v16579_v46 = vpop.f32.mrf.mxu1 }
 0x633   :  { %v26063_v7 = vpop.f32.mrf.mxu0 }
 0x634   :  { %v16581_v33 = vpop.f32.mrf.mxu1 }
 0x635   :  { %v26065_v53 = vpop.f32.mrf.mxu0 }
 0x636   :  { %v16586_v55 = vpop.f32.mrf.mxu1 }
 0x637   :  { %v16674_v20 = vpop.f32.mrf.mxu0  ;;  %v16587_v31 = vadd.f32 %v16586_v55, %v16462_v21 }
 0x638   :  { %v16588_v35 = vpop.f32.mrf.mxu1  ;;  %v16675_v27 = vadd.f32 %v16674_v20, %v16566_v5  ;;  %v16580_v20 = vadd.f32 %v16579_v46, %v16451_v48  ;;  %v16582_v5 = vadd.f32 %v16581_v33, %v16453_v6 }
 0x639   :  { %v16676_v29 = vpop.f32.mrf.mxu0 }
 0x63a   :  { %v16593_v39 = vpop.f32.mrf.mxu1  ;;  %v16677_v60 = vadd.f32 %v16676_v29, %v16568_v2 }
 0x63b   :  { %v16682_v42 = vpop.f32.mrf.mxu0 }
 0x63c   :  { %v26067_v43 = vpop.f32.mrf.mxu1  ;;  %v16683_v56 = vadd.f32 %v16682_v42, %v16573_v41  ;;  %v16589_v41 = vadd.f32 %v16588_v35, %v16464_v36 }
 0x63d   :  { %v16684_v23 = vpop.f32.mrf.mxu0 }
 0x63e   :  { %v16784_v37 = vpop.f32.mrf.mxu1  ;;  %v16685_v1 = vadd.f32 %v16684_v23, %v16575_v44  ;;  %v27135_v44 = vld [vmem:[#allocation156_spill] sm:$0xff] }
 0x63f   :  { %v16690_v9 = vpop.f32.mrf.mxu0  ;;  %v16785_v32 = vadd.f32 %v16784_v37, %v16675_v27 }
 0x640   :  { %v16786_v57 = vpop.f32.mrf.mxu1 }
 0x641   :  { %v16692_v26 = vpop.f32.mrf.mxu0  ;;  %v16787_v22 = vadd.f32 %v16786_v57, %v16677_v60  ;;  %v16691_v60 = vadd.f32 %v16690_v9, %v16580_v20 }
 0x642   :  { %v16793_v15 = vpop.f32.mrf.mxu1 }
 0x643   :  { %v16698_v12 = vpop.f32.mrf.mxu0  ;;  %v16794_v17 = vadd.f32 %v16793_v15, %v16683_v56 }
 0x644   :  { %v16795_v52 = vpop.f32.mrf.mxu1  ;;  %v16699_v48 = vadd.f32 %v16698_v12, %v16587_v31 }
 0x645   :  { %v16700_v63 = vpop.f32.mrf.mxu0  ;;  %v16796_v11 = vadd.f32 %v16795_v52, %v16685_v1 }
 0x646   :  { %v16802_v3 = vpop.f32.mrf.mxu1 }
 0x647   :  { %v26069_v8 = vpop.f32.mrf.mxu0 }
 0x648   :  { %v16804_v30 = vpop.f32.mrf.mxu1 }
 0x649   :  { %v26071_v28 = vpop.f32.mrf.mxu0 }
 0x64a   :  { %v16811_v51 = vpop.f32.mrf.mxu1 }
 0x64b   :  { %v16904_v58 = vpop.f32.mrf.mxu0  ;;  %v16812_v55 = vadd.f32 %v16811_v51, %v16699_v48 }
 0x64c   :  { %v16813_v50 = vpop.f32.mrf.mxu1  ;;  %v16905_v18 = vadd.f32 %v16904_v58, %v16785_v32  ;;  %v16693_v32 = vadd.f32 %v16692_v26, %v16582_v5 }
 0x64d   :  { %v16906_v24 = vpop.f32.mrf.mxu0 }
 0x64e   :  { %v26073_v45 = vpop.f32.mrf.mxu1  ;;  %v16907_v34 = vadd.f32 %v16906_v24, %v16787_v22  ;;  %v16594_v24 = vadd.f32 %v16593_v39, %v26063_v7  ;;  %v16805_v6 = vadd.f32 %v16804_v30, %v16693_v32 }
 0x64f   :  { %v16911_v10 = vpop.f32.mrf.mxu0 }
 0x650   :  { %v26075_v38 = vpop.f32.mrf.mxu1  ;;  %v16912_v2 = vadd.f32 %v16911_v10, %v16794_v17  ;;  %v16803_v10 = vadd.f32 %v16802_v3, %v16691_v60  ;;  %v16707_v26 = vadd.f32 %v26069_v8, %v16594_v24 }
 0x651   :  { %v16913_v59 = vpop.f32.mrf.mxu0 }
 0x652   :  { %v17008_v14 = vpop.f32.mrf.mxu1  ;;  %v16914_v42 = vadd.f32 %v16913_v59, %v16796_v11  ;;  %v16701_v59 = vadd.f32 %v16700_v63, %v16589_v41  ;;  %v16821_v1 = vadd.f32 %v26073_v45, %v16707_v26 }
 0x653   :  { %v16918_v13 = vpop.f32.mrf.mxu0  ;;  %v17009_v54 = vadd.f32 %v17008_v14, %v16905_v18 }
 0x654   :  { %v17010_v47 = vpop.f32.mrf.mxu1  ;;  %v16919_v35 = vadd.f32 %v16918_v13, %v16803_v10  ;;  %v16814_v15 = vadd.f32 %v16813_v50, %v16701_v59  ;;  %v27138_v10 = vld [vmem:[#allocation86_spill] sm:$0xff] }
 0x655   :  { %v18359_v27 = vadd.f32 %v17009_v54, %v25752_v0  ;;  %v16920_v4 = vpop.f32.mrf.mxu0  ;;  %v17011_v29 = vadd.f32 %v17010_v47, %v16907_v34  ;;  %v27136_v47 = vld [vmem:[#allocation75_spill] sm:$0xff] }
 0x656   :  { %v17015_v40 = vpop.f32.mrf.mxu1  ;;  %v16921_v23 = vadd.f32 %v16920_v4, %v16805_v6 }
 0x657   :  { %v18384_v56 = vadd.f32 %v18359_v27, %v27135_v44  ;;  %v18360_v22 = vadd.f32 %v17011_v29, %v25759_v62  ;;  %v16925_v14 = vpop.f32.mrf.mxu0  ;;  %v17016_v18 = vadd.f32 %v17015_v40, %v16912_v2  ;;  %v27137_v40 = vld [vmem:[#allocation106_spill] sm:$0xff] }
 0x658   :  { %v17017_v0 = vpop.f32.mrf.mxu1  ;;  %v16926_v12 = vadd.f32 %v16925_v14, %v16812_v55  ;;  %v27139_v55 = vld [vmem:[#allocation90_spill] sm:$0xff] }
 0x659   :  { %v18409_v46 = vmax.f32 %v18384_v56, 0.05  ;;  %v18385_v34 = vadd.f32 %v18360_v22, %v27136_v47  ;;  %v18364_v21 = vadd.f32 %v17016_v18, %v25766_v25  ;;  %v16927_v36 = vpop.f32.mrf.mxu0  ;;  %v17018_v33 = vadd.f32 %v17017_v0, %v16914_v42 }
 0x65a   :  { %v17022_v62 = vpop.f32.mrf.mxu1  ;;  %v16928_v8 = vadd.f32 %v16927_v36, %v16814_v15 }
 0x65b   :  { %v18434_v37 = vmin.f32 %v18409_v46, 0.08  ;;  %v18410_v9 = vmax.f32 %v18385_v34, 0.05  ;;  %v18389_v7 = vadd.f32 %v18364_v21, %v27135_v44  ;;  %v18365_v39 = vadd.f32 %v17018_v33, %v25771_v19  ;;  %v16932_v57 = vpop.f32.mrf.mxu0 }
 0x65c   :  { %v17023_v52 = vadd.f32 %v17022_v62, %v16919_v35  ;;  %v17024_v25 = vpop.f32.mrf.mxu1  ;;  %v16596_v19 = vadd.f32 %v26067_v43, %v26065_v53  ;;  %v16933_v53 = vadd.f32 %v16932_v57, %v16821_v1 }
 0x65d   :  { %18774 = vst [vmem:[%s26257_s3 + $0xc8] sm:$0xff] %v18434_v37  ;;  %v18435_v63 = vmin.f32 %v18410_v9, 0.08  ;;  %v18414_v3 = vmax.f32 %v18389_v7, 0.05  ;;  %v18390_v30 = vadd.f32 %v18365_v39, %v27136_v47  ;;  %v16934_v51 = vpop.f32.mrf.mxu0  ;;  %v17025_v58 = vadd.f32 %v17024_v25, %v16921_v23 }
 0x65e   :  { %v18369_v50 = vadd.f32 %v17023_v52, %v25775_v16  ;;  %v17029_v17 = vpop.f32.mrf.mxu1  ;;  %v16709_v2 = vadd.f32 %v26071_v28, %v16596_v19 }
 0x65f   :  { %18775 = vst [vmem:[%s26257_s3 + $0xd0] sm:$0xff] %v18435_v63  ;;  %v18439_v13 = vmin.f32 %v18414_v3, 0.08  ;;  %v18415_v54 = vmax.f32 %v18390_v30, 0.05  ;;  %v18370_v20 = vadd.f32 %v17025_v58, %v25781_v61  ;;  %v17030_v5 = vadd.f32 %v17029_v17, %v16926_v12  ;;  %v26098_v11 = vpop.f32.mrf.mxu0 }
 0x660   :  { %v18394_v45 = vadd.f32 %v18369_v50, %v27135_v44  ;;  %v17031_v43 = vpop.f32.mrf.mxu1  ;;  %v16823_v31 = vadd.f32 %v26075_v38, %v16709_v2 }
 0x661   :  { %18779 = vst [vmem:[%s26257_s3 + $0xf0] sm:$0xff] %v18439_v13  ;;  %v18440_v16 = vmin.f32 %v18415_v54, 0.08  ;;  %v18395_v27 = vadd.f32 %v18370_v20, %v27136_v47  ;;  %v18374_v4 = vadd.f32 %v17030_v5, %v25788_v49  ;;  %v17032_v29 = vadd.f32 %v17031_v43, %v16928_v8  ;;  %v26107_v61 = vpop.f32.mrf.mxu0 }
 0x662   :  { %v18419_v41 = vmax.f32 %v18394_v45, 0.05  ;;  %v17036_v28 = vpop.f32.mrf.mxu1  ;;  %v16935_v14 = vadd.f32 %v16934_v51, %v16823_v31 }
 0x663   :  { %18780 = vst [vmem:[%s26257_s3 + $0xf8] sm:$0xff] %v18440_v16  ;;  %v18420_v60 = vmax.f32 %v18395_v27, 0.05  ;;  %v18399_v32 = vadd.f32 %v18374_v4, %v27135_v44  ;;  %v18375_v42 = vadd.f32 %v17032_v29, %v27137_v40  ;;  %v17037_v56 = vadd.f32 %v17036_v28, %v16933_v53  ;;  %v26115_v22 = vpop.f32.mrf.mxu0 }
 0x664   :  { %v18444_v49 = vmin.f32 %v18419_v41, 0.08  ;;  %v17038_v18 = vpop.f32.mrf.mxu1 }
 0x665   :  { %v18445_v24 = vmin.f32 %v18420_v60, 0.08  ;;  %v18424_v48 = vmax.f32 %v18399_v32, 0.05  ;;  %v18400_v38 = vadd.f32 %v18375_v42, %v27136_v47  ;;  %v18379_v6 = vadd.f32 %v17037_v56, %v27138_v10  ;;  %v26119_v0 = vpop.f32.mrf.mxu0 }
 0x666   :  { %18784 = vst [vmem:[%s26257_s3 + $0x118] sm:$0xff] %v18444_v49  ;;  %v17039_v46 = vadd.f32 %v17038_v18, %v16935_v14  ;;  %v17252_v34 = vpop.f32.mrf.mxu1 }
 0x667   :  { %18785 = vst [vmem:[%s26257_s3 + $0x120] sm:$0xff] %v18445_v24  ;;  %v18449_v21 = vmin.f32 %v18424_v48, 0.08  ;;  %v18425_v36 = vmax.f32 %v18400_v38, 0.05  ;;  %v18404_v33 = vadd.f32 %v18379_v6, %v27135_v44  ;;  %v26128_v59 = vpop.f32.mrf.mxu0  ;;  %v17253_v41 = vadd.f32 %v17252_v34, %v26098_v11 }
 0x668   :  { %v18380_v35 = vadd.f32 %v17039_v46, %v27139_v55  ;;  %v17254_v23 = vpop.f32.mrf.mxu1 }
 0x669   :  { %18789 = vst [vmem:[%s26257_s3 + $0x140] sm:$0xff] %v18449_v21  ;;  %v18450_v62 = vmin.f32 %v18425_v36, 0.08  ;;  %v18429_v37 = vmax.f32 %v18404_v33, 0.05  ;;  %v17140_v9 = vpop.f32.mrf.mxu0  ;;  %v17255_v32 = vadd.f32 %v17254_v23, %v26107_v61 }
 0x66a   :  { %v18405_v7 = vadd.f32 %v18380_v35, %v27136_v47  ;;  %v17259_v39 = vpop.f32.mrf.mxu1 }
 0x66b   :  { %18790 = vst [vmem:[%s26257_s3 + $0x148] sm:$0xff] %v18450_v62  ;;  %v18454_v44 = vmin.f32 %v18429_v37, 0.08  ;;  %v26138_v57 = vpop.f32.mrf.mxu0  ;;  %v17260_v49 = vadd.f32 %v17259_v39, %v26115_v22 }
 0x66c   :  { %v18430_v26 = vmax.f32 %v18405_v7, 0.05  ;;  %v17261_v15 = vpop.f32.mrf.mxu1  ;;  %v27140_v7 = vld [vmem:[#allocation111_spill] sm:$0xff] }
 0x66d   :  { %18794 = vst [vmem:[%s26257_s3 + $0x168] sm:$0x1] %v18454_v44  ;;  %v17151_v12 = vpop.f32.mrf.mxu0  ;;  %v17262_v38 = vadd.f32 %v17261_v15, %v26119_v0 }
 0x66e   :  { %v18455_v52 = vmin.f32 %v18430_v26, 0.08  ;;  %v17266_v25 = vpop.f32.mrf.mxu1 }
 0x66f   :  { %v26143_v63 = vpop.f32.mrf.mxu0  ;;  %v17267_v35 = vadd.f32 %v17266_v25, %v26128_v59 }
 0x670   :  { %18795 = vst [vmem:[%s26257_s3 + $0x170] sm:$0x1] %v18455_v52  ;;  %v17268_v47 = vpop.f32.mrf.mxu1 }
 0x671   :  { %v26148_v3 = vpop.f32.mrf.mxu0  ;;  %v17269_v22 = vadd.f32 %v17268_v47, %v17140_v9 }
 0x672   :  { %v17273_v30 = vpop.f32.mrf.mxu1 }
 0x673   :  { %v17361_v51 = vpop.f32.mrf.mxu0  ;;  %v17274_v26 = vadd.f32 %v17273_v30, %v26138_v57 }
 0x674   :  { %v17275_v58 = vpop.f32.mrf.mxu1  ;;  %v17362_v40 = vadd.f32 %v17361_v51, %v17253_v41 }
 0x675   :  { %v17363_v19 = vpop.f32.mrf.mxu0  ;;  %v17276_v15 = vadd.f32 %v17275_v58, %v17151_v12  ;;  %v27144_v12 = vld [vmem:[#allocation87_spill] sm:$0xff] }
 0x676   :  { %v17280_v1 = vpop.f32.mrf.mxu1  ;;  %v17364_v14 = vadd.f32 %v17363_v19, %v17255_v32 }
 0x677   :  { %v17369_v8 = vpop.f32.mrf.mxu0  ;;  %v17281_v25 = vadd.f32 %v17280_v1, %v26143_v63  ;;  %v27145_v1 = vld [vmem:[#allocation94_spill] sm:$0xff] }
 0x678   :  { %v26150_v50 = vpop.f32.mrf.mxu1  ;;  %v17370_v10 = vadd.f32 %v17369_v8, %v17260_v49 }
 0x679   :  { %v17371_v17 = vpop.f32.mrf.mxu0 }
 0x67a   :  { %v17471_v13 = vpop.f32.mrf.mxu1  ;;  %v17372_v21 = vadd.f32 %v17371_v17, %v17262_v38  ;;  %v27141_v17 = vld [vmem:[#allocation79_spill] sm:$0xff] }
 0x67b   :  { %v17377_v54 = vpop.f32.mrf.mxu0  ;;  %v17472_v18 = vadd.f32 %v17471_v13, %v17362_v40  ;;  %v27143_v40 = vld [vmem:[#allocation15_spill] sm:$0xff] }
 0x67c   :  { %v17473_v20 = vpop.f32.mrf.mxu1  ;;  %v17378_v52 = vadd.f32 %v17377_v54, %v17267_v35 }
 0x67d   :  { %v17379_v5 = vpop.f32.mrf.mxu0  ;;  %v17474_v6 = vadd.f32 %v17473_v20, %v17364_v14  ;;  %v27142_v20 = vld [vmem:[#allocation83_spill] sm:$0xff] }
 0x67e   :  { %v17480_v2 = vpop.f32.mrf.mxu1  ;;  %v17380_v51 = vadd.f32 %v17379_v5, %v17269_v22 }
 0x67f   :  { %v17385_v53 = vpop.f32.mrf.mxu0  ;;  %v17481_v61 = vadd.f32 %v17480_v2, %v17370_v10 }
 0x680   :  { %v17482_v45 = vpop.f32.mrf.mxu1  ;;  %v17386_v47 = vadd.f32 %v17385_v53, %v17274_v26 }
 0x681   :  { %v17387_v43 = vpop.f32.mrf.mxu0  ;;  %v17483_v62 = vadd.f32 %v17482_v45, %v17372_v21 }
 0x682   :  { %v17489_v16 = vpop.f32.mrf.mxu1  ;;  %v17388_v5 = vadd.f32 %v17387_v43, %v17276_v15  ;;  %v27148_v15 = vld [vmem:[#allocation115_spill] sm:$0xff] }
 0x683   :  { %v26152_v27 = vpop.f32.mrf.mxu0  ;;  %v17490_v45 = vadd.f32 %v17489_v16, %v17378_v52 }
 0x684   :  { %v17491_v4 = vpop.f32.mrf.mxu1 }
 0x685   :  { %v26154_v29 = vpop.f32.mrf.mxu0  ;;  %v17492_v41 = vadd.f32 %v17491_v4, %v17380_v51  ;;  %v17394_v4 = vadd.f32 %v26152_v27, %v17281_v25 }
 0x686   :  { %v17498_v31 = vpop.f32.mrf.mxu1 }
 0x687   :  { %v17591_v28 = vpop.f32.mrf.mxu0 }
 0x688   :  { %v17500_v60 = vpop.f32.mrf.mxu1  ;;  %v17592_v11 = vadd.f32 %v17591_v28, %v17472_v18 }
 0x689   :  { %v17593_v42 = vpop.f32.mrf.mxu0  ;;  %v17501_v10 = vadd.f32 %v17500_v60, %v17388_v5  ;;  %v27146_v60 = vld [vmem:[#allocation91_spill] sm:$0xff] }
 0x68a   :  { %v26158_v56 = vpop.f32.mrf.mxu1  ;;  %v17594_v36 = vadd.f32 %v17593_v42, %v17474_v6  ;;  %v17499_v42 = vadd.f32 %v17498_v31, %v17386_v47 }
 0x68b   :  { %v17598_v24 = vpop.f32.mrf.mxu0 }
 0x68c   :  { %v26161_v48 = vpop.f32.mrf.mxu1  ;;  %v17599_v37 = vadd.f32 %v17598_v24, %v17481_v61 }
 0x68d   :  { %v17600_v46 = vpop.f32.mrf.mxu0 }
 0x68e   :  { %v17695_v34 = vpop.f32.mrf.mxu1  ;;  %v17601_v8 = vadd.f32 %v17600_v46, %v17483_v62  ;;  %v27147_v62 = vld [vmem:[#allocation97_spill] sm:$0xff] }
 0x68f   :  { %v17605_v33 = vpop.f32.mrf.mxu0  ;;  %v17696_v55 = vadd.f32 %v17695_v34, %v17592_v11 }
 0x690   :  { %v17697_v23 = vpop.f32.mrf.mxu1  ;;  %v17606_v49 = vadd.f32 %v17605_v33, %v17490_v45  ;;  %v17508_v33 = vadd.f32 %v26158_v56, %v17394_v4 }
 0x691   :  { %v18361_v39 = vadd.f32 %v17696_v55, %v27140_v7  ;;  %v17607_v44 = vpop.f32.mrf.mxu0  ;;  %v17698_v0 = vadd.f32 %v17697_v23, %v17594_v36  ;;  %v17283_v36 = vadd.f32 %v26150_v50, %v26148_v3 }
 0x692   :  { %v17702_v19 = vpop.f32.mrf.mxu1  ;;  %v17608_v14 = vadd.f32 %v17607_v44, %v17492_v41 }
 0x693   :  { %v18386_v13 = vadd.f32 %v18361_v39, %v27141_v17  ;;  %v18362_v2 = vadd.f32 %v17698_v0, %v27142_v20  ;;  %v17612_v59 = vpop.f32.mrf.mxu0  ;;  %v17703_v9 = vadd.f32 %v17702_v19, %v17599_v37  ;;  %v17396_v44 = vadd.f32 %v26154_v29, %v17283_v36 }
 0x694   :  { %v17704_v28 = vpop.f32.mrf.mxu1  ;;  %v17613_v6 = vadd.f32 %v17612_v59, %v17499_v42  ;;  %v27149_v59 = vld [vmem:[#allocation95_spill] sm:$0xff] }
 0x695   :  { %v18411_v32 = vmax.f32 %v18386_v13, 0.05  ;;  %v18387_v57 = vadd.f32 %v18362_v2, %v27143_v40  ;;  %v18366_v30 = vadd.f32 %v17703_v9, %v27144_v12  ;;  %v17614_v58 = vpop.f32.mrf.mxu0  ;;  %v17705_v54 = vadd.f32 %v17704_v28, %v17601_v8  ;;  %v27150_v12 = vld [vmem:[#allocation99_spill] sm:$0xff] }
 0x696   :  { %v17709_v18 = vpop.f32.mrf.mxu1  ;;  %v17615_v27 = vadd.f32 %v17614_v58, %v17501_v10  ;;  %v17510_v8 = vadd.f32 %v26161_v48, %v17396_v44 }
 0x697   :  { %v18436_v24 = vmin.f32 %v18411_v32, 0.08  ;;  %v18412_v38 = vmax.f32 %v18387_v57, 0.05  ;;  %v18391_v63 = vadd.f32 %v18366_v30, %v27141_v17  ;;  %v18367_v53 = vadd.f32 %v17705_v54, %v27145_v1  ;;  %v17619_v16 = vpop.f32.mrf.mxu0 }
 0x698   :  { %v17710_v11 = vadd.f32 %v17709_v18, %v17606_v49  ;;  %v17711_v46 = vpop.f32.mrf.mxu1  ;;  %v17620_v3 = vadd.f32 %v17619_v16, %v17508_v33 }
 0x699   :  { %18776 = vst [vmem:[%s26257_s3 + $0xd8] sm:$0xff] %v18436_v24  ;;  %v18437_v43 = vmin.f32 %v18412_v38, 0.08  ;;  %v18416_v31 = vmax.f32 %v18391_v63, 0.05  ;;  %v18392_v34 = vadd.f32 %v18367_v53, %v27143_v40  ;;  %v17621_v21 = vpop.f32.mrf.mxu0  ;;  %v17712_v61 = vadd.f32 %v17711_v46, %v17608_v14  ;;  %v27151_v24 = vld [vmem:[#allocation98_spill] sm:$0xff] }
 0x69a   :  { %v18371_v55 = vadd.f32 %v17710_v11, %v27146_v60  ;;  %v17716_v35 = vpop.f32.mrf.mxu1  ;;  %v17622_v41 = vadd.f32 %v17621_v21, %v17510_v8 }
 0x69b   :  { %18777 = vst [vmem:[%s26257_s3 + $0xe0] sm:$0xff] %v18437_v43  ;;  %v18441_v22 = vmin.f32 %v18416_v31, 0.08  ;;  %v18417_v23 = vmax.f32 %v18392_v34, 0.05  ;;  %v18372_v37 = vadd.f32 %v17712_v61, %v27147_v62  ;;  %v17717_v7 = vadd.f32 %v17716_v35, %v17613_v6  ;;  %v26187_v39 = vpop.f32.mrf.mxu0 }
 0x69c   :  { %v18396_v50 = vadd.f32 %v18371_v55, %v27141_v17  ;;  %v17718_v56 = vpop.f32.mrf.mxu1 }
 0x69d   :  { %18781 = vst [vmem:[%s26257_s3 + $0x100] sm:$0xff] %v18441_v22  ;;  %v18442_v0 = vmin.f32 %v18417_v23, 0.08  ;;  %v18397_v26 = vadd.f32 %v18372_v37, %v27143_v40  ;;  %v18376_v52 = vadd.f32 %v17717_v7, %v27148_v15  ;;  %v17719_v51 = vadd.f32 %v17718_v56, %v17615_v27  ;;  %v19795_v19 = vpop.f32.mrf.mxu0 }
 0x69e   :  { %v18421_v13 = vmax.f32 %v18396_v50, 0.05  ;;  %v17723_v20 = vpop.f32.mrf.mxu1 }
 0x69f   :  { %18782 = vst [vmem:[%s26257_s3 + $0x108] sm:$0xff] %v18442_v0  ;;  %v18422_v29 = vmax.f32 %v18397_v26, 0.05  ;;  %v18401_v2 = vadd.f32 %v18376_v52, %v27141_v17  ;;  %v18377_v9 = vadd.f32 %v17719_v51, %v27149_v59  ;;  %v17724_v25 = vadd.f32 %v17723_v20, %v17620_v3  ;;  %v26202_v47 = vpop.f32.mrf.mxu0 }
 0x6a0   :  { %v18446_v45 = vmin.f32 %v18421_v13, 0.08  ;;  %v17725_v28 = vpop.f32.mrf.mxu1 }
 0x6a1   :  { %v18447_v32 = vmin.f32 %v18422_v29, 0.08  ;;  %v18426_v57 = vmax.f32 %v18401_v2, 0.05  ;;  %v18402_v48 = vadd.f32 %v18377_v9, %v27143_v40  ;;  %v18381_v30 = vadd.f32 %v17724_v25, %v27150_v12  ;;  %v19798_v58 = vpop.f32.mrf.mxu0 }
 0x6a2   :  { %18786 = vst [vmem:[%s26257_s3 + $0x128] sm:$0xff] %v18446_v45  ;;  %v17726_v54 = vadd.f32 %v17725_v28, %v17622_v41  ;;  %v17922_v5 = vpop.f32.mrf.mxu1 }
 0x6a3   :  { %18787 = vst [vmem:[%s26257_s3 + $0x130] sm:$0xff] %v18447_v32  ;;  %v18451_v42 = vmin.f32 %v18426_v57, 0.08  ;;  %v18427_v49 = vmax.f32 %v18402_v48, 0.05  ;;  %v18406_v14 = vadd.f32 %v18381_v30, %v27141_v17  ;;  %v17821_v18 = vpop.f32.mrf.mxu0  ;;  %v17923_v8 = vadd.f32 %v17922_v5, %v26187_v39 }
 0x6a4   :  { %v18382_v38 = vadd.f32 %v17726_v54, %v27151_v24  ;;  %v19814_v63 = vpop.f32.mrf.mxu1 }
 0x6a5   :  { %18791 = vst [vmem:[%s26257_s3 + $0x150] sm:$0xff] %v18451_v42  ;;  %v18452_v1 = vmin.f32 %v18427_v49, 0.08  ;;  %v18431_v53 = vmax.f32 %v18406_v14, 0.05  ;;  %v19801_v16 = vpop.f32.mrf.mxu0  ;;  %v27152_v49 = vld [vmem:[#allocation57_spill] sm:$0xff] }
 0x6a6   :  { %v18407_v4 = vadd.f32 %v18382_v38, %v27143_v40  ;;  %v17928_v10 = vpop.f32.mrf.mxu1 }
 0x6a7   :  { %18792 = vst [vmem:[%s26257_s3 + $0x158] sm:$0xff] %v18452_v1  ;;  %v18456_v6 = vmin.f32 %v18431_v53, 0.08  ;;  %v17831_v17 = vpop.f32.mrf.mxu0  ;;  %v17929_v9 = vadd.f32 %v17928_v10, %v26202_v47  ;;  %v27153_v1 = vld [vmem:[#allocation101_spill] sm:$0xff] }
 0x6a8   :  { %v18432_v11 = vmax.f32 %v18407_v4, 0.05  ;;  %v19817_v46 = vpop.f32.mrf.mxu1 }
 0x6a9   :  { %18796 = vst [vmem:[%s26257_s3 + $0x178] sm:$0x1] %v18456_v6  ;;  %v19804_v43 = vpop.f32.mrf.mxu0  ;;  %v27154_v46 = vld [vmem:[#allocation102_spill] sm:$0xff] }
 0x6aa   :  { %v18457_v31 = vmin.f32 %v18432_v11, 0.08  ;;  %v17934_v34 = vpop.f32.mrf.mxu1 }
 0x6ab   :  { %v17841_v21 = vpop.f32.mrf.mxu0  ;;  %v17935_v12 = vadd.f32 %v17934_v34, %v17821_v18 }
 0x6ac   :  { %18797 = vst [vmem:[%s26257_s3 + $0x180] sm:$0x1] %v18457_v31  ;;  %v19820_v40 = vpop.f32.mrf.mxu1 }
 0x6ad   :  { %v19807_v61 = vpop.f32.mrf.mxu0 }
 0x6ae   :  { %v17940_v36 = vpop.f32.mrf.mxu1 }
 0x6af   :  { %v18022_v33 = vpop.f32.mrf.mxu0  ;;  %v17941_v63 = vadd.f32 %v17940_v36, %v17831_v17 }
 0x6b0   :  { %v19823_v27 = vpop.f32.mrf.mxu1  ;;  %v18023_v29 = vadd.f32 %v18022_v33, %v17923_v8 }
 0x6b1   :  { %v19833_v60 = vpop.f32.mrf.mxu0 }
 0x6b2   :  { %v17946_v55 = vpop.f32.mrf.mxu1 }
 0x6b3   :  { %v18029_v35 = vpop.f32.mrf.mxu0  ;;  %v17947_v34 = vadd.f32 %v17946_v55, %v17841_v21 }
 0x6b4   :  { %v19826_v22 = vpop.f32.mrf.mxu1  ;;  %v18030_v28 = vadd.f32 %v18029_v35, %v17929_v9 }
 0x6b5   :  { %v19836_v23 = vpop.f32.mrf.mxu0 }
 0x6b6   :  { %v18125_v62 = vpop.f32.mrf.mxu1 }
 0x6b7   :  { %v18036_v37 = vpop.f32.mrf.mxu0  ;;  %v18126_v25 = vadd.f32 %v18125_v62, %v18023_v29  ;;  %v27155_v62 = vld [vmem:[#allocation89_spill] sm:$0xff] }
 0x6b8   :  { %v19852_v7 = vpop.f32.mrf.mxu1  ;;  %v18037_v39 = vadd.f32 %v18036_v37, %v17935_v12 }
 0x6b9   :  { %v19839_v44 = vpop.f32.mrf.mxu0 }
 0x6ba   :  { %v18133_v3 = vpop.f32.mrf.mxu1 }
 0x6bb   :  { %v18043_v50 = vpop.f32.mrf.mxu0  ;;  %v18134_v30 = vadd.f32 %v18133_v3, %v18030_v28 }
 0x6bc   :  { %v19855_v56 = vpop.f32.mrf.mxu1  ;;  %v18044_v6 = vadd.f32 %v18043_v50, %v17941_v63 }
 0x6bd   :  { %v19842_v0 = vpop.f32.mrf.mxu0 }
 0x6be   :  { %v18141_v26 = vpop.f32.mrf.mxu1 }
 0x6bf   :  { %v18050_v15 = vpop.f32.mrf.mxu0  ;;  %v18142_v47 = vadd.f32 %v18141_v26, %v18037_v39 }
 0x6c0   :  { %v19858_v52 = vpop.f32.mrf.mxu1  ;;  %v18051_v35 = vadd.f32 %v18050_v15, %v17947_v34  ;;  %v27156_v15 = vld [vmem:[#allocation67_spill] sm:$0xff] }
 0x6c1   :  { %v19845_v51 = vpop.f32.mrf.mxu0 }
 0x6c2   :  { %v18149_v19 = vpop.f32.mrf.mxu1 }
 0x6c3   :  { %v18234_v13 = vpop.f32.mrf.mxu0  ;;  %v18150_v61 = vadd.f32 %v18149_v19, %v18044_v6 }
 0x6c4   :  { %v19861_v20 = vpop.f32.mrf.mxu1  ;;  %v18235_v32 = vadd.f32 %v18234_v13, %v18126_v25 }
 0x6c5   :  { %v19871_v2 = vpop.f32.mrf.mxu0 }
 0x6c6   :  { %v18157_v59 = vpop.f32.mrf.mxu1  ;;  %v27157_v2 = vld [vmem:[#allocation73_spill] sm:$0xff] }
 0x6c7   :  { %v18240_v45 = vpop.f32.mrf.mxu0  ;;  %v18158_v21 = vadd.f32 %v18157_v59, %v18051_v35 }
 0x6c8   :  { %v19864_v41 = vpop.f32.mrf.mxu1  ;;  %v18241_v5 = vadd.f32 %v18240_v45, %v18134_v30 }
 0x6c9   :  { %v19874_v57 = vpop.f32.mrf.mxu0 }
 0x6ca   :  { %v18331_v48 = vpop.f32.mrf.mxu1 }
 0x6cb   :  { %v18246_v58 = vpop.f32.mrf.mxu0  ;;  %v18332_v54 = vadd.f32 %v18331_v48, %v18235_v32 }
 0x6cc   :  { %v19890_v42 = vpop.f32.mrf.mxu1  ;;  %v18247_v11 = vadd.f32 %v18246_v58, %v18142_v47 }
 0x6cd   :  { %v18363_v14 = vadd.f32 %v18332_v54, %v27152_v49  ;;  %v19877_v24 = vpop.f32.mrf.mxu0 }
 0x6ce   :  { %v18337_v38 = vpop.f32.mrf.mxu1 }
 0x6cf   :  { %v18388_v53 = vadd.f32 %v18363_v14, %v27153_v1  ;;  %v18252_v16 = vpop.f32.mrf.mxu0  ;;  %v18338_v4 = vadd.f32 %v18337_v38, %v18241_v5 }
 0x6d0   :  { %v19893_v10 = vpop.f32.mrf.mxu1  ;;  %v18253_v22 = vadd.f32 %v18252_v16, %v18150_v61 }
 0x6d1   :  { %v18413_v18 = vmax.f32 %v18388_v53, 0.05  ;;  %v18368_v43 = vadd.f32 %v18338_v4, %v27154_v46  ;;  %v19880_v31 = vpop.f32.mrf.mxu0 }
 0x6d2   :  { %v18343_v40 = vpop.f32.mrf.mxu1 }
 0x6d3   :  { %v18438_v33 = vmin.f32 %v18413_v18, 0.08  ;;  %v18393_v27 = vadd.f32 %v18368_v43, %v27153_v1  ;;  %v18258_v60 = vpop.f32.mrf.mxu0  ;;  %v18344_v17 = vadd.f32 %v18343_v40, %v18247_v11 }
 0x6d4   :  { %v19896_v36 = vpop.f32.mrf.mxu1  ;;  %v18259_v0 = vadd.f32 %v18258_v60, %v18158_v21 }
 0x6d5   :  { %18778 = vst [vmem:[%s26257_s3 + $0xe8] sm:$0xff] %v18438_v33  ;;  %v18418_v23 = vmax.f32 %v18393_v27, 0.05  ;;  %v18373_v37 = vadd.f32 %v18344_v17, %v27155_v62  ;;  %v19883_v7 = vpop.f32.mrf.mxu0 }
 0x6d6   :  { %v18349_v44 = vpop.f32.mrf.mxu1 }
 0x6d7   :  { %v18443_v55 = vmin.f32 %v18418_v23, 0.08  ;;  %v18398_v3 = vadd.f32 %v18373_v37, %v27153_v1  ;;  %v18350_v50 = vadd.f32 %v18349_v44, %v18253_v22 }
 0x6d8   :  { %v19899_v56 = vpop.f32.mrf.mxu1 }
 0x6d9   :  { %18783 = vst [vmem:[%s26257_s3 + $0x110] sm:$0xff] %v18443_v55  ;;  %v18423_v26 = vmax.f32 %v18398_v3, 0.05  ;;  %v18378_v52 = vadd.f32 %v18350_v50, %v27156_v15 }
 0x6da   :  { %v18355_v51 = vpop.f32.mrf.mxu1 }
 0x6db   :  { %v18448_v19 = vmin.f32 %v18423_v26, 0.08  ;;  %v18403_v8 = vadd.f32 %v18378_v52, %v27153_v1  ;;  %v18356_v13 = vadd.f32 %v18355_v51, %v18259_v0 }
 0x6dc   :  { %v19902_v20 = vpop.f32.mrf.mxu1 }
 0x6dd   :  { %18788 = vst [vmem:[%s26257_s3 + $0x138] sm:$0xff] %v18448_v19  ;;  %v18428_v29 = vmax.f32 %v18403_v8, 0.05  ;;  %v18383_v59 = vadd.f32 %v18356_v13, %v27157_v2 }
 0x6df   :  { %v18453_v9 = vmin.f32 %v18428_v29, 0.08  ;;  %v18408_v25 = vadd.f32 %v18383_v59, %v27153_v1 }
 0x6e1   :  { %18793 = vst [vmem:[%s26257_s3 + $0x160] sm:$0xff] %v18453_v9  ;;  %v18433_v45 = vmax.f32 %v18408_v25, 0.05 }
 0x6e3   :  { %v18458_v41 = vmin.f32 %v18433_v45, 0.08 }
 0x6e5   :  { %18798 = vst [vmem:[%s26257_s3 + $0x188] sm:$0x1] %v18458_v41 }

</bundles_post_ra>
